<compile_context>
chip_gen: v7x
topology: tpu7x:2x2x1
jax: 0.10.0
libtpu: 0.0.40
codegen_flags: <defaults>
</compile_context>

<pallas_src>
import functools

import jax
import jax.numpy as jnp
from jax import lax
from jax.experimental import pallas as pl
from jax.experimental.pallas import tpu as pltpu

EPS = 1e-5
LANE = 128


def _round_up(v, m):
    return (v + m - 1) // m * m


# ----------------------------------------------------------------------------
# In-kernel helpers
# ----------------------------------------------------------------------------
def _conv3x3_taps(pad_ref, w_ref, hh, ww):
    """3x3 SAME conv as 9 shifted MXU matmuls.

    pad_ref: (hh+2, ww+2, cin) VMEM ref (compute dtype, zero halo).
    w_ref:   (3, 3, cin, cout) ref (compute dtype).
    Returns (hh*ww, cout) float32 accumulator.
    """
    cin = pad_ref.shape[-1]
    cout = w_ref.shape[-1]
    acc = jnp.zeros((hh * ww, cout), jnp.float32)
    for kh in range(3):
        for kw in range(3):
            # Static ref-slice per tap: no full-tile value kept live, no
            # value-level relayout; scheduler overlaps vld with vmatmul.
            patch = pad_ref[pl.ds(kh, hh), pl.ds(kw, ww), :].reshape(hh * ww, cin)
            acc = acc + jnp.dot(patch, w_ref[kh, kw],
                                preferred_element_type=jnp.float32)
    return acc


def _zero_halo(pad_ref, hh, ww, c):
    """Zero only the 1-wide halo (interior is fully overwritten each step)."""
    z_row = jnp.zeros((1, ww + 2, c), pad_ref.dtype)
    z_col = jnp.zeros((hh + 2, 1, c), pad_ref.dtype)
    pad_ref[pl.ds(0, 1), :, :] = z_row
    pad_ref[pl.ds(hh + 1, 1), :, :] = z_row
    pad_ref[:, pl.ds(0, 1), :] = z_col
    pad_ref[:, pl.ds(ww + 1, 1), :] = z_col


def _basic_block_kernel(*refs, H, W, stride, has_sc):
    """Fully fused BasicBlock forward for one batch element."""
    if has_sc:
        (x_ref, w1_ref, w2_ref, w3_ref, ws_ref, aff_ref, o_ref,
         pad1_ref, pad2_ref) = refs
    else:
        (x_ref, w1_ref, w2_ref, w3_ref, aff_ref, o_ref,
         pad1_ref, pad2_ref) = refs
        ws_ref = None

    Cp = x_ref.shape[-1]          # lane-padded in-channels
    Pp = o_ref.shape[-1]          # lane-padded out-channels
    Hm, Wm = H // stride, W // stride

    _zero_halo(pad1_ref, H, W, Cp)
    _zero_halo(pad2_ref, Hm, Wm, Pp)

    xin = x_ref[0]                                            # (H, W, Cp) bf16
    pad1_ref[pl.ds(1, H), pl.ds(1, W), :] = xin

    # ---- conv1 (+ optional 2x2 maxpool) + bn1 + relu ---------------------
    acc1 = _conv3x3_taps(pad1_ref, w1_ref, H, W)              # (H*W, Pp) f32
    s1, b1 = aff_ref[0:1, :], aff_ref[1:2, :]
    if stride == 2:
        # Pool BEFORE bn1/relu (module order: conv1 -> pool -> bn1 -> relu).
        hmax = jnp.max(acc1.reshape(Hm, 2, W, Pp), axis=1)    # H pairs: major dim
        pooled = jnp.max(hmax.reshape(Hm, Wm, 2, Pp), axis=2)  # W pairs
        act1 = jnp.maximum(pooled * s1 + b1, 0.0)             # (Hm, Wm, Pp)
    else:
        act1 = jnp.maximum(acc1 * s1 + b1, 0.0).reshape(Hm, Wm, Pp)
    pad2_ref[pl.ds(1, Hm), pl.ds(1, Wm), :] = act1.astype(pad2_ref.dtype)

    # ---- conv2 + bn2 + relu ----------------------------------------------
    acc2 = _conv3x3_taps(pad2_ref, w2_ref, Hm, Wm)
    s2, b2 = aff_ref[2:3, :], aff_ref[3:4, :]
    act2 = jnp.maximum(acc2 * s2 + b2, 0.0)
    pad2_ref[pl.ds(1, Hm), pl.ds(1, Wm), :] = (
        act2.reshape(Hm, Wm, Pp).astype(pad2_ref.dtype))

    # ---- conv3 + bn3 + relu ----------------------------------------------
    acc3 = _conv3x3_taps(pad2_ref, w3_ref, Hm, Wm)
    s3, b3 = aff_ref[4:5, :], aff_ref[5:6, :]
    act3 = jnp.maximum(acc3 * s3 + b3, 0.0)                   # (Hm*Wm, Pp) f32

    # ---- shortcut + residual add (module adds AFTER the final ReLU) -------
    if has_sc:
        if stride == 2:
            # Top-left sample of every 2x2 window == 1x1 conv with stride 2.
            xh = xin.reshape(Hm, 2, W, Cp)[:, 0]              # major dim, free
            xs = xh.reshape(Hm, Wm, 2, Cp)[:, :, 0, :]        # one sublane regroup
        else:
            xs = xin
        sc = jnp.dot(xs.reshape(Hm * Wm, Cp), ws_ref[...],
                     preferred_element_type=jnp.float32)
        ss, bs = aff_ref[6:7, :], aff_ref[7:8, :]
        sc = sc * ss + bs
    else:
        sc = xin.reshape(Hm * Wm, Pp).astype(jnp.float32)      # identity

    out = act3 + sc
    o_ref[0] = out.reshape(Hm, Wm, Pp).astype(o_ref.dtype)


# ----------------------------------------------------------------------------
# Wrapper: parameter folding, lane-width channel padding, one pallas_call
# ----------------------------------------------------------------------------
def _fold_bn(bn, pp):
    scale = bn["gamma"] / jnp.sqrt(bn["var"] + EPS)
    bias = bn["beta"] - bn["mean"] * scale
    pad = pp - scale.shape[0]
    return jnp.pad(scale, (0, pad)), jnp.pad(bias, (0, pad))


def basic_block_forward(x, params, *, in_planes, planes, stride,
                        compute_dtype=jnp.bfloat16):
    N, H, W, Cin = x.shape
    assert Cin == in_planes
    assert H % stride == 0 and W % stride == 0
    P = planes
    Hm, Wm = H // stride, W // stride
    has_sc = (stride != 1) or (in_planes != planes)

    # Lane-width channel padding: dense vector loads/stores, lane-dense output
    # store, and a full 128-wide MXU contraction per tap (zero pads are inert).
    Cp = _round_up(Cin, LANE)
    Pp = _round_up(P, LANE)

    s1, b1 = _fold_bn(params["bn1"], Pp)
    s2, b2 = _fold_bn(params["bn2"], Pp)
    s3, b3 = _fold_bn(params["bn3"], Pp)
    rows = [s1, b1, s2, b2, s3, b3]
    if has_sc:
        ss, bs = _fold_bn(params["bn_s"], Pp)
        rows += [ss, bs]
    affine = jnp.stack(rows).astype(jnp.float32)              # (n_aff, Pp)
    n_aff = len(rows)

    def pad_w(w, ci, co):
        return jnp.pad(w, ((0, 0), (0, 0), (0, ci - w.shape[2]),
                           (0, co - w.shape[3]))).astype(compute_dtype)

    w1 = pad_w(params["w1"], Cp, Pp)
    w2 = pad_w(params["w2"], Pp, Pp)
    w3 = pad_w(params["w3"], Pp, Pp)

    # bf16 activations through HBM (halves activation DMA bytes vs f32).
    xp = jnp.pad(x, ((0, 0), (0, 0), (0, 0), (0, Cp - Cin))).astype(compute_dtype)

    kernel = functools.partial(_basic_block_kernel, H=H, W=W,
                               stride=stride, has_sc=has_sc)

    in_specs = [
        pl.BlockSpec((1, H, W, Cp), lambda n: (n, 0, 0, 0)),
        pl.BlockSpec((3, 3, Cp, Pp), lambda n: (0, 0, 0, 0)),
        pl.BlockSpec((3, 3, Pp, Pp), lambda n: (0, 0, 0, 0)),
        pl.BlockSpec((3, 3, Pp, Pp), lambda n: (0, 0, 0, 0)),
    ]
    args = [xp, w1, w2, w3]
    if has_sc:
        ws = jnp.pad(params["ws"],
                     ((0, Cp - Cin), (0, Pp - P))).astype(compute_dtype)
        in_specs.append(pl.BlockSpec((Cp, Pp), lambda n: (0, 0)))
        args.append(ws)
    in_specs.append(pl.BlockSpec((n_aff, Pp), lambda n: (0, 0)))
    args.append(affine)

    # Cost estimate / VMEM budget from the actual (padded) block+scratch sizes.
    flops = 2 * N * (H * W * 9 * Cp * Pp + 2 * Hm * Wm * 9 * Pp * Pp
                     + (Hm * Wm * Cp * Pp if has_sc else 0))
    w_bytes = 2 * (9 * Cp * Pp + 18 * Pp * Pp + (Cp * Pp if has_sc else 0))
    bytes_accessed = (2 * N * H * W * Cp + 4 * N * Hm * Wm * Pp
                      + w_bytes + 4 * n_aff * Pp)

    scratch_bytes = 2 * ((H + 2) * (W + 2) * Cp + (Hm + 2) * (Wm + 2) * Pp)
    block_bytes = 2 * (2 * H * W * Cp) + 2 * (4 * Hm * Wm * Pp)  # dbl-buffered
    resident = block_bytes + 2 * (w_bytes + 4 * n_aff * Pp) + scratch_bytes
    vmem_limit = int(min(max(2 * resident + (4 << 20), 16 << 20), 64 << 20))

    out = pl.pallas_call(
        kernel,
        out_shape=jax.ShapeDtypeStruct((N, Hm, Wm, Pp), x.dtype),
        grid=(N,),
        in_specs=in_specs,
        out_specs=pl.BlockSpec((1, Hm, Wm, Pp), lambda n: (n, 0, 0, 0)),
        scratch_shapes=[
            pltpu.VMEM((H + 2, W + 2, Cp), compute_dtype),    # padded conv1 in
            pltpu.VMEM((Hm + 2, Wm + 2, Pp), compute_dtype),  # padded conv2/3 in
        ],
        compiler_params=pltpu.CompilerParams(
            dimension_semantics=("parallel",),
            vmem_limit_bytes=vmem_limit),
        cost_estimate=pl.CostEstimate(flops=flops, transcendentals=0,
                                      bytes_accessed=bytes_accessed),
    )(*args)
    return out[..., :P]   # drop lane padding on the out-channel dim


# ----------------------------------------------------------------------------
# Deterministic parameter init (synthetic) & pure-JAX reference
# ----------------------------------------------------------------------------
def init_params(key, in_planes, planes, stride):
    ks = jax.random.split(key, 8)

    def bn_init(k):
        k1, k2, k3, k4 = jax.random.split(k, 4)
        return dict(
            gamma=1.0 + 0.1 * jax.random.normal(k1, (planes,), jnp.float32),
            beta=0.1 * jax.random.normal(k2, (planes,), jnp.float32),
            mean=0.1 * jax.random.normal(k3, (planes,), jnp.float32),
            var=jax.random.uniform(k4, (planes,), jnp.float32, 0.5, 1.5),
        )

    p = dict(
        w1=0.2 * jax.random.normal(ks[0], (3, 3, in_planes, planes), jnp.float32),
        bn1=bn_init(ks[1]),
        w2=0.2 * jax.random.normal(ks[2], (3, 3, planes, planes), jnp.float32),
        bn2=bn_init(ks[3]),
        w3=0.2 * jax.random.normal(ks[4], (3, 3, planes, planes), jnp.float32),
        bn3=bn_init(ks[5]),
    )
    if stride != 1 or in_planes != planes:
        p["ws"] = 0.2 * jax.random.normal(ks[6], (in_planes, planes), jnp.float32)
        p["bn_s"] = bn_init(ks[7])
    return p


def ref_forward(x, params, *, in_planes, planes, stride,
                compute_dtype=jnp.bfloat16):
    """Reference with conv operands at the same (bf16) precision as the kernel."""
    def conv(inp, w, strides=(1, 1), pad="SAME"):
        return lax.conv_general_dilated(
            inp.astype(compute_dtype), w.astype(compute_dtype), strides, pad,
            dimension_numbers=("NHWC", "HWIO", "NHWC"),
            preferred_element_type=jnp.float32)

    def bn(v, p):
        return (v - p["mean"]) / jnp.sqrt(p["var"] + EPS) * p["gamma"] + p["beta"]

    out = conv(x, params["w1"])
    if stride == 2:
        out = lax.reduce_window(out, -jnp.inf, lax.max,
                                (1, 2, 2, 1), (1, 2, 2, 1), "VALID")
    out = jax.nn.relu(bn(out, params["bn1"]))
    out = jax.nn.relu(bn(conv(out, params["w2"]), params["bn2"]))
    out = jax.nn.relu(bn(conv(out, params["w3"]), params["bn3"]))
    if stride != 1 or in_planes != planes:
        w4 = params["ws"].reshape(1, 1, in_planes, planes)
        sc = bn(conv(x, w4, strides=(stride, stride), pad="VALID"),
                params["bn_s"])
    else:
        sc = x
    return out + sc


# ----------------------------------------------------------------------------
if __name__ == "__main__":
    key = jax.random.PRNGKey(0)
    kx, kp, kx1, kp1 = jax.random.split(key, 4)

    # Case 1: stride=2 with 1x1-conv shortcut (in_planes != planes)
    N, H, W, Cin, planes = 2, 16, 16, 4, 8
    x = jax.random.normal(kx, (N, H, W, Cin), jnp.float32)      # NHWC
    params = init_params(kp, Cin, planes, stride=2)
    out = basic_block_forward(x, params, in_planes=Cin, planes=planes, stride=2)
    out = jax.block_until_ready(out)
    assert out.shape == (N, H // 2, W // 2, planes), out.shape
    ref = ref_forward(x, params, in_planes=Cin, planes=planes, stride=2)
    if not jnp.allclose(out, ref, rtol=2e-2, atol=2e-2):
        raise RuntimeError(
            f"stride=2 mismatch, max err {float(jnp.max(jnp.abs(out - ref)))}")

    # Case 2: stride=1 with identity shortcut (in_planes == planes)
    x1 = jax.random.normal(kx1, (N, H, W, planes), jnp.float32)
    params1 = init_params(kp1, planes, planes, stride=1)
    out1 = basic_block_forward(x1, params1, in_planes=planes, planes=planes,
                               stride=1)
    out1 = jax.block_until_ready(out1)
    assert out1.shape == (N, H, W, planes), out1.shape
    ref1 = ref_forward(x1, params1, in_planes=planes, planes=planes, stride=1)
    if not jnp.allclose(out1, ref1, rtol=2e-2, atol=2e-2):
        raise RuntimeError(
            f"stride=1 mismatch, max err {float(jnp.max(jnp.abs(out1 - ref1)))}")

    print("KERNEL_OK")
</pallas_src>

<mosaic_0001>
module attributes {stable_mosaic.version = 11 : i64} {
  func.func @_basic_block_kernel(%arg0: i32, %arg1: memref<1x16x16x128xbf16, #tpu.memory_space<vmem>>, %arg2: memref<3x3x128x128xbf16, #tpu.memory_space<vmem>>, %arg3: memref<3x3x128x128xbf16, #tpu.memory_space<vmem>>, %arg4: memref<3x3x128x128xbf16, #tpu.memory_space<vmem>>, %arg5: memref<128x128xbf16, #tpu.memory_space<vmem>>, %arg6: memref<8x128xf32, #tpu.memory_space<vmem>>, %arg7: memref<1x8x8x128xf32, #tpu.memory_space<vmem>>, %arg8: memref<18x18x128xbf16, #tpu.memory_space<vmem>>, %arg9: memref<10x10x128xbf16, #tpu.memory_space<vmem>>) attributes {dimension_semantics = [#tpu.dimension_semantics<parallel>], iteration_bounds = array<i64: 2>, scalar_prefetch = 0 : i64, scratch_operands = 2 : i64, tpu.core_type = #tpu.core_type<tc>, window_params = [{transform_indices = @transform_0, window_bounds = array<i64: 1, 16, 16, 128>}, {pipeline_mode = #tpu.pipeline_mode<synchronous>, transform_indices = @transform_1, window_bounds = array<i64: 3, 3, 128, 128>}, {pipeline_mode = #tpu.pipeline_mode<synchronous>, transform_indices = @transform_2, window_bounds = array<i64: 3, 3, 128, 128>}, {pipeline_mode = #tpu.pipeline_mode<synchronous>, transform_indices = @transform_3, window_bounds = array<i64: 3, 3, 128, 128>}, {pipeline_mode = #tpu.pipeline_mode<synchronous>, transform_indices = @transform_4, window_bounds = array<i64: 128, 128>}, {pipeline_mode = #tpu.pipeline_mode<synchronous>, transform_indices = @transform_5, window_bounds = array<i64: 8, 128>}, {transform_indices = @transform_6, window_bounds = array<i64: 1, 8, 8, 128>}]} {
    %cst = arith.constant 0.000000e+00 : bf16
    %0 = vector.broadcast %cst : bf16 to vector<1x18x128xbf16>
    %cst_0 = arith.constant 0.000000e+00 : bf16
    %1 = vector.broadcast %cst_0 : bf16 to vector<18x1x128xbf16>
    %c0 = arith.constant 0 : index
    %c0_1 = arith.constant 0 : index
    %c0_2 = arith.constant 0 : index
    %2 = vector.load %arg8[%c0, %c0_1, %c0_2] : memref<18x18x128xbf16, #tpu.memory_space<vmem>>, vector<1x18x128xbf16>
    tpu.vector_store %arg8[%c0, %c0_1, %c0_2], %0 {strides = array<i32>} : memref<18x18x128xbf16, #tpu.memory_space<vmem>>, vector<1x18x128xbf16>,
    %c17 = arith.constant 17 : index
    %c0_3 = arith.constant 0 : index
    %c0_4 = arith.constant 0 : index
    %3 = vector.load %arg8[%c17, %c0_3, %c0_4] : memref<18x18x128xbf16, #tpu.memory_space<vmem>>, vector<1x18x128xbf16>
    tpu.vector_store %arg8[%c17, %c0_3, %c0_4], %0 {strides = array<i32>} : memref<18x18x128xbf16, #tpu.memory_space<vmem>>, vector<1x18x128xbf16>,
    %c0_5 = arith.constant 0 : index
    %c0_6 = arith.constant 0 : index
    %c0_7 = arith.constant 0 : index
    %4 = vector.load %arg8[%c0_5, %c0_6, %c0_7] : memref<18x18x128xbf16, #tpu.memory_space<vmem>>, vector<18x1x128xbf16>
    tpu.vector_store %arg8[%c0_5, %c0_6, %c0_7], %1 {strides = array<i32>} : memref<18x18x128xbf16, #tpu.memory_space<vmem>>, vector<18x1x128xbf16>,
    %c0_8 = arith.constant 0 : index
    %c17_9 = arith.constant 17 : index
    %c0_10 = arith.constant 0 : index
    %5 = vector.load %arg8[%c0_8, %c17_9, %c0_10] : memref<18x18x128xbf16, #tpu.memory_space<vmem>>, vector<18x1x128xbf16>
    tpu.vector_store %arg8[%c0_8, %c17_9, %c0_10], %1 {strides = array<i32>} : memref<18x18x128xbf16, #tpu.memory_space<vmem>>, vector<18x1x128xbf16>,
    %cst_11 = arith.constant 0.000000e+00 : bf16
    %6 = vector.broadcast %cst_11 : bf16 to vector<1x10x128xbf16>
    %cst_12 = arith.constant 0.000000e+00 : bf16
    %7 = vector.broadcast %cst_12 : bf16 to vector<10x1x128xbf16>
    %c0_13 = arith.constant 0 : index
    %c0_14 = arith.constant 0 : index
    %c0_15 = arith.constant 0 : index
    %8 = vector.load %arg9[%c0_13, %c0_14, %c0_15] : memref<10x10x128xbf16, #tpu.memory_space<vmem>>, vector<1x10x128xbf16>
    tpu.vector_store %arg9[%c0_13, %c0_14, %c0_15], %6 {strides = array<i32>} : memref<10x10x128xbf16, #tpu.memory_space<vmem>>, vector<1x10x128xbf16>,
    %c9 = arith.constant 9 : index
    %c0_16 = arith.constant 0 : index
    %c0_17 = arith.constant 0 : index
    %9 = vector.load %arg9[%c9, %c0_16, %c0_17] : memref<10x10x128xbf16, #tpu.memory_space<vmem>>, vector<1x10x128xbf16>
    tpu.vector_store %arg9[%c9, %c0_16, %c0_17], %6 {strides = array<i32>} : memref<10x10x128xbf16, #tpu.memory_space<vmem>>, vector<1x10x128xbf16>,
    %c0_18 = arith.constant 0 : index
    %c0_19 = arith.constant 0 : index
    %c0_20 = arith.constant 0 : index
    %10 = vector.load %arg9[%c0_18, %c0_19, %c0_20] : memref<10x10x128xbf16, #tpu.memory_space<vmem>>, vector<10x1x128xbf16>
    tpu.vector_store %arg9[%c0_18, %c0_19, %c0_20], %7 {strides = array<i32>} : memref<10x10x128xbf16, #tpu.memory_space<vmem>>, vector<10x1x128xbf16>,
    %c0_21 = arith.constant 0 : index
    %c9_22 = arith.constant 9 : index
    %c0_23 = arith.constant 0 : index
    %11 = vector.load %arg9[%c0_21, %c9_22, %c0_23] : memref<10x10x128xbf16, #tpu.memory_space<vmem>>, vector<10x1x128xbf16>
    tpu.vector_store %arg9[%c0_21, %c9_22, %c0_23], %7 {strides = array<i32>} : memref<10x10x128xbf16, #tpu.memory_space<vmem>>, vector<10x1x128xbf16>,
    %c0_24 = arith.constant 0 : index
    %c0_25 = arith.constant 0 : index
    %c0_26 = arith.constant 0 : index
    %c0_27 = arith.constant 0 : index
    %12 = vector.load %arg1[%c0_24, %c0_25, %c0_26, %c0_27] : memref<1x16x16x128xbf16, #tpu.memory_space<vmem>>, vector<1x16x16x128xbf16>
    %13 = vector.shape_cast %12 : vector<1x16x16x128xbf16> to vector<16x16x128xbf16>
    %c1 = arith.constant 1 : index
    %c1_28 = arith.constant 1 : index
    %c0_29 = arith.constant 0 : index
    %14 = vector.load %arg8[%c1, %c1_28, %c0_29] : memref<18x18x128xbf16, #tpu.memory_space<vmem>>, vector<16x16x128xbf16>
    tpu.vector_store %arg8[%c1, %c1_28, %c0_29], %13 {strides = array<i32>} : memref<18x18x128xbf16, #tpu.memory_space<vmem>>, vector<16x16x128xbf16>,
    %cst_30 = arith.constant 0.000000e+00 : f32
    %15 = vector.broadcast %cst_30 : f32 to vector<256x128xf32>
    %c0_31 = arith.constant 0 : index
    %c0_32 = arith.constant 0 : index
    %c0_33 = arith.constant 0 : index
    %16 = vector.load %arg8[%c0_31, %c0_32, %c0_33] : memref<18x18x128xbf16, #tpu.memory_space<vmem>>, vector<16x16x128xbf16>
    %17 = vector.shape_cast %16 : vector<16x16x128xbf16> to vector<256x128xbf16>
    %c0_34 = arith.constant 0 : index
    %c0_35 = arith.constant 0 : index
    %c0_36 = arith.constant 0 : index
    %c0_37 = arith.constant 0 : index
    %18 = vector.load %arg2[%c0_34, %c0_35, %c0_36, %c0_37] : memref<3x3x128x128xbf16, #tpu.memory_space<vmem>>, vector<1x1x128x128xbf16>
    %19 = vector.shape_cast %18 : vector<1x1x128x128xbf16> to vector<128x128xbf16>
    %cst_38 = arith.constant dense<0.000000e+00> : vector<256x128xf32>
    %20 = tpu.matmul %17, %19, %cst_38 {dimension_numbers = #tpu.dot_dimension_numbers<[1], [0], [0], [1], [0, 0, 1, 1], [], []>} : vector<256x128xbf16>, vector<128x128xbf16>, vector<256x128xf32> -> vector<256x128xf32>
    %21 = arith.addf %15, %20 : vector<256x128xf32>
    %c0_39 = arith.constant 0 : index
    %c1_40 = arith.constant 1 : index
    %c0_41 = arith.constant 0 : index
    %22 = vector.load %arg8[%c0_39, %c1_40, %c0_41] : memref<18x18x128xbf16, #tpu.memory_space<vmem>>, vector<16x16x128xbf16>
    %23 = vector.shape_cast %22 : vector<16x16x128xbf16> to vector<256x128xbf16>
    %c0_42 = arith.constant 0 : index
    %c1_43 = arith.constant 1 : index
    %c0_44 = arith.constant 0 : index
    %c0_45 = arith.constant 0 : index
    %24 = vector.load %arg2[%c0_42, %c1_43, %c0_44, %c0_45] : memref<3x3x128x128xbf16, #tpu.memory_space<vmem>>, vector<1x1x128x128xbf16>
    %25 = vector.shape_cast %24 : vector<1x1x128x128xbf16> to vector<128x128xbf16>
    %cst_46 = arith.constant dense<0.000000e+00> : vector<256x128xf32>
    %26 = tpu.matmul %23, %25, %cst_46 {dimension_numbers = #tpu.dot_dimension_numbers<[1], [0], [0], [1], [0, 0, 1, 1], [], []>} : vector<256x128xbf16>, vector<128x128xbf16>, vector<256x128xf32> -> vector<256x128xf32>
    %27 = arith.addf %21, %26 : vector<256x128xf32>
    %c0_47 = arith.constant 0 : index
    %c2 = arith.constant 2 : index
    %c0_48 = arith.constant 0 : index
    %28 = vector.load %arg8[%c0_47, %c2, %c0_48] : memref<18x18x128xbf16, #tpu.memory_space<vmem>>, vector<16x16x128xbf16>
    %29 = vector.shape_cast %28 : vector<16x16x128xbf16> to vector<256x128xbf16>
    %c0_49 = arith.constant 0 : index
    %c2_50 = arith.constant 2 : index
    %c0_51 = arith.constant 0 : index
    %c0_52 = arith.constant 0 : index
    %30 = vector.load %arg2[%c0_49, %c2_50, %c0_51, %c0_52] : memref<3x3x128x128xbf16, #tpu.memory_space<vmem>>, vector<1x1x128x128xbf16>
    %31 = vector.shape_cast %30 : vector<1x1x128x128xbf16> to vector<128x128xbf16>
    %cst_53 = arith.constant dense<0.000000e+00> : vector<256x128xf32>
    %32 = tpu.matmul %29, %31, %cst_53 {dimension_numbers = #tpu.dot_dimension_numbers<[1], [0], [0], [1], [0, 0, 1, 1], [], []>} : vector<256x128xbf16>, vector<128x128xbf16>, vector<256x128xf32> -> vector<256x128xf32>
    %33 = arith.addf %27, %32 : vector<256x128xf32>
    %c1_54 = arith.constant 1 : index
    %c0_55 = arith.constant 0 : index
    %c0_56 = arith.constant 0 : index
    %34 = vector.load %arg8[%c1_54, %c0_55, %c0_56] : memref<18x18x128xbf16, #tpu.memory_space<vmem>>, vector<16x16x128xbf16>
    %35 = vector.shape_cast %34 : vector<16x16x128xbf16> to vector<256x128xbf16>
    %c1_57 = arith.constant 1 : index
    %c0_58 = arith.constant 0 : index
    %c0_59 = arith.constant 0 : index
    %c0_60 = arith.constant 0 : index
    %36 = vector.load %arg2[%c1_57, %c0_58, %c0_59, %c0_60] : memref<3x3x128x128xbf16, #tpu.memory_space<vmem>>, vector<1x1x128x128xbf16>
    %37 = vector.shape_cast %36 : vector<1x1x128x128xbf16> to vector<128x128xbf16>
    %cst_61 = arith.constant dense<0.000000e+00> : vector<256x128xf32>
    %38 = tpu.matmul %35, %37, %cst_61 {dimension_numbers = #tpu.dot_dimension_numbers<[1], [0], [0], [1], [0, 0, 1, 1], [], []>} : vector<256x128xbf16>, vector<128x128xbf16>, vector<256x128xf32> -> vector<256x128xf32>
    %39 = arith.addf %33, %38 : vector<256x128xf32>
    %c1_62 = arith.constant 1 : index
    %c1_63 = arith.constant 1 : index
    %c0_64 = arith.constant 0 : index
    %40 = vector.load %arg8[%c1_62, %c1_63, %c0_64] : memref<18x18x128xbf16, #tpu.memory_space<vmem>>, vector<16x16x128xbf16>
    %41 = vector.shape_cast %40 : vector<16x16x128xbf16> to vector<256x128xbf16>
    %c1_65 = arith.constant 1 : index
    %c1_66 = arith.constant 1 : index
    %c0_67 = arith.constant 0 : index
    %c0_68 = arith.constant 0 : index
    %42 = vector.load %arg2[%c1_65, %c1_66, %c0_67, %c0_68] : memref<3x3x128x128xbf16, #tpu.memory_space<vmem>>, vector<1x1x128x128xbf16>
    %43 = vector.shape_cast %42 : vector<1x1x128x128xbf16> to vector<128x128xbf16>
    %cst_69 = arith.constant dense<0.000000e+00> : vector<256x128xf32>
    %44 = tpu.matmul %41, %43, %cst_69 {dimension_numbers = #tpu.dot_dimension_numbers<[1], [0], [0], [1], [0, 0, 1, 1], [], []>} : vector<256x128xbf16>, vector<128x128xbf16>, vector<256x128xf32> -> vector<256x128xf32>
    %45 = arith.addf %39, %44 : vector<256x128xf32>
    %c1_70 = arith.constant 1 : index
    %c2_71 = arith.constant 2 : index
    %c0_72 = arith.constant 0 : index
    %46 = vector.load %arg8[%c1_70, %c2_71, %c0_72] : memref<18x18x128xbf16, #tpu.memory_space<vmem>>, vector<16x16x128xbf16>
    %47 = vector.shape_cast %46 : vector<16x16x128xbf16> to vector<256x128xbf16>
    %c1_73 = arith.constant 1 : index
    %c2_74 = arith.constant 2 : index
    %c0_75 = arith.constant 0 : index
    %c0_76 = arith.constant 0 : index
    %48 = vector.load %arg2[%c1_73, %c2_74, %c0_75, %c0_76] : memref<3x3x128x128xbf16, #tpu.memory_space<vmem>>, vector<1x1x128x128xbf16>
    %49 = vector.shape_cast %48 : vector<1x1x128x128xbf16> to vector<128x128xbf16>
    %cst_77 = arith.constant dense<0.000000e+00> : vector<256x128xf32>
    %50 = tpu.matmul %47, %49, %cst_77 {dimension_numbers = #tpu.dot_dimension_numbers<[1], [0], [0], [1], [0, 0, 1, 1], [], []>} : vector<256x128xbf16>, vector<128x128xbf16>, vector<256x128xf32> -> vector<256x128xf32>
    %51 = arith.addf %45, %50 : vector<256x128xf32>
    %c2_78 = arith.constant 2 : index
    %c0_79 = arith.constant 0 : index
    %c0_80 = arith.constant 0 : index
    %52 = vector.load %arg8[%c2_78, %c0_79, %c0_80] : memref<18x18x128xbf16, #tpu.memory_space<vmem>>, vector<16x16x128xbf16>
    %53 = vector.shape_cast %52 : vector<16x16x128xbf16> to vector<256x128xbf16>
    %c2_81 = arith.constant 2 : index
    %c0_82 = arith.constant 0 : index
    %c0_83 = arith.constant 0 : index
    %c0_84 = arith.constant 0 : index
    %54 = vector.load %arg2[%c2_81, %c0_82, %c0_83, %c0_84] : memref<3x3x128x128xbf16, #tpu.memory_space<vmem>>, vector<1x1x128x128xbf16>
    %55 = vector.shape_cast %54 : vector<1x1x128x128xbf16> to vector<128x128xbf16>
    %cst_85 = arith.constant dense<0.000000e+00> : vector<256x128xf32>
    %56 = tpu.matmul %53, %55, %cst_85 {dimension_numbers = #tpu.dot_dimension_numbers<[1], [0], [0], [1], [0, 0, 1, 1], [], []>} : vector<256x128xbf16>, vector<128x128xbf16>, vector<256x128xf32> -> vector<256x128xf32>
    %57 = arith.addf %51, %56 : vector<256x128xf32>
    %c2_86 = arith.constant 2 : index
    %c1_87 = arith.constant 1 : index
    %c0_88 = arith.constant 0 : index
    %58 = vector.load %arg8[%c2_86, %c1_87, %c0_88] : memref<18x18x128xbf16, #tpu.memory_space<vmem>>, vector<16x16x128xbf16>
    %59 = vector.shape_cast %58 : vector<16x16x128xbf16> to vector<256x128xbf16>
    %c2_89 = arith.constant 2 : index
    %c1_90 = arith.constant 1 : index
    %c0_91 = arith.constant 0 : index
    %c0_92 = arith.constant 0 : index
    %60 = vector.load %arg2[%c2_89, %c1_90, %c0_91, %c0_92] : memref<3x3x128x128xbf16, #tpu.memory_space<vmem>>, vector<1x1x128x128xbf16>
    %61 = vector.shape_cast %60 : vector<1x1x128x128xbf16> to vector<128x128xbf16>
    %cst_93 = arith.constant dense<0.000000e+00> : vector<256x128xf32>
    %62 = tpu.matmul %59, %61, %cst_93 {dimension_numbers = #tpu.dot_dimension_numbers<[1], [0], [0], [1], [0, 0, 1, 1], [], []>} : vector<256x128xbf16>, vector<128x128xbf16>, vector<256x128xf32> -> vector<256x128xf32>
    %63 = arith.addf %57, %62 : vector<256x128xf32>
    %c2_94 = arith.constant 2 : index
    %c2_95 = arith.constant 2 : index
    %c0_96 = arith.constant 0 : index
    %64 = vector.load %arg8[%c2_94, %c2_95, %c0_96] : memref<18x18x128xbf16, #tpu.memory_space<vmem>>, vector<16x16x128xbf16>
    %65 = vector.shape_cast %64 : vector<16x16x128xbf16> to vector<256x128xbf16>
    %c2_97 = arith.constant 2 : index
    %c2_98 = arith.constant 2 : index
    %c0_99 = arith.constant 0 : index
    %c0_100 = arith.constant 0 : index
    %66 = vector.load %arg2[%c2_97, %c2_98, %c0_99, %c0_100] : memref<3x3x128x128xbf16, #tpu.memory_space<vmem>>, vector<1x1x128x128xbf16>
    %67 = vector.shape_cast %66 : vector<1x1x128x128xbf16> to vector<128x128xbf16>
    %cst_101 = arith.constant dense<0.000000e+00> : vector<256x128xf32>
    %68 = tpu.matmul %65, %67, %cst_101 {dimension_numbers = #tpu.dot_dimension_numbers<[1], [0], [0], [1], [0, 0, 1, 1], [], []>} : vector<256x128xbf16>, vector<128x128xbf16>, vector<256x128xf32> -> vector<256x128xf32>
    %69 = arith.addf %63, %68 : vector<256x128xf32>
    %c0_102 = arith.constant 0 : index
    %c0_103 = arith.constant 0 : index
    %70 = vector.load %arg6[%c0_102, %c0_103] : memref<8x128xf32, #tpu.memory_space<vmem>>, vector<1x128xf32>
    %c1_104 = arith.constant 1 : index
    %c0_105 = arith.constant 0 : index
    %71 = vector.load %arg6[%c1_104, %c0_105] : memref<8x128xf32, #tpu.memory_space<vmem>>, vector<1x128xf32>
    %72 = vector.shape_cast %69 : vector<256x128xf32> to vector<8x2x16x128xf32>
    %cst_106 = arith.constant dense<0xFF800000> : vector<8x16x128xf32>
    %73 = vector.multi_reduction <maximumf>, %72, %cst_106 [1] : vector<8x2x16x128xf32> to vector<8x16x128xf32>
    %74 = vector.shape_cast %73 : vector<8x16x128xf32> to vector<8x8x2x128xf32>
    %cst_107 = arith.constant dense<0xFF800000> : vector<8x8x128xf32>
    %75 = vector.multi_reduction <maximumf>, %74, %cst_107 [2] : vector<8x8x2x128xf32> to vector<8x8x128xf32>
    %76 = vector.shape_cast %70 : vector<1x128xf32> to vector<1x1x128xf32>
    %77 = vector.broadcast %76 : vector<1x1x128xf32> to vector<8x8x128xf32>
    %78 = arith.mulf %75, %77 : vector<8x8x128xf32>
    %79 = vector.shape_cast %71 : vector<1x128xf32> to vector<1x1x128xf32>
    %80 = vector.broadcast %79 : vector<1x1x128xf32> to vector<8x8x128xf32>
    %81 = arith.addf %78, %80 : vector<8x8x128xf32>
    %cst_108 = arith.constant 0.000000e+00 : f32
    %82 = vector.broadcast %cst_108 : f32 to vector<8x8x128xf32>
    %83 = arith.maximumf %81, %82 : vector<8x8x128xf32>
    %84 = arith.truncf %83 : vector<8x8x128xf32> to vector<8x8x128xbf16>
    %c1_109 = arith.constant 1 : index
    %c1_110 = arith.constant 1 : index
    %c0_111 = arith.constant 0 : index
    %85 = vector.load %arg9[%c1_109, %c1_110, %c0_111] : memref<10x10x128xbf16, #tpu.memory_space<vmem>>, vector<8x8x128xbf16>
    tpu.vector_store %arg9[%c1_109, %c1_110, %c0_111], %84 {strides = array<i32>} : memref<10x10x128xbf16, #tpu.memory_space<vmem>>, vector<8x8x128xbf16>,
    %cst_112 = arith.constant 0.000000e+00 : f32
    %86 = vector.broadcast %cst_112 : f32 to vector<64x128xf32>
    %c0_113 = arith.constant 0 : index
    %c0_114 = arith.constant 0 : index
    %c0_115 = arith.constant 0 : index
    %87 = vector.load %arg9[%c0_113, %c0_114, %c0_115] : memref<10x10x128xbf16, #tpu.memory_space<vmem>>, vector<8x8x128xbf16>
    %88 = vector.shape_cast %87 : vector<8x8x128xbf16> to vector<64x128xbf16>
    %c0_116 = arith.constant 0 : index
    %c0_117 = arith.constant 0 : index
    %c0_118 = arith.constant 0 : index
    %c0_119 = arith.constant 0 : index
    %89 = vector.load %arg3[%c0_116, %c0_117, %c0_118, %c0_119] : memref<3x3x128x128xbf16, #tpu.memory_space<vmem>>, vector<1x1x128x128xbf16>
    %90 = vector.shape_cast %89 : vector<1x1x128x128xbf16> to vector<128x128xbf16>
    %cst_120 = arith.constant dense<0.000000e+00> : vector<64x128xf32>
    %91 = tpu.matmul %88, %90, %cst_120 {dimension_numbers = #tpu.dot_dimension_numbers<[1], [0], [0], [1], [0, 0, 1, 1], [], []>} : vector<64x128xbf16>, vector<128x128xbf16>, vector<64x128xf32> -> vector<64x128xf32>
    %92 = arith.addf %86, %91 : vector<64x128xf32>
    %c0_121 = arith.constant 0 : index
    %c1_122 = arith.constant 1 : index
    %c0_123 = arith.constant 0 : index
    %93 = vector.load %arg9[%c0_121, %c1_122, %c0_123] : memref<10x10x128xbf16, #tpu.memory_space<vmem>>, vector<8x8x128xbf16>
    %94 = vector.shape_cast %93 : vector<8x8x128xbf16> to vector<64x128xbf16>
    %c0_124 = arith.constant 0 : index
    %c1_125 = arith.constant 1 : index
    %c0_126 = arith.constant 0 : index
    %c0_127 = arith.constant 0 : index
    %95 = vector.load %arg3[%c0_124, %c1_125, %c0_126, %c0_127] : memref<3x3x128x128xbf16, #tpu.memory_space<vmem>>, vector<1x1x128x128xbf16>
    %96 = vector.shape_cast %95 : vector<1x1x128x128xbf16> to vector<128x128xbf16>
    %cst_128 = arith.constant dense<0.000000e+00> : vector<64x128xf32>
    %97 = tpu.matmul %94, %96, %cst_128 {dimension_numbers = #tpu.dot_dimension_numbers<[1], [0], [0], [1], [0, 0, 1, 1], [], []>} : vector<64x128xbf16>, vector<128x128xbf16>, vector<64x128xf32> -> vector<64x128xf32>
    %98 = arith.addf %92, %97 : vector<64x128xf32>
    %c0_129 = arith.constant 0 : index
    %c2_130 = arith.constant 2 : index
    %c0_131 = arith.constant 0 : index
    %99 = vector.load %arg9[%c0_129, %c2_130, %c0_131] : memref<10x10x128xbf16, #tpu.memory_space<vmem>>, vector<8x8x128xbf16>
    %100 = vector.shape_cast %99 : vector<8x8x128xbf16> to vector<64x128xbf16>
    %c0_132 = arith.constant 0 : index
    %c2_133 = arith.constant 2 : index
    %c0_134 = arith.constant 0 : index
    %c0_135 = arith.constant 0 : index
    %101 = vector.load %arg3[%c0_132, %c2_133, %c0_134, %c0_135] : memref<3x3x128x128xbf16, #tpu.memory_space<vmem>>, vector<1x1x128x128xbf16>
    %102 = vector.shape_cast %101 : vector<1x1x128x128xbf16> to vector<128x128xbf16>
    %cst_136 = arith.constant dense<0.000000e+00> : vector<64x128xf32>
    %103 = tpu.matmul %100, %102, %cst_136 {dimension_numbers = #tpu.dot_dimension_numbers<[1], [0], [0], [1], [0, 0, 1, 1], [], []>} : vector<64x128xbf16>, vector<128x128xbf16>, vector<64x128xf32> -> vector<64x128xf32>
    %104 = arith.addf %98, %103 : vector<64x128xf32>
    %c1_137 = arith.constant 1 : index
    %c0_138 = arith.constant 0 : index
    %c0_139 = arith.constant 0 : index
    %105 = vector.load %arg9[%c1_137, %c0_138, %c0_139] : memref<10x10x128xbf16, #tpu.memory_space<vmem>>, vector<8x8x128xbf16>
    %106 = vector.shape_cast %105 : vector<8x8x128xbf16> to vector<64x128xbf16>
    %c1_140 = arith.constant 1 : index
    %c0_141 = arith.constant 0 : index
    %c0_142 = arith.constant 0 : index
    %c0_143 = arith.constant 0 : index
    %107 = vector.load %arg3[%c1_140, %c0_141, %c0_142, %c0_143] : memref<3x3x128x128xbf16, #tpu.memory_space<vmem>>, vector<1x1x128x128xbf16>
    %108 = vector.shape_cast %107 : vector<1x1x128x128xbf16> to vector<128x128xbf16>
    %cst_144 = arith.constant dense<0.000000e+00> : vector<64x128xf32>
    %109 = tpu.matmul %106, %108, %cst_144 {dimension_numbers = #tpu.dot_dimension_numbers<[1], [0], [0], [1], [0, 0, 1, 1], [], []>} : vector<64x128xbf16>, vector<128x128xbf16>, vector<64x128xf32> -> vector<64x128xf32>
    %110 = arith.addf %104, %109 : vector<64x128xf32>
    %c1_145 = arith.constant 1 : index
    %c1_146 = arith.constant 1 : index
    %c0_147 = arith.constant 0 : index
    %111 = vector.load %arg9[%c1_145, %c1_146, %c0_147] : memref<10x10x128xbf16, #tpu.memory_space<vmem>>, vector<8x8x128xbf16>
    %112 = vector.shape_cast %111 : vector<8x8x128xbf16> to vector<64x128xbf16>
    %c1_148 = arith.constant 1 : index
    %c1_149 = arith.constant 1 : index
    %c0_150 = arith.constant 0 : index
    %c0_151 = arith.constant 0 : index
    %113 = vector.load %arg3[%c1_148, %c1_149, %c0_150, %c0_151] : memref<3x3x128x128xbf16, #tpu.memory_space<vmem>>, vector<1x1x128x128xbf16>
    %114 = vector.shape_cast %113 : vector<1x1x128x128xbf16> to vector<128x128xbf16>
    %cst_152 = arith.constant dense<0.000000e+00> : vector<64x128xf32>
    %115 = tpu.matmul %112, %114, %cst_152 {dimension_numbers = #tpu.dot_dimension_numbers<[1], [0], [0], [1], [0, 0, 1, 1], [], []>} : vector<64x128xbf16>, vector<128x128xbf16>, vector<64x128xf32> -> vector<64x128xf32>
    %116 = arith.addf %110, %115 : vector<64x128xf32>
    %c1_153 = arith.constant 1 : index
    %c2_154 = arith.constant 2 : index
    %c0_155 = arith.constant 0 : index
    %117 = vector.load %arg9[%c1_153, %c2_154, %c0_155] : memref<10x10x128xbf16, #tpu.memory_space<vmem>>, vector<8x8x128xbf16>
    %118 = vector.shape_cast %117 : vector<8x8x128xbf16> to vector<64x128xbf16>
    %c1_156 = arith.constant 1 : index
    %c2_157 = arith.constant 2 : index
    %c0_158 = arith.constant 0 : index
    %c0_159 = arith.constant 0 : index
    %119 = vector.load %arg3[%c1_156, %c2_157, %c0_158, %c0_159] : memref<3x3x128x128xbf16, #tpu.memory_space<vmem>>, vector<1x1x128x128xbf16>
    %120 = vector.shape_cast %119 : vector<1x1x128x128xbf16> to vector<128x128xbf16>
    %cst_160 = arith.constant dense<0.000000e+00> : vector<64x128xf32>
    %121 = tpu.matmul %118, %120, %cst_160 {dimension_numbers = #tpu.dot_dimension_numbers<[1], [0], [0], [1], [0, 0, 1, 1], [], []>} : vector<64x128xbf16>, vector<128x128xbf16>, vector<64x128xf32> -> vector<64x128xf32>
    %122 = arith.addf %116, %121 : vector<64x128xf32>
    %c2_161 = arith.constant 2 : index
    %c0_162 = arith.constant 0 : index
    %c0_163 = arith.constant 0 : index
    %123 = vector.load %arg9[%c2_161, %c0_162, %c0_163] : memref<10x10x128xbf16, #tpu.memory_space<vmem>>, vector<8x8x128xbf16>
    %124 = vector.shape_cast %123 : vector<8x8x128xbf16> to vector<64x128xbf16>
    %c2_164 = arith.constant 2 : index
    %c0_165 = arith.constant 0 : index
    %c0_166 = arith.constant 0 : index
    %c0_167 = arith.constant 0 : index
    %125 = vector.load %arg3[%c2_164, %c0_165, %c0_166, %c0_167] : memref<3x3x128x128xbf16, #tpu.memory_space<vmem>>, vector<1x1x128x128xbf16>
    %126 = vector.shape_cast %125 : vector<1x1x128x128xbf16> to vector<128x128xbf16>
    %cst_168 = arith.constant dense<0.000000e+00> : vector<64x128xf32>
    %127 = tpu.matmul %124, %126, %cst_168 {dimension_numbers = #tpu.dot_dimension_numbers<[1], [0], [0], [1], [0, 0, 1, 1], [], []>} : vector<64x128xbf16>, vector<128x128xbf16>, vector<64x128xf32> -> vector<64x128xf32>
    %128 = arith.addf %122, %127 : vector<64x128xf32>
    %c2_169 = arith.constant 2 : index
    %c1_170 = arith.constant 1 : index
    %c0_171 = arith.constant 0 : index
    %129 = vector.load %arg9[%c2_169, %c1_170, %c0_171] : memref<10x10x128xbf16, #tpu.memory_space<vmem>>, vector<8x8x128xbf16>
    %130 = vector.shape_cast %129 : vector<8x8x128xbf16> to vector<64x128xbf16>
    %c2_172 = arith.constant 2 : index
    %c1_173 = arith.constant 1 : index
    %c0_174 = arith.constant 0 : index
    %c0_175 = arith.constant 0 : index
    %131 = vector.load %arg3[%c2_172, %c1_173, %c0_174, %c0_175] : memref<3x3x128x128xbf16, #tpu.memory_space<vmem>>, vector<1x1x128x128xbf16>
    %132 = vector.shape_cast %131 : vector<1x1x128x128xbf16> to vector<128x128xbf16>
    %cst_176 = arith.constant dense<0.000000e+00> : vector<64x128xf32>
    %133 = tpu.matmul %130, %132, %cst_176 {dimension_numbers = #tpu.dot_dimension_numbers<[1], [0], [0], [1], [0, 0, 1, 1], [], []>} : vector<64x128xbf16>, vector<128x128xbf16>, vector<64x128xf32> -> vector<64x128xf32>
    %134 = arith.addf %128, %133 : vector<64x128xf32>
    %c2_177 = arith.constant 2 : index
    %c2_178 = arith.constant 2 : index
    %c0_179 = arith.constant 0 : index
    %135 = vector.load %arg9[%c2_177, %c2_178, %c0_179] : memref<10x10x128xbf16, #tpu.memory_space<vmem>>, vector<8x8x128xbf16>
    %136 = vector.shape_cast %135 : vector<8x8x128xbf16> to vector<64x128xbf16>
    %c2_180 = arith.constant 2 : index
    %c2_181 = arith.constant 2 : index
    %c0_182 = arith.constant 0 : index
    %c0_183 = arith.constant 0 : index
    %137 = vector.load %arg3[%c2_180, %c2_181, %c0_182, %c0_183] : memref<3x3x128x128xbf16, #tpu.memory_space<vmem>>, vector<1x1x128x128xbf16>
    %138 = vector.shape_cast %137 : vector<1x1x128x128xbf16> to vector<128x128xbf16>
    %cst_184 = arith.constant dense<0.000000e+00> : vector<64x128xf32>
    %139 = tpu.matmul %136, %138, %cst_184 {dimension_numbers = #tpu.dot_dimension_numbers<[1], [0], [0], [1], [0, 0, 1, 1], [], []>} : vector<64x128xbf16>, vector<128x128xbf16>, vector<64x128xf32> -> vector<64x128xf32>
    %140 = arith.addf %134, %139 : vector<64x128xf32>
    %c2_185 = arith.constant 2 : index
    %c0_186 = arith.constant 0 : index
    %141 = vector.load %arg6[%c2_185, %c0_186] : memref<8x128xf32, #tpu.memory_space<vmem>>, vector<1x128xf32>
    %c3 = arith.constant 3 : index
    %c0_187 = arith.constant 0 : index
    %142 = vector.load %arg6[%c3, %c0_187] : memref<8x128xf32, #tpu.memory_space<vmem>>, vector<1x128xf32>
    %143 = vector.broadcast %141 : vector<1x128xf32> to vector<64x128xf32>
    %144 = arith.mulf %140, %143 : vector<64x128xf32>
    %145 = vector.broadcast %142 : vector<1x128xf32> to vector<64x128xf32>
    %146 = arith.addf %144, %145 : vector<64x128xf32>
    %cst_188 = arith.constant 0.000000e+00 : f32
    %147 = vector.broadcast %cst_188 : f32 to vector<64x128xf32>
    %148 = arith.maximumf %146, %147 : vector<64x128xf32>
    %149 = vector.shape_cast %148 : vector<64x128xf32> to vector<8x8x128xf32>
    %150 = arith.truncf %149 : vector<8x8x128xf32> to vector<8x8x128xbf16>
    %c1_189 = arith.constant 1 : index
    %c1_190 = arith.constant 1 : index
    %c0_191 = arith.constant 0 : index
    %151 = vector.load %arg9[%c1_189, %c1_190, %c0_191] : memref<10x10x128xbf16, #tpu.memory_space<vmem>>, vector<8x8x128xbf16>
    tpu.vector_store %arg9[%c1_189, %c1_190, %c0_191], %150 {strides = array<i32>} : memref<10x10x128xbf16, #tpu.memory_space<vmem>>, vector<8x8x128xbf16>,
    %cst_192 = arith.constant 0.000000e+00 : f32
    %152 = vector.broadcast %cst_192 : f32 to vector<64x128xf32>
    %c0_193 = arith.constant 0 : index
    %c0_194 = arith.constant 0 : index
    %c0_195 = arith.constant 0 : index
    %153 = vector.load %arg9[%c0_193, %c0_194, %c0_195] : memref<10x10x128xbf16, #tpu.memory_space<vmem>>, vector<8x8x128xbf16>
    %154 = vector.shape_cast %153 : vector<8x8x128xbf16> to vector<64x128xbf16>
    %c0_196 = arith.constant 0 : index
    %c0_197 = arith.constant 0 : index
    %c0_198 = arith.constant 0 : index
    %c0_199 = arith.constant 0 : index
    %155 = vector.load %arg4[%c0_196, %c0_197, %c0_198, %c0_199] : memref<3x3x128x128xbf16, #tpu.memory_space<vmem>>, vector<1x1x128x128xbf16>
    %156 = vector.shape_cast %155 : vector<1x1x128x128xbf16> to vector<128x128xbf16>
    %cst_200 = arith.constant dense<0.000000e+00> : vector<64x128xf32>
    %157 = tpu.matmul %154, %156, %cst_200 {dimension_numbers = #tpu.dot_dimension_numbers<[1], [0], [0], [1], [0, 0, 1, 1], [], []>} : vector<64x128xbf16>, vector<128x128xbf16>, vector<64x128xf32> -> vector<64x128xf32>
    %158 = arith.addf %152, %157 : vector<64x128xf32>
    %c0_201 = arith.constant 0 : index
    %c1_202 = arith.constant 1 : index
    %c0_203 = arith.constant 0 : index
    %159 = vector.load %arg9[%c0_201, %c1_202, %c0_203] : memref<10x10x128xbf16, #tpu.memory_space<vmem>>, vector<8x8x128xbf16>
    %160 = vector.shape_cast %159 : vector<8x8x128xbf16> to vector<64x128xbf16>
    %c0_204 = arith.constant 0 : index
    %c1_205 = arith.constant 1 : index
    %c0_206 = arith.constant 0 : index
    %c0_207 = arith.constant 0 : index
    %161 = vector.load %arg4[%c0_204, %c1_205, %c0_206, %c0_207] : memref<3x3x128x128xbf16, #tpu.memory_space<vmem>>, vector<1x1x128x128xbf16>
    %162 = vector.shape_cast %161 : vector<1x1x128x128xbf16> to vector<128x128xbf16>
    %cst_208 = arith.constant dense<0.000000e+00> : vector<64x128xf32>
    %163 = tpu.matmul %160, %162, %cst_208 {dimension_numbers = #tpu.dot_dimension_numbers<[1], [0], [0], [1], [0, 0, 1, 1], [], []>} : vector<64x128xbf16>, vector<128x128xbf16>, vector<64x128xf32> -> vector<64x128xf32>
    %164 = arith.addf %158, %163 : vector<64x128xf32>
    %c0_209 = arith.constant 0 : index
    %c2_210 = arith.constant 2 : index
    %c0_211 = arith.constant 0 : index
    %165 = vector.load %arg9[%c0_209, %c2_210, %c0_211] : memref<10x10x128xbf16, #tpu.memory_space<vmem>>, vector<8x8x128xbf16>
    %166 = vector.shape_cast %165 : vector<8x8x128xbf16> to vector<64x128xbf16>
    %c0_212 = arith.constant 0 : index
    %c2_213 = arith.constant 2 : index
    %c0_214 = arith.constant 0 : index
    %c0_215 = arith.constant 0 : index
    %167 = vector.load %arg4[%c0_212, %c2_213, %c0_214, %c0_215] : memref<3x3x128x128xbf16, #tpu.memory_space<vmem>>, vector<1x1x128x128xbf16>
    %168 = vector.shape_cast %167 : vector<1x1x128x128xbf16> to vector<128x128xbf16>
    %cst_216 = arith.constant dense<0.000000e+00> : vector<64x128xf32>
    %169 = tpu.matmul %166, %168, %cst_216 {dimension_numbers = #tpu.dot_dimension_numbers<[1], [0], [0], [1], [0, 0, 1, 1], [], []>} : vector<64x128xbf16>, vector<128x128xbf16>, vector<64x128xf32> -> vector<64x128xf32>
    %170 = arith.addf %164, %169 : vector<64x128xf32>
    %c1_217 = arith.constant 1 : index
    %c0_218 = arith.constant 0 : index
    %c0_219 = arith.constant 0 : index
    %171 = vector.load %arg9[%c1_217, %c0_218, %c0_219] : memref<10x10x128xbf16, #tpu.memory_space<vmem>>, vector<8x8x128xbf16>
    %172 = vector.shape_cast %171 : vector<8x8x128xbf16> to vector<64x128xbf16>
    %c1_220 = arith.constant 1 : index
    %c0_221 = arith.constant 0 : index
    %c0_222 = arith.constant 0 : index
    %c0_223 = arith.constant 0 : index
    %173 = vector.load %arg4[%c1_220, %c0_221, %c0_222, %c0_223] : memref<3x3x128x128xbf16, #tpu.memory_space<vmem>>, vector<1x1x128x128xbf16>
    %174 = vector.shape_cast %173 : vector<1x1x128x128xbf16> to vector<128x128xbf16>
    %cst_224 = arith.constant dense<0.000000e+00> : vector<64x128xf32>
    %175 = tpu.matmul %172, %174, %cst_224 {dimension_numbers = #tpu.dot_dimension_numbers<[1], [0], [0], [1], [0, 0, 1, 1], [], []>} : vector<64x128xbf16>, vector<128x128xbf16>, vector<64x128xf32> -> vector<64x128xf32>
    %176 = arith.addf %170, %175 : vector<64x128xf32>
    %c1_225 = arith.constant 1 : index
    %c1_226 = arith.constant 1 : index
    %c0_227 = arith.constant 0 : index
    %177 = vector.load %arg9[%c1_225, %c1_226, %c0_227] : memref<10x10x128xbf16, #tpu.memory_space<vmem>>, vector<8x8x128xbf16>
    %178 = vector.shape_cast %177 : vector<8x8x128xbf16> to vector<64x128xbf16>
    %c1_228 = arith.constant 1 : index
    %c1_229 = arith.constant 1 : index
    %c0_230 = arith.constant 0 : index
    %c0_231 = arith.constant 0 : index
    %179 = vector.load %arg4[%c1_228, %c1_229, %c0_230, %c0_231] : memref<3x3x128x128xbf16, #tpu.memory_space<vmem>>, vector<1x1x128x128xbf16>
    %180 = vector.shape_cast %179 : vector<1x1x128x128xbf16> to vector<128x128xbf16>
    %cst_232 = arith.constant dense<0.000000e+00> : vector<64x128xf32>
    %181 = tpu.matmul %178, %180, %cst_232 {dimension_numbers = #tpu.dot_dimension_numbers<[1], [0], [0], [1], [0, 0, 1, 1], [], []>} : vector<64x128xbf16>, vector<128x128xbf16>, vector<64x128xf32> -> vector<64x128xf32>
    %182 = arith.addf %176, %181 : vector<64x128xf32>
    %c1_233 = arith.constant 1 : index
    %c2_234 = arith.constant 2 : index
    %c0_235 = arith.constant 0 : index
    %183 = vector.load %arg9[%c1_233, %c2_234, %c0_235] : memref<10x10x128xbf16, #tpu.memory_space<vmem>>, vector<8x8x128xbf16>
    %184 = vector.shape_cast %183 : vector<8x8x128xbf16> to vector<64x128xbf16>
    %c1_236 = arith.constant 1 : index
    %c2_237 = arith.constant 2 : index
    %c0_238 = arith.constant 0 : index
    %c0_239 = arith.constant 0 : index
    %185 = vector.load %arg4[%c1_236, %c2_237, %c0_238, %c0_239] : memref<3x3x128x128xbf16, #tpu.memory_space<vmem>>, vector<1x1x128x128xbf16>
    %186 = vector.shape_cast %185 : vector<1x1x128x128xbf16> to vector<128x128xbf16>
    %cst_240 = arith.constant dense<0.000000e+00> : vector<64x128xf32>
    %187 = tpu.matmul %184, %186, %cst_240 {dimension_numbers = #tpu.dot_dimension_numbers<[1], [0], [0], [1], [0, 0, 1, 1], [], []>} : vector<64x128xbf16>, vector<128x128xbf16>, vector<64x128xf32> -> vector<64x128xf32>
    %188 = arith.addf %182, %187 : vector<64x128xf32>
    %c2_241 = arith.constant 2 : index
    %c0_242 = arith.constant 0 : index
    %c0_243 = arith.constant 0 : index
    %189 = vector.load %arg9[%c2_241, %c0_242, %c0_243] : memref<10x10x128xbf16, #tpu.memory_space<vmem>>, vector<8x8x128xbf16>
    %190 = vector.shape_cast %189 : vector<8x8x128xbf16> to vector<64x128xbf16>
    %c2_244 = arith.constant 2 : index
    %c0_245 = arith.constant 0 : index
    %c0_246 = arith.constant 0 : index
    %c0_247 = arith.constant 0 : index
    %191 = vector.load %arg4[%c2_244, %c0_245, %c0_246, %c0_247] : memref<3x3x128x128xbf16, #tpu.memory_space<vmem>>, vector<1x1x128x128xbf16>
    %192 = vector.shape_cast %191 : vector<1x1x128x128xbf16> to vector<128x128xbf16>
    %cst_248 = arith.constant dense<0.000000e+00> : vector<64x128xf32>
    %193 = tpu.matmul %190, %192, %cst_248 {dimension_numbers = #tpu.dot_dimension_numbers<[1], [0], [0], [1], [0, 0, 1, 1], [], []>} : vector<64x128xbf16>, vector<128x128xbf16>, vector<64x128xf32> -> vector<64x128xf32>
    %194 = arith.addf %188, %193 : vector<64x128xf32>
    %c2_249 = arith.constant 2 : index
    %c1_250 = arith.constant 1 : index
    %c0_251 = arith.constant 0 : index
    %195 = vector.load %arg9[%c2_249, %c1_250, %c0_251] : memref<10x10x128xbf16, #tpu.memory_space<vmem>>, vector<8x8x128xbf16>
    %196 = vector.shape_cast %195 : vector<8x8x128xbf16> to vector<64x128xbf16>
    %c2_252 = arith.constant 2 : index
    %c1_253 = arith.constant 1 : index
    %c0_254 = arith.constant 0 : index
    %c0_255 = arith.constant 0 : index
    %197 = vector.load %arg4[%c2_252, %c1_253, %c0_254, %c0_255] : memref<3x3x128x128xbf16, #tpu.memory_space<vmem>>, vector<1x1x128x128xbf16>
    %198 = vector.shape_cast %197 : vector<1x1x128x128xbf16> to vector<128x128xbf16>
    %cst_256 = arith.constant dense<0.000000e+00> : vector<64x128xf32>
    %199 = tpu.matmul %196, %198, %cst_256 {dimension_numbers = #tpu.dot_dimension_numbers<[1], [0], [0], [1], [0, 0, 1, 1], [], []>} : vector<64x128xbf16>, vector<128x128xbf16>, vector<64x128xf32> -> vector<64x128xf32>
    %200 = arith.addf %194, %199 : vector<64x128xf32>
    %c2_257 = arith.constant 2 : index
    %c2_258 = arith.constant 2 : index
    %c0_259 = arith.constant 0 : index
    %201 = vector.load %arg9[%c2_257, %c2_258, %c0_259] : memref<10x10x128xbf16, #tpu.memory_space<vmem>>, vector<8x8x128xbf16>
    %202 = vector.shape_cast %201 : vector<8x8x128xbf16> to vector<64x128xbf16>
    %c2_260 = arith.constant 2 : index
    %c2_261 = arith.constant 2 : index
    %c0_262 = arith.constant 0 : index
    %c0_263 = arith.constant 0 : index
    %203 = vector.load %arg4[%c2_260, %c2_261, %c0_262, %c0_263] : memref<3x3x128x128xbf16, #tpu.memory_space<vmem>>, vector<1x1x128x128xbf16>
    %204 = vector.shape_cast %203 : vector<1x1x128x128xbf16> to vector<128x128xbf16>
    %cst_264 = arith.constant dense<0.000000e+00> : vector<64x128xf32>
    %205 = tpu.matmul %202, %204, %cst_264 {dimension_numbers = #tpu.dot_dimension_numbers<[1], [0], [0], [1], [0, 0, 1, 1], [], []>} : vector<64x128xbf16>, vector<128x128xbf16>, vector<64x128xf32> -> vector<64x128xf32>
    %206 = arith.addf %200, %205 : vector<64x128xf32>
    %c4 = arith.constant 4 : index
    %c0_265 = arith.constant 0 : index
    %207 = vector.load %arg6[%c4, %c0_265] : memref<8x128xf32, #tpu.memory_space<vmem>>, vector<1x128xf32>
    %c5 = arith.constant 5 : index
    %c0_266 = arith.constant 0 : index
    %208 = vector.load %arg6[%c5, %c0_266] : memref<8x128xf32, #tpu.memory_space<vmem>>, vector<1x128xf32>
    %209 = vector.broadcast %207 : vector<1x128xf32> to vector<64x128xf32>
    %210 = arith.mulf %206, %209 : vector<64x128xf32>
    %211 = vector.broadcast %208 : vector<1x128xf32> to vector<64x128xf32>
    %212 = arith.addf %210, %211 : vector<64x128xf32>
    %cst_267 = arith.constant 0.000000e+00 : f32
    %213 = vector.broadcast %cst_267 : f32 to vector<64x128xf32>
    %214 = arith.maximumf %212, %213 : vector<64x128xf32>
    %215 = vector.shape_cast %13 : vector<16x16x128xbf16> to vector<8x2x16x128xbf16>
    %216 = vector.extract_strided_slice %215 {offsets = [0, 0, 0, 0], sizes = [8, 1, 16, 128], strides = [1, 1, 1, 1]} : vector<8x2x16x128xbf16> to vector<8x1x16x128xbf16>
    %217 = vector.shape_cast %216 : vector<8x1x16x128xbf16> to vector<8x16x128xbf16>
    %218 = vector.shape_cast %217 : vector<8x16x128xbf16> to vector<8x8x2x128xbf16>
    %219 = vector.extract_strided_slice %218 {offsets = [0, 0, 0, 0], sizes = [8, 8, 1, 128], strides = [1, 1, 1, 1]} : vector<8x8x2x128xbf16> to vector<8x8x1x128xbf16>
    %220 = vector.shape_cast %219 : vector<8x8x1x128xbf16> to vector<8x8x128xbf16>
    %221 = vector.shape_cast %220 : vector<8x8x128xbf16> to vector<64x128xbf16>
    %c0_268 = arith.constant 0 : index
    %c0_269 = arith.constant 0 : index
    %222 = vector.load %arg5[%c0_268, %c0_269] : memref<128x128xbf16, #tpu.memory_space<vmem>>, vector<128x128xbf16>
    %cst_270 = arith.constant dense<0.000000e+00> : vector<64x128xf32>
    %223 = tpu.matmul %221, %222, %cst_270 {dimension_numbers = #tpu.dot_dimension_numbers<[1], [0], [0], [1], [0, 0, 1, 1], [], []>} : vector<64x128xbf16>, vector<128x128xbf16>, vector<64x128xf32> -> vector<64x128xf32>
    %c6 = arith.constant 6 : index
    %c0_271 = arith.constant 0 : index
    %224 = vector.load %arg6[%c6, %c0_271] : memref<8x128xf32, #tpu.memory_space<vmem>>, vector<1x128xf32>
    %c7 = arith.constant 7 : index
    %c0_272 = arith.constant 0 : index
    %225 = vector.load %arg6[%c7, %c0_272] : memref<8x128xf32, #tpu.memory_space<vmem>>, vector<1x128xf32>
    %226 = vector.broadcast %224 : vector<1x128xf32> to vector<64x128xf32>
    %227 = arith.mulf %223, %226 : vector<64x128xf32>
    %228 = vector.broadcast %225 : vector<1x128xf32> to vector<64x128xf32>
    %229 = arith.addf %227, %228 : vector<64x128xf32>
    %230 = arith.addf %214, %229 : vector<64x128xf32>
    %231 = vector.shape_cast %230 : vector<64x128xf32> to vector<8x8x128xf32>
    %c0_273 = arith.constant 0 : index
    %c0_274 = arith.constant 0 : index
    %c0_275 = arith.constant 0 : index
    %c0_276 = arith.constant 0 : index
    %232 = vector.load %arg7[%c0_273, %c0_274, %c0_275, %c0_276] : memref<1x8x8x128xf32, #tpu.memory_space<vmem>>, vector<1x8x8x128xf32>
    %233 = vector.shape_cast %232 : vector<1x8x8x128xf32> to vector<8x8x128xf32>
    %234 = vector.shape_cast %231 : vector<8x8x128xf32> to vector<1x8x8x128xf32>
    tpu.vector_store %arg7[%c0_273, %c0_274, %c0_275, %c0_276], %234 {strides = array<i32>} : memref<1x8x8x128xf32, #tpu.memory_space<vmem>>, vector<1x8x8x128xf32>,
    return
  }
  func.func @transform_0(%arg0: i32) -> (i32, i32, i32, i32) {
    %c0_i32 = arith.constant 0 : i32
    %c0_i32_0 = arith.constant 0 : i32
    %c0_i32_1 = arith.constant 0 : i32
    %c0_i32_2 = arith.constant 0 : i32
    return %arg0, %c0_i32, %c0_i32_0, %c0_i32_1 : i32, i32, i32, i32
  }
  func.func @transform_1(%arg0: i32) -> (i32, i32, i32, i32) {
    %c0_i32 = arith.constant 0 : i32
    %c0_i32_0 = arith.constant 0 : i32
    %c0_i32_1 = arith.constant 0 : i32
    %c0_i32_2 = arith.constant 0 : i32
    %c0_i32_3 = arith.constant 0 : i32
    return %c0_i32, %c0_i32_0, %c0_i32_1, %c0_i32_2 : i32, i32, i32, i32
  }
  func.func @transform_2(%arg0: i32) -> (i32, i32, i32, i32) {
    %c0_i32 = arith.constant 0 : i32
    %c0_i32_0 = arith.constant 0 : i32
    %c0_i32_1 = arith.constant 0 : i32
    %c0_i32_2 = arith.constant 0 : i32
    %c0_i32_3 = arith.constant 0 : i32
    return %c0_i32, %c0_i32_0, %c0_i32_1, %c0_i32_2 : i32, i32, i32, i32
  }
  func.func @transform_3(%arg0: i32) -> (i32, i32, i32, i32) {
    %c0_i32 = arith.constant 0 : i32
    %c0_i32_0 = arith.constant 0 : i32
    %c0_i32_1 = arith.constant 0 : i32
    %c0_i32_2 = arith.constant 0 : i32
    %c0_i32_3 = arith.constant 0 : i32
    return %c0_i32, %c0_i32_0, %c0_i32_1, %c0_i32_2 : i32, i32, i32, i32
  }
  func.func @transform_4(%arg0: i32) -> (i32, i32) {
    %c0_i32 = arith.constant 0 : i32
    %c0_i32_0 = arith.constant 0 : i32
    %c0_i32_1 = arith.constant 0 : i32
    return %c0_i32, %c0_i32_0 : i32, i32
  }
  func.func @transform_5(%arg0: i32) -> (i32, i32) {
    %c0_i32 = arith.constant 0 : i32
    %c0_i32_0 = arith.constant 0 : i32
    %c0_i32_1 = arith.constant 0 : i32
    return %c0_i32, %c0_i32_0 : i32, i32
  }
  func.func @transform_6(%arg0: i32) -> (i32, i32, i32, i32) {
    %c0_i32 = arith.constant 0 : i32
    %c0_i32_0 = arith.constant 0 : i32
    %c0_i32_1 = arith.constant 0 : i32
    %c0_i32_2 = arith.constant 0 : i32
    return %arg0, %c0_i32, %c0_i32_0, %c0_i32_1 : i32, i32, i32, i32
  }
}

</mosaic_0001>

<bundles_post_ra>
// kernel: tpu_custom_call.1
= control target key start
LH: loop header
LB: loop body
LE: loop exit
PB: predicated region body
PF: predicated region fallthrough
CT: control target
= control target key end

     0   :  { %11 = vsyncpa [#allocation5], 0  ;;  %s19706_s0 = inlined_call_operand.hbm [shape: bf16[2,16,16,128], index: 0, kind: input, shape index: {}]   ;;  %s19707_s1 = inlined_call_operand.hbm [shape: bf16[3,3,128,128], index: 1, kind: input, shape index: {}]   ;;  %s19708_s2 = inlined_call_operand.hbm [shape: bf16[3,3,128,128], index: 2, kind: input, shape index: {}]   ;;  %s19709_s3 = inlined_call_operand.hbm [shape: bf16[3,3,128,128], index: 3, kind: input, shape index: {}]   ;;  %s19710_s4 = inlined_call_operand.hbm [shape: bf16[128,128], index: 4, kind: input, shape index: {}]   ;;  %s19711_s5 = inlined_call_operand.vmem [shape: f32[8,128], index: 5, kind: input, shape index: {}]   ;;  %s19712_s6 = inlined_call_operand.hbm [shape: f32[2,8,8,128], index: 6, kind: output, shape index: {}]  }
   0x1   :  { %13 = vsyncpa [#allocation5 + $0x1], 0 }
   0x2   :  { %14 = vsyncpa [#allocation8], 0 }
   0x3   :  { %15 = vsyncpa [#allocation11], 0 }
   0x4   :  { %16 = vsyncpa [#allocation6], 0 }
   0x5   :  { %18 = vsyncpa [#allocation6 + $0x1], 0  ;;  %s16452_s21 = smov 0   ;;  %s16454_s22 = smov 0  }
   0x6   :  { %s16456_s23 = smov 0   ;;  %s16458_s24 = smov 0  }
   0x7 LB: > { %s16473_s25 = sadd.s32 4294967295, %s16402_s24   ;;  %s13248_s26 = sadd.s32 4294967294, %s16402_s24   ;;  %s16402_s24 = sphi %s16458_s24, %s19888_s24   ;;  %s16398_s23 = sphi %s16456_s23, %s19887_s23   ;;  %s16394_s22 = sphi %s16454_s22, %s19886_s22   ;;  %s16390_s21 = sphi %s16452_s21, %s19885_s21  }
   0x8   : > { %p44_p0 = scmp.ne.s32.totalorder %s16394_s22, %s16390_s21  ;;  %p19713_p1 = scmp.eq.s32.totalorder %s16473_s25, 0 }
   0x9   : > { %p179_p3 = scmp.eq.s32.totalorder %s13248_s26, 1  ;;  %p13249_p5 = scmp.ge.s32.totalorder %s16402_s24, 1 }
   0xa   : > { %p16482_p4 = por %p19713_p1, %p44_p0  ;;  %p186_p7 = scmp.lt.s32.totalorder %s16402_s24, 3 }
   0xb   : > { %p16487_p6 = por %p179_p3, %p44_p0  ;;  %s16404_s30 = smov [#allocation7]  }
   0xc   : > { %s19749_s27 = scalar_select %p16482_p4, 1, 0 }
   0xd   : > { %s19750_s28 = scalar_select %p16487_p6, 1, 0 }
   0xe   : > { %p16492_p8 = pnand %p13249_p5, %p186_p7  ;;  %s198_s7 = sshll.u32 %s16404_s30, 4  ;;  %s16496_s7 = int_to_ptr.vmem [resolvable:$true] %s198_s7 }
   0xf   : > { %s16405_s9 = smov [#allocation10]   ;;  %s16406_s11 = smov [#allocation9]  }
  0x10   : > { %s19751_s29 = scalar_select %p16492_p8, 1, 0 }
  0x11   : > { %p15728_p9 = pneg %p16492_p8  ;;  %s224_s10 = sshll.u32 %s16405_s9, 4  ;;  %s16507_s10 = int_to_ptr.vmem [resolvable:$true] %s224_s10 }
  0x12   : > { %s16509_s12 = sshll.u32 %s16406_s11, 4  ;;  %s16186_s15 = scalar_lea.hbm %s19707_s1, 9216  ;;  %s212_s12 = int_to_ptr.vmem [resolvable:$true] %s16509_s12 }
  0x13   : > { %p16503_p11 = pnand %p15728_p9, %p19713_p1  ;;  %p16187_p12 = scmp.ne.s32.totalorder %s19707_s1, %s16186_s15 }
  0x14   : > { %p16193_p5 = scmp.lt.u32.totalorder %s16186_s15, %s19707_s1 }
  0x15   : > { %p16519_p13 = pneg %p16503_p11 }
  0x17   : > { %p16189_p0 = pnand %p16519_p13, %p16187_p12 }
  0x19   : > { %p16190_p3 = pneg %p16189_p0 }
  0x1b   : > { %p16195_p7 = pnand %p16193_p5, %p16190_p3 }
  0x1d   : > { %16198 = shalt.err (!%p16195_p7)
}
  0x1e   : > { %s16199_s26 = scalar_lea.vmem %s16496_s7, 9216  ;;  %p16207_p2 = scmp.lt.s32.totalorder %s16496_s7, %s16496_s7 }
  0x1f   : > { %p16200_p9 = scmp.ne.s32.totalorder %s16496_s7, %s16199_s26  ;;  %p16208_p6 = scmp.lt.s32.totalorder %s16199_s26, %s16199_s26 }
  0x21   : > { %p16202_p10 = pnand %p16200_p9, %p16519_p13  ;;  %p16209_p12 = por %p16208_p6, %p16207_p2 }
  0x23   : > { %p16203_p1 = pneg %p16202_p10 }
  0x25   : > { %p16210_p0 = pnand %p16209_p12, %p16203_p1 }
  0x27   : > { %16213 = shalt.err (!%p16210_p0)
}
  0x28   : > { %s16407_s30 = smov 64   ;;  %s16408_s9 = smov 4  }
  0x29   : > { %15731 = dma.hbm_to_vmem [thread:$0]  (!%p16503_p11), %s19707_s1, 9216, %s16496_s7, [#allocation8], %s16407_s30, %s16407_s30, %s16408_s9  }
  0x2a   : > { %s16214_s16 = scalar_lea.hbm %s19709_s3, 9216 }
  0x2b   : > { %p16215_p1 = scmp.ne.s32.totalorder %s19709_s3, %s16214_s16  ;;  %p16221_p10 = scmp.lt.u32.totalorder %s16214_s16, %s19709_s3 }
  0x2d   : > { %p16217_p2 = pnand %p16215_p1, %p16519_p13 }
  0x2f   : > { %p16218_p6 = pneg %p16217_p2 }
  0x31   : > { %p16223_p3 = pnand %p16221_p10, %p16218_p6 }
  0x33   : > { %16226 = shalt.err (!%p16223_p3)
}
  0x34   : > { %s16227_s7 = scalar_lea.vmem %s16507_s10, 9216  ;;  %p16235_p12 = scmp.lt.s32.totalorder %s16507_s10, %s16507_s10 }
  0x35   : > { %p16228_p5 = scmp.ne.s32.totalorder %s16507_s10, %s16227_s7  ;;  %p16236_p0 = scmp.lt.s32.totalorder %s16227_s7, %s16227_s7 }
  0x37   : > { %p16230_p7 = pnand %p16228_p5, %p16519_p13  ;;  %p16237_p1 = por %p16236_p0, %p16235_p12 }
  0x39   : > { %p16231_p9 = pneg %p16230_p7 }
  0x3b   : > { %p16238_p2 = pnand %p16237_p1, %p16231_p9 }
  0x3d   : > { %16241 = shalt.err (!%p16238_p2)
}
  0x3e   : > { %15737 = dma.hbm_to_vmem [thread:$0]  (!%p16503_p11), %s19709_s3, 9216, %s16507_s10, [#allocation11], %s16407_s30, %s16407_s30, %s16408_s9  }
  0x3f   : > { %s16242_s16 = scalar_lea.hbm %s19708_s2, 9216 }
  0x40   : > { %p16243_p6 = scmp.ne.s32.totalorder %s19708_s2, %s16242_s16  ;;  %p16249_p5 = scmp.lt.u32.totalorder %s16242_s16, %s19708_s2 }
  0x42   : > { %p16245_p10 = pnand %p16243_p6, %p16519_p13 }
  0x44   : > { %p16246_p3 = pneg %p16245_p10 }
  0x46   : > { %p16251_p7 = pnand %p16249_p5, %p16246_p3 }
  0x48   : > { %16254 = shalt.err (!%p16251_p7)
}
  0x49   : > { %s16255_s7 = scalar_lea.vmem %s212_s12, 9216  ;;  %p16263_p1 = scmp.lt.s32.totalorder %s212_s12, %s212_s12 }
  0x4a   : > { %p16256_p9 = scmp.ne.s32.totalorder %s212_s12, %s16255_s7  ;;  %p16264_p2 = scmp.lt.s32.totalorder %s16255_s7, %s16255_s7 }
  0x4c   : > { %p16258_p12 = pnand %p16256_p9, %p16519_p13  ;;  %p16265_p4 = por %p16264_p2, %p16263_p1 }
  0x4e   : > { %p16259_p0 = pneg %p16258_p12 }
  0x50   : > { %p16266_p8 = pnand %p16265_p4, %p16259_p0 }
  0x52   : > { %16269 = shalt.err (!%p16266_p8)
}
  0x53   : > { %15734 = dma.hbm_to_vmem [thread:$0]  (!%p16503_p11), %s19708_s2, 9216, %s212_s12, [#allocation8], %s16407_s30, %s16407_s30, %s16408_s9  }
  0x54   : > { %s16409_s13 = smov [#allocation12]   ;;  %s16270_s17 = scalar_lea.hbm %s19710_s4, 1024 }
  0x55   : > { %s237_s14 = sshll.u32 %s16409_s13, 4  ;;  %p16271_p4 = scmp.ne.s32.totalorder %s19710_s4, %s16270_s17  ;;  %s238_s14 = int_to_ptr.vmem [resolvable:$true] %s237_s14 }
  0x56   : > { %p16277_p10 = scmp.lt.u32.totalorder %s16270_s17, %s19710_s4 }
  0x57   : > { %p16273_p8 = pnand %p16271_p4, %p16519_p13 }
  0x59   : > { %p16274_p6 = pneg %p16273_p8 }
  0x5b   : > { %p16279_p3 = pnand %p16277_p10, %p16274_p6 }
  0x5d   : > { %16282 = shalt.err (!%p16279_p3)
}
  0x5e   : > { %s16283_s12 = scalar_lea.vmem %s238_s14, 1024  ;;  %p16291_p12 = scmp.lt.s32.totalorder %s238_s14, %s238_s14 }
  0x5f   : > { %p16284_p5 = scmp.ne.s32.totalorder %s238_s14, %s16283_s12  ;;  %p16292_p0 = scmp.lt.s32.totalorder %s16283_s12, %s16283_s12 }
  0x61   : > { %p16286_p7 = pnand %p16284_p5, %p16519_p13  ;;  %p16293_p1 = por %p16292_p0, %p16291_p12 }
  0x63   : > { %p16287_p9 = pneg %p16286_p7 }
  0x65   : > { %p16294_p2 = pnand %p16293_p1, %p16287_p9 }
  0x67   : > { %16297 = shalt.err (!%p16294_p2)
}
  0x68   : > { %15740 = dma.hbm_to_vmem [thread:$0]  (!%p16503_p11), %s19710_s4, 1024, %s238_s14, [#allocation11], %s16407_s30, %s16407_s30, %s16408_s9  }
  0x69   : > { %s16613_s18 = sadd.s32 1, %s16402_s24   ;;  %s31_s8 = sadd.s32 1, %s16398_s23 }
  0x6a   : > { %s28_s13 = ssub.s32 %s16402_s24, %s16613_s18  ;;  %p38_p13 = scmp.ne.s32.totalorder %s16398_s23, %s16394_s22 }
  0x6b   : > { %p29_p4 = scmp.eq.s32.totalorder %s28_s13, 0  ;;  %p39_p8 = scmp.eq.s32.totalorder %s16402_s24, 0 }
  0x6c   : > { %p19754_p6 = scmp.eq.s32.totalorder %s16473_s25, 1  ;;  %p15753_p3 = scmp.lt.s32.totalorder %s16402_s24, 2 }
  0x6d   : > { %s16629_s16 = scalar_select %p29_p4, %s16398_s23, %s31_s8  }
  0x6e   : > { %p16623_p10 = por %p19754_p6, %p38_p13  ;;  %p40_p5 = por %p39_p8, %p38_p13 }
  0x6f   : > { %s254_s17 = sand.u32 1, %s16398_s23   ;;  %s13894_s14 = sshll.u32 %s16402_s24, 11 }
  0x70   : > { %s13255_s19 = sshll.u32 %s254_s17, 7  ;;  %s16636_s7 = scalar_lea.hbm %s19706_s0, %s13894_s14 }
  0x71   : > { %s258_s12 = scalar_lea.vmem [#allocation4], %s13255_s19  ;;  %p16640_p11 = pnand %p15753_p3, %p40_p5 }
  0x72   : > { %s265_s10 = sshll.u32 %s258_s12, 4  ;;  %s16644_s8 = scalar_lea.sflag [#allocation5], %s254_s17  ;;  %s16638_s10 = int_to_ptr.vmem [resolvable:$true] %s265_s10 }
  0x73   : > { %s16298_s13 = scalar_lea.hbm %s16636_s7, 2048  ;;  %p16300_p9 = pneg %p16640_p11 }
  0x74   : > { %p16299_p7 = scmp.ne.s32.totalorder %s16636_s7, %s16298_s13  ;;  %s16303_s20 = scalar_lea.hbm %s19706_s0, 4096 }
  0x75   : > { %p16304_p1 = scmp.lt.u32.totalorder %s16636_s7, %s19706_s0  ;;  %p16305_p2 = scmp.lt.u32.totalorder %s16303_s20, %s16298_s13 }
  0x76   : > { %p16301_p12 = pnand %p16300_p9, %p16299_p7  ;;  %p16307_p4 = scmp.lt.u32.totalorder %s16298_s13, %s16636_s7 }
  0x77   : > { %p16306_p13 = por %p16305_p2, %p16304_p1 }
  0x78   : > { %p16302_p0 = pneg %p16301_p12 }
  0x79   : > { %p16308_p8 = por %p16307_p4, %p16306_p13 }
  0x7b   : > { %p16309_p6 = pnand %p16308_p8, %p16302_p0 }
  0x7d   : > { %16312 = shalt.err (!%p16309_p6)
}
  0x7e   : > { %s16313_s17 = scalar_lea.vmem %s16638_s10, 2048  ;;  %s16410_s19 = smov [#allocation4]  }
  0x7f   : > { %p16314_p3 = scmp.ne.s32.totalorder %s16638_s10, %s16313_s17  ;;  %s16318_s14 = sshll.u32 %s16410_s19, 4  ;;  %s16319_s14 = int_to_ptr.vmem [resolvable:$false] %s16318_s14 }
  0x80   : > { %s16320_s26 = scalar_lea.vmem %s16319_s14, 4096  ;;  %p16321_p12 = scmp.lt.s32.totalorder %s16638_s10, %s16319_s14 }
  0x81   : > { %p16316_p5 = pnand %p16314_p3, %p16300_p9  ;;  %p16322_p1 = scmp.lt.s32.totalorder %s16320_s26, %s16313_s17 }
  0x83   : > { %p16317_p7 = pneg %p16316_p5  ;;  %p16323_p2 = por %p16322_p1, %p16321_p12 }
  0x85   : > { %p16324_p13 = pnand %p16323_p2, %p16317_p7 }
  0x87   : > { %16327 = shalt.err (!%p16324_p13)
}
  0x88   : > { %15744 = dma.hbm_to_vmem [thread:$0]  (!%p16640_p11), %s16636_s7, 2048, %s16638_s10, %s16644_s8, %s16407_s30, %s16407_s30, %s16408_s9  }
  0x89   : > { %p19757_p9 = scmp.ne.s32.totalorder %s19751_s29, 0 }
  0x8b   : > { %277 = sbr.rel (%p19757_p9) target bundleno = 2286 (0x8ee), region = 44 }
  0x92   : > { %s16678_s13 = sand.u32 1, %s16394_s22   ;;  %p19758_p0 = scmp.ne.s32.totalorder %s19749_s27, 0 }
  0x93   : > { %s13259_s20 = sshll.u32 %s16678_s13, 7  ;;  %s280_s12 = scalar_lea.sflag [#allocation5], %s16678_s13 }
  0x94   : > { %s16682_s17 = scalar_lea.vmem [#allocation4], %s13259_s20 }
  0x95   : > { %16373 = dma.done.wait (%p19758_p0), %s280_s12, 2048  }
  0x96   : > { %16375 = vsyncadd (%p19758_p0), %s280_s12, 4294965248  ;;  %p19759_p11 = scmp.eq.s32.totalorder %s16473_s25, 0 }
  0x98   : > { %16377 = dma.done.wait (%p19759_p11), [#allocation8], 18432   ;;  %p19760_p4 = pmov %p19759_p11 }
  0x9a   : > { %16379 = vsyncadd (%p19760_p4), [#allocation8], 4294948864  ;;  %p19761_p8 = pmov %p19760_p4 }
  0x9b   : > { %p19762_p6 = pmov %p19760_p4 }
  0x9c   : > { %16381 = dma.done.wait (%p19761_p8), [#allocation11], 10240  }
  0x9d   : > { %16383 = vsyncadd (%p19762_p6), [#allocation11], 4294957056  ;;  %v16411_v0 = vmov 0   ;;  %v15802_v1 = vld [vmem:[#allocation7 + $0x40] sm:$0xff]   ;;  %v15803_v2 = vld [vmem:[#allocation7 + $0x48] sm:$0xff]   ;;  %vm336_vm0 = vcmask 1040384  }
  0x9e   : > { %329 = vst [vmem:[#allocation2] sm:$0xf] %v16411_v0  ;;  %330 = vst [vmem:[#allocation2 + $0x4] sm:$0xf] %v16411_v0  ;;  %14420 = vmatprep.subr.bf16.mxu0 %v15802_v1  ;;  %vm337_vm1 = vsmask.f32 256 }
  0x9f   : > { %331 = vst [vmem:[#allocation2 + $0x8] sm:$0x1] %v16411_v0  ;;  %333 = vst [vmem:[#allocation2 + $0xcc] sm:$0xf] %v16411_v0  ;;  %14421 = vmatpush3.bf16.msra.mxu0 %v15802_v1  ;;  %vm393_vm2 = vsmask.f32 7938 }
  0xa0   : > { %334 = vst [vmem:[#allocation2 + $0xd0] sm:$0xf] %v16411_v0  ;;  %335 = vst [vmem:[#allocation2 + $0xd4] sm:$0x1] %v16411_v0  ;;  %14422 = vmatprep.subr.bf16.mxu0 %v15803_v2  ;;  %v15804_v3 = vld [vmem:[#allocation7 + $0x50] sm:$0xff]   ;;  %v19763_v4 = vmov 0 }
  0xa1   : > { %449 = vst [vmem:[#allocation3] sm:$0xf] %v16411_v0  ;;  %450 = vst [vmem:[#allocation3 + $0x4] sm:$0x1] %v16411_v0  ;;  %v19766_v5 = vmov 0  ;;  %v15805_v6 = vld [vmem:[#allocation7 + $0x58] sm:$0xff]  }
  0xa2   : > { %452 = vst [vmem:[#allocation3 + $0x48] sm:$0xf] %v16411_v0  ;;  %453 = vst [vmem:[#allocation3 + $0x4c] sm:$0x1] %v16411_v0  ;;  %vm546_vm5 = vsmask.f32 4368 }
  0xa3   : > { %vm16697_vm3 = vmand %vm336_vm0, %vm337_vm1  ;;  %14423 = vmatpush3.bf16.msra.mxu0 %v15803_v2  ;;  %v342_v14 = vld [vmem:[#allocation2 + $0xc] sm:$0x1]  ;;  %vm869_vm6 = vcmask 1043456   ;;  %vm1047_vm7 = vsmask.f32 3328  ;;  %v19769_v34 = vmov 0 }
  0xa4   : > { %v19764_v4 = vsel %vm16697_vm3, 4294967295, %v19763_v4  ;;  %vm16702_vm4 = vmand %vm336_vm0, %vm393_vm2  ;;  %14424 = vmatprep.subr.bf16.mxu0 %v15804_v3  ;;  %v343_v15 = vsel %vm16697_vm3, 0, %v342_v14  ;;  %v398_v16 = vld [vmem:[#allocation2 + $0x14] sm:$0x1]  ;;  %v514_v17 = vld [vmem:[%s16682_s17] sm:$0xf] }
  0xa5   : > { %19765 = vst [vmem:[#allocation18_spill] sm:$0xff] %v19764_v4  ;;  %v19767_v5 = vsel %vm16702_vm4, 4294967295, %v19766_v5  ;;  %v339_v7 = vld [vmem:[#allocation2] sm:$0x1]  ;;  %v984_v9 = vld [vmem:[#allocation2 + $0x4] sm:$0xf]  ;;  %vm16724_vm8 = vmand %vm869_vm6, %vm393_vm2 }
  0xa6   : > { %19768 = vst [vmem:[#allocation19_spill] sm:$0xff] %v19767_v5  ;;  %v395_v8 = vld [vmem:[#allocation2 + $0x8] sm:$0x1]  ;;  %v340_v10 = vsel %vm16697_vm3, 0, %v339_v7  ;;  %v1060_v12 = vshll.u32 %v984_v9, 16  ;;  %v1064_v13 = vshrl.u32 %v984_v9, 16  ;;  %vm16733_vm10 = vmor %vm337_vm1, %vm546_vm5 }
  0xa7   : > { %v396_v11 = vsel %vm16702_vm4, 0, %v395_v8  ;;  %341 = vst [vmem:[#allocation2] sm:$0x1] %v340_v10  ;;  %14425 = vmatpush3.bf16.msra.mxu0 %v15804_v3  ;;  %344 = vst [vmem:[#allocation2 + $0xc] sm:$0x1] %v343_v15  ;;  %v399_v20 = vsel %vm16702_vm4, 0, %v398_v16 }
  0xa8   : > { %397 = vst [vmem:[#allocation2 + $0x8] sm:$0x1] %v396_v11  ;;  %v16713_v18 = vrot.slane %v1060_v12, 5  ;;  %v1066_v19 = vrot.slane %v1064_v13, 4  ;;  %v515_v21 = vld [vmem:[%s16682_s17 + $0x4] sm:$0xf]  ;;  %14426 = vmatprep.subr.bf16.mxu0 %v15805_v6 }
  0xa9   : > { %v549_v22 = vshrl.u32 %v514_v17, 16  ;;  %v15806_v23 = vld [vmem:[#allocation7 + $0x60] sm:$0xff]   ;;  %400 = vst [vmem:[#allocation2 + $0x14] sm:$0x1] %v399_v20  ;;  %v552_v24 = vshll.u32 %v514_v17, 16  ;;  %v557_v25 = vshrl.u32 %v515_v21, 16 }
  0xaa   : > { %v560_v26 = vshll.u32 %v515_v21, 16  ;;  %v345_v28 = vld [vmem:[#allocation2 + $0x18] sm:$0x1]  ;;  %v1067_v29 = vor.u32 %v1066_v19, %v16713_v18  ;;  %v401_v32 = vld [vmem:[#allocation2 + $0x20] sm:$0x1]  ;;  %v19770_v34 = vsel %vm16724_vm8, 4294967295, %v19769_v34 }
  0xab   : > { %v551_v27 = vrot.slane %v549_v22, 7  ;;  %v559_v30 = vrot.slane %v557_v25, 7  ;;  %v346_v31 = vsel %vm16697_vm3, 0, %v345_v28  ;;  %v516_v33 = vld [vmem:[%s16682_s17 + $0x8] sm:$0xf]  ;;  %14427 = vmatpush3.bf16.msra.mxu0 %v15805_v6  ;;  %19771 = vst [vmem:[#allocation20_spill] sm:$0xff] %v19770_v34 }
  0xac   : > { %vm1048_vm9 = vsmask.f32 7440  ;;  %347 = vst [vmem:[#allocation2 + $0x18] sm:$0x1] %v346_v31  ;;  %v402_v37 = vsel %vm16702_vm4, 0, %v401_v32  ;;  %14428 = vmatprep.subr.bf16.mxu0 %v15806_v23  ;;  %v15807_v39 = vld [vmem:[#allocation7 + $0x68] sm:$0xff]  }
  0xad   : > { %v554_v35 = vor.u32 %v552_v24, %v551_v27  ;;  %v555_v36 = vrot.slane %v551_v27, 4  ;;  %v517_v38 = vld [vmem:[%s16682_s17 + $0xc] sm:$0xf]  ;;  %v562_v41 = vor.u32 %v560_v26, %v559_v30  ;;  %v564_v42 = vrot.slane %v559_v30, 4  ;;  %403 = vst [vmem:[#allocation2 + $0x20] sm:$0x1] %v402_v37  ;;  %vm16748_vm11 = vmor %vm1047_vm7, %vm1048_vm9 }
  0xae   : > { %v566_v43 = vshrl.u32 %v516_v33, 16  ;;  %v569_v44 = vshll.u32 %v516_v33, 16  ;;  %v983_v45 = vld [vmem:[#allocation2] sm:$0xf]  ;;  %v574_v47 = vshrl.u32 %v517_v38, 16  ;;  %v577_v48 = vshll.u32 %v517_v38, 16 }
  0xaf   : > { %v1031_v46 = vld [vmem:[#allocation2 + $0x8] sm:$0x1]  ;;  %v348_v49 = vld [vmem:[#allocation2 + $0x24] sm:$0x1]  ;;  %v1051_v50 = vshrl.u32 %v983_v45, 16  ;;  %v1054_v51 = vshll.u32 %v983_v45, 16  ;;  %14429 = vmatpush3.bf16.msra.mxu0 %v15806_v23  ;;  %v563_v55 = vsel %vm16733_vm10, %v555_v36, %v562_v41 }
  0xb0   : > { %v16737_v52 = vrot.slane %v1067_v29, 4  ;;  %v1070_v53 = vshll.u32 %v1031_v46, 16  ;;  %v871_v54 = vld [vmem:[#allocation2 + $0xc] sm:$0xf]  ;;  %v875_v57 = vld [vmem:[#allocation2 + $0x14] sm:$0x1]  ;;  %14430 = vmatprep.subr.bf16.mxu0 %v15807_v39 }
  0xb1   : > { %v872_v56 = vsel %vm16724_vm8, %v554_v35, %v871_v54  ;;  %v568_v58 = vrot.slane %v566_v43, 7  ;;  %v576_v59 = vrot.slane %v574_v47, 7  ;;  %v404_v60 = vld [vmem:[#allocation2 + $0x2c] sm:$0x1]  ;;  %v15808_v61 = vld [vmem:[#allocation7 + $0x70] sm:$0xff]   ;;  %v1053_v62 = vrot.slane %v1051_v50, 4 }
  0xb2   : > { %v1056_v63 = vrot.slane %v1054_v51, 5  ;;  %v1072_v0 = vrot.slane %v1070_v53, 5  ;;  %873 = vst [vmem:[#allocation2 + $0xc] sm:$0xf] %v872_v56  ;;  %874 = vst [vmem:[#allocation2 + $0x10] sm:$0xf] %v563_v55  ;;  %v876_v1 = vsel %vm16697_vm3, %v564_v42, %v875_v57 }
  0xb3   : > { %v518_v2 = vld [vmem:[%s16682_s17 + $0x10] sm:$0xf]  ;;  %877 = vst [vmem:[#allocation2 + $0x14] sm:$0x1] %v876_v1  ;;  %v571_v6 = vor.u32 %v569_v44, %v568_v58  ;;  %v572_v7 = vrot.slane %v568_v58, 4  ;;  %v579_v8 = vor.u32 %v577_v48, %v576_v59  ;;  %v581_v9 = vrot.slane %v576_v59, 4  ;;  %14431 = vmatpush3.bf16.msra.mxu0 %v15807_v39 }
  0xb4   : > { %v519_v10 = vld [vmem:[%s16682_s17 + $0x14] sm:$0xf]  ;;  %v1057_v11 = vor.u32 %v1056_v63, %v1053_v62  ;;  %v878_v12 = vld [vmem:[#allocation2 + $0x18] sm:$0xf]  ;;  %v349_v13 = vsel %vm16697_vm3, 0, %v348_v49  ;;  %v405_v14 = vsel %vm16702_vm4, 0, %v404_v60  ;;  %14432 = vmatprep.subr.bf16.mxu0 %v15808_v61  ;;  %v1073_v24 = vsel %vm16748_vm11, %v16737_v52, %v1072_v0 }
  0xb5   : > { %v580_v15 = vsel %vm16733_vm10, %v572_v7, %v579_v8  ;;  %v879_v16 = vsel %vm16724_vm8, %v571_v6, %v878_v12  ;;  %v882_v17 = vld [vmem:[#allocation2 + $0x20] sm:$0x1]  ;;  %350 = vst [vmem:[#allocation2 + $0x24] sm:$0x1] %v349_v13  ;;  %406 = vst [vmem:[#allocation2 + $0x2c] sm:$0x1] %v405_v14 }
  0xb6   : > { %v583_v19 = vshrl.u32 %v518_v2, 16  ;;  %v586_v20 = vshll.u32 %v518_v2, 16  ;;  %v351_v21 = vld [vmem:[#allocation2 + $0x30] sm:$0x1]  ;;  %v15809_v22 = vld [vmem:[#allocation7 + $0x78] sm:$0xff]   ;;  %v1058_v23 = vrot.slane %v1057_v11, 4  ;;  %v883_v25 = vsel %vm16697_vm3, %v581_v9, %v882_v17 }
  0xb7   : > { %880 = vst [vmem:[#allocation2 + $0x18] sm:$0xf] %v879_v16  ;;  %881 = vst [vmem:[#allocation2 + $0x1c] sm:$0xf] %v580_v15  ;;  %v591_v26 = vshrl.u32 %v519_v10, 16  ;;  %v594_v29 = vshll.u32 %v519_v10, 16  ;;  %14433 = vmatpush3.bf16.msra.mxu0 %v15808_v61 }
  0xb8   : > { %v407_v27 = vld [vmem:[#allocation2 + $0x38] sm:$0x1]  ;;  %884 = vst [vmem:[#allocation2 + $0x20] sm:$0x1] %v883_v25  ;;  %v585_v28 = vrot.slane %v583_v19, 7  ;;  %v352_v30 = vsel %vm16697_vm3, 0, %v351_v21  ;;  %v1063_v33 = vsel %vm16748_vm11, %v1058_v23, %v16713_v18  ;;  %14434 = vmatprep.subr.bf16.mxu0 %v15809_v22 }
  0xb9   : > { %v408_v31 = vsel %vm16702_vm4, 0, %v407_v27  ;;  %v520_v32 = vld [vmem:[%s16682_s17 + $0x18] sm:$0xf]  ;;  %v16774_v35 = vld [vmem:[#allocation7] sm:$0xff]   ;;  %v593_v36 = vrot.slane %v591_v26, 7  ;;  %v13265_v39 = vcombine.low %v1063_v33, %v1073_v24  ;;  %vm2077_vm12 = vcmask 1042432  }
  0xba   : > { %353 = vst [vmem:[#allocation2 + $0x30] sm:$0x1] %v352_v30  ;;  %409 = vst [vmem:[#allocation2 + $0x38] sm:$0x1] %v408_v31  ;;  %v16777_v37 = vld [vmem:[%s16682_s17 + $0x1c] sm:$0xf]  ;;  %v588_v43 = vor.u32 %v586_v20, %v585_v28 }
  0xbb   : > { %v600_v38 = vshrl.u32 %v520_v32, 16  ;;  %v985_v41 = vld [vmem:[#allocation2 + $0xc] sm:$0xf]  ;;  %v986_v42 = vld [vmem:[#allocation2 + $0x10] sm:$0xf]  ;;  %v589_v44 = vrot.slane %v585_v28, 4  ;;  %14436 = vmatprep.mubr.bf16.mxu0 %v13265_v39  ;;  %v596_v51 = vor.u32 %v594_v29, %v593_v36  ;;  %14435 = vmatpush3.bf16.msra.mxu0 %v15809_v22 }
  0xbc   : > { %v603_v45 = vshll.u32 %v520_v32, 16  ;;  %v1032_v46 = vld [vmem:[#allocation2 + $0x14] sm:$0x1]  ;;  %v1075_v47 = vshrl.u32 %v985_v41, 16  ;;  %v1078_v48 = vshll.u32 %v985_v41, 16  ;;  %v1084_v18 = vshll.u32 %v986_v42, 16  ;;  %14468 = vmatprep.subr.bf16.mxu0 %v16774_v35 }
  0xbd   : > { %v1088_v49 = vshrl.u32 %v986_v42, 16  ;;  %v1094_v50 = vshll.u32 %v1032_v46, 16  ;;  %v598_v52 = vrot.slane %v593_v36, 4  ;;  %v608_v53 = vshrl.u32 %v16777_v37, 16  ;;  %v885_v58 = vld [vmem:[#allocation2 + $0x24] sm:$0xf] }
  0xbe   : > { %v1077_v54 = vrot.slane %v1075_v47, 4  ;;  %v1080_v55 = vrot.slane %v1078_v48, 5  ;;  %v1086_v56 = vrot.slane %v1084_v18, 5  ;;  %v987_v60 = vld [vmem:[#allocation2 + $0x18] sm:$0xf]  ;;  %v597_v62 = vsel %vm16733_vm10, %v589_v44, %v596_v51  ;;  %v15811_v29 = vld [vmem:[#allocation7 + $0x8] sm:$0xff]  }
  0xbf   : > { %v1090_v57 = vrot.slane %v1088_v49, 4  ;;  %v1096_v59 = vrot.slane %v1094_v50, 5  ;;  %v988_v61 = vld [vmem:[#allocation2 + $0x1c] sm:$0xf]  ;;  %v886_v63 = vsel %vm16724_vm8, %v588_v43, %v885_v58  ;;  %v602_v0 = vrot.slane %v600_v38, 7  ;;  %s13264_s26 = sshll.u32 %s16678_s13, 6 }
  0xc0   : > { %v1081_v1 = vor.u32 %v1080_v55, %v1077_v54  ;;  %v1033_v6 = vld [vmem:[#allocation2 + $0x20] sm:$0x1]  ;;  %v1099_v7 = vshrl.u32 %v987_v60, 16  ;;  %v1102_v8 = vshll.u32 %v987_v60, 16  ;;  %887 = vst [vmem:[#allocation2 + $0x24] sm:$0xf] %v886_v63 }
  0xc1   : > { %v1091_v2 = vor.u32 %v1090_v57, %v1086_v56  ;;  %888 = vst [vmem:[#allocation2 + $0x28] sm:$0xf] %v597_v62  ;;  %v889_v9 = vld [vmem:[#allocation2 + $0x2c] sm:$0x1]  ;;  %v1108_v10 = vshll.u32 %v988_v61, 16  ;;  %v1112_v11 = vshrl.u32 %v988_v61, 16  ;;  %v605_v24 = vor.u32 %v603_v45, %v602_v0 }
  0xc2   : > { %v1118_v12 = vshll.u32 %v1033_v6, 16  ;;  %v890_v13 = vsel %vm16697_vm3, %v598_v52, %v889_v9  ;;  %v354_v14 = vld [vmem:[#allocation2 + $0x3c] sm:$0x1]  ;;  %v1082_v15 = vrot.slane %v1081_v1, 4  ;;  %v1101_v17 = vrot.slane %v1099_v7, 4  ;;  %s19641_s20 = scalar_lea.vmem [#allocation13], %s13264_s26 }
  0xc3   : > { %v1092_v16 = vrot.slane %v1091_v2, 4  ;;  %v1104_v19 = vrot.slane %v1102_v8, 5  ;;  %891 = vst [vmem:[#allocation2 + $0x2c] sm:$0x1] %v890_v13  ;;  %v892_v20 = vld [vmem:[#allocation2 + $0x30] sm:$0xf] }
  0xc4   : > { %v1110_v21 = vrot.slane %v1108_v10, 5  ;;  %v1114_v22 = vrot.slane %v1112_v11, 4  ;;  %v1120_v23 = vrot.slane %v1118_v12, 5  ;;  %v410_v25 = vld [vmem:[#allocation2 + $0x44] sm:$0x1]  ;;  %v1087_v26 = vsel %vm16748_vm11, %v1082_v15, %v1086_v56  ;;  %s13975_s12 = sshll.u32 %s16473_s25, 10 }
  0xc5   : > { %v1097_v27 = vsel %vm16748_vm11, %v1092_v16, %v1096_v59  ;;  %v1105_v28 = vor.u32 %v1104_v19, %v1101_v17  ;;  %v606_v30 = vrot.slane %v602_v0, 4  ;;  %v896_v31 = vld [vmem:[#allocation2 + $0x38] sm:$0x1]  ;;  %v610_v36 = vrot.slane %v608_v53, 7  ;;  %v522_v44 = vld [vmem:[%s16682_s17 + $0x20] sm:$0xf] }
  0xc6   : > { %v13266_v32 = vcombine.low %v1087_v26, %v1097_v27  ;;  %v1115_v33 = vor.u32 %v1114_v22, %v1110_v21  ;;  %v611_v38 = vshll.u32 %v16777_v37, 16  ;;  %v893_v41 = vsel %vm16724_vm8, %v605_v24, %v892_v20  ;;  %v523_v52 = vld [vmem:[%s16682_s17 + $0x24] sm:$0xf]  ;;  %v357_v58 = vld [vmem:[#allocation2 + $0x48] sm:$0x1]  ;;  %v15813_v15 = vld [vmem:[#allocation7 + $0x18] sm:$0xff]  }
  0xc7   : > { %v1106_v39 = vrot.slane %v1105_v28, 4  ;;  %v355_v42 = vsel %vm16697_vm3, 0, %v354_v14  ;;  %v411_v43 = vsel %vm16702_vm4, 0, %v410_v25  ;;  %v989_v46 = vld [vmem:[#allocation2 + $0x24] sm:$0xf]  ;;  %v615_v18 = vrot.slane %v610_v36, 4 }
  0xc8   : > { %14437 = vmatmul.mubr.bf16.vlgmr.msra.gmra.mrb[0].mxu0 %v13266_v32  ;;  %v1116_v45 = vrot.slane %v1115_v33, 4  ;;  %v990_v47 = vld [vmem:[#allocation2 + $0x28] sm:$0xf]  ;;  %v613_v48 = vor.u32 %v611_v38, %v610_v36  ;;  %894 = vst [vmem:[#allocation2 + $0x30] sm:$0xf] %v893_v41  ;;  %v1123_v49 = vshrl.u32 %v989_v46, 16 }
  0xc9   : > { %356 = vst [vmem:[#allocation2 + $0x3c] sm:$0x1] %v355_v42  ;;  %412 = vst [vmem:[#allocation2 + $0x44] sm:$0x1] %v411_v43  ;;  %14469 = vmatpush3.bf16.msra.mxu0 %v16774_v35  ;;  %v1111_v37 = vsel %vm16748_vm11, %v1106_v39, %v1110_v21  ;;  %v1126_v50 = vshll.u32 %v989_v46, 16  ;;  %v1132_v51 = vshll.u32 %v990_v47, 16  ;;  %v897_v57 = vsel %vm16697_vm3, %v615_v18, %v896_v31 }
  0xca   : > { %v1121_v53 = vsel %vm16748_vm11, %v1116_v45, %v1120_v23  ;;  %v1034_v54 = vld [vmem:[#allocation2 + $0x2c] sm:$0x1]  ;;  %v1136_v55 = vshrl.u32 %v990_v47, 16  ;;  %14470 = vmatprep.subr.bf16.mxu0 %v15811_v29  ;;  %v614_v56 = vsel %vm16733_vm10, %v606_v30, %v613_v48  ;;  %v15812_v35 = vld [vmem:[#allocation7 + $0x10] sm:$0xff]   ;;  %v1125_v60 = vrot.slane %v1123_v49, 4  ;;  %s13137_s27 = sshll.u32 %s19641_s20, 4  ;;  %s19659_s27 = int_to_ptr.vmem [resolvable:$true] %s13137_s27 }
  0xcb   : > { %v13267_v59 = vcombine.low %v1111_v37, %v1121_v53  ;;  %v1128_v61 = vrot.slane %v1126_v50, 5  ;;  %v1134_v62 = vrot.slane %v1132_v51, 5  ;;  %895 = vst [vmem:[#allocation2 + $0x34] sm:$0xf] %v614_v56  ;;  %898 = vst [vmem:[#allocation2 + $0x38] sm:$0x1] %v897_v57 }
  0xcc   : > { %v413_v63 = vld [vmem:[#allocation2 + $0x50] sm:$0x1]  ;;  %v1138_v0 = vrot.slane %v1136_v55, 4  ;;  %v1142_v1 = vshll.u32 %v1034_v54, 16  ;;  %v617_v2 = vshrl.u32 %v522_v44, 16  ;;  %v620_v6 = vshll.u32 %v522_v44, 16 }
  0xcd   : > { %14440 = vmatprep.mubr.bf16.mxu0 %v13267_v59  ;;  %v1129_v7 = vor.u32 %v1128_v61, %v1125_v60  ;;  %14471 = vmatpush3.bf16.msra.mxu0 %v15811_v29  ;;  %v625_v8 = vshrl.u32 %v523_v52, 16  ;;  %v628_v9 = vshll.u32 %v523_v52, 16  ;;  %v358_v10 = vsel %vm16697_vm3, 0, %v357_v58  ;;  %v524_v25 = vld [vmem:[%s16682_s17 + $0x28] sm:$0xf]  ;;  %v15814_v47 = vld [vmem:[#allocation7 + $0x20] sm:$0xff]  }
  0xce   : > { %v1139_v11 = vor.u32 %v1138_v0, %v1134_v62  ;;  %v1144_v12 = vrot.slane %v1142_v1, 5  ;;  %v619_v13 = vrot.slane %v617_v2, 7  ;;  %14472 = vmatprep.subr.bf16.mxu0 %v15812_v35  ;;  %359 = vst [vmem:[#allocation2 + $0x48] sm:$0x1] %v358_v10  ;;  %v414_v14 = vsel %vm16702_vm4, 0, %v413_v63  ;;  %v15815_v1 = vld [vmem:[#allocation7 + $0x28] sm:$0xff]  }
  0xcf   : > { %v1130_v16 = vrot.slane %v1129_v7, 4  ;;  %v991_v17 = vld [vmem:[#allocation2 + $0x30] sm:$0xf]  ;;  %v627_v19 = vrot.slane %v625_v8, 7  ;;  %415 = vst [vmem:[#allocation2 + $0x50] sm:$0x1] %v414_v14 }
  0xd0   : > { %v899_v20 = vld [vmem:[#allocation2 + $0x3c] sm:$0xf]  ;;  %v1140_v21 = vrot.slane %v1139_v11, 4  ;;  %v1147_v22 = vshrl.u32 %v991_v17, 16  ;;  %v1150_v23 = vshll.u32 %v991_v17, 16  ;;  %v622_v24 = vor.u32 %v620_v6, %v619_v13  ;;  %s13124_s25 = scalar_lea.sflag [#allocation6], %s16678_s13 }
  0xd1   : > { %v1135_v26 = vsel %vm16748_vm11, %v1130_v16, %v1134_v62  ;;  %v623_v27 = vrot.slane %v619_v13, 4  ;;  %v630_v28 = vor.u32 %v628_v9, %v627_v19  ;;  %v632_v29 = vrot.slane %v627_v19, 4  ;;  %v903_v30 = vld [vmem:[#allocation2 + $0x44] sm:$0x1]  ;;  %14473 = vmatpush3.bf16.msra.mxu0 %v15812_v35  ;;  %v525_v31 = vld [vmem:[%s16682_s17 + $0x2c] sm:$0xf] }
  0xd2   : > { %v1145_v32 = vsel %vm16748_vm11, %v1140_v21, %v1144_v12  ;;  %v992_v33 = vld [vmem:[#allocation2 + $0x34] sm:$0xf]  ;;  %v1035_v36 = vld [vmem:[#allocation2 + $0x38] sm:$0x1]  ;;  %v1149_v38 = vrot.slane %v1147_v22, 4  ;;  %v1152_v39 = vrot.slane %v1150_v23, 5  ;;  %v900_v41 = vsel %vm16724_vm8, %v622_v24, %v899_v20  ;;  %14474 = vmatprep.subr.bf16.mxu0 %v15813_v15 }
  0xd3   : > { %v360_v42 = vld [vmem:[#allocation2 + $0x54] sm:$0x1]  ;;  %v13268_v43 = vcombine.low %v1135_v26, %v1145_v32  ;;  %v1156_v44 = vshll.u32 %v992_v33, 16  ;;  %v1160_v45 = vshrl.u32 %v992_v33, 16  ;;  %v1166_v46 = vshll.u32 %v1035_v36, 16  ;;  %v15816_v14 = vld [vmem:[#allocation7 + $0x30] sm:$0xff]  }
  0xd4   : > { %901 = vst [vmem:[#allocation2 + $0x3c] sm:$0xf] %v900_v41  ;;  %v1153_v48 = vor.u32 %v1152_v39, %v1149_v38  ;;  %v631_v18 = vsel %vm16733_vm10, %v623_v27, %v630_v28  ;;  %v904_v37 = vsel %vm16697_vm3, %v632_v29, %v903_v30  ;;  %v634_v49 = vshrl.u32 %v524_v25, 16  ;;  %v416_v50 = vld [vmem:[#allocation2 + $0x5c] sm:$0x1]  ;;  %s16328_s9 = scalar_lea.vmem %s19659_s27, 1024 }
  0xd5   : > { %v526_v51 = vld [vmem:[%s16682_s17 + $0x30] sm:$0xf]  ;;  %14441 = vmatmul.mubr.bf16.gmra.mrb[4].mxu0 %v13268_v43  ;;  %v1158_v52 = vrot.slane %v1156_v44, 5  ;;  %v1162_v53 = vrot.slane %v1160_v45, 4  ;;  %v1168_v54 = vrot.slane %v1166_v46, 5  ;;  %v637_v55 = vshll.u32 %v524_v25, 16  ;;  %p16329_p3 = scmp.ne.s32.totalorder %s19659_s27, %s16328_s9 }
  0xd6   : > { %902 = vst [vmem:[#allocation2 + $0x40] sm:$0xf] %v631_v18  ;;  %905 = vst [vmem:[#allocation2 + $0x44] sm:$0x1] %v904_v37  ;;  %v1154_v56 = vrot.slane %v1153_v48, 4  ;;  %v636_v57 = vrot.slane %v634_v49, 7  ;;  %14475 = vmatpush3.bf16.msra.mxu0 %v15813_v15 }
  0xd7   : > { %v642_v35 = vshrl.u32 %v525_v31, 16  ;;  %v645_v58 = vshll.u32 %v525_v31, 16  ;;  %v16827_v59 = vld [vmem:[%s16682_s17 + $0x34] sm:$0xf]  ;;  %v1163_v60 = vor.u32 %v1162_v53, %v1158_v52  ;;  %v906_v61 = vld [vmem:[#allocation2 + $0x48] sm:$0xf]  ;;  %14476 = vmatprep.subr.bf16.mxu0 %v15814_v47  ;;  %p16330_p5 = pnand %p16329_p3, %p16623_p10 }
  0xd8   : > { %v361_v62 = vsel %vm16697_vm3, 0, %v360_v42  ;;  %v417_v63 = vsel %vm16702_vm4, 0, %v416_v50  ;;  %v651_v0 = vshrl.u32 %v526_v51, 16  ;;  %v1159_v2 = vsel %vm16748_vm11, %v1154_v56, %v1158_v52  ;;  %v910_v10 = vld [vmem:[#allocation2 + $0x50] sm:$0x1]  ;;  %v15817_v42 = vld [vmem:[#allocation7 + $0x38] sm:$0xff]  }
  0xd9   : > { %v639_v6 = vor.u32 %v637_v55, %v636_v57  ;;  %v640_v7 = vrot.slane %v636_v57, 4  ;;  %v644_v8 = vrot.slane %v642_v35, 7  ;;  %362 = vst [vmem:[#allocation2 + $0x54] sm:$0x1] %v361_v62  ;;  %418 = vst [vmem:[#allocation2 + $0x5c] sm:$0x1] %v417_v63  ;;  %p16331_p7 = pneg %p16330_p5 }
  0xda   : > { %v1164_v9 = vrot.slane %v1163_v60, 4  ;;  %v653_v11 = vrot.slane %v651_v0, 7  ;;  %v654_v12 = vshll.u32 %v526_v51, 16  ;;  %v659_v13 = vshrl.u32 %v16827_v59, 16  ;;  %v363_v21 = vld [vmem:[#allocation2 + $0x60] sm:$0x1]  ;;  %14477 = vmatpush3.bf16.msra.mxu0 %v15814_v47 }
  0xdb   : > { %v993_v15 = vld [vmem:[#allocation2 + $0x3c] sm:$0xf]  ;;  %v647_v16 = vor.u32 %v645_v58, %v644_v8  ;;  %v649_v17 = vrot.slane %v644_v8, 4  ;;  %v907_v19 = vsel %vm16724_vm8, %v639_v6, %v906_v61  ;;  %v662_v20 = vshll.u32 %v16827_v59, 16  ;;  %v419_v26 = vld [vmem:[#allocation2 + $0x68] sm:$0x1]  ;;  %14478 = vmatprep.subr.bf16.mxu0 %v15815_v1 }
  0xdc   : > { %v1169_v22 = vsel %vm16748_vm11, %v1164_v9, %v1168_v54  ;;  %v1171_v23 = vshrl.u32 %v993_v15, 16  ;;  %v1174_v24 = vshll.u32 %v993_v15, 16  ;;  %908 = vst [vmem:[#allocation2 + $0x48] sm:$0xf] %v907_v19  ;;  %v656_v25 = vor.u32 %v654_v12, %v653_v11  ;;  %v528_v33 = vld [vmem:[%s16682_s17 + $0x38] sm:$0xf] }
  0xdd   : > { %v13269_v27 = vcombine.low %v1159_v2, %v1169_v22  ;;  %v994_v28 = vld [vmem:[#allocation2 + $0x40] sm:$0xf]  ;;  %v1036_v29 = vld [vmem:[#allocation2 + $0x44] sm:$0x1]  ;;  %v648_v30 = vsel %vm16733_vm10, %v640_v7, %v647_v16  ;;  %v911_v31 = vsel %vm16697_vm3, %v649_v17, %v910_v10  ;;  %v657_v32 = vrot.slane %v653_v11, 4  ;;  %v16859_v6 = vld [vmem:[#allocation7 + $0x80] sm:$0xff]  }
  0xde   : > { %v1173_v36 = vrot.slane %v1171_v23, 4  ;;  %v1176_v38 = vrot.slane %v1174_v24, 5  ;;  %v1180_v39 = vshll.u32 %v994_v28, 16  ;;  %v1184_v41 = vshrl.u32 %v994_v28, 16  ;;  %909 = vst [vmem:[#allocation2 + $0x4c] sm:$0xf] %v648_v30  ;;  %14479 = vmatpush3.bf16.msra.mxu0 %v15815_v1 }
  0xdf   : > { %912 = vst [vmem:[#allocation2 + $0x50] sm:$0x1] %v911_v31  ;;  %14444 = vmatprep.mubr.bf16.mxu0 %v13269_v27  ;;  %v1190_v43 = vshll.u32 %v1036_v29, 16  ;;  %v661_v44 = vrot.slane %v659_v13, 7  ;;  %v364_v45 = vsel %vm16697_vm3, 0, %v363_v21  ;;  %v420_v46 = vsel %vm16702_vm4, 0, %v419_v26  ;;  %14480 = vmatprep.subr.bf16.mxu0 %v15816_v14 }
  0xe0   : > { %v529_v47 = vld [vmem:[%s16682_s17 + $0x3c] sm:$0xf]  ;;  %v1177_v48 = vor.u32 %v1176_v38, %v1173_v36  ;;  %v1182_v18 = vrot.slane %v1180_v39, 5  ;;  %v1186_v37 = vrot.slane %v1184_v41, 4  ;;  %v913_v49 = vld [vmem:[#allocation2 + $0x54] sm:$0xf] }
  0xe1   : > { %v917_v50 = vld [vmem:[#allocation2 + $0x5c] sm:$0x1]  ;;  %365 = vst [vmem:[#allocation2 + $0x60] sm:$0x1] %v364_v45  ;;  %421 = vst [vmem:[#allocation2 + $0x68] sm:$0x1] %v420_v46  ;;  %v664_v52 = vor.u32 %v662_v20, %v661_v44  ;;  %v914_v54 = vsel %vm16724_vm8, %v656_v25, %v913_v49 }
  0xe2   : > { %v1192_v51 = vrot.slane %v1190_v43, 5  ;;  %v666_v53 = vrot.slane %v661_v44, 4  ;;  %v1178_v55 = vrot.slane %v1177_v48, 4  ;;  %v1187_v56 = vor.u32 %v1186_v37, %v1182_v18  ;;  %915 = vst [vmem:[#allocation2 + $0x54] sm:$0xf] %v914_v54  ;;  %14481 = vmatpush3.bf16.msra.mxu0 %v15816_v14  ;;  %s16414_s7 = smov [#allocation13]  }
  0xe3   : > { %v668_v57 = vshrl.u32 %v528_v33, 16  ;;  %v671_v35 = vshll.u32 %v528_v33, 16  ;;  %v995_v58 = vld [vmem:[#allocation2 + $0x48] sm:$0xf]  ;;  %v665_v59 = vsel %vm16733_vm10, %v657_v32, %v664_v52  ;;  %v676_v61 = vshrl.u32 %v529_v47, 16  ;;  %14482 = vmatprep.subr.bf16.mxu0 %v15817_v42  ;;  %s16332_s10 = sshll.u32 %s16414_s7, 4  ;;  %s16333_s10 = int_to_ptr.vmem [resolvable:$false] %s16332_s10 }
  0xe4   : > { %v918_v60 = vsel %vm16697_vm3, %v666_v53, %v917_v50  ;;  %v679_v62 = vshll.u32 %v529_v47, 16  ;;  %v1183_v63 = vsel %vm16748_vm11, %v1178_v55, %v1182_v18  ;;  %v1188_v0 = vrot.slane %v1187_v56, 4  ;;  %916 = vst [vmem:[#allocation2 + $0x58] sm:$0xf] %v665_v59  ;;  %v366_v15 = vld [vmem:[#allocation2 + $0x6c] sm:$0x1]  ;;  %p16335_p12 = scmp.lt.s32.totalorder %s19659_s27, %s16333_s10 }
  0xe5   : > { %v1195_v1 = vshrl.u32 %v995_v58, 16  ;;  %v1198_v2 = vshll.u32 %v995_v58, 16  ;;  %919 = vst [vmem:[#allocation2 + $0x5c] sm:$0x1] %v918_v60  ;;  %v996_v7 = vld [vmem:[#allocation2 + $0x4c] sm:$0xf] }
  0xe6   : > { %v1037_v8 = vld [vmem:[#allocation2 + $0x50] sm:$0x1]  ;;  %v670_v9 = vrot.slane %v668_v57, 7  ;;  %v678_v10 = vrot.slane %v676_v61, 7  ;;  %v1193_v11 = vsel %vm16748_vm11, %v1188_v0, %v1192_v51  ;;  %v1204_v14 = vshll.u32 %v996_v7, 16  ;;  %14483 = vmatpush3.bf16.msra.mxu0 %v15817_v42  ;;  %v15857_v4 = vld [vmem:[#allocation2 + $0x48] sm:$0xff]  }
  0xe7   : > { %v1197_v12 = vrot.slane %v1195_v1, 4  ;;  %v1200_v13 = vrot.slane %v1198_v2, 5  ;;  %v13270_v16 = vcombine.low %v1183_v63, %v1193_v11  ;;  %v1208_v17 = vshrl.u32 %v996_v7, 16  ;;  %v422_v22 = vld [vmem:[#allocation2 + $0x74] sm:$0x1]  ;;  %14516 = vmatprep.subr.bf16.mxu0 %v16859_v6  ;;  %s16334_s11 = scalar_lea.vmem %s16333_s10, 2048 }
  0xe8   : > { %v1214_v19 = vshll.u32 %v1037_v8, 16  ;;  %v673_v20 = vor.u32 %v671_v35, %v670_v9  ;;  %v920_v21 = vld [vmem:[#allocation2 + $0x60] sm:$0xf]  ;;  %v1206_v24 = vrot.slane %v1204_v14, 5  ;;  %v674_v25 = vrot.slane %v670_v9, 4  ;;  %p16336_p1 = scmp.lt.s32.totalorder %s16334_s11, %s16328_s9 }
  0xe9   : > { %v1201_v23 = vor.u32 %v1200_v13, %v1197_v12  ;;  %v681_v26 = vor.u32 %v679_v62, %v678_v10  ;;  %v924_v27 = vld [vmem:[#allocation2 + $0x68] sm:$0x1]  ;;  %14445 = vmatmul.mubr.bf16.gmra.mrb[8].mxu0 %v13270_v16  ;;  %v1210_v29 = vrot.slane %v1208_v17, 4  ;;  %v997_v31 = vld [vmem:[#allocation2 + $0x54] sm:$0xf]  ;;  %v683_v32 = vrot.slane %v678_v10, 4 }
  0xea   : > { %v530_v28 = vld [vmem:[%s16682_s17 + $0x40] sm:$0xf]  ;;  %v1216_v30 = vrot.slane %v1214_v19, 5  ;;  %v921_v33 = vsel %vm16724_vm8, %v673_v20, %v920_v21  ;;  %v531_v36 = vld [vmem:[%s16682_s17 + $0x44] sm:$0xf]  ;;  %v1219_v39 = vshrl.u32 %v997_v31, 16  ;;  %p16337_p2 = por %p16336_p1, %p16335_p12 }
  0xeb   : > { %v1202_v38 = vrot.slane %v1201_v23, 4  ;;  %v1222_v41 = vshll.u32 %v997_v31, 16  ;;  %v682_v42 = vsel %vm16733_vm10, %v674_v25, %v681_v26  ;;  %922 = vst [vmem:[#allocation2 + $0x60] sm:$0xf] %v921_v33  ;;  %v1211_v43 = vor.u32 %v1210_v29, %v1206_v24  ;;  %v998_v44 = vld [vmem:[#allocation2 + $0x58] sm:$0xf] }
  0xec   : > { %v1038_v45 = vld [vmem:[#allocation2 + $0x5c] sm:$0x1]  ;;  %923 = vst [vmem:[#allocation2 + $0x64] sm:$0xf] %v682_v42  ;;  %v925_v46 = vsel %vm16697_vm3, %v683_v32, %v924_v27  ;;  %v367_v47 = vsel %vm16697_vm3, 0, %v366_v15  ;;  %v423_v48 = vsel %vm16702_vm4, 0, %v422_v22  ;;  %p16338_p13 = pnand %p16337_p2, %p16331_p7 }
  0xed   : > { %v1207_v18 = vsel %vm16748_vm11, %v1202_v38, %v1206_v24  ;;  %v1221_v37 = vrot.slane %v1219_v39, 4  ;;  %v1224_v49 = vrot.slane %v1222_v41, 5  ;;  %v1228_v50 = vshll.u32 %v998_v44, 16  ;;  %926 = vst [vmem:[#allocation2 + $0x68] sm:$0x1] %v925_v46 }
  0xee   : > { %368 = vst [vmem:[#allocation2 + $0x6c] sm:$0x1] %v367_v47  ;;  %424 = vst [vmem:[#allocation2 + $0x74] sm:$0x1] %v423_v48  ;;  %v1212_v51 = vrot.slane %v1211_v43, 4  ;;  %v1232_v52 = vshrl.u32 %v998_v44, 16 }
  0xef   : > { %v1238_v53 = vshll.u32 %v1038_v45, 16  ;;  %v685_v54 = vshrl.u32 %v530_v28, 16  ;;  %v1225_v55 = vor.u32 %v1224_v49, %v1221_v37  ;;  %v1230_v56 = vrot.slane %v1228_v50, 5  ;;  %v369_v58 = vld [vmem:[#allocation2 + $0x78] sm:$0x1] }
  0xf0   : > { %v688_v57 = vshll.u32 %v530_v28, 16  ;;  %v693_v35 = vshrl.u32 %v531_v36, 16  ;;  %v1217_v59 = vsel %vm16748_vm11, %v1212_v51, %v1216_v30  ;;  %v1234_v60 = vrot.slane %v1232_v52, 4  ;;  %v425_v17 = vld [vmem:[#allocation2 + $0x80] sm:$0x1] }
  0xf1   : > { %v1240_v61 = vrot.slane %v1238_v53, 5  ;;  %v687_v62 = vrot.slane %v685_v54, 7  ;;  %v13271_v63 = vcombine.low %v1207_v18, %v1217_v59  ;;  %v1226_v0 = vrot.slane %v1225_v55, 4  ;;  %v532_v19 = vld [vmem:[%s16682_s17 + $0x48] sm:$0xf] }
  0xf2   : > { %v695_v1 = vrot.slane %v693_v35, 7  ;;  %v696_v2 = vshll.u32 %v531_v36, 16  ;;  %v1235_v7 = vor.u32 %v1234_v60, %v1230_v56  ;;  %v999_v8 = vld [vmem:[#allocation2 + $0x60] sm:$0xf]  ;;  %v370_v11 = vsel %vm16697_vm3, 0, %v369_v58 }
  0xf3   : > { %v690_v9 = vor.u32 %v688_v57, %v687_v62  ;;  %v691_v10 = vrot.slane %v687_v62, 4  ;;  %14448 = vmatprep.mubr.bf16.mxu0 %v13271_v63  ;;  %v1231_v12 = vsel %vm16748_vm11, %v1226_v0, %v1230_v56  ;;  %v1000_v13 = vld [vmem:[#allocation2 + $0x64] sm:$0xf]  ;;  %v1243_v14 = vshrl.u32 %v999_v8, 16  ;;  %371 = vst [vmem:[#allocation2 + $0x78] sm:$0x1] %v370_v11 }
  0xf4   : > { %v1246_v15 = vshll.u32 %v999_v8, 16  ;;  %v698_v16 = vor.u32 %v696_v2, %v695_v1  ;;  %v1236_v20 = vrot.slane %v1235_v7, 4  ;;  %v1039_v21 = vld [vmem:[#allocation2 + $0x68] sm:$0x1]  ;;  %v1252_v22 = vshll.u32 %v1000_v13, 16 }
  0xf5   : > { %v1256_v23 = vshrl.u32 %v1000_v13, 16  ;;  %v700_v24 = vrot.slane %v695_v1, 4  ;;  %v533_v25 = vld [vmem:[%s16682_s17 + $0x4c] sm:$0xf]  ;;  %v372_v26 = vld [vmem:[#allocation2 + $0x84] sm:$0x1] }
  0xf6   : > { %v1245_v27 = vrot.slane %v1243_v14, 4  ;;  %v1248_v28 = vrot.slane %v1246_v15, 5  ;;  %v1262_v29 = vshll.u32 %v1039_v21, 16  ;;  %v699_v30 = vsel %vm16733_vm10, %v691_v10, %v698_v16  ;;  %v927_v31 = vld [vmem:[#allocation2 + $0x6c] sm:$0xf] }
  0xf7   : > { %v428_v32 = vld [vmem:[#allocation2 + $0x8c] sm:$0x1]  ;;  %v1241_v33 = vsel %vm16748_vm11, %v1236_v20, %v1240_v61  ;;  %v1254_v36 = vrot.slane %v1252_v22, 5  ;;  %v1258_v38 = vrot.slane %v1256_v23, 4  ;;  %v928_v39 = vsel %vm16724_vm8, %v690_v9, %v927_v31  ;;  %930 = vst [vmem:[#allocation2 + $0x70] sm:$0xf] %v699_v30 }
  0xf8   : > { %v931_v41 = vld [vmem:[#allocation2 + $0x74] sm:$0x1]  ;;  %v534_v42 = vld [vmem:[%s16682_s17 + $0x50] sm:$0xf]  ;;  %v13272_v43 = vcombine.low %v1231_v12, %v1241_v33  ;;  %v1249_v44 = vor.u32 %v1248_v28, %v1245_v27  ;;  %v1264_v45 = vrot.slane %v1262_v29, 5  ;;  %v426_v48 = vsel %vm16702_vm4, 0, %v425_v17 }
  0xf9   : > { %929 = vst [vmem:[#allocation2 + $0x6c] sm:$0xf] %v928_v39  ;;  %v932_v46 = vsel %vm16697_vm3, %v700_v24, %v931_v41  ;;  %v1259_v47 = vor.u32 %v1258_v38, %v1254_v36  ;;  %v702_v18 = vshrl.u32 %v532_v19, 16  ;;  %v705_v37 = vshll.u32 %v532_v19, 16  ;;  %v535_v49 = vld [vmem:[%s16682_s17 + $0x54] sm:$0xf] }
  0xfa   : > { %933 = vst [vmem:[#allocation2 + $0x74] sm:$0x1] %v932_v46  ;;  %14449 = vmatmul.mubr.bf16.gmra.mrb[12].mxu0 %v13272_v43  ;;  %v1250_v50 = vrot.slane %v1249_v44, 4  ;;  %427 = vst [vmem:[#allocation2 + $0x80] sm:$0x1] %v426_v48  ;;  %v710_v51 = vshrl.u32 %v533_v25, 16 }
  0xfb   : > { %v713_v52 = vshll.u32 %v533_v25, 16  ;;  %v373_v53 = vsel %vm16697_vm3, 0, %v372_v26  ;;  %v1260_v54 = vrot.slane %v1259_v47, 4  ;;  %v704_v55 = vrot.slane %v702_v18, 7  ;;  %v934_v59 = vld [vmem:[#allocation2 + $0x78] sm:$0xf] }
  0xfc   : > { %374 = vst [vmem:[#allocation2 + $0x84] sm:$0x1] %v373_v53  ;;  %v429_v56 = vsel %vm16702_vm4, 0, %v428_v32  ;;  %v719_v57 = vshrl.u32 %v534_v42, 16  ;;  %v1255_v35 = vsel %vm16748_vm11, %v1250_v50, %v1254_v36  ;;  %v712_v58 = vrot.slane %v710_v51, 7 }
  0xfd   : > { %430 = vst [vmem:[#allocation2 + $0x8c] sm:$0x1] %v429_v56  ;;  %v722_v60 = vshll.u32 %v534_v42, 16  ;;  %v727_v61 = vshrl.u32 %v535_v49, 16  ;;  %v1265_v62 = vsel %vm16748_vm11, %v1260_v54, %v1264_v45  ;;  %v707_v63 = vor.u32 %v705_v37, %v704_v55  ;;  %v375_v16 = vld [vmem:[#allocation2 + $0x90] sm:$0x1] }
  0xfe   : > { %v708_v0 = vrot.slane %v704_v55, 4  ;;  %v721_v1 = vrot.slane %v719_v57, 7  ;;  %v13273_v2 = vcombine.low %v1255_v35, %v1265_v62  ;;  %v16906_v7 = vld [vmem:[#allocation2 + $0x70] sm:$0xf]  ;;  %v715_v8 = vor.u32 %v713_v52, %v712_v58  ;;  %v431_v17 = vld [vmem:[#allocation2 + $0x98] sm:$0x1] }
  0xff   : > { %v717_v9 = vrot.slane %v712_v58, 4  ;;  %v729_v10 = vrot.slane %v727_v61, 7  ;;  %v1276_v12 = vshll.u32 %v16906_v7, 16  ;;  %v1280_v13 = vshrl.u32 %v16906_v7, 16  ;;  %v536_v24 = vld [vmem:[%s16682_s17 + $0x58] sm:$0xf] }
 0x100   : > { %v16908_v11 = vld [vmem:[#allocation2 + $0x6c] sm:$0xf]  ;;  %v935_v14 = vsel %vm16724_vm8, %v707_v63, %v934_v59  ;;  %v724_v15 = vor.u32 %v722_v60, %v721_v1  ;;  %14452 = vmatprep.mubr.bf16.mxu0 %v13273_v2  ;;  %v716_v22 = vsel %vm16733_vm10, %v708_v0, %v715_v8  ;;  %v725_v23 = vrot.slane %v721_v1, 4  ;;  %v537_v30 = vld [vmem:[%s16682_s17 + $0x5c] sm:$0xf] }
 0x101   : > { %v16914_v19 = vld [vmem:[#allocation2 + $0x74] sm:$0x1]  ;;  %v1267_v20 = vshrl.u32 %v16908_v11, 16  ;;  %v1270_v21 = vshll.u32 %v16908_v11, 16  ;;  %936 = vst [vmem:[#allocation2 + $0x78] sm:$0xf] %v935_v14 }
 0x102   : > { %v1278_v25 = vrot.slane %v1276_v12, 5  ;;  %v1282_v26 = vrot.slane %v1280_v13, 4  ;;  %v1286_v27 = vshll.u32 %v16914_v19, 16  ;;  %937 = vst [vmem:[#allocation2 + $0x7c] sm:$0xf] %v716_v22  ;;  %v730_v29 = vshll.u32 %v535_v49, 16 }
 0x103   : > { %v938_v28 = vld [vmem:[#allocation2 + $0x80] sm:$0x1]  ;;  %v378_v31 = vld [vmem:[#allocation2 + $0x9c] sm:$0x1]  ;;  %v1269_v32 = vrot.slane %v1267_v20, 4  ;;  %v1272_v33 = vrot.slane %v1270_v21, 5 }
 0x104   : > { %v939_v36 = vsel %vm16697_vm3, %v717_v9, %v938_v28  ;;  %v734_v38 = vrot.slane %v729_v10, 4  ;;  %v941_v39 = vld [vmem:[#allocation2 + $0x84] sm:$0xf]  ;;  %v1283_v42 = vor.u32 %v1282_v26, %v1278_v25  ;;  %v1288_v43 = vrot.slane %v1286_v27, 5  ;;  %v945_v46 = vld [vmem:[#allocation2 + $0x8c] sm:$0x1] }
 0x105   : > { %v434_v41 = vld [vmem:[#allocation2 + $0xa4] sm:$0x1]  ;;  %940 = vst [vmem:[#allocation2 + $0x80] sm:$0x1] %v939_v36  ;;  %v732_v44 = vor.u32 %v730_v29, %v729_v10  ;;  %v942_v45 = vsel %vm16724_vm8, %v724_v15, %v941_v39  ;;  %v16928_v47 = vld [vmem:[%s16682_s17 + $0x60] sm:$0xf]  ;;  %v1273_v48 = vor.u32 %v1272_v33, %v1269_v32 }
 0x106   : > { %943 = vst [vmem:[#allocation2 + $0x84] sm:$0xf] %v942_v45  ;;  %v946_v18 = vsel %vm16697_vm3, %v734_v38, %v945_v46  ;;  %v376_v37 = vsel %vm16697_vm3, 0, %v375_v16  ;;  %v432_v49 = vsel %vm16702_vm4, 0, %v431_v17  ;;  %v1284_v50 = vrot.slane %v1283_v42, 4 }
 0x107   : > { %v733_v51 = vsel %vm16733_vm10, %v725_v23, %v732_v44  ;;  %947 = vst [vmem:[#allocation2 + $0x8c] sm:$0x1] %v946_v18  ;;  %377 = vst [vmem:[#allocation2 + $0x90] sm:$0x1] %v376_v37  ;;  %v736_v52 = vshrl.u32 %v536_v24, 16  ;;  %v739_v53 = vshll.u32 %v536_v24, 16 }
 0x108   : > { %433 = vst [vmem:[#allocation2 + $0x98] sm:$0x1] %v432_v49  ;;  %v1274_v54 = vrot.slane %v1273_v48, 4  ;;  %944 = vst [vmem:[#allocation2 + $0x88] sm:$0xf] %v733_v51  ;;  %v744_v55 = vshrl.u32 %v537_v30, 16  ;;  %v1289_v35 = vsel %vm16748_vm11, %v1284_v50, %v1288_v43 }
 0x109   : > { %v747_v56 = vshll.u32 %v537_v30, 16  ;;  %v379_v57 = vsel %vm16697_vm3, 0, %v378_v31  ;;  %v16942_v58 = vld [vmem:[#allocation2 + $0x78] sm:$0xf]  ;;  %v738_v59 = vrot.slane %v736_v52, 7  ;;  %v435_v60 = vsel %vm16702_vm4, 0, %v434_v41 }
 0x10a   : > { %380 = vst [vmem:[#allocation2 + $0x9c] sm:$0x1] %v379_v57  ;;  %v753_v61 = vshrl.u32 %v16928_v47, 16  ;;  %v1279_v62 = vsel %vm16748_vm11, %v1274_v54, %v1278_v25  ;;  %v16949_v63 = vld [vmem:[#allocation2 + $0x7c] sm:$0xf]  ;;  %v1291_v0 = vshrl.u32 %v16942_v58, 16 }
 0x10b   : > { %v1294_v1 = vshll.u32 %v16942_v58, 16  ;;  %v746_v2 = vrot.slane %v744_v55, 7  ;;  %436 = vst [vmem:[#allocation2 + $0xa4] sm:$0x1] %v435_v60  ;;  %v13274_v8 = vcombine.low %v1279_v62, %v1289_v35  ;;  %v1300_v9 = vshll.u32 %v16949_v63, 16 }
 0x10c   : > { %v1304_v10 = vshrl.u32 %v16949_v63, 16  ;;  %v741_v12 = vor.u32 %v739_v53, %v738_v59  ;;  %v16955_v13 = vld [vmem:[#allocation2 + $0x80] sm:$0x1]  ;;  %v1293_v14 = vrot.slane %v1291_v0, 4  ;;  %v742_v16 = vrot.slane %v738_v59, 4 }
 0x10d   : > { %v1296_v15 = vrot.slane %v1294_v1, 5  ;;  %v749_v17 = vor.u32 %v747_v56, %v746_v2  ;;  %14453 = vmatmul.mubr.bf16.gmra.mrb[16].mxu0 %v13274_v8  ;;  %v1302_v20 = vrot.slane %v1300_v9, 5  ;;  %v1310_v22 = vshll.u32 %v16955_v13, 16  ;;  %v16958_v23 = vld [vmem:[#allocation2 + $0x84] sm:$0xf] }
 0x10e   : > { %v1306_v21 = vrot.slane %v1304_v10, 4  ;;  %v751_v24 = vrot.slane %v746_v2, 4  ;;  %v16960_v26 = vld [vmem:[#allocation2 + $0x8c] sm:$0x1]  ;;  %v1315_v27 = vshrl.u32 %v16958_v23, 16  ;;  %v1318_v28 = vshll.u32 %v16958_v23, 16 }
 0x10f   : > { %v1297_v25 = vor.u32 %v1296_v15, %v1293_v14  ;;  %v750_v29 = vsel %vm16733_vm10, %v742_v16, %v749_v17  ;;  %v948_v30 = vld [vmem:[#allocation2 + $0x90] sm:$0xf]  ;;  %v539_v31 = vld [vmem:[%s16682_s17 + $0x64] sm:$0xf]  ;;  %v1312_v33 = vrot.slane %v1310_v22, 5  ;;  %v1334_v38 = vshll.u32 %v16960_v26, 16 }
 0x110   : > { %v1307_v32 = vor.u32 %v1306_v21, %v1302_v20  ;;  %v16967_v36 = vld [vmem:[#allocation2 + $0x88] sm:$0xf]  ;;  %v949_v39 = vsel %vm16724_vm8, %v741_v12, %v948_v30  ;;  %951 = vst [vmem:[#allocation2 + $0x94] sm:$0xf] %v750_v29  ;;  %v952_v41 = vld [vmem:[#allocation2 + $0x98] sm:$0x1] }
 0x111   : > { %v1298_v42 = vrot.slane %v1297_v25, 4  ;;  %v1317_v43 = vrot.slane %v1315_v27, 4  ;;  %v1320_v44 = vrot.slane %v1318_v28, 5  ;;  %v1324_v45 = vshll.u32 %v16967_v36, 16  ;;  %950 = vst [vmem:[#allocation2 + $0x90] sm:$0xf] %v949_v39 }
 0x112   : > { %v381_v46 = vld [vmem:[#allocation2 + $0xa8] sm:$0x1]  ;;  %v1308_v48 = vrot.slane %v1307_v32, 4  ;;  %v1328_v18 = vshrl.u32 %v16967_v36, 16  ;;  %v1336_v37 = vrot.slane %v1334_v38, 5  ;;  %v953_v49 = vsel %vm16697_vm3, %v751_v24, %v952_v41 }
 0x113   : > { %v437_v50 = vld [vmem:[#allocation2 + $0xb0] sm:$0x1]  ;;  %v1303_v52 = vsel %vm16748_vm11, %v1298_v42, %v1302_v20  ;;  %v1321_v53 = vor.u32 %v1320_v44, %v1317_v43  ;;  %v1326_v54 = vrot.slane %v1324_v45, 5  ;;  %954 = vst [vmem:[#allocation2 + $0x98] sm:$0x1] %v953_v49  ;;  %v755_v55 = vrot.slane %v753_v61, 7 }
 0x114   : > { %v16977_v51 = vld [vmem:[%s16682_s17 + $0x68] sm:$0xf]  ;;  %v1313_v56 = vsel %vm16748_vm11, %v1308_v48, %v1312_v33  ;;  %v1330_v57 = vrot.slane %v1328_v18, 4  ;;  %v756_v35 = vshll.u32 %v16928_v47, 16  ;;  %v761_v59 = vshrl.u32 %v539_v31, 16 }
 0x115   : > { %v955_v60 = vld [vmem:[#allocation2 + $0x9c] sm:$0xf]  ;;  %v13275_v62 = vcombine.low %v1303_v52, %v1313_v56  ;;  %v1322_v0 = vrot.slane %v1321_v53, 4  ;;  %v759_v1 = vrot.slane %v755_v55, 4  ;;  %v764_v2 = vshll.u32 %v539_v31, 16 }
 0x116   : > { %v1331_v8 = vor.u32 %v1330_v57, %v1326_v54  ;;  %v758_v9 = vor.u32 %v756_v35, %v755_v55  ;;  %v763_v10 = vrot.slane %v761_v59, 7  ;;  %v382_v12 = vsel %vm16697_vm3, 0, %v381_v46  ;;  %v959_v47 = vld [vmem:[#allocation2 + $0xa4] sm:$0x1]  ;;  %v541_v16 = vld [vmem:[%s16682_s17 + $0x6c] sm:$0xf] }
 0x117   : > { %14456 = vmatprep.mubr.bf16.mxu0 %v13275_v62  ;;  %v1327_v61 = vsel %vm16748_vm11, %v1322_v0, %v1326_v54  ;;  %v16988_v14 = vld [vmem:[#allocation2 + $0x94] sm:$0xf]  ;;  %383 = vst [vmem:[#allocation2 + $0xa8] sm:$0x1] %v382_v12  ;;  %v438_v15 = vsel %vm16702_vm4, 0, %v437_v50  ;;  %v770_v17 = vshrl.u32 %v16977_v51, 16 }
 0x118   : > { %v773_v20 = vshll.u32 %v16977_v51, 16  ;;  %v1332_v21 = vrot.slane %v1331_v8, 4  ;;  %v16995_v22 = vld [vmem:[#allocation2 + $0x90] sm:$0xf]  ;;  %v1348_v24 = vshll.u32 %v16988_v14, 16  ;;  %v1352_v25 = vshrl.u32 %v16988_v14, 16 }
 0x119   : > { %v766_v27 = vor.u32 %v764_v2, %v763_v10  ;;  %439 = vst [vmem:[#allocation2 + $0xb0] sm:$0x1] %v438_v15  ;;  %v384_v28 = vld [vmem:[#allocation2 + $0xb4] sm:$0x1]  ;;  %v1339_v29 = vshrl.u32 %v16995_v22, 16  ;;  %v1342_v30 = vshll.u32 %v16995_v22, 16  ;;  %v956_v32 = vsel %vm16724_vm8, %v758_v9, %v955_v60 }
 0x11a   : > { %v768_v31 = vrot.slane %v763_v10, 4  ;;  %v1337_v33 = vsel %vm16748_vm11, %v1332_v21, %v1336_v37  ;;  %v17005_v38 = vld [vmem:[#allocation2 + $0x98] sm:$0x1]  ;;  %v1350_v39 = vrot.slane %v1348_v24, 5  ;;  %v1354_v41 = vrot.slane %v1352_v25, 4 }
 0x11b   : > { %v767_v42 = vsel %vm16733_vm10, %v759_v1, %v766_v27  ;;  %957 = vst [vmem:[#allocation2 + $0x9c] sm:$0xf] %v956_v32  ;;  %v440_v43 = vld [vmem:[#allocation2 + $0xbc] sm:$0x1]  ;;  %v542_v44 = vld [vmem:[%s16682_s17 + $0x70] sm:$0xf]  ;;  %v13276_v45 = vcombine.low %v1327_v61, %v1337_v33 }
 0x11c   : > { %v1341_v46 = vrot.slane %v1339_v29, 4  ;;  %v1344_v48 = vrot.slane %v1342_v30, 5  ;;  %v1358_v18 = vshll.u32 %v17005_v38, 16  ;;  %958 = vst [vmem:[#allocation2 + $0xa0] sm:$0xf] %v767_v42  ;;  %v1355_v49 = vor.u32 %v1354_v41, %v1350_v39 }
 0x11d   : > { %v960_v37 = vsel %vm16697_vm3, %v768_v31, %v959_v47  ;;  %v772_v50 = vrot.slane %v770_v17, 7  ;;  %v778_v51 = vshrl.u32 %v541_v16, 16  ;;  %v543_v52 = vld [vmem:[%s16682_s17 + $0x74] sm:$0xf]  ;;  %14457 = vmatmul.mubr.bf16.gmra.mrb[20].mxu0 %v13276_v45  ;;  %v781_v55 = vshll.u32 %v541_v16, 16 }
 0x11e   : > { %v1345_v53 = vor.u32 %v1344_v48, %v1341_v46  ;;  %v1360_v54 = vrot.slane %v1358_v18, 5  ;;  %961 = vst [vmem:[#allocation2 + $0xa4] sm:$0x1] %v960_v37  ;;  %v385_v56 = vsel %vm16697_vm3, 0, %v384_v28  ;;  %v1356_v57 = vrot.slane %v1355_v49, 4 }
 0x11f   : > { %v775_v35 = vor.u32 %v773_v20, %v772_v50  ;;  %v776_v59 = vrot.slane %v772_v50, 4  ;;  %v780_v60 = vrot.slane %v778_v51, 7  ;;  %v962_v62 = vld [vmem:[#allocation2 + $0xa8] sm:$0xf]  ;;  %386 = vst [vmem:[#allocation2 + $0xb4] sm:$0x1] %v385_v56 }
 0x120   : > { %v1346_v0 = vrot.slane %v1345_v53, 4  ;;  %v441_v1 = vsel %vm16702_vm4, 0, %v440_v43  ;;  %v787_v2 = vshrl.u32 %v542_v44, 16  ;;  %v790_v8 = vshll.u32 %v542_v44, 16  ;;  %v966_v47 = vld [vmem:[#allocation2 + $0xb0] sm:$0x1] }
 0x121   : > { %v1361_v9 = vsel %vm16748_vm11, %v1356_v57, %v1360_v54  ;;  %v783_v10 = vor.u32 %v781_v55, %v780_v60  ;;  %v785_v12 = vrot.slane %v780_v60, 4  ;;  %v963_v61 = vsel %vm16724_vm8, %v775_v35, %v962_v62  ;;  %442 = vst [vmem:[#allocation2 + $0xbc] sm:$0x1] %v441_v1 }
 0x122   : > { %v1351_v15 = vsel %vm16748_vm11, %v1346_v0, %v1350_v39  ;;  %v17024_v16 = vld [vmem:[#allocation2 + $0x9c] sm:$0xf]  ;;  %964 = vst [vmem:[#allocation2 + $0xa8] sm:$0xf] %v963_v61  ;;  %v789_v17 = vrot.slane %v787_v2, 7  ;;  %v795_v20 = vshrl.u32 %v543_v52, 16  ;;  %v13299_v1 = vcombine.low %v16942_v58, %v16949_v63 }
 0x123   : > { %v798_v21 = vshll.u32 %v543_v52, 16  ;;  %v13277_v24 = vcombine.low %v1351_v15, %v1361_v9  ;;  %v17026_v25 = vld [vmem:[#allocation2 + $0xa0] sm:$0xf]  ;;  %v1363_v27 = vshrl.u32 %v17024_v16, 16  ;;  %v1366_v28 = vshll.u32 %v17024_v16, 16 }
 0x124   : > { %v784_v29 = vsel %vm16733_vm10, %v776_v59, %v783_v10  ;;  %v1372_v30 = vshll.u32 %v17026_v25, 16  ;;  %v1376_v31 = vshrl.u32 %v17026_v25, 16  ;;  %v967_v32 = vsel %vm16697_vm3, %v785_v12, %v966_v47 }
 0x125   : > { %965 = vst [vmem:[#allocation2 + $0xac] sm:$0xf] %v784_v29  ;;  %v792_v33 = vor.u32 %v790_v8, %v789_v17  ;;  %14460 = vmatprep.mubr.bf16.mxu0 %v13277_v24  ;;  %v17036_v39 = vld [vmem:[#allocation2 + $0xa4] sm:$0x1]  ;;  %v1365_v41 = vrot.slane %v1363_v27, 4  ;;  %v1368_v42 = vrot.slane %v1366_v28, 5  ;;  %v13298_v59 = vcombine.low %v16908_v11, %v16906_v7 }
 0x126   : > { %968 = vst [vmem:[#allocation2 + $0xb0] sm:$0x1] %v967_v32  ;;  %v793_v43 = vrot.slane %v789_v17, 4  ;;  %v797_v44 = vrot.slane %v795_v20, 7  ;;  %v1374_v45 = vrot.slane %v1372_v30, 5  ;;  %v1378_v46 = vrot.slane %v1376_v31, 4 }
 0x127   : > { %v1382_v48 = vshll.u32 %v17036_v39, 16  ;;  %v969_v18 = vld [vmem:[#allocation2 + $0xb4] sm:$0xf]  ;;  %v1369_v49 = vor.u32 %v1368_v42, %v1365_v41  ;;  %v13300_v9 = vcombine.low %v16958_v23, %v16967_v36  ;;  %v13301_v10 = vcombine.low %v16995_v22, %v16988_v14  ;;  %v2031_v22 = vld [vmem:[#allocation2 + $0x18] sm:$0xe] }
 0x128   : > { %v800_v37 = vor.u32 %v798_v21, %v797_v44  ;;  %v802_v50 = vrot.slane %v797_v44, 4  ;;  %v970_v51 = vsel %vm16724_vm8, %v792_v33, %v969_v18  ;;  %v1379_v52 = vor.u32 %v1378_v46, %v1374_v45  ;;  %v973_v54 = vld [vmem:[#allocation2 + $0xbc] sm:$0x1] }
 0x129   : > { %v1384_v53 = vrot.slane %v1382_v48, 5  ;;  %971 = vst [vmem:[#allocation2 + $0xb4] sm:$0xf] %v970_v51  ;;  %v1370_v55 = vrot.slane %v1369_v49, 4  ;;  %v17041_v56 = vld [vmem:[#allocation2 + $0xa8] sm:$0xf]  ;;  %v13302_v12 = vcombine.low %v17024_v16, %v17026_v25 }
 0x12a   : > { %v801_v57 = vsel %vm16733_vm10, %v793_v43, %v800_v37  ;;  %v974_v35 = vsel %vm16697_vm3, %v802_v50, %v973_v54  ;;  %v1380_v60 = vrot.slane %v1379_v52, 4  ;;  %v1387_v62 = vshrl.u32 %v17041_v56, 16 }
 0x12b   : > { %v1390_v0 = vshll.u32 %v17041_v56, 16  ;;  %972 = vst [vmem:[#allocation2 + $0xb8] sm:$0xf] %v801_v57  ;;  %975 = vst [vmem:[#allocation2 + $0xbc] sm:$0x1] %v974_v35  ;;  %v1375_v2 = vsel %vm16748_vm11, %v1370_v55, %v1374_v45  ;;  %vm2078_vm13 = vcmask 1046532  }
 0x12c   : > { %v17055_v8 = vld [vmem:[#allocation2 + $0xac] sm:$0xf]  ;;  %v1385_v61 = vsel %vm16748_vm11, %v1380_v60, %v1384_v53  ;;  %v1389_v15 = vrot.slane %v1387_v62, 4  ;;  %vm17103_vm14 = vmor %vm2077_vm12, %vm2078_vm13  ;;  %vm6161_vm15 = vcmask 1041408   ;;  %vm7132_vm0 = vcmask 1042434  }
 0x12d   : > { %v17065_v47 = vld [vmem:[#allocation2 + $0xb0] sm:$0x1]  ;;  %v1392_v17 = vrot.slane %v1390_v0, 5  ;;  %v1396_v20 = vshll.u32 %v17055_v8, 16  ;;  %v13278_v21 = vcombine.low %v1375_v2, %v1385_v61  ;;  %v1400_v24 = vshrl.u32 %v17055_v8, 16 }
 0x12e   : > { %v1406_v27 = vshll.u32 %v17065_v47, 16  ;;  %v13303_v28 = vcombine.low %v17041_v56, %v17055_v8  ;;  %vm7135_vm1 = vcmask 1043459   ;;  %vm7138_vm2 = vcmask 1044484  }
 0x12f   : > { %v1393_v29 = vor.u32 %v1392_v17, %v1389_v15  ;;  %v1398_v30 = vrot.slane %v1396_v20, 5  ;;  %14461 = vmatmul.mubr.bf16.gmra.mrb[24].mxu0 %v13278_v21  ;;  %v1402_v31 = vrot.slane %v1400_v24, 4  ;;  %v17093_v20 = vld [vmem:[#allocation2 + $0x4] sm:$0xf]  ;;  %v16099_v21 = vld [vmem:[#allocation2] sm:$0xf] }
 0x130   : > { %v17072_v32 = vld [vmem:[#allocation2 + $0xb4] sm:$0xf]  ;;  %v1408_v44 = vrot.slane %v1406_v27, 5  ;;  %v13289_v24 = vcombine.low %v16099_v21, %v17093_v20  ;;  %vm7141_vm5 = vcmask 1045509   ;;  %vm7144_vm6 = vcmask 1046534  }
 0x131   : > { %v1394_v33 = vrot.slane %v1393_v29, 4  ;;  %v1411_v41 = vshrl.u32 %v17072_v32, 16  ;;  %v1414_v42 = vshll.u32 %v17072_v32, 16  ;;  %v1403_v43 = vor.u32 %v1402_v31, %v1398_v30  ;;  %v2038_v29 = vld [vmem:[#allocation2 + $0x6c] sm:$0xe] }
 0x132   : > { %v17076_v45 = vld [vmem:[#allocation2 + $0xb8] sm:$0xf]  ;;  %v17078_v46 = vld [vmem:[#allocation2 + $0xbc] sm:$0x1]  ;;  %v16100_v31 = vld [vmem:[#allocation2 + $0xc] sm:$0xf] }
 0x133   : > { %v1399_v48 = vsel %vm16748_vm11, %v1394_v33, %v1398_v30  ;;  %v1413_v18 = vrot.slane %v1411_v41, 4  ;;  %v1416_v49 = vrot.slane %v1414_v42, 5  ;;  %v1420_v37 = vshll.u32 %v17076_v45, 16  ;;  %v2039_v30 = vld [vmem:[#allocation2 + $0x78] sm:$0xe]  ;;  %v15823_v42 = vld [vmem:[#allocation7 + $0x88] sm:$0xff]  }
 0x134   : > { %v1404_v50 = vrot.slane %v1403_v43, 4  ;;  %v1424_v51 = vshrl.u32 %v17076_v45, 16  ;;  %v1430_v52 = vshll.u32 %v17078_v46, 16  ;;  %v13304_v53 = vcombine.low %v17072_v32, %v17076_v45  ;;  %v17096_v33 = vld [vmem:[#allocation2 + $0x10] sm:$0xf] }
 0x135   : > { %v1417_v54 = vor.u32 %v1416_v49, %v1413_v18  ;;  %v1422_v55 = vrot.slane %v1420_v37, 5  ;;  %v13290_v41 = vcombine.low %v16100_v31, %v17096_v33  ;;  %v2040_v43 = vld [vmem:[#allocation2 + $0x84] sm:$0xe]  ;;  %v13322_v49 = vrot.slane %v2038_v29, 9  ;;  %v17119_v21 = vld [vmem:[#allocation2 + $0x34] sm:$0xf] }
 0x136   : > { %v1409_v57 = vsel %vm16748_vm11, %v1404_v50, %v1408_v44  ;;  %v1426_v35 = vrot.slane %v1424_v51, 4  ;;  %v1432_v2 = vrot.slane %v1430_v52, 5  ;;  %v16102_v44 = vld [vmem:[#allocation2 + $0x18] sm:$0xf]  ;;  %v2145_v37 = vrot.slane %v16906_v7, 5 }
 0x137   : > { %v13279_v60 = vcombine.low %v1399_v48, %v1409_v57  ;;  %v1418_v62 = vrot.slane %v1417_v54, 4  ;;  %v17099_v48 = vld [vmem:[#allocation2 + $0x1c] sm:$0xf]  ;;  %v2148_v51 = vrot.slane %v16914_v19, 5  ;;  %v2041_v52 = vld [vmem:[#allocation2 + $0x90] sm:$0xe] }
 0x138   : > { %v1427_v0 = vor.u32 %v1426_v35, %v1422_v55  ;;  %v13291_v18 = vcombine.low %v16102_v44, %v17099_v48  ;;  %v17110_v54 = vsel %vm17103_vm14, %v13322_v49, %v2145_v37  ;;  %v13323_v57 = vrot.slane %v2039_v30, 9  ;;  %v2043_v31 = vld [vmem:[#allocation2 + $0xa8] sm:$0xe] }
 0x139   : > { %14464 = vmatprep.mubr.bf16.mxu0 %v13279_v60  ;;  %v1423_v61 = vsel %vm16748_vm11, %v1418_v62, %v1422_v55  ;;  %v2147_v55 = vrot.slane %v2145_v37, 4  ;;  %v2152_v35 = vrot.slane %v16949_v63, 5  ;;  %v2042_v60 = vld [vmem:[#allocation2 + $0x9c] sm:$0xe]  ;;  %v16104_v62 = vld [vmem:[#allocation2 + $0x24] sm:$0xf] }
 0x13a   : > { %v1428_v15 = vrot.slane %v1427_v0, 4  ;;  %v17113_v0 = vld [vmem:[#allocation2 + $0x28] sm:$0xf]  ;;  %v2159_v19 = vrot.slane %v16967_v36, 5  ;;  %v2162_v44 = vrot.slane %v16960_v26, 5  ;;  %v13325_v37 = vrot.slane %v2041_v52, 9 }
 0x13b   : > { %v17124_v29 = vsel %vm17103_vm14, %v2147_v55, %v2148_v51  ;;  %v17128_v30 = vsel %vm17103_vm14, %v13323_v57, %v2152_v35  ;;  %v2166_v51 = vrot.slane %v16988_v14, 5  ;;  %v2169_v55 = vrot.slane %v17005_v38, 5  ;;  %v2030_v14 = vld [vmem:[#allocation2 + $0xc] sm:$0xe] }
 0x13c   : > { %v1433_v17 = vsel %vm16748_vm11, %v1428_v15, %v1432_v2  ;;  %v13292_v2 = vcombine.low %v16104_v62, %v17113_v0  ;;  %v13324_v15 = vrot.slane %v2040_v43, 9  ;;  %v2161_v43 = vrot.slane %v2159_v19, 4 }
 0x13d   : > { %v13280_v27 = vcombine.low %v1423_v61, %v1433_v17  ;;  %v2155_v61 = vrot.slane %v16955_v13, 5  ;;  %v16106_v17 = vld [vmem:[#allocation2 + $0x30] sm:$0xf]  ;;  %v2154_v13 = vrot.slane %v2152_v35, 4  ;;  %v13326_v62 = vrot.slane %v2042_v60, 9 }
 0x13e   : > { %v17147_v35 = vsel %vm17103_vm14, %v2161_v43, %v2162_v44  ;;  %v2173_v26 = vrot.slane %v17026_v25, 5  ;;  %v17154_v52 = vsel %vm17103_vm14, %v13325_v37, %v2166_v51  ;;  %v2176_v38 = vrot.slane %v17036_v39, 5  ;;  %v16114_v39 = vld [vmem:[#allocation2 + $0x60] sm:$0xf] }
 0x13f   : > { %14465 = vmatmul.mubr.bf16.gmra.mrb[28].mxu0 %v13280_v27  ;;  %v15826_v27 = vld [vmem:[#allocation7 + $0x90] sm:$0xff]   ;;  %v17139_v49 = vsel %vm17103_vm14, %v2154_v13, %v2155_v61  ;;  %v13327_v13 = vrot.slane %v2043_v31, 9  ;;  %v2183_v44 = vrot.slane %v17065_v47, 5  ;;  %v17200_v47 = vld [vmem:[#allocation2 + $0x4c] sm:$0xf]  ;;  %v2096_v40 = vrot.slane %v17099_v48, 5 }
 0x140   : > { %14484 = vmatprep.mubr.bf16.mxu0 %v13289_v24  ;;  %v13293_v24 = vcombine.low %v16106_v17, %v17119_v21  ;;  %v13339_v57 = vcombine.low %v17128_v30, %v17139_v49  ;;  %v17159_v17 = vsel %vm17103_vm14, %v13326_v62, %v2173_v26  ;;  %v2175_v60 = vrot.slane %v2173_v26, 4  ;;  %v2911_v49 = vld [vmem:[#allocation2 + $0x38] sm:$0x1] }
 0x141   : > { %v13314_v25 = vrot.slane %v2030_v14, 9  ;;  %v2110_v32 = vrot.slane %v17119_v21, 5  ;;  %vm7147_vm7 = vcmask 1047559  }
 0x142   : > { %v17172_v62 = vsel %vm17103_vm14, %v2175_v60, %v2176_v38  ;;  %v16108_v60 = vld [vmem:[#allocation2 + $0x3c] sm:$0xf] }
 0x147   : > { %14485 = vmatmul.mubr.bf16.vlgmr.msra.gmra.mrb[0].mxu0 %v13290_v41  ;;  %v17134_v41 = vsel %vm17103_vm14, %v13324_v15, %v2159_v19  ;;  %v2168_v15 = vrot.slane %v2166_v51, 4  ;;  %v15829_v19 = vld [vmem:[#allocation7 + $0x98] sm:$0xff]   ;;  %v2187_v51 = vrot.slane %v17076_v45, 5 }
 0x148   : > { %14517 = vmatpush3.bf16.msra.mxu0 %v16859_v6  ;;  %14488 = vmatprep.mubr.bf16.mxu0 %v13291_v18  ;;  %v13338_v6 = vcombine.low %v17110_v54, %v17124_v29  ;;  %v2044_v18 = vld [vmem:[#allocation2 + $0xb4] sm:$0xe]  ;;  %v2908_v29 = vld [vmem:[#allocation2 + $0x2c] sm:$0x1] }
 0x149   : > { %14518 = vmatprep.subr.bf16.mxu0 %v15823_v42  ;;  %v17164_v43 = vsel %vm17103_vm14, %v2168_v15, %v2169_v55  ;;  %v13328_v37 = vrot.slane %v2044_v18, 9  ;;  %v15832_v55 = vld [vmem:[#allocation7 + $0xa0] sm:$0xff]   ;;  %v2189_v18 = vrot.slane %v2187_v51, 4  ;;  %v2190_v15 = vrot.slane %v17078_v46, 5  ;;  %v17206_v46 = vld [vmem:[#allocation2 + $0x64] sm:$0xf] }
 0x14a   : > { %v13297_v61 = vcombine.low %v16114_v39, %v17206_v46  ;;  %v2029_v39 = vld [vmem:[#allocation2] sm:$0xe] }
 0x14b   : > { %v13313_v58 = vrot.slane %v2029_v39, 9 }
 0x14c   : > { %14519 = vmatpush3.bf16.msra.mxu0 %v15823_v42  ;;  %v2180_v42 = vrot.slane %v17055_v8, 5  ;;  %v2032_v8 = vld [vmem:[#allocation2 + $0x24] sm:$0xe] }
 0x14d   : > { %14520 = vmatprep.subr.bf16.mxu0 %v15826_v27 }
 0x14e   : > { %v17176_v31 = vsel %vm17103_vm14, %v13327_v13, %v2180_v42  ;;  %v2182_v26 = vrot.slane %v2180_v42, 4  ;;  %v17195_v13 = vld [vmem:[#allocation2 + $0x40] sm:$0xf] }
 0x14f   : > { %14489 = vmatmul.mubr.bf16.gmra.mrb[4].mxu0 %v13292_v2  ;;  %v17182_v2 = vsel %vm17103_vm14, %v13328_v37, %v2187_v51  ;;  %v13294_v42 = vcombine.low %v16108_v60, %v17195_v13  ;;  %v15835_v37 = vld [vmem:[#allocation7 + $0xa8] sm:$0xff]   ;;  %v16110_v51 = vld [vmem:[#allocation2 + $0x48] sm:$0xf] }
 0x150   : > { %14492 = vmatprep.mubr.bf16.mxu0 %v13293_v24  ;;  %14521 = vmatpush3.bf16.msra.mxu0 %v15826_v27  ;;  %v17187_v38 = vsel %vm17103_vm14, %v2182_v26, %v2183_v44  ;;  %v17193_v27 = vsel %vm17103_vm14, %v2189_v18, %v2190_v15  ;;  %v13295_v44 = vcombine.low %v16110_v51, %v17200_v47  ;;  %v15838_v26 = vld [vmem:[#allocation7 + $0xb0] sm:$0xff]   ;;  %v16112_v18 = vld [vmem:[#allocation2 + $0x54] sm:$0xf]  ;;  %v15841_v24 = vld [vmem:[#allocation7 + $0xb8] sm:$0xff]  }
 0x151   : > { %14522 = vmatprep.subr.bf16.mxu0 %v15829_v19  ;;  %v17203_v15 = vld [vmem:[#allocation2 + $0x58] sm:$0xf] }
 0x152   : > { %v13296_v60 = vcombine.low %v16112_v18, %v17203_v15 }
 0x154   : > { %14523 = vmatpush3.bf16.msra.mxu0 %v15829_v19  ;;  %v17209_v19 = vld [vmem:[#allocation7 + $0xc0] sm:$0xff]  }
 0x155   : > { %14524 = vmatprep.subr.bf16.mxu0 %v15832_v55 }
 0x157   : > { %14493 = vmatmul.mubr.bf16.gmra.mrb[8].mxu0 %v13294_v42  ;;  %v544_v42 = vld [vmem:[%s16682_s17 + $0x78] sm:$0xf] }
 0x158   : > { %14496 = vmatprep.mubr.bf16.mxu0 %v13295_v44  ;;  %14525 = vmatpush3.bf16.msra.mxu0 %v15832_v55  ;;  %v387_v55 = vld [vmem:[#allocation2 + $0xc0] sm:$0x1]  ;;  %v804_v7 = vshrl.u32 %v544_v42, 16 }
 0x159   : > { %14526 = vmatprep.subr.bf16.mxu0 %v15835_v37 }
 0x15a   : > { %v806_v63 = vrot.slane %v804_v7, 7  ;;  %v13315_v7 = vrot.slane %v2031_v22, 9 }
 0x15c   : > { %14527 = vmatpush3.bf16.msra.mxu0 %v15835_v37  ;;  %v545_v37 = vld [vmem:[%s16682_s17 + $0x7c] sm:$0xf]  ;;  %v810_v23 = vrot.slane %v806_v63, 4 }
 0x15d   : > { %14528 = vmatprep.subr.bf16.mxu0 %v15838_v26  ;;  %v812_v11 = vshrl.u32 %v545_v37, 16 }
 0x15f   : > { %14497 = vmatmul.mubr.bf16.gmra.mrb[12].mxu0 %v13296_v60  ;;  %v17229_v44 = vrot.slane %v812_v11, 7  ;;  %v2098_v11 = vrot.slane %v2096_v40, 4 }
 0x160   : > { %14500 = vmatprep.mubr.bf16.mxu0 %v13297_v61  ;;  %14529 = vmatpush3.bf16.msra.mxu0 %v15838_v26  ;;  %v388_v61 = vsel %vm16697_vm3, 0, %v387_v55  ;;  %v815_v26 = vshll.u32 %v545_v37, 16 }
 0x161   : > { %14530 = vmatprep.subr.bf16.mxu0 %v15841_v24  ;;  %389 = vst [vmem:[#allocation2 + $0xc0] sm:$0x1] %v388_v61 }
 0x162   : > { %v817_v36 = vor.u32 %v815_v26, %v17229_v44  ;;  %v16119_v26 = vld [vmem:[#allocation2 + $0x2c] sm:$0x1] }
 0x164   : > { %14531 = vmatpush3.bf16.msra.mxu0 %v15841_v24  ;;  %v2082_v24 = vrot.slane %v17093_v20, 5  ;;  %v818_v20 = vsel %vm16733_vm10, %v810_v23, %v817_v36  ;;  %v2112_v36 = vrot.slane %v2110_v32, 4 }
 0x165   : > { %14564 = vmatprep.subr.bf16.mxu0 %v17209_v19  ;;  %979 = vst [vmem:[#allocation2 + $0xc4] sm:$0xf] %v818_v20 }
 0x166   : > { %v2084_v18 = vrot.slane %v2082_v24, 4  ;;  %v2083_v39 = vsel %vm17103_vm14, %v13313_v58, %v2082_v24  ;;  %v2103_v24 = vrot.slane %v17113_v0, 5 }
 0x167   : > { %14501 = vmatmul.mubr.bf16.gmra.mrb[16].mxu0 %v13298_v59  ;;  %v16116_v59 = vld [vmem:[#allocation2 + $0x8] sm:$0x1] }
 0x168   : > { %14504 = vmatprep.mubr.bf16.mxu0 %v13299_v1  ;;  %v2085_v51 = vrot.slane %v16116_v59, 5  ;;  %v807_v1 = vshll.u32 %v544_v42, 16  ;;  %v16117_v42 = vld [vmem:[#allocation2 + $0x14] sm:$0x1]  ;;  %v16118_v59 = vld [vmem:[#allocation2 + $0x20] sm:$0x1] }
 0x169   : > { %v2092_v37 = vrot.slane %v16117_v42, 5  ;;  %v2099_v56 = vrot.slane %v16118_v59, 5 }
 0x16a   : > { %v809_v60 = vor.u32 %v807_v1, %v806_v63  ;;  %v2086_v61 = vsel %vm17103_vm14, %v2084_v18, %v2085_v51  ;;  %v2097_v51 = vsel %vm17103_vm14, %v13315_v7, %v2096_v40  ;;  %v2105_v1 = vrot.slane %v2103_v24, 4  ;;  %v15844_v40 = vld [vmem:[#allocation7 + $0xd0] sm:$0xff]  }
 0x16b   : > { %v13329_v16 = vcombine.low %v2083_v39, %v2086_v61  ;;  %v2100_v58 = vsel %vm17103_vm14, %v2098_v11, %v2099_v56  ;;  %v2106_v18 = vrot.slane %v16119_v26, 5  ;;  %v2035_v39 = vld [vmem:[#allocation2 + $0x48] sm:$0xe]  ;;  %v16122_v11 = vld [vmem:[#allocation2 + $0x50] sm:$0x1]  ;;  %v15845_v56 = vld [vmem:[#allocation7 + $0xd8] sm:$0xff]  }
 0x16c   : > { %v13331_v63 = vcombine.low %v2097_v51, %v2100_v58  ;;  %v2127_v59 = vrot.slane %v16122_v11, 5  ;;  %v2138_v51 = vrot.slane %v17206_v46, 5  ;;  %v15846_v58 = vld [vmem:[#allocation7 + $0xe0] sm:$0xff]   ;;  %v16123_v26 = vld [vmem:[#allocation2 + $0x5c] sm:$0x1] }
 0x16d   : > { %v2107_v21 = vsel %vm17103_vm14, %v2105_v1, %v2106_v18  ;;  %v2134_v18 = vrot.slane %v16123_v26, 5 }
 0x16f   : > { %14505 = vmatmul.mubr.bf16.gmra.mrb[20].mxu0 %v13300_v9  ;;  %v976_v9 = vld [vmem:[#allocation2 + $0xc0] sm:$0xf] }
 0x170   : > { %14508 = vmatprep.mubr.bf16.mxu0 %v13301_v10  ;;  %v977_v55 = vsel %vm16724_vm8, %v809_v60, %v976_v9  ;;  %v2089_v10 = vrot.slane %v17096_v33, 5  ;;  %v15843_v60 = vld [vmem:[#allocation7 + $0xc8] sm:$0xff]   ;;  %v16120_v9 = vld [vmem:[#allocation2 + $0x38] sm:$0x1] }
 0x171   : > { %978 = vst [vmem:[#allocation2 + $0xc0] sm:$0xf] %v977_v55  ;;  %v2113_v20 = vrot.slane %v16120_v9, 5  ;;  %v2117_v55 = vrot.slane %v17195_v13, 5  ;;  %v13319_v13 = vrot.slane %v2035_v39, 9  ;;  %v15847_v9 = vld [vmem:[#allocation7 + $0xe8] sm:$0xff]  }
 0x172   : > { %v2090_v33 = vsel %vm17103_vm14, %v13314_v25, %v2089_v10  ;;  %v16121_v25 = vld [vmem:[#allocation2 + $0x44] sm:$0x1] }
 0x173   : > { %v2114_v22 = vsel %vm17103_vm14, %v2112_v36, %v2113_v20  ;;  %v2900_v20 = vld [vmem:[#allocation2 + $0xc] sm:$0xf] }
 0x177   : > { %14509 = vmatmul.mubr.bf16.gmra.mrb[24].mxu0 %v13302_v12  ;;  %v2091_v12 = vrot.slane %v2089_v10, 4  ;;  %v2034_v10 = vld [vmem:[#allocation2 + $0x3c] sm:$0xe] }
 0x178   : > { %14512 = vmatprep.mubr.bf16.mxu0 %v13303_v28  ;;  %v2033_v28 = vld [vmem:[#allocation2 + $0x30] sm:$0xe] }
 0x179   : > { %v2093_v48 = vsel %vm17103_vm14, %v2091_v12, %v2092_v37  ;;  %v13317_v23 = vrot.slane %v2033_v28, 9  ;;  %v13318_v37 = vrot.slane %v2034_v10, 9  ;;  %v2120_v12 = vrot.slane %v16121_v25, 5  ;;  %v2036_v28 = vld [vmem:[#allocation2 + $0x54] sm:$0xe] }
 0x17a   : > { %v13330_v45 = vcombine.low %v2090_v33, %v2093_v48  ;;  %v2131_v33 = vrot.slane %v17203_v15, 5  ;;  %v2140_v15 = vrot.slane %v2138_v51, 4  ;;  %v2902_v25 = vld [vmem:[#allocation2 + $0x14] sm:$0x1] }
 0x17b   : > { %v2111_v14 = vsel %vm17103_vm14, %v13317_v23, %v2110_v32  ;;  %v2037_v32 = vld [vmem:[#allocation2 + $0x60] sm:$0xe]  ;;  %v16124_v23 = vld [vmem:[#allocation2 + $0x68] sm:$0x1] }
 0x17c   : > { %v13333_v42 = vcombine.low %v2111_v14, %v2114_v22  ;;  %v2133_v1 = vrot.slane %v2131_v33, 4  ;;  %v2141_v36 = vrot.slane %v16124_v23, 5  ;;  %v2952_v14 = vshll.u32 %v2900_v20, 16 }
 0x17e   : > { %v2142_v10 = vsel %vm17103_vm14, %v2140_v15, %v2141_v36  ;;  %v2910_v36 = vld [vmem:[#allocation2 + $0x34] sm:$0xf] }
 0x17f   : > { %14513 = vmatmul.mubr.bf16.gmra.mrb[28].mxu0 %v13304_v53  ;;  %v13316_v53 = vrot.slane %v2032_v8, 9  ;;  %v2118_v8 = vsel %vm17103_vm14, %v13318_v37, %v2117_v55 }
 0x180   : > { %14532 = vmatprep.mubr.bf16.mxu0 %v13329_v16  ;;  %v2119_v16 = vrot.slane %v2117_v55, 4  ;;  %v2949_v55 = vshrl.u32 %v2900_v20, 16 }
 0x181   : > { %v2104_v0 = vsel %vm17103_vm14, %v13316_v53, %v2103_v24 }
 0x182   : > { %v13332_v61 = vcombine.low %v2104_v0, %v2107_v21  ;;  %v2901_v0 = vld [vmem:[#allocation2 + $0x10] sm:$0xf]  ;;  %v2135_v21 = vsel %vm17103_vm14, %v2133_v1, %v2134_v18  ;;  %v2907_v18 = vld [vmem:[#allocation2 + $0x28] sm:$0xf] }
 0x183   : > { %v2962_v39 = vshrl.u32 %v2901_v0, 16 }
 0x185   : > { %v2964_v11 = vrot.slane %v2962_v39, 4  ;;  %v3034_v39 = vshrl.u32 %v2910_v36, 16 }
 0x187   : > { %14533 = vmatmul.mubr.bf16.vlgmr.msra.gmra.mrb[0].mxu0 %v13330_v45 }
 0x188   : > { %14565 = vmatpush3.bf16.msra.mxu0 %v17209_v19  ;;  %14536 = vmatprep.mubr.bf16.mxu0 %v13331_v63  ;;  %v2124_v19 = vrot.slane %v17200_v47, 5  ;;  %v2121_v47 = vsel %vm17103_vm14, %v2119_v16, %v2120_v12  ;;  %v13320_v63 = vrot.slane %v2036_v28, 9  ;;  %v15849_v16 = vld [vmem:[#allocation7 + $0xf8] sm:$0xff]   ;;  %v2951_v12 = vrot.slane %v2949_v55, 4 }
 0x189   : > { %14566 = vmatprep.subr.bf16.mxu0 %v15843_v60  ;;  %v13334_v45 = vcombine.low %v2118_v8, %v2121_v47  ;;  %v2968_v47 = vshll.u32 %v2902_v25, 16  ;;  %v2913_v55 = vld [vmem:[#allocation2 + $0x40] sm:$0xf] }
 0x18a   : > { %v2126_v7 = vrot.slane %v2124_v19, 4  ;;  %v2125_v48 = vsel %vm17103_vm14, %v13319_v13, %v2124_v19  ;;  %v2132_v46 = vsel %vm17103_vm14, %v13320_v63, %v2131_v33  ;;  %v2958_v19 = vshll.u32 %v2901_v0, 16  ;;  %v2905_v33 = vld [vmem:[#allocation2 + $0x20] sm:$0x1]  ;;  %v2906_v63 = vld [vmem:[#allocation2 + $0x24] sm:$0xf] }
 0x18b   : > { %v2954_v13 = vrot.slane %v2952_v14, 5  ;;  %v17296_v1 = vrot.slane %v2968_v47, 5  ;;  %v2992_v26 = vshll.u32 %v2905_v33, 16  ;;  %v3006_v14 = vshll.u32 %v2907_v18, 16 }
 0x18c   : > { %14567 = vmatpush3.bf16.msra.mxu0 %v15843_v60  ;;  %v2128_v24 = vsel %vm17103_vm14, %v2126_v7, %v2127_v59  ;;  %v13321_v60 = vrot.slane %v2037_v32, 9  ;;  %v17290_v7 = vrot.slane %v2958_v19, 5  ;;  %v2904_v59 = vld [vmem:[#allocation2 + $0x1c] sm:$0xf]  ;;  %v3030_v19 = vshll.u32 %v2910_v36, 16 }
 0x18d   : > { %14568 = vmatprep.subr.bf16.mxu0 %v15844_v40  ;;  %v13335_v53 = vcombine.low %v2125_v48, %v2128_v24  ;;  %v2955_v28 = vor.u32 %v2954_v13, %v2951_v12  ;;  %v2982_v48 = vshll.u32 %v2904_v59, 16  ;;  %v17292_v24 = vld [vmem:[#allocation7 + $0x100] sm:$0xff]   ;;  %v3036_v47 = vrot.slane %v3034_v39, 4 }
 0x18e   : > { %v2139_v22 = vsel %vm17103_vm14, %v13321_v60, %v2138_v51  ;;  %v2965_v51 = vor.u32 %v2964_v11, %v17290_v7  ;;  %v2909_v60 = vld [vmem:[#allocation2 + $0x30] sm:$0xf]  ;;  %v2915_v11 = vld [vmem:[#allocation2 + $0x48] sm:$0xf]  ;;  %v3016_v36 = vshll.u32 %v2908_v29, 16 }
 0x18f   : > { %14537 = vmatmul.mubr.bf16.gmra.mrb[4].mxu0 %v13332_v61  ;;  %v13336_v61 = vcombine.low %v2132_v46, %v2135_v21  ;;  %v13337_v37 = vcombine.low %v2139_v22, %v2142_v10  ;;  %v17298_v15 = vrot.slane %v2955_v28, 4  ;;  %v17300_v23 = vrot.slane %v2982_v48, 5  ;;  %v2919_v29 = vld [vmem:[#allocation2 + $0x58] sm:$0xf] }
 0x190   : > { %14540 = vmatprep.mubr.bf16.mxu0 %v13333_v42  ;;  %14569 = vmatpush3.bf16.msra.mxu0 %v15844_v40  ;;  %v15848_v40 = vld [vmem:[#allocation7 + $0xf0] sm:$0xff]   ;;  %v17303_v20 = vrot.slane %v2965_v51, 4  ;;  %v2997_v46 = vshrl.u32 %v2906_v63, 16  ;;  %v3000_v21 = vshll.u32 %v2906_v63, 16  ;;  %v3010_v22 = vshrl.u32 %v2907_v18, 16 }
 0x191   : > { %14570 = vmatprep.subr.bf16.mxu0 %v15845_v56  ;;  %v2903_v42 = vld [vmem:[#allocation2 + $0x18] sm:$0xf]  ;;  %v3021_v10 = vshrl.u32 %v2909_v60, 16  ;;  %v3069_v51 = vshrl.u32 %v2915_v11, 16 }
 0x192   : > { %v2976_v8 = vshll.u32 %v2903_v42, 16  ;;  %v2999_v12 = vrot.slane %v2997_v46, 4  ;;  %v3002_v13 = vrot.slane %v3000_v21, 5  ;;  %v17325_v46 = vld [vmem:[#allocation2 + $0x50] sm:$0x1] }
 0x194   : > { %14571 = vmatpush3.bf16.msra.mxu0 %v15845_v56  ;;  %v2973_v56 = vshrl.u32 %v2903_v42, 16  ;;  %v3003_v18 = vor.u32 %v3002_v13, %v2999_v12  ;;  %v17344_v12 = vrot.slane %v3016_v36, 5  ;;  %v17367_v36 = vld [vmem:[#allocation2 + $0x64] sm:$0xf] }
 0x195   : > { %14572 = vmatprep.subr.bf16.mxu0 %v15846_v58 }
 0x197   : > { %14541 = vmatmul.mubr.bf16.gmra.mrb[8].mxu0 %v13334_v45  ;;  %v2975_v45 = vrot.slane %v2973_v56, 4  ;;  %v3012_v56 = vrot.slane %v3010_v22, 4  ;;  %v2918_v22 = vld [vmem:[#allocation2 + $0x54] sm:$0xf] }
 0x198   : > { %14544 = vmatprep.mubr.bf16.mxu0 %v13335_v53  ;;  %14573 = vmatpush3.bf16.msra.mxu0 %v15846_v58  ;;  %v2986_v58 = vshrl.u32 %v2904_v59, 16  ;;  %v2978_v53 = vrot.slane %v2976_v8, 5  ;;  %v17311_v59 = vrot.slane %v3006_v14, 5  ;;  %v3023_v8 = vrot.slane %v3021_v10, 4 }
 0x199   : > { %14574 = vmatprep.subr.bf16.mxu0 %v15847_v9  ;;  %v19779_v10 = vcombine.low %v17154_v52, %v17164_v43  ;;  %v3093_v52 = vshrl.u32 %v2918_v22, 16 }
 0x19a   : > { %v2988_v0 = vrot.slane %v2986_v58, 4  ;;  %v2979_v25 = vor.u32 %v2978_v53, %v2975_v45  ;;  %v17318_v58 = vrot.slane %v2992_v26, 5  ;;  %v2914_v45 = vld [vmem:[#allocation2 + $0x44] sm:$0x1]  ;;  %v3072_v53 = vshll.u32 %v2915_v11, 16 }
 0x19b   : > { %v3064_v39 = vshll.u32 %v2914_v45, 16  ;;  %v443_v45 = vld [vmem:[#allocation2 + $0xc8] sm:$0x1] }
 0x19c   : > { %14575 = vmatpush3.bf16.msra.mxu0 %v15847_v9  ;;  %v2912_v9 = vld [vmem:[#allocation2 + $0x3c] sm:$0xf]  ;;  %v2989_v30 = vor.u32 %v2988_v0, %v17300_v23  ;;  %v17320_v63 = vrot.slane %v2979_v25, 4  ;;  %v19778_v0 = vcombine.low %v17134_v41, %v17147_v35 }
 0x19d   : > { %14576 = vmatprep.subr.bf16.mxu0 %v15848_v40  ;;  %v3048_v42 = vshll.u32 %v2912_v9, 16 }
 0x19f   : > { %14545 = vmatmul.mubr.bf16.gmra.mrb[12].mxu0 %v13336_v61  ;;  %v3045_v61 = vshrl.u32 %v2912_v9, 16  ;;  %v3050_v33 = vrot.slane %v3048_v42, 5  ;;  %v17323_v9 = vld [vmem:[#allocation2 + $0x4c] sm:$0xf]  ;;  %v3074_v42 = vrot.slane %v3072_v53, 5  ;;  %v19780_v53 = vcombine.low %v17159_v17, %v17172_v62 }
 0x1a0   : > { %14548 = vmatprep.mubr.bf16.mxu0 %v13337_v37  ;;  %14577 = vmatpush3.bf16.msra.mxu0 %v15848_v40  ;;  %v3024_v40 = vshll.u32 %v2909_v60, 16  ;;  %v3054_v37 = vshll.u32 %v2913_v55, 16  ;;  %v3013_v60 = vor.u32 %v3012_v56, %v17311_v59  ;;  %v3078_v41 = vshll.u32 %v17323_v9, 16  ;;  %v2925_v17 = vld [vmem:[#allocation2 + $0x70] sm:$0xf] }
 0x1a1   : > { %14578 = vmatprep.subr.bf16.mxu0 %v15849_v16  ;;  %v3047_v28 = vrot.slane %v3045_v61, 4  ;;  %v3071_v61 = vrot.slane %v3069_v51, 4  ;;  %v3082_v35 = vshrl.u32 %v17323_v9, 16  ;;  %v2921_v51 = vld [vmem:[#allocation2 + $0x60] sm:$0xf] }
 0x1a2   : > { %v3026_v54 = vrot.slane %v3024_v40, 5  ;;  %v17334_v40 = vrot.slane %v2989_v30, 4  ;;  %v17342_v25 = vrot.slane %v3013_v60, 4  ;;  %v3106_v60 = vshrl.u32 %v2919_v29, 16 }
 0x1a3   : > { %v3051_v14 = vor.u32 %v3050_v33, %v3047_v28  ;;  %v17358_v28 = vrot.slane %v3078_v41, 5  ;;  %v3084_v33 = vrot.slane %v3082_v35, 4  ;;  %v3130_v41 = vshrl.u32 %v17367_v36, 16 }
 0x1a4   : > { %14579 = vmatpush3.bf16.msra.mxu0 %v15849_v16  ;;  %v3058_v16 = vshrl.u32 %v2913_v55, 16  ;;  %v3027_v21 = vor.u32 %v3026_v54, %v3023_v8  ;;  %v3040_v55 = vshll.u32 %v2911_v49, 16  ;;  %v17356_v54 = vrot.slane %v3064_v39, 5 }
 0x1a5   : > { %14612 = vmatprep.subr.bf16.mxu0 %v17292_v24  ;;  %v17352_v56 = vrot.slane %v3051_v14, 4  ;;  %v17362_v49 = vrot.slane %v3093_v52, 4  ;;  %v444_v14 = vsel %vm16702_vm4, 0, %v443_v45  ;;  %v3150_v52 = vshll.u32 %v2925_v17, 16  ;;  %v2926_v45 = vld [vmem:[#allocation2 + $0x74] sm:$0x1] }
 0x1a6   : > { %v3060_v48 = vrot.slane %v3058_v16, 4  ;;  %v17340_v16 = vrot.slane %v3003_v18, 4  ;;  %v17346_v43 = vrot.slane %v3027_v21, 4  ;;  %v17350_v11 = vrot.slane %v3040_v55, 5  ;;  %v2920_v21 = vld [vmem:[#allocation2 + $0x5c] sm:$0x1] }
 0x1a7   : > { %14549 = vmatmul.mubr.bf16.gmra.mrb[16].mxu0 %v13338_v6  ;;  %v17313_v6 = vrot.slane %v3030_v19, 5  ;;  %v3102_v18 = vshll.u32 %v2919_v29, 16  ;;  %v2924_v55 = vld [vmem:[#allocation2 + $0x6c] sm:$0xf]  ;;  %445 = vst [vmem:[#allocation2 + $0xc8] sm:$0x1] %v444_v14 }
 0x1a8   : > { %14552 = vmatprep.mubr.bf16.mxu0 %v13339_v57  ;;  %v17316_v57 = vrot.slane %v3054_v37, 5  ;;  %v3088_v37 = vshll.u32 %v17325_v46, 16  ;;  %v3112_v39 = vshll.u32 %v2920_v21, 16  ;;  %v3141_v35 = vshrl.u32 %v2924_v55, 16 }
 0x1a9   : > { %v3037_v26 = vor.u32 %v3036_v47, %v17313_v6  ;;  %v3075_v47 = vor.u32 %v3074_v42, %v3071_v61  ;;  %v3117_v61 = vshrl.u32 %v2921_v51, 16  ;;  %v17379_v42 = vld [vmem:[#allocation2 + $0x68] sm:$0x1]  ;;  %v3132_v14 = vrot.slane %v3130_v41, 4 }
 0x1aa   : > { %v3061_v19 = vor.u32 %v3060_v48, %v17316_v57  ;;  %v17360_v30 = vrot.slane %v3088_v37, 5  ;;  %v3096_v48 = vshll.u32 %v2918_v22, 16  ;;  %v15850_v22 = vld [vmem:[#allocation2 + $0xc] sm:$0xff]   ;;  %v3144_v37 = vshll.u32 %v2924_v55, 16  ;;  %v15851_v55 = vld [vmem:[#allocation2 + $0x18] sm:$0xff]  }
 0x1ab   : > { %v17348_v13 = vrot.slane %v3037_v26, 4  ;;  %v17372_v26 = vrot.slane %v3075_v47, 4  ;;  %v3108_v47 = vrot.slane %v3106_v60, 4  ;;  %v3143_v32 = vrot.slane %v3141_v35, 4 }
 0x1ac   : > { %v17354_v8 = vrot.slane %v3061_v19, 4  ;;  %v3098_v62 = vrot.slane %v3096_v48, 5  ;;  %v17377_v19 = vrot.slane %v3102_v18, 5  ;;  %v17388_v48 = vrot.slane %v3112_v39, 5  ;;  %v2927_v18 = vld [vmem:[#allocation2 + $0x78] sm:$0xf] }
 0x1ad   : > { %v3146_v60 = vrot.slane %v3144_v37, 5  ;;  %v17393_v34 = vrot.slane %v3150_v52, 5  ;;  %v3160_v39 = vshll.u32 %v2926_v45, 16  ;;  %v17401_v52 = vld [vmem:[#allocation2 + $0x7c] sm:$0xf] }
 0x1ae   : > { %19784 = vst [vmem:[#allocation22_spill] sm:$0xff] %v17388_v48  ;;  %v3099_v41 = vor.u32 %v3098_v62, %v17362_v49  ;;  %v3109_v35 = vor.u32 %v3108_v47, %v17377_v19  ;;  %v15858_v48 = vld [vmem:[#allocation7 + $0x110] sm:$0xff]   ;;  %v17413_v47 = vld [vmem:[#allocation2 + $0x80] sm:$0x1] }
 0x1af   : > { %14553 = vmatmul.mubr.bf16.gmra.mrb[20].mxu0 %v19778_v0  ;;  %v19781_v0 = vcombine.low %v17176_v31, %v17187_v38  ;;  %v3120_v31 = vshll.u32 %v2921_v51, 16  ;;  %v3126_v38 = vshll.u32 %v17367_v36, 16  ;;  %v3119_v51 = vrot.slane %v3117_v61, 4  ;;  %v15855_v61 = vld [vmem:[#allocation7 + $0x108] sm:$0xff]  }
 0x1b0   : > { %14556 = vmatprep.mubr.bf16.mxu0 %v19779_v10  ;;  %v3085_v10 = vor.u32 %v3084_v33, %v17358_v28  ;;  %v19783_v33 = vcombine.low %v17182_v2, %v17193_v27  ;;  %v980_v2 = vld [vmem:[#allocation2 + $0xc8] sm:$0x1]  ;;  %v3147_v45 = vor.u32 %v3146_v60, %v3143_v32  ;;  %v17420_v60 = vrot.slane %v3160_v39, 5 }
 0x1b1   : > { %v17390_v21 = vrot.slane %v3126_v38, 5  ;;  %v15853_v27 = vld [vmem:[#allocation2 + $0x24] sm:$0xff]   ;;  %v3168_v38 = vshll.u32 %v2927_v18, 16 }
 0x1b2   : > { %v17383_v29 = vrot.slane %v3085_v10, 4  ;;  %v3136_v10 = vshll.u32 %v17379_v42, 16  ;;  %19787 = vst [vmem:[#allocation24_spill] sm:$0xff] %v17420_v60 }
 0x1b3   : > { %v3133_v5 = vor.u32 %v3132_v14, %v17390_v21  ;;  %v2930_v14 = vld [vmem:[#allocation2 + $0x84] sm:$0xf] }
 0x1b4   : > { %19782 = vst [vmem:[#allocation21_spill] sm:$0xff] %v17383_v29  ;;  %v3170_v29 = vrot.slane %v3168_v38, 5  ;;  %v17411_v62 = vrot.slane %v3136_v10, 5  ;;  %v3189_v38 = vshrl.u32 %v2930_v14, 16 }
 0x1b5   : > { %v17415_v32 = vrot.slane %v3133_v5, 4 }
 0x1b7   : > { %14557 = vmatmul.mubr.bf16.gmra.mrb[24].mxu0 %v19780_v53  ;;  %v3154_v53 = vshrl.u32 %v2925_v17, 16  ;;  %v19785_v17 = vrot.slane %v17229_v44, 4 }
 0x1b8   : > { %14560 = vmatprep.mubr.bf16.mxu0 %v19781_v0  ;;  %v3122_v0 = vrot.slane %v3120_v31, 5 }
 0x1b9   : > { %v3156_v31 = vrot.slane %v3154_v53, 4  ;;  %v17405_v53 = vrot.slane %v3099_v41, 4  ;;  %v15864_v41 = vld [vmem:[#allocation7 + $0x120] sm:$0xff]  }
 0x1ba   : > { %v3123_v37 = vor.u32 %v3122_v0, %v3119_v51  ;;  %v15854_v51 = vld [vmem:[#allocation2 + $0x30] sm:$0xff]   ;;  %v3174_v0 = vshll.u32 %v17401_v52, 16 }
 0x1bc   : > { %v17409_v49 = vrot.slane %v3123_v37, 4  ;;  %v17425_v5 = vrot.slane %v3174_v0, 5  ;;  %v3192_v37 = vshll.u32 %v2930_v14, 16  ;;  %v3758_v0 = vrot.slane %v17325_v46, 5  ;;  %v15867_v14 = vld [vmem:[#allocation7 + $0x128] sm:$0xff]  }
 0x1bf   : > { %14561 = vmatmul.mubr.bf16.gmra.mrb[28].mxu0 %v19783_v33  ;;  %v3165_v33 = vshrl.u32 %v2927_v18, 16  ;;  %v17407_v18 = vrot.slane %v3109_v35, 4 }
 0x1c0   : > { %14580 = vmatprep.mubr.bf16.mxu0 %v15850_v22  ;;  %v981_v22 = vsel %vm16697_vm3, %v19785_v17, %v980_v2  ;;  %v2931_v2 = vld [vmem:[#allocation2 + $0x88] sm:$0xf]  ;;  %v3178_v17 = vshrl.u32 %v17401_v52, 16 }
 0x1c1   : > { %982 = vst [vmem:[#allocation2 + $0xc8] sm:$0x1] %v981_v22  ;;  %v3167_v44 = vrot.slane %v3165_v33, 4  ;;  %v3157_v33 = vor.u32 %v3156_v31, %v17393_v34  ;;  %v3184_v22 = vshll.u32 %v17413_v47, 16 }
 0x1c3   : > { %v3171_v10 = vor.u32 %v3170_v29, %v3167_v44  ;;  %v17427_v35 = vrot.slane %v3157_v33, 4  ;;  %v3180_v29 = vrot.slane %v3178_v17, 4  ;;  %v17431_v31 = vrot.slane %v3184_v22, 5  ;;  %v3659_v44 = vld [vmem:[#allocation2 + $0x48] sm:$0xe]  ;;  %v15859_v33 = vld [vmem:[#allocation2 + $0x54] sm:$0xff]  }
 0x1c4   : > { %v13406_v60 = vrot.slane %v3659_v44, 9  ;;  %v3194_v17 = vrot.slane %v3192_v37, 5 }
 0x1c5   : > { %19788 = vst [vmem:[#allocation25_spill] sm:$0xff] %v17427_v35  ;;  %v17429_v39 = vrot.slane %v3171_v10, 4  ;;  %19790 = vst [vmem:[#allocation27_spill] sm:$0xff] %v17431_v31  ;;  %v2932_v35 = vld [vmem:[#allocation2 + $0x8c] sm:$0x1]  ;;  %v3202_v10 = vshrl.u32 %v2931_v2, 16 }
 0x1c6   : > { %v3208_v44 = vshll.u32 %v2932_v35, 16  ;;  %v3769_v31 = vrot.slane %v17367_v36, 5  ;;  %v3181_v35 = vor.u32 %v3180_v29, %v17425_v5 }
 0x1c7   : > { %14581 = vmatmul.mubr.bf16.vlgmr.msra.gmra.mrb[0].mxu0 %v15851_v55  ;;  %v15856_v55 = vld [vmem:[#allocation2 + $0x3c] sm:$0xff]   ;;  %19789 = vst [vmem:[#allocation26_spill] sm:$0xff] %v17429_v39 }
 0x1c8   : > { %14613 = vmatpush3.bf16.msra.mxu0 %v17292_v24  ;;  %14584 = vmatprep.mubr.bf16.mxu0 %v15853_v27  ;;  %v17418_v24 = vrot.slane %v3147_v45, 4  ;;  %v15861_v27 = vld [vmem:[#allocation7 + $0x118] sm:$0xff]   ;;  %v3198_v45 = vshll.u32 %v2931_v2, 16  ;;  %v15870_v2 = vld [vmem:[#allocation7 + $0x130] sm:$0xff]  }
 0x1c9   : > { %14614 = vmatprep.subr.bf16.mxu0 %v15855_v61 }
 0x1ca   : > { %19786 = vst [vmem:[#allocation23_spill] sm:$0xff] %v17418_v24  ;;  %v2933_v24 = vld [vmem:[#allocation2 + $0x90] sm:$0xf]  ;;  %v17447_v22 = vrot.slane %v3198_v45, 5  ;;  %v3771_v45 = vrot.slane %v3769_v31, 4 }
 0x1cc   : > { %14615 = vmatpush3.bf16.msra.mxu0 %v15855_v61  ;;  %v3755_v61 = vrot.slane %v17323_v9, 5 }
 0x1cd   : > { %14616 = vmatprep.subr.bf16.mxu0 %v15858_v48 }
 0x1ce   : > { %v3757_v39 = vrot.slane %v3755_v61, 4 }
 0x1cf   : > { %14585 = vmatmul.mubr.bf16.gmra.mrb[4].mxu0 %v15854_v51  ;;  %v3191_v51 = vrot.slane %v3189_v38, 4  ;;  %v3204_v38 = vrot.slane %v3202_v10, 4  ;;  %v15873_v10 = vld [vmem:[#allocation7 + $0x138] sm:$0xff]  }
 0x1d0   : > { %14588 = vmatprep.mubr.bf16.mxu0 %v15856_v55  ;;  %14617 = vmatpush3.bf16.msra.mxu0 %v15858_v48  ;;  %v17437_v48 = vsel %vm17103_vm14, %v13406_v60, %v3755_v61  ;;  %v17439_v55 = vld [vmem:[#allocation2 + $0x94] sm:$0xf]  ;;  %v17443_v9 = vsel %vm17103_vm14, %v3757_v39, %v3758_v0  ;;  %v3213_v60 = vshrl.u32 %v2933_v24, 16  ;;  %v3661_v61 = vld [vmem:[#allocation2 + $0x60] sm:$0xe]  ;;  %v3772_v39 = vrot.slane %v17379_v42, 5 }
 0x1d1   : > { %14618 = vmatprep.subr.bf16.mxu0 %v15861_v27  ;;  %19791 = vst [vmem:[#allocation28_spill] sm:$0xff] %v17437_v48  ;;  %19792 = vst [vmem:[#allocation29_spill] sm:$0xff] %v17443_v9  ;;  %v15860_v0 = vld [vmem:[#allocation2 + $0x60] sm:$0xff]   ;;  %v3222_v46 = vshll.u32 %v17439_v55, 16  ;;  %v15862_v9 = vld [vmem:[#allocation2 + $0x6c] sm:$0xff]   ;;  %v3226_v37 = vshrl.u32 %v17439_v55, 16 }
 0x1d2   : > { %v17460_v36 = vsel %vm17103_vm14, %v3771_v45, %v3772_v39  ;;  %v3783_v45 = vrot.slane %v17401_v52, 5  ;;  %v15863_v42 = vld [vmem:[#allocation2 + $0x78] sm:$0xff]  }
 0x1d3   : > { %19794 = vst [vmem:[#allocation31_spill] sm:$0xff] %v17460_v36  ;;  %v17472_v39 = vrot.slane %v3222_v46, 5 }
 0x1d4   : > { %14619 = vmatpush3.bf16.msra.mxu0 %v15861_v27  ;;  %v3216_v27 = vshll.u32 %v2933_v24, 16  ;;  %v3785_v48 = vrot.slane %v3783_v45, 4 }
 0x1d5   : > { %14620 = vmatprep.subr.bf16.mxu0 %v15864_v41  ;;  %19797 = vst [vmem:[#allocation34_spill] sm:$0xff] %v17472_v39 }
 0x1d7   : > { %14589 = vmatmul.mubr.bf16.gmra.mrb[8].mxu0 %v15857_v4  ;;  %v13408_v4 = vrot.slane %v3661_v61, 9  ;;  %v17466_v61 = vrot.slane %v3181_v35, 4  ;;  %v3228_v35 = vrot.slane %v3226_v37, 4 }
 0x1d8   : > { %14592 = vmatprep.mubr.bf16.mxu0 %v15859_v33  ;;  %14621 = vmatpush3.bf16.msra.mxu0 %v15864_v41  ;;  %v3195_v41 = vor.u32 %v3194_v17, %v3191_v51  ;;  %v17464_v33 = vld [vmem:[#allocation7 + $0x140] sm:$0xff]   ;;  %v17470_v51 = vrot.slane %v3208_v44, 5  ;;  %v3215_v17 = vrot.slane %v3213_v60, 4  ;;  %v2936_v44 = vld [vmem:[#allocation2 + $0x9c] sm:$0xf]  ;;  %v3205_v60 = vor.u32 %v3204_v38, %v17447_v22 }
 0x1d9   : > { %14622 = vmatprep.subr.bf16.mxu0 %v15867_v14  ;;  %v17456_v24 = vsel %vm17103_vm14, %v13408_v4, %v3769_v31  ;;  %v2935_v31 = vld [vmem:[#allocation2 + $0x98] sm:$0x1]  ;;  %v3663_v4 = vld [vmem:[#allocation2 + $0x78] sm:$0xe] }
 0x1da   : > { %19793 = vst [vmem:[#allocation30_spill] sm:$0xff] %v17456_v24  ;;  %v17468_v29 = vrot.slane %v3195_v41, 4  ;;  %19796 = vst [vmem:[#allocation33_spill] sm:$0xff] %v17470_v51  ;;  %v13410_v36 = vrot.slane %v3663_v4, 9  ;;  %v15865_v41 = vld [vmem:[#allocation2 + $0x84] sm:$0xff]   ;;  %v3232_v24 = vshll.u32 %v2935_v31, 16 }
 0x1db   : > { %v17489_v38 = vrot.slane %v3205_v60, 4  ;;  %v3240_v4 = vshll.u32 %v2936_v44, 16  ;;  %v17506_v60 = vld [vmem:[#allocation2 + $0xac] sm:$0xf] }
 0x1dc   : > { %14623 = vmatpush3.bf16.msra.mxu0 %v15867_v14  ;;  %19795 = vst [vmem:[#allocation32_spill] sm:$0xff] %v17468_v29  ;;  %v3218_v14 = vrot.slane %v3216_v27, 5  ;;  %v17479_v46 = vsel %vm17103_vm14, %v13410_v36, %v3783_v45  ;;  %v3229_v27 = vor.u32 %v3228_v35, %v17472_v39  ;;  %v17491_v37 = vrot.slane %v3232_v24, 5  ;;  %v15871_v29 = vld [vmem:[#allocation2 + $0xb4] sm:$0xff]  }
 0x1dd   : > { %14624 = vmatprep.subr.bf16.mxu0 %v15870_v2  ;;  %19798 = vst [vmem:[#allocation35_spill] sm:$0xff] %v17479_v46  ;;  %19800 = vst [vmem:[#allocation37_spill] sm:$0xff] %v17489_v38  ;;  %v3237_v36 = vshrl.u32 %v2936_v44, 16  ;;  %v3800_v45 = vrot.slane %v2935_v31, 5  ;;  %v2938_v44 = vld [vmem:[#allocation2 + $0xa4] sm:$0x1] }
 0x1de   : > { %19801 = vst [vmem:[#allocation38_spill] sm:$0xff] %v17491_v37  ;;  %v17496_v35 = vrot.slane %v3229_v27, 4  ;;  %v3242_v27 = vrot.slane %v3240_v4, 5  ;;  %v3667_v37 = vld [vmem:[#allocation2 + $0xa8] sm:$0xe] }
 0x1df   : > { %14593 = vmatmul.mubr.bf16.gmra.mrb[12].mxu0 %v15860_v0  ;;  %v3786_v0 = vrot.slane %v17413_v47, 5  ;;  %v13414_v38 = vrot.slane %v3667_v37, 9  ;;  %v2939_v37 = vld [vmem:[#allocation2 + $0xa8] sm:$0xf] }
 0x1e0   : > { %14596 = vmatprep.mubr.bf16.mxu0 %v15862_v9  ;;  %14625 = vmatpush3.bf16.msra.mxu0 %v15870_v2  ;;  %v2937_v9 = vld [vmem:[#allocation2 + $0xa0] sm:$0xf]  ;;  %v3219_v2 = vor.u32 %v3218_v14, %v3215_v17  ;;  %v3797_v14 = vrot.slane %v17439_v55, 5  ;;  %19803 = vst [vmem:[#allocation40_spill] sm:$0xff] %v17496_v35  ;;  %v17508_v55 = vld [vmem:[#allocation2 + $0xb0] sm:$0x1] }
 0x1e1   : > { %14626 = vmatprep.subr.bf16.mxu0 %v15873_v10  ;;  %v17483_v52 = vsel %vm17103_vm14, %v3785_v48, %v3786_v0  ;;  %v3246_v17 = vshll.u32 %v2937_v9, 16  ;;  %v3665_v48 = vld [vmem:[#allocation2 + $0x90] sm:$0xe]  ;;  %v3250_v51 = vshrl.u32 %v2937_v9, 16  ;;  %v3804_v46 = vrot.slane %v2937_v9, 5 }
 0x1e2   : > { %19799 = vst [vmem:[#allocation36_spill] sm:$0xff] %v17483_v52  ;;  %v15866_v0 = vld [vmem:[#allocation2 + $0x90] sm:$0xff]   ;;  %v13412_v47 = vrot.slane %v3665_v48, 9  ;;  %v15868_v52 = vld [vmem:[#allocation2 + $0x9c] sm:$0xff]   ;;  %v3807_v35 = vrot.slane %v2938_v44, 5 }
 0x1e3   : > { %v3666_v48 = vld [vmem:[#allocation2 + $0x9c] sm:$0xe]  ;;  %v3806_v39 = vrot.slane %v3804_v46, 4  ;;  %v3252_v31 = vrot.slane %v3250_v51, 4  ;;  %v3256_v51 = vshll.u32 %v2938_v44, 16  ;;  %v3261_v44 = vshrl.u32 %v2939_v37, 16 }
 0x1e4   : > { %14627 = vmatpush3.bf16.msra.mxu0 %v15873_v10  ;;  %v17493_v10 = vrot.slane %v3219_v2, 4  ;;  %v17500_v24 = vsel %vm17103_vm14, %v13412_v47, %v3797_v14  ;;  %v3239_v2 = vrot.slane %v3237_v36, 4  ;;  %v17512_v47 = vrot.slane %v3246_v17, 5  ;;  %v17528_v17 = vld [vmem:[#allocation2 + $0xb8] sm:$0xf] }
 0x1e5   : > { %14660 = vmatprep.subr.bf16.mxu0 %v17464_v33  ;;  %19804 = vst [vmem:[#allocation41_spill] sm:$0xff] %v17500_v24 }
 0x1e6   : > { %19802 = vst [vmem:[#allocation39_spill] sm:$0xff] %v17493_v10  ;;  %v15869_v10 = vld [vmem:[#allocation2 + $0xa8] sm:$0xff]   ;;  %v3243_v24 = vor.u32 %v3242_v27, %v3239_v2  ;;  %v17578_v27 = vrot.slane %v3256_v51, 5  ;;  %v3019_v51 = vsel %vm16748_vm11, %v17342_v25, %v17344_v12 }
 0x1e7   : > { %14597 = vmatmul.mubr.bf16.gmra.mrb[16].mxu0 %v15863_v42  ;;  %v3799_v42 = vrot.slane %v3797_v14, 4  ;;  %v13413_v14 = vrot.slane %v3666_v48, 9  ;;  %v17538_v48 = vld [vmem:[#allocation2 + $0xc4] sm:$0xf] }
 0x1e8   : > { %14600 = vmatprep.mubr.bf16.mxu0 %v15865_v41  ;;  %v17576_v2 = vrot.slane %v3243_v24, 4  ;;  %v3274_v24 = vshrl.u32 %v17506_v60, 16 }
 0x1e9   : > { %v17504_v41 = vsel %vm17103_vm14, %v3799_v42, %v3800_v45  ;;  %v3811_v45 = vrot.slane %v17506_v60, 5  ;;  %v3814_v42 = vrot.slane %v17508_v55, 5  ;;  %v17518_v36 = vsel %vm17103_vm14, %v13413_v14, %v3804_v46 }
 0x1ea   : > { %19805 = vst [vmem:[#allocation42_spill] sm:$0xff] %v17504_v41  ;;  %19806 = vst [vmem:[#allocation43_spill] sm:$0xff] %v17518_v36  ;;  %v3818_v14 = vrot.slane %v17528_v17, 5  ;;  %v3669_v36 = vld [vmem:[#allocation2 + $0xc0] sm:$0xe] }
 0x1eb   : > { %v3813_v9 = vrot.slane %v3811_v45, 4  ;;  %v17526_v4 = vsel %vm17103_vm14, %v13414_v38, %v3811_v45  ;;  %v17542_v38 = vld [vmem:[#allocation2 + $0xc8] sm:$0x1]  ;;  %v15872_v41 = vld [vmem:[#allocation2 + $0xc0] sm:$0xff]  }
 0x1ec   : > { %19808 = vst [vmem:[#allocation45_spill] sm:$0xff] %v17526_v4  ;;  %19810 = vst [vmem:[#allocation47_spill] sm:$0xff] %v17542_v38 }
 0x1ed   : > { %v17536_v46 = vsel %vm17103_vm14, %v3813_v9, %v3814_v42  ;;  %v3825_v42 = vrot.slane %v17538_v48, 5  ;;  %v3828_v9 = vrot.slane %v17542_v38, 5 }
 0x1ee   : > { %19809 = vst [vmem:[#allocation46_spill] sm:$0xff] %v17536_v46  ;;  %v3820_v46 = vrot.slane %v3818_v14, 4 }
 0x1ef   : > { %14601 = vmatmul.mubr.bf16.gmra.mrb[20].mxu0 %v15866_v0  ;;  %v17530_v0 = vld [vmem:[#allocation2 + $0xbc] sm:$0x1]  ;;  %v3827_v4 = vrot.slane %v3825_v42, 4 }
 0x1f0   : > { %14604 = vmatprep.mubr.bf16.mxu0 %v15868_v52  ;;  %v17522_v52 = vsel %vm17103_vm14, %v3806_v39, %v3807_v35  ;;  %v3668_v35 = vld [vmem:[#allocation2 + $0xb4] sm:$0xe]  ;;  %v3821_v45 = vrot.slane %v17530_v0, 5  ;;  %v2971_v39 = vsel %vm16748_vm11, %v17303_v20, %v17296_v1 }
 0x1f1   : > { %19807 = vst [vmem:[#allocation44_spill] sm:$0xff] %v17522_v52  ;;  %v13415_v52 = vrot.slane %v3668_v35, 9  ;;  %v17572_v20 = vsel %vm17103_vm14, %v3827_v4, %v3828_v9  ;;  %v2995_v4 = vsel %vm16748_vm11, %v17334_v40, %v17318_v58  ;;  %v3033_v58 = vsel %vm16748_vm11, %v17346_v43, %v17313_v6  ;;  %v15876_v40 = vld [vmem:[#allocation7 + $0x150] sm:$0xff]  }
 0x1f2   : > { %v17562_v38 = vsel %vm17103_vm14, %v3820_v46, %v3821_v45  ;;  %v3270_v46 = vshll.u32 %v17506_v60, 16  ;;  %v2942_v45 = vld [vmem:[#allocation2 + $0xb4] sm:$0xf]  ;;  %v3276_v60 = vrot.slane %v3274_v24, 4  ;;  %v3057_v6 = vsel %vm16748_vm11, %v17352_v56, %v17316_v57  ;;  %v19811_v56 = vld [vmem:[#allocation21_spill] sm:$0xff] }
 0x1f3   : > { %v17558_v35 = vsel %vm17103_vm14, %v13415_v52, %v3818_v14  ;;  %v3264_v52 = vshll.u32 %v2939_v37, 16  ;;  %v3263_v14 = vrot.slane %v3261_v44, 4  ;;  %v3285_v9 = vshrl.u32 %v2942_v45, 16  ;;  %v2945_v24 = vld [vmem:[#allocation2 + $0xc0] sm:$0xf] }
 0x1f4   : > { %v13431_v1 = vcombine.low %v17558_v35, %v17562_v38  ;;  %v17610_v12 = vrot.slane %v3270_v46, 5  ;;  %v3067_v43 = vsel %vm16748_vm11, %v17354_v8, %v17356_v54  ;;  %v3081_v57 = vsel %vm16748_vm11, %v17372_v26, %v17358_v28  ;;  %v15894_v38 = vld [vmem:[#allocation2 + $0x3c] sm:$0xff]   ;;  %v15896_v35 = vld [vmem:[#allocation2 + $0x48] sm:$0xff]  }
 0x1f5   : > { %v3266_v25 = vrot.slane %v3264_v52, 5  ;;  %v3287_v44 = vrot.slane %v3285_v9, 4  ;;  %v3294_v52 = vshll.u32 %v17528_v17, 16  ;;  %v3091_v8 = vsel %vm16748_vm11, %v19811_v56, %v17360_v30 }
 0x1f6   : > { %v3298_v46 = vshrl.u32 %v17528_v17, 16  ;;  %v13382_v26 = vcombine.low %v3081_v57, %v3091_v8  ;;  %v3277_v30 = vor.u32 %v3276_v60, %v17610_v12  ;;  %v3318_v9 = vshll.u32 %v17538_v48, 16 }
 0x1f7   : > { %14605 = vmatmul.mubr.bf16.gmra.mrb[24].mxu0 %v15869_v10  ;;  %v2961_v10 = vsel %vm16748_vm11, %v17298_v15, %v17290_v7 }
 0x1f8   : > { %14608 = vmatprep.mubr.bf16.mxu0 %v15871_v29  ;;  %v13416_v29 = vrot.slane %v3669_v36, 9  ;;  %v13377_v15 = vcombine.low %v2961_v10, %v2971_v39  ;;  %v2985_v39 = vsel %vm16748_vm11, %v17320_v63, %v17300_v23  ;;  %v15875_v23 = vld [vmem:[#allocation7 + $0x148] sm:$0xff]   ;;  %v3253_v63 = vor.u32 %v3252_v31, %v17512_v47 }
 0x1f9   : > { %v13378_v37 = vcombine.low %v2985_v39, %v2995_v4  ;;  %v3280_v31 = vshll.u32 %v17508_v55, 16  ;;  %v3267_v10 = vor.u32 %v3266_v25, %v3263_v14  ;;  %v15878_v55 = vld [vmem:[#allocation7 + $0x160] sm:$0xff]   ;;  %v3105_v39 = vsel %vm16748_vm11, %v17405_v53, %v17377_v19  ;;  %v15879_v14 = vld [vmem:[#allocation7 + $0x168] sm:$0xff]   ;;  %v15881_v25 = vld [vmem:[#allocation7 + $0x178] sm:$0xff]  }
 0x1fa   : > { %v17566_v7 = vsel %vm17103_vm14, %v13416_v29, %v3825_v42  ;;  %v19812_v4 = vld [vmem:[#allocation22_spill] sm:$0xff]  ;;  %v17644_v17 = vrot.slane %v3277_v30, 4  ;;  %v17646_v19 = vrot.slane %v3294_v52, 5  ;;  %v3304_v53 = vshll.u32 %v17530_v0, 16  ;;  %v19814_v0 = vld [vmem:[#allocation24_spill] sm:$0xff] }
 0x1fb   : > { %v13432_v36 = vcombine.low %v17566_v7, %v17572_v20  ;;  %v17621_v29 = vrot.slane %v3280_v31, 5  ;;  %v17632_v54 = vrot.slane %v3267_v10, 4  ;;  %v3115_v28 = vsel %vm16748_vm11, %v17407_v18, %v19812_v4  ;;  %v19818_v10 = vld [vmem:[#allocation32_spill] sm:$0xff]  ;;  %v5298_v7 = vld [vmem:[#allocation2 + $0x54] sm:$0xe] }
 0x1fc   : > { %v3129_v18 = vsel %vm16748_vm11, %v17409_v49, %v17390_v21  ;;  %v3312_v31 = vshll.u32 %v2945_v24, 16  ;;  %v3320_v8 = vrot.slane %v3318_v9, 5  ;;  %v390_v9 = vld [vmem:[#allocation2 + $0xcc] sm:$0x1] }
 0x1fe   : > { %v3314_v56 = vrot.slane %v3312_v31, 5 }
 0x1ff   : > { %14609 = vmatmul.mubr.bf16.gmra.mrb[28].mxu0 %v15872_v41  ;;  %v3009_v41 = vsel %vm16748_vm11, %v17340_v16, %v17311_v59  ;;  %v3043_v59 = vsel %vm16748_vm11, %v17348_v13, %v17350_v11  ;;  %v17607_v16 = vrot.slane %v3253_v63, 4  ;;  %v15877_v11 = vld [vmem:[#allocation7 + $0x158] sm:$0xff]   ;;  %v3300_v63 = vrot.slane %v3298_v46, 4 }
 0x200   : > { %14628 = vmatprep.mubr.bf16.mxu0 %v13377_v15  ;;  %v13379_v42 = vcombine.low %v3009_v41, %v3019_v51  ;;  %v13380_v13 = vcombine.low %v3033_v58, %v3043_v59  ;;  %v3288_v15 = vshll.u32 %v2942_v45, 16  ;;  %v13383_v41 = vcombine.low %v3105_v39, %v3115_v28  ;;  %v15880_v51 = vld [vmem:[#allocation7 + $0x170] sm:$0xff]   ;;  %v19815_v59 = vld [vmem:[#allocation25_spill] sm:$0xff]  ;;  %v19822_v39 = vld [vmem:[#allocation39_spill] sm:$0xff] }
 0x201   : > { %v3309_v45 = vshrl.u32 %v2945_v24, 16  ;;  %v19823_v28 = vld [vmem:[#allocation38_spill] sm:$0xff]  ;;  %v19825_v24 = vld [vmem:[#allocation47_spill] sm:$0xff] }
 0x207   : > { %14629 = vmatmul.mubr.bf16.vlgmr.msra.gmra.mrb[0].mxu0 %v13378_v37  ;;  %v3290_v37 = vrot.slane %v3288_v15, 5  ;;  %v19820_v15 = vld [vmem:[#allocation37_spill] sm:$0xff] }
 0x208   : > { %14661 = vmatpush3.bf16.msra.mxu0 %v17464_v33  ;;  %14632 = vmatprep.mubr.bf16.mxu0 %v13379_v42  ;;  %v13381_v33 = vcombine.low %v3057_v6, %v3067_v43  ;;  %v19813_v42 = vld [vmem:[#allocation23_spill] sm:$0xff] }
 0x209   : > { %14662 = vmatprep.subr.bf16.mxu0 %v15875_v23  ;;  %v3153_v58 = vsel %vm16748_vm11, %v19813_v42, %v17393_v34  ;;  %v3291_v49 = vor.u32 %v3290_v37, %v3287_v44  ;;  %v19816_v34 = vld [vmem:[#allocation26_spill] sm:$0xff]  ;;  %v19817_v43 = vld [vmem:[#allocation27_spill] sm:$0xff]  ;;  %v19819_v44 = vld [vmem:[#allocation33_spill] sm:$0xff]  ;;  %v3259_v37 = vsel %vm16748_vm11, %v17607_v16, %v17578_v27 }
 0x20a   : > { %v3177_v6 = vsel %vm16748_vm11, %v19816_v34, %v17425_v5  ;;  %v3211_v5 = vsel %vm16748_vm11, %v19820_v15, %v19819_v44 }
 0x20c   : > { %14663 = vmatpush3.bf16.msra.mxu0 %v15875_v23  ;;  %v3139_v23 = vsel %vm16748_vm11, %v17415_v32, %v17411_v62  ;;  %v3292_v62 = vrot.slane %v3291_v49, 4  ;;  %v3306_v32 = vrot.slane %v3304_v53, 5  ;;  %v3654_v53 = vld [vmem:[#allocation2 + $0xc] sm:$0xe] }
 0x20d   : > { %14664 = vmatprep.subr.bf16.mxu0 %v15876_v40  ;;  %v13384_v21 = vcombine.low %v3129_v18, %v3139_v23 }
 0x20e   : > { %v3297_v49 = vsel %vm16748_vm11, %v3292_v62, %v17646_v19 }
 0x20f   : > { %14633 = vmatmul.mubr.bf16.gmra.mrb[4].mxu0 %v13380_v13  ;;  %v3187_v13 = vsel %vm16748_vm11, %v17466_v61, %v19817_v43  ;;  %v3301_v61 = vor.u32 %v3300_v63, %v17646_v19  ;;  %v3655_v43 = vld [vmem:[#allocation2 + $0x18] sm:$0xe] }
 0x210   : > { %14636 = vmatprep.mubr.bf16.mxu0 %v13381_v33  ;;  %14665 = vmatpush3.bf16.msra.mxu0 %v15876_v40  ;;  %v3163_v40 = vsel %vm16748_vm11, %v19815_v59, %v19814_v0  ;;  %v17675_v33 = vld [vmem:[#allocation7 + $0x180] sm:$0xff]   ;;  %v13386_v52 = vcombine.low %v3177_v6, %v3187_v13  ;;  %v16125_v0 = vld [vmem:[#allocation2 + $0x10] sm:$0xf]  ;;  %v13402_v15 = vrot.slane %v3655_v43, 9 }
 0x211   : > { %14666 = vmatprep.subr.bf16.mxu0 %v15877_v11  ;;  %v13385_v60 = vcombine.low %v3153_v58, %v3163_v40  ;;  %v3302_v30 = vrot.slane %v3301_v61, 4  ;;  %v13401_v58 = vrot.slane %v3654_v53, 9  ;;  %v3720_v59 = vrot.slane %v16125_v0, 5  ;;  %v16126_v40 = vld [vmem:[#allocation2 + $0x14] sm:$0x1] }
 0x212   : > { %v16128_v13 = vld [vmem:[#allocation2 + $0x28] sm:$0xf]  ;;  %v16134_v0 = vld [vmem:[#allocation2 + $0x44] sm:$0x1]  ;;  %v3662_v43 = vld [vmem:[#allocation2 + $0x6c] sm:$0xe] }
 0x213   : > { %v3722_v34 = vrot.slane %v3720_v59, 4  ;;  %v3721_v62 = vsel %vm17103_vm14, %v13401_v58, %v3720_v59  ;;  %v3751_v59 = vrot.slane %v16134_v0, 5  ;;  %v19837_v0 = vld [vmem:[#allocation42_spill] sm:$0xff] }
 0x214   : > { %14667 = vmatpush3.bf16.msra.mxu0 %v15877_v11  ;;  %v3322_v11 = vshrl.u32 %v17538_v48, 16  ;;  %v3311_v48 = vrot.slane %v3309_v45, 4 }
 0x215   : > { %14668 = vmatprep.subr.bf16.mxu0 %v15878_v55 }
 0x216   : > { %v3324_v46 = vrot.slane %v3322_v11, 4  ;;  %v3315_v23 = vor.u32 %v3314_v56, %v3311_v48  ;;  %v3734_v11 = vrot.slane %v16128_v13, 5  ;;  %v16130_v56 = vld [vmem:[#allocation2 + $0x2c] sm:$0x1] }
 0x217   : > { %14637 = vmatmul.mubr.bf16.gmra.mrb[8].mxu0 %v13382_v26  ;;  %v19824_v26 = vld [vmem:[#allocation40_spill] sm:$0xff] }
 0x218   : > { %14640 = vmatprep.mubr.bf16.mxu0 %v13383_v41  ;;  %14669 = vmatpush3.bf16.msra.mxu0 %v15878_v55  ;;  %v3201_v55 = vsel %vm16748_vm11, %v19818_v10, %v17447_v22  ;;  %v19821_v22 = vld [vmem:[#allocation34_spill] sm:$0xff]  ;;  %v3328_v41 = vshll.u32 %v19825_v24, 16  ;;  %v3325_v45 = vor.u32 %v3324_v46, %v3320_v8  ;;  %v3316_v42 = vrot.slane %v3315_v23, 4  ;;  %v3656_v10 = vld [vmem:[#allocation2 + $0x24] sm:$0xe] }
 0x219   : > { %14670 = vmatprep.subr.bf16.mxu0 %v15879_v14  ;;  %v13387_v57 = vcombine.low %v3201_v55, %v3211_v5  ;;  %v3225_v4 = vsel %vm16748_vm11, %v19822_v39, %v19821_v22  ;;  %v13403_v61 = vrot.slane %v3656_v10, 9  ;;  %v3736_v48 = vrot.slane %v3734_v11, 4  ;;  %v16131_v39 = vld [vmem:[#allocation2 + $0x34] sm:$0xf]  ;;  %v16133_v23 = vld [vmem:[#allocation2 + $0x38] sm:$0x1] }
 0x21a   : > { %v3326_v27 = vrot.slane %v3325_v45, 4  ;;  %v3330_v16 = vrot.slane %v3328_v41, 5  ;;  %v3658_v41 = vld [vmem:[#allocation2 + $0x3c] sm:$0xe]  ;;  %v15883_v45 = vld [vmem:[#allocation7 + $0x188] sm:$0xff]  }
 0x21c   : > { %14671 = vmatpush3.bf16.msra.mxu0 %v15879_v14  ;;  %v3235_v14 = vsel %vm16748_vm11, %v19824_v26, %v19823_v28  ;;  %v3331_v19 = vsel %vm16748_vm11, %v3326_v27, %v3330_v16  ;;  %v3735_v28 = vsel %vm17103_vm14, %v13403_v61, %v3734_v11  ;;  %v15884_v27 = vld [vmem:[#allocation7 + $0x190] sm:$0xff]   ;;  %v13409_v11 = vrot.slane %v3662_v43, 9 }
 0x21d   : > { %14672 = vmatprep.subr.bf16.mxu0 %v15880_v51  ;;  %v13388_v18 = vcombine.low %v3225_v4, %v3235_v14  ;;  %v3741_v4 = vrot.slane %v16131_v39, 5  ;;  %v3657_v14 = vld [vmem:[#allocation2 + $0x30] sm:$0xe]  ;;  %v16135_v16 = vld [vmem:[#allocation2 + $0x58] sm:$0xf] }
 0x21e   : > { %v13404_v53 = vrot.slane %v3657_v14, 9 }
 0x21f   : > { %14641 = vmatmul.mubr.bf16.gmra.mrb[12].mxu0 %v13384_v21  ;;  %v3723_v21 = vrot.slane %v16126_v40, 5 }
 0x220   : > { %14644 = vmatprep.mubr.bf16.mxu0 %v13385_v60  ;;  %14673 = vmatpush3.bf16.msra.mxu0 %v15880_v51  ;;  %v3249_v51 = vsel %vm16748_vm11, %v17576_v2, %v17512_v47  ;;  %v3273_v47 = vsel %vm16748_vm11, %v17632_v54, %v17610_v12  ;;  %v3283_v2 = vsel %vm16748_vm11, %v17644_v17, %v17621_v29  ;;  %v391_v12 = vsel %vm16697_vm3, 0, %v390_v9  ;;  %v16127_v54 = vld [vmem:[#allocation2 + $0x1c] sm:$0xf] }
 0x221   : > { %14674 = vmatprep.subr.bf16.mxu0 %v15881_v25  ;;  %v13389_v63 = vcombine.low %v3249_v51, %v3259_v37  ;;  %v13390_v60 = vcombine.low %v3273_v47, %v3283_v2  ;;  %392 = vst [vmem:[#allocation2 + $0xcc] sm:$0x1] %v391_v12  ;;  %v3727_v29 = vrot.slane %v16127_v54, 5  ;;  %v3321_v17 = vsel %vm16748_vm11, %v3316_v42, %v3320_v8  ;;  %v15885_v54 = vld [vmem:[#allocation7 + $0x198] sm:$0xff]  }
 0x222   : > { %v13392_v55 = vcombine.low %v3321_v17, %v3331_v19  ;;  %v3737_v8 = vrot.slane %v16130_v56, 5  ;;  %v13405_v42 = vrot.slane %v3658_v41, 9  ;;  %v3742_v40 = vsel %vm17103_vm14, %v13404_v53, %v3741_v4  ;;  %v16137_v19 = vld [vmem:[#allocation2 + $0x70] sm:$0xf]  ;;  %v16139_v56 = vld [vmem:[#allocation2 + $0x88] sm:$0xf] }
 0x223   : > { %v3729_v5 = vrot.slane %v3727_v29, 4  ;;  %v3728_v46 = vsel %vm17103_vm14, %v13402_v15, %v3727_v29  ;;  %v15887_v15 = vld [vmem:[#allocation7 + $0x1a8] sm:$0xff]  }
 0x224   : > { %14675 = vmatpush3.bf16.msra.mxu0 %v15881_v25  ;;  %v3307_v25 = vsel %vm16748_vm11, %v3302_v30, %v3306_v32  ;;  %v3724_v32 = vsel %vm17103_vm14, %v3722_v34, %v3723_v21  ;;  %v3738_v26 = vsel %vm17103_vm14, %v3736_v48, %v3737_v8  ;;  %v16132_v30 = vld [vmem:[#allocation2 + $0x40] sm:$0xf]  ;;  %v16136_v34 = vld [vmem:[#allocation2 + $0x5c] sm:$0x1]  ;;  %v3790_v8 = vrot.slane %v16139_v56, 5  ;;  %v19831_v41 = vld [vmem:[#allocation31_spill] sm:$0xff] }
 0x225   : > { %14708 = vmatprep.subr.bf16.mxu0 %v17675_v33  ;;  %v13391_v31 = vcombine.low %v3297_v49, %v3307_v25  ;;  %v13417_v44 = vcombine.low %v3721_v62, %v3724_v32  ;;  %v3748_v24 = vrot.slane %v16132_v30, 5  ;;  %v13419_v37 = vcombine.low %v3735_v28, %v3738_v26  ;;  %v3660_v25 = vld [vmem:[#allocation2 + $0x54] sm:$0xe]  ;;  %v15886_v32 = vld [vmem:[#allocation7 + $0x1a0] sm:$0xff]   ;;  %v15889_v30 = vld [vmem:[#allocation7 + $0x1b8] sm:$0xff]  }
 0x226   : > { %v3762_v49 = vrot.slane %v16135_v16, 5  ;;  %v3765_v12 = vrot.slane %v16136_v34, 5  ;;  %v3776_v62 = vrot.slane %v16137_v19, 5  ;;  %v3792_v28 = vrot.slane %v3790_v8, 4  ;;  %v16140_v26 = vld [vmem:[#allocation2 + $0x8c] sm:$0x1] }
 0x227   : > { %14645 = vmatmul.mubr.bf16.gmra.mrb[16].mxu0 %v13386_v52  ;;  %v16129_v52 = vld [vmem:[#allocation2 + $0x20] sm:$0x1]  ;;  %v3750_v58 = vrot.slane %v3748_v24, 4  ;;  %v3749_v47 = vsel %vm17103_vm14, %v13405_v42, %v3748_v24  ;;  %v3793_v14 = vrot.slane %v16140_v26, 5  ;;  %v19830_v24 = vld [vmem:[#allocation30_spill] sm:$0xff]  ;;  %v15895_v34 = vld [vmem:[#allocation7 + $0x1c8] sm:$0xff]  }
 0x228   : > { %14648 = vmatprep.mubr.bf16.mxu0 %v13387_v57  ;;  %v3730_v57 = vrot.slane %v16129_v52, 5  ;;  %v3764_v9 = vrot.slane %v3762_v49, 4  ;;  %v3778_v10 = vrot.slane %v3776_v62, 4  ;;  %v19828_v52 = vld [vmem:[#allocation29_spill] sm:$0xff]  ;;  %v3777_v61 = vsel %vm17103_vm14, %v13409_v11, %v3776_v62 }
 0x229   : > { %v3752_v2 = vsel %vm17103_vm14, %v3750_v58, %v3751_v59  ;;  %v3794_v53 = vsel %vm17103_vm14, %v3792_v28, %v3793_v14  ;;  %v19836_v58 = vld [vmem:[#allocation41_spill] sm:$0xff]  ;;  %v13494_v19 = vrot.slane %v5298_v7, 9  ;;  %v4548_v7 = vld [vmem:[#allocation2 + $0x3c] sm:$0xf] }
 0x22a   : > { %v3731_v22 = vsel %vm17103_vm14, %v3729_v5, %v3730_v57  ;;  %v3766_v17 = vsel %vm17103_vm14, %v3764_v9, %v3765_v12  ;;  %v19827_v5 = vld [vmem:[#allocation28_spill] sm:$0xff]  ;;  %v19838_v59 = vcombine.low %v19836_v58, %v19837_v0  ;;  %v15893_v9 = vld [vmem:[#allocation2 + $0x30] sm:$0xff]   ;;  %v4542_v14 = vld [vmem:[#allocation2 + $0x24] sm:$0xf] }
 0x22b   : > { %v13418_v51 = vcombine.low %v3728_v46, %v3731_v22  ;;  %v19829_v57 = vcombine.low %v19827_v5, %v19828_v52  ;;  %v15888_v46 = vld [vmem:[#allocation7 + $0x1b0] sm:$0xff]   ;;  %v3664_v22 = vld [vmem:[#allocation2 + $0x84] sm:$0xe]  ;;  %v5300_v5 = vld [vmem:[#allocation2 + $0x6c] sm:$0xe] }
 0x22c   : > { %v15898_v12 = vld [vmem:[#allocation7 + $0x1d0] sm:$0xff]   ;;  %v13496_v56 = vrot.slane %v5300_v5, 9  ;;  %v5302_v0 = vld [vmem:[#allocation2 + $0x84] sm:$0xe] }
 0x22f   : > { %14649 = vmatmul.mubr.bf16.gmra.mrb[20].mxu0 %v13388_v18  ;;  %v3743_v18 = vrot.slane %v3741_v4, 4  ;;  %v13411_v4 = vrot.slane %v3664_v22, 9  ;;  %v17804_v22 = vld [vmem:[#allocation2 + $0x1c] sm:$0xf] }
 0x230   : > { %14652 = vmatprep.mubr.bf16.mxu0 %v13389_v63  ;;  %v3744_v63 = vrot.slane %v16133_v23, 5 }
 0x232   : > { %v3745_v21 = vsel %vm17103_vm14, %v3743_v18, %v3744_v63  ;;  %v15892_v18 = vld [vmem:[#allocation7 + $0x1c0] sm:$0xff]   ;;  %v19833_v63 = vld [vmem:[#allocation35_spill] sm:$0xff] }
 0x237   : > { %14653 = vmatmul.mubr.bf16.gmra.mrb[24].mxu0 %v13390_v60  ;;  %v13420_v60 = vcombine.low %v3742_v40, %v3745_v21  ;;  %v19839_v40 = vld [vmem:[#allocation43_spill] sm:$0xff]  ;;  %v19840_v21 = vld [vmem:[#allocation44_spill] sm:$0xff] }
 0x238   : > { %14656 = vmatprep.mubr.bf16.mxu0 %v13391_v31  ;;  %v13407_v31 = vrot.slane %v3660_v25, 9 }
 0x23a   : > { %v3763_v29 = vsel %vm17103_vm14, %v13407_v31, %v3762_v49  ;;  %v446_v49 = vld [vmem:[#allocation2 + $0xd4] sm:$0x1]  ;;  %v15891_v31 = vld [vmem:[#allocation2 + $0x24] sm:$0xff]  }
 0x23b   : > { %v13423_v13 = vcombine.low %v3763_v29, %v3766_v17  ;;  %v17784_v29 = vld [vmem:[#allocation2 + $0x5c] sm:$0x1]  ;;  %v15904_v17 = vld [vmem:[#allocation7 + $0x1e0] sm:$0xff]  }
 0x23f   : > { %14657 = vmatmul.mubr.bf16.gmra.mrb[28].mxu0 %v13392_v55  ;;  %v16138_v55 = vld [vmem:[#allocation2 + $0x74] sm:$0x1] }
 0x240   : > { %14676 = vmatprep.mubr.bf16.mxu0 %v13417_v44  ;;  %v3779_v44 = vrot.slane %v16138_v55, 5  ;;  %v15909_v55 = vld [vmem:[#allocation2 + $0xb4] sm:$0xff]  }
 0x242   : > { %v3780_v48 = vsel %vm17103_vm14, %v3778_v10, %v3779_v44  ;;  %v15907_v10 = vld [vmem:[#allocation7 + $0x1e8] sm:$0xff]  }
 0x243   : > { %v13425_v39 = vcombine.low %v3777_v61, %v3780_v48  ;;  %v17798_v44 = vld [vmem:[#allocation2 + $0x70] sm:$0xf]  ;;  %v15910_v61 = vld [vmem:[#allocation7 + $0x1f0] sm:$0xff]  }
 0x244   : > { %v5408_v52 = vrot.slane %v17798_v44, 5  ;;  %v4539_v48 = vld [vmem:[#allocation2 + $0x18] sm:$0xf] }
 0x245   : > { %v4588_v28 = vshrl.u32 %v4539_v48, 16  ;;  %v4591_v26 = vshll.u32 %v4539_v48, 16 }
 0x247   : > { %14677 = vmatmul.mubr.bf16.vlgmr.msra.gmra.mrb[0].mxu0 %v13418_v51  ;;  %v19832_v51 = vcombine.low %v19830_v24, %v19831_v41  ;;  %v15913_v24 = vld [vmem:[#allocation7 + $0x1f8] sm:$0xff]   ;;  %v4593_v58 = vrot.slane %v4591_v26, 5 }
 0x248   : > { %14709 = vmatpush3.bf16.msra.mxu0 %v17675_v33  ;;  %14680 = vmatprep.mubr.bf16.mxu0 %v13419_v37  ;;  %v13421_v33 = vcombine.low %v3749_v47, %v3752_v2  ;;  %v3791_v37 = vsel %vm17103_vm14, %v13411_v4, %v3790_v8  ;;  %v19841_v47 = vcombine.low %v19839_v40, %v19840_v21  ;;  %v19842_v2 = vld [vmem:[#allocation45_spill] sm:$0xff]  ;;  %v5410_v8 = vrot.slane %v5408_v52, 4  ;;  %v15902_v4 = vld [vmem:[#allocation2 + $0x78] sm:$0xff]  }
 0x249   : > { %14710 = vmatprep.subr.bf16.mxu0 %v15883_v45  ;;  %v13427_v23 = vcombine.low %v3791_v37, %v3794_v53  ;;  %v4601_v37 = vshrl.u32 %v17804_v22, 16  ;;  %v17818_v53 = vld [vmem:[#allocation2 + $0x28] sm:$0xf] }
 0x24a   : > { %v4621_v21 = vshll.u32 %v17818_v53, 16 }
 0x24c   : > { %14711 = vmatpush3.bf16.msra.mxu0 %v15883_v45  ;;  %v19834_v45 = vld [vmem:[#allocation36_spill] sm:$0xff] }
 0x24d   : > { %14712 = vmatprep.subr.bf16.mxu0 %v15884_v27  ;;  %v19835_v42 = vcombine.low %v19833_v63, %v19834_v45  ;;  %v17820_v63 = vld [vmem:[#allocation2 + $0x88] sm:$0xf]  ;;  %v17822_v45 = vld [vmem:[#allocation2 + $0x8c] sm:$0x1] }
 0x24e   : > { %v5425_v40 = vrot.slane %v17822_v45, 5 }
 0x24f   : > { %14681 = vmatmul.mubr.bf16.gmra.mrb[4].mxu0 %v13420_v60  ;;  %v447_v60 = vsel %vm16702_vm4, 0, %v446_v49 }
 0x250   : > { %14684 = vmatprep.mubr.bf16.mxu0 %v13421_v33  ;;  %14713 = vmatpush3.bf16.msra.mxu0 %v15884_v27  ;;  %v19843_v27 = vld [vmem:[#allocation46_spill] sm:$0xff]  ;;  %448 = vst [vmem:[#allocation2 + $0xd4] sm:$0x1] %v447_v60  ;;  %v15890_v33 = vld [vmem:[#allocation2 + $0x18] sm:$0xff]   ;;  %v4603_v60 = vrot.slane %v4601_v37, 4 }
 0x251   : > { %14714 = vmatprep.subr.bf16.mxu0 %v15885_v54  ;;  %v19844_v16 = vcombine.low %v19842_v2, %v19843_v27  ;;  %v13498_v2 = vrot.slane %v5302_v0, 9  ;;  %v15903_v27 = vld [vmem:[#allocation2 + $0x84] sm:$0xff]  }
 0x254   : > { %14715 = vmatpush3.bf16.msra.mxu0 %v15885_v54  ;;  %v17782_v54 = vld [vmem:[#allocation2 + $0x58] sm:$0xf] }
 0x255   : > { %14716 = vmatprep.subr.bf16.mxu0 %v15886_v32  ;;  %v5394_v20 = vrot.slane %v17782_v54, 5 }
 0x257   : > { %14685 = vmatmul.mubr.bf16.gmra.mrb[8].mxu0 %v19829_v57  ;;  %v5396_v62 = vrot.slane %v5394_v20, 4  ;;  %v17790_v43 = vsel %vm17103_vm14, %v13494_v19, %v5394_v20  ;;  %v17846_v19 = vrot.slane %v4621_v21, 5  ;;  %v15906_v21 = vld [vmem:[#allocation2 + $0x9c] sm:$0xff]  }
 0x258   : > { %14688 = vmatprep.mubr.bf16.mxu0 %v13423_v13  ;;  %14717 = vmatpush3.bf16.msra.mxu0 %v15886_v32  ;;  %v15897_v32 = vld [vmem:[#allocation2 + $0x54] sm:$0xff]   ;;  %19846 = vst [vmem:[#allocation21_spill] sm:$0xff] %v17790_v43  ;;  %v15899_v13 = vld [vmem:[#allocation2 + $0x60] sm:$0xff]  }
 0x259   : > { %14718 = vmatprep.subr.bf16.mxu0 %v15887_v15 }
 0x25c   : > { %14719 = vmatpush3.bf16.msra.mxu0 %v15887_v15  ;;  %v17800_v15 = vld [vmem:[#allocation2 + $0x74] sm:$0x1] }
 0x25d   : > { %14720 = vmatprep.subr.bf16.mxu0 %v15888_v46  ;;  %v5411_v57 = vrot.slane %v17800_v15, 5 }
 0x25f   : > { %14689 = vmatmul.mubr.bf16.gmra.mrb[12].mxu0 %v19832_v51  ;;  %v4597_v51 = vshll.u32 %v17804_v22, 16 }
 0x260   : > { %14692 = vmatprep.mubr.bf16.mxu0 %v13425_v39  ;;  %14721 = vmatpush3.bf16.msra.mxu0 %v15888_v46  ;;  %v15900_v46 = vld [vmem:[#allocation2 + $0x6c] sm:$0xff]   ;;  %v17808_v39 = vsel %vm17103_vm14, %v13496_v56, %v5408_v52  ;;  %v4660_v56 = vshrl.u32 %v4548_v7, 16 }
 0x261   : > { %14722 = vmatprep.subr.bf16.mxu0 %v15889_v30  ;;  %19848 = vst [vmem:[#allocation23_spill] sm:$0xff] %v17808_v39  ;;  %v17831_v49 = vrot.slane %v4597_v51, 5  ;;  %v4721_v39 = vshrl.u32 %v17782_v54, 16 }
 0x264   : > { %14723 = vmatpush3.bf16.msra.mxu0 %v15889_v30  ;;  %v17812_v30 = vsel %vm17103_vm14, %v5410_v8, %v5411_v57  ;;  %v17854_v57 = vld [vmem:[#allocation2 + $0x40] sm:$0xf]  ;;  %v4663_v8 = vshll.u32 %v4548_v7, 16  ;;  %v4551_v7 = vld [vmem:[#allocation2 + $0x48] sm:$0xf] }
 0x265   : > { %14756 = vmatprep.subr.bf16.mxu0 %v15892_v18  ;;  %19849 = vst [vmem:[#allocation24_spill] sm:$0xff] %v17812_v30 }
 0x267   : > { %14693 = vmatmul.mubr.bf16.gmra.mrb[16].mxu0 %v19835_v42  ;;  %v4590_v42 = vrot.slane %v4588_v28, 4 }
 0x268   : > { %14696 = vmatprep.mubr.bf16.mxu0 %v13427_v23  ;;  %v4615_v23 = vshll.u32 %v4542_v14, 16 }
 0x26f   : > { %14697 = vmatmul.mubr.bf16.gmra.mrb[20].mxu0 %v19838_v59  ;;  %v5422_v59 = vrot.slane %v17820_v63, 5 }
 0x270   : > { %14700 = vmatprep.mubr.bf16.mxu0 %v19841_v47  ;;  %v17827_v47 = vld [vmem:[#allocation7 + $0x200] sm:$0xff]  }
 0x277   : > { %14701 = vmatmul.mubr.bf16.gmra.mrb[24].mxu0 %v19844_v16  ;;  %v17829_v16 = vld [vmem:[#allocation2 + $0x20] sm:$0x1] }
 0x278   : > { %14704 = vmatprep.mubr.bf16.mxu0 %v13431_v1  ;;  %v15901_v1 = vld [vmem:[#allocation7 + $0x1d8] sm:$0xff]  }
 0x27f   : > { %14705 = vmatmul.mubr.bf16.gmra.mrb[28].mxu0 %v13432_v36  ;;  %v5397_v36 = vrot.slane %v17784_v29, 5 }
 0x280   : > { %14724 = vmatprep.mubr.bf16.mxu0 %v15890_v33  ;;  %v5424_v33 = vrot.slane %v5422_v59, 4 }
 0x281   : > { %v17794_v11 = vsel %vm17103_vm14, %v5396_v62, %v5397_v36  ;;  %v4607_v36 = vshll.u32 %v17829_v16, 16  ;;  %v4625_v62 = vshrl.u32 %v17818_v53, 16 }
 0x282   : > { %19847 = vst [vmem:[#allocation22_spill] sm:$0xff] %v17794_v11  ;;  %v17841_v20 = vsel %vm17103_vm14, %v5424_v33, %v5425_v40  ;;  %v4665_v33 = vrot.slane %v4663_v8, 5  ;;  %v15912_v11 = vld [vmem:[#allocation2 + $0xcc] sm:$0xff]  }
 0x283   : > { %19851 = vst [vmem:[#allocation26_spill] sm:$0xff] %v17841_v20  ;;  %v4627_v37 = vrot.slane %v4625_v62, 4 }
 0x287   : > { %14725 = vmatmul.mubr.bf16.vlgmr.msra.gmra.mrb[0].mxu0 %v15891_v31 }
 0x288   : > { %14757 = vmatpush3.bf16.msra.mxu0 %v15892_v18  ;;  %14728 = vmatprep.mubr.bf16.mxu0 %v15893_v9  ;;  %v4612_v18 = vshrl.u32 %v4542_v14, 16  ;;  %v4617_v9 = vrot.slane %v4615_v23, 5  ;;  %v5304_v14 = vld [vmem:[#allocation2 + $0x9c] sm:$0xe]  ;;  %v4673_v23 = vshrl.u32 %v17854_v57, 16 }
 0x289   : > { %14758 = vmatprep.subr.bf16.mxu0 %v15895_v34 }
 0x28a   : > { %v4614_v31 = vrot.slane %v4612_v18, 4  ;;  %v4669_v18 = vshll.u32 %v17854_v57, 16 }
 0x28c   : > { %14759 = vmatpush3.bf16.msra.mxu0 %v15895_v34  ;;  %v4545_v34 = vld [vmem:[#allocation2 + $0x30] sm:$0xf]  ;;  %v4618_v48 = vor.u32 %v4617_v9, %v4614_v31  ;;  %v15908_v9 = vld [vmem:[#allocation2 + $0xa8] sm:$0xff]  }
 0x28d   : > { %14760 = vmatprep.subr.bf16.mxu0 %v15898_v12 }
 0x28f   : > { %14729 = vmatmul.mubr.bf16.gmra.mrb[4].mxu0 %v15894_v38  ;;  %v17837_v38 = vsel %vm17103_vm14, %v13498_v2, %v5422_v59  ;;  %v17870_v2 = vld [vmem:[#allocation2 + $0x38] sm:$0x1] }
 0x290   : > { %14732 = vmatprep.mubr.bf16.mxu0 %v15896_v35  ;;  %14761 = vmatpush3.bf16.msra.mxu0 %v15898_v12  ;;  %v17833_v12 = vld [vmem:[#allocation2 + $0x34] sm:$0xf]  ;;  %19850 = vst [vmem:[#allocation25_spill] sm:$0xff] %v17837_v38  ;;  %v4655_v8 = vshll.u32 %v17870_v2, 16 }
 0x291   : > { %14762 = vmatprep.subr.bf16.mxu0 %v15901_v1  ;;  %v15905_v35 = vld [vmem:[#allocation2 + $0x90] sm:$0xff]   ;;  %v4645_v5 = vshll.u32 %v17833_v12, 16  ;;  %v4649_v52 = vshrl.u32 %v17833_v12, 16 }
 0x293   : > { %v17868_v59 = vrot.slane %v4645_v5, 5  ;;  %v4675_v5 = vrot.slane %v4673_v23, 4  ;;  %v17897_v23 = vld [vmem:[#allocation2 + $0xbc] sm:$0x1] }
 0x294   : > { %14763 = vmatpush3.bf16.msra.mxu0 %v15901_v1  ;;  %v4594_v1 = vor.u32 %v4593_v58, %v4590_v42  ;;  %v13500_v42 = vrot.slane %v5304_v14, 9 }
 0x295   : > { %14764 = vmatprep.subr.bf16.mxu0 %v15904_v17 }
 0x296   : > { %v17861_v28 = vrot.slane %v4594_v1, 4  ;;  %v17876_v1 = vrot.slane %v4618_v48, 4 }
 0x297   : > { %14733 = vmatmul.mubr.bf16.gmra.mrb[8].mxu0 %v15897_v32  ;;  %v4554_v32 = vld [vmem:[#allocation2 + $0x54] sm:$0xf] }
 0x298   : > { %14736 = vmatprep.mubr.bf16.mxu0 %v15899_v13  ;;  %14765 = vmatpush3.bf16.msra.mxu0 %v15904_v17  ;;  %v17844_v17 = vld [vmem:[#allocation2 + $0x2c] sm:$0x1]  ;;  %v4636_v13 = vshrl.u32 %v4545_v34, 16 }
 0x299   : > { %14766 = vmatprep.subr.bf16.mxu0 %v15907_v10  ;;  %v4631_v26 = vshll.u32 %v17844_v17, 16 }
 0x29a   : > { %v4638_v58 = vrot.slane %v4636_v13, 4  ;;  %v17882_v13 = vld [vmem:[#allocation2 + $0x44] sm:$0x1] }
 0x29b   : > { %19854 = vst [vmem:[#allocation33_spill] sm:$0xff] %v17882_v13 }
 0x29c   : > { %14767 = vmatpush3.bf16.msra.mxu0 %v15907_v10  ;;  %v4639_v10 = vshll.u32 %v4545_v34, 16 }
 0x29d   : > { %14768 = vmatprep.subr.bf16.mxu0 %v15910_v61 }
 0x29e   : > { %v4641_v0 = vrot.slane %v4639_v10, 5  ;;  %v17884_v10 = vrot.slane %v4669_v18, 5  ;;  %v4687_v18 = vshll.u32 %v4551_v7, 16 }
 0x29f   : > { %14737 = vmatmul.mubr.bf16.gmra.mrb[12].mxu0 %v15900_v46  ;;  %v17857_v46 = vld [vmem:[#allocation2 + $0xa0] sm:$0xf] }
 0x2a0   : > { %14740 = vmatprep.mubr.bf16.mxu0 %v15902_v4  ;;  %14769 = vmatpush3.bf16.msra.mxu0 %v15910_v61  ;;  %v4604_v61 = vor.u32 %v4603_v60, %v17831_v49  ;;  %v17859_v4 = vld [vmem:[#allocation2 + $0xa4] sm:$0x1]  ;;  %v4662_v60 = vrot.slane %v4660_v56, 4  ;;  %v4642_v48 = vor.u32 %v4641_v0, %v4638_v58  ;;  %v5453_v0 = vrot.slane %v17897_v23, 5 }
 0x2a1   : > { %14770 = vmatprep.subr.bf16.mxu0 %v15913_v24  ;;  %v5439_v51 = vrot.slane %v17859_v4, 5  ;;  %v17914_v56 = vrot.slane %v4655_v8, 5  ;;  %v17934_v8 = vld [vmem:[#allocation2 + $0x50] sm:$0x1] }
 0x2a2   : > { %v4605_v34 = vrot.slane %v4604_v61, 4  ;;  %v4628_v61 = vor.u32 %v4627_v37, %v17846_v19  ;;  %19857 = vst [vmem:[#allocation39_spill] sm:$0xff] %v17934_v8 }
 0x2a4   : > { %14771 = vmatpush3.bf16.msra.mxu0 %v15913_v24  ;;  %v5436_v24 = vrot.slane %v17857_v46, 5 }
 0x2a5   : > { %14804 = vmatprep.subr.bf16.mxu0 %v17827_v47 }
 0x2a6   : > { %v5438_v40 = vrot.slane %v5436_v24, 4  ;;  %v17874_v31 = vsel %vm17103_vm14, %v13500_v42, %v5436_v24  ;;  %v4666_v24 = vor.u32 %v4665_v33, %v4662_v60  ;;  %v17895_v42 = vld [vmem:[#allocation2 + $0xb8] sm:$0xf]  ;;  %v4676_v60 = vor.u32 %v4675_v5, %v17884_v10 }
 0x2a7   : > { %14741 = vmatmul.mubr.bf16.gmra.mrb[16].mxu0 %v15903_v27  ;;  %v4651_v27 = vrot.slane %v4649_v52, 4  ;;  %19852 = vst [vmem:[#allocation27_spill] sm:$0xff] %v17874_v31  ;;  %v17886_v52 = vld [vmem:[#allocation2 + $0x4c] sm:$0xf]  ;;  %v5450_v58 = vrot.slane %v17895_v42, 5 }
 0x2a8   : > { %14744 = vmatprep.mubr.bf16.mxu0 %v15905_v35  ;;  %v4609_v35 = vrot.slane %v4607_v36, 5  ;;  %v17880_v62 = vsel %vm17103_vm14, %v5438_v40, %v5439_v51  ;;  %v17891_v36 = vrot.slane %v4631_v26, 5  ;;  %v4684_v51 = vshrl.u32 %v4551_v7, 16  ;;  %v5306_v26 = vld [vmem:[#allocation2 + $0xb4] sm:$0xe] }
 0x2a9   : > { %19853 = vst [vmem:[#allocation32_spill] sm:$0xff] %v17880_v62  ;;  %v4652_v14 = vor.u32 %v4651_v27, %v17868_v59  ;;  %v4679_v40 = vshll.u32 %v17882_v13, 16  ;;  %v4693_v37 = vshll.u32 %v17886_v52, 16  ;;  %v13502_v33 = vrot.slane %v5306_v26, 9  ;;  %v17947_v26 = vld [vmem:[#allocation2 + $0xd0] sm:$0xf] }
 0x2aa   : > { %v4610_v27 = vsel %vm16748_vm11, %v4605_v34, %v4609_v35  ;;  %v17912_v7 = vrot.slane %v4642_v48, 4  ;;  %v5452_v41 = vrot.slane %v5450_v58, 4  ;;  %v4686_v25 = vrot.slane %v4684_v51, 4  ;;  %v5308_v31 = vld [vmem:[#allocation2 + $0xcc] sm:$0xe] }
 0x2ab   : > { %v17916_v6 = vrot.slane %v4652_v14, 4  ;;  %v4689_v62 = vrot.slane %v4687_v18, 5  ;;  %v17922_v34 = vrot.slane %v4666_v24, 4  ;;  %v17924_v35 = vrot.slane %v4679_v40, 5  ;;  %v4557_v40 = vld [vmem:[#allocation2 + $0x60] sm:$0xf] }
 0x2ac   : > { %v17926_v5 = vrot.slane %v4693_v37, 5  ;;  %v17932_v48 = vrot.slane %v4676_v60, 4  ;;  %v4697_v14 = vshrl.u32 %v17886_v52, 16  ;;  %v4708_v51 = vshrl.u32 %v4554_v32, 16  ;;  %v17943_v37 = vld [vmem:[#allocation2 + $0xc4] sm:$0xf] }
 0x2ad   : > { %v17949_v60 = vld [vmem:[#allocation2 + $0xd4] sm:$0x1]  ;;  %v5457_v18 = vrot.slane %v17943_v37, 5  ;;  %v4703_v24 = vshll.u32 %v17934_v8, 16  ;;  %v5464_v20 = vrot.slane %v17947_v26, 5  ;;  %v4732_v43 = vshrl.u32 %v4557_v40, 16 }
 0x2ae   : > { %v5467_v38 = vrot.slane %v17949_v60, 5  ;;  %v4699_v30 = vrot.slane %v4697_v14, 4  ;;  %v4735_v8 = vshll.u32 %v4557_v40, 16  ;;  %v4710_v13 = vrot.slane %v4708_v51, 4 }
 0x2af   : > { %14745 = vmatmul.mubr.bf16.gmra.mrb[20].mxu0 %v15906_v21  ;;  %v4600_v21 = vsel %vm16748_vm11, %v17861_v28, %v17831_v49  ;;  %v17920_v49 = vsel %vm17103_vm14, %v13502_v33, %v5450_v58  ;;  %v15911_v28 = vld [vmem:[#allocation2 + $0xc0] sm:$0xff]  }
 0x2b0   : > { %14748 = vmatprep.mubr.bf16.mxu0 %v15908_v9  ;;  %v17910_v9 = vrot.slane %v4628_v61, 4  ;;  %19855 = vst [vmem:[#allocation37_spill] sm:$0xff] %v17920_v49  ;;  %v17930_v61 = vsel %vm17103_vm14, %v5452_v41, %v5453_v0  ;;  %v17945_v41 = vld [vmem:[#allocation2 + $0xc8] sm:$0x1]  ;;  %v13465_v58 = vcombine.low %v4600_v21, %v4610_v27  ;;  %v4690_v0 = vor.u32 %v4689_v62, %v4686_v25  ;;  %v5307_v33 = vld [vmem:[#allocation2 + $0xc0] sm:$0xe] }
 0x2b1   : > { %19856 = vst [vmem:[#allocation34_spill] sm:$0xff] %v17930_v61  ;;  %v5460_v61 = vrot.slane %v17945_v41, 5  ;;  %v13503_v49 = vrot.slane %v5307_v33, 9  ;;  %v17956_v21 = vld [vmem:[#allocation2 + $0x64] sm:$0xf]  ;;  %v5459_v25 = vrot.slane %v5457_v18, 4  ;;  %v4700_v40 = vor.u32 %v4699_v30, %v17926_v5 }
 0x2b2   : > { %v13504_v62 = vrot.slane %v5308_v31, 9  ;;  %v4717_v27 = vshll.u32 %v17782_v54, 16  ;;  %v5466_v33 = vrot.slane %v5464_v20, 4  ;;  %v4741_v31 = vshll.u32 %v17956_v21, 16 }
 0x2b3   : > { %v17966_v14 = vsel %vm17103_vm14, %v5459_v25, %v5460_v61  ;;  %v4745_v54 = vshrl.u32 %v17956_v21, 16  ;;  %v4658_v30 = vsel %vm16748_vm11, %v17916_v6, %v17914_v56  ;;  %v4701_v25 = vrot.slane %v4700_v40, 4  ;;  %v15915_v40 = vld [vmem:[#allocation7 + $0x208] sm:$0xff]  }
 0x2b4   : > { %v18003_v51 = vrot.slane %v4717_v27, 5  ;;  %v18005_v6 = vrot.slane %v4741_v31, 5  ;;  %v4563_v31 = vld [vmem:[#allocation2 + $0x78] sm:$0xf] }
 0x2b5   : > { %v4747_v56 = vrot.slane %v4745_v54, 4  ;;  %v18020_v54 = vld [vmem:[#allocation2 + $0x7c] sm:$0xf] }
 0x2b7   : > { %14749 = vmatmul.mubr.bf16.gmra.mrb[24].mxu0 %v15909_v55  ;;  %v4711_v55 = vshll.u32 %v4554_v32, 16  ;;  %v17970_v32 = vsel %vm17103_vm14, %v13504_v62, %v5464_v20  ;;  %v4634_v20 = vsel %vm16748_vm11, %v17910_v9, %v17891_v36  ;;  %v4648_v62 = vsel %vm16748_vm11, %v17912_v7, %v17868_v59  ;;  %v4560_v7 = vld [vmem:[#allocation2 + $0x6c] sm:$0xf] }
 0x2b8   : > { %14752 = vmatprep.mubr.bf16.mxu0 %v15911_v28  ;;  %v17962_v28 = vsel %vm17103_vm14, %v13503_v49, %v5457_v18  ;;  %v17978_v18 = vsel %vm17103_vm14, %v5466_v33, %v5467_v38  ;;  %v4672_v38 = vsel %vm16748_vm11, %v17922_v34, %v17884_v10  ;;  %v4682_v36 = vsel %vm16748_vm11, %v17932_v48, %v17924_v35  ;;  %v18008_v34 = vld [vmem:[#allocation2 + $0x68] sm:$0x1] }
 0x2b9   : > { %19858 = vst [vmem:[#allocation38_spill] sm:$0xff] %v17978_v18  ;;  %v4713_v61 = vrot.slane %v4711_v55, 5  ;;  %v4691_v9 = vrot.slane %v4690_v0, 4  ;;  %v4723_v59 = vrot.slane %v4721_v39, 4  ;;  %v4734_v55 = vrot.slane %v4732_v43, 4 }
 0x2ba   : > { %v4737_v33 = vrot.slane %v4735_v8, 5  ;;  %v4705_v49 = vrot.slane %v4703_v24, 5  ;;  %v4756_v18 = vshrl.u32 %v4560_v7, 16  ;;  %v4759_v35 = vshll.u32 %v4560_v7, 16 }
 0x2bb   : > { %v4714_v10 = vor.u32 %v4713_v61, %v4710_v13  ;;  %v4765_v48 = vshll.u32 %v17798_v44, 16  ;;  %v4769_v39 = vshrl.u32 %v17798_v44, 16  ;;  %v19859_v43 = vsel %vm16748_vm11, %v17876_v1, %v17846_v19 }
 0x2bc   : > { %v13466_v8 = vcombine.low %v19859_v43, %v4634_v20  ;;  %v13468_v0 = vcombine.low %v4672_v38, %v4682_v36  ;;  %v4724_v13 = vor.u32 %v4723_v59, %v18003_v51  ;;  %v4738_v24 = vor.u32 %v4737_v33, %v4734_v55  ;;  %v4566_v36 = vld [vmem:[#allocation2 + $0x84] sm:$0xf] }
 0x2bd   : > { %v4751_v27 = vshll.u32 %v18008_v34, 16  ;;  %v4696_v44 = vsel %vm16748_vm11, %v4691_v9, %v17926_v5  ;;  %v4706_v19 = vsel %vm16748_vm11, %v4701_v25, %v4705_v49  ;;  %v4715_v1 = vrot.slane %v4714_v10, 4 }
 0x2be   : > { %v4758_v20 = vrot.slane %v4756_v18, 4  ;;  %v4771_v38 = vrot.slane %v4769_v39, 4  ;;  %v4780_v59 = vshrl.u32 %v4563_v31, 16  ;;  %v4783_v7 = vshll.u32 %v4563_v31, 16  ;;  %v15916_v18 = vld [vmem:[#allocation7 + $0x210] sm:$0xff]  }
 0x2bf   : > { %14753 = vmatmul.mubr.bf16.gmra.mrb[28].mxu0 %v15912_v11  ;;  %v4727_v11 = vshll.u32 %v17784_v29, 16  ;;  %v4748_v29 = vor.u32 %v4747_v56, %v18005_v6  ;;  %v4789_v55 = vshll.u32 %v18020_v54, 16  ;;  %v4793_v33 = vshrl.u32 %v18020_v54, 16 }
 0x2c0   : > { %14772 = vmatprep.mubr.bf16.mxu0 %v13465_v58  ;;  %v13467_v58 = vcombine.low %v4648_v62, %v4658_v30  ;;  %v4761_v62 = vrot.slane %v4759_v35, 5  ;;  %v18027_v30 = vrot.slane %v4765_v48, 5  ;;  %v4725_v5 = vrot.slane %v4724_v13, 4 }
 0x2c1   : > { %v4729_v61 = vrot.slane %v4727_v11, 5  ;;  %v4739_v49 = vrot.slane %v4738_v24, 4  ;;  %v4749_v25 = vrot.slane %v4748_v29, 4  ;;  %v4753_v9 = vrot.slane %v4751_v27, 5 }
 0x2c2   : > { %v4804_v56 = vshrl.u32 %v4566_v36, 16  ;;  %v4807_v10 = vshll.u32 %v4566_v36, 16  ;;  %v4813_v11 = vshll.u32 %v17820_v63, 16  ;;  %v4817_v35 = vshrl.u32 %v17820_v63, 16  ;;  %v18052_v36 = vld [vmem:[#allocation2 + $0x94] sm:$0xf] }
 0x2c3   : > { %v13469_v48 = vcombine.low %v4696_v44, %v4706_v19  ;;  %v4762_v39 = vor.u32 %v4761_v62, %v4758_v20  ;;  %v4772_v43 = vor.u32 %v4771_v38, %v18027_v30  ;;  %v4785_v13 = vrot.slane %v4783_v7, 5  ;;  %v15917_v44 = vld [vmem:[#allocation7 + $0x218] sm:$0xff]   ;;  %v4569_v19 = vld [vmem:[#allocation2 + $0x90] sm:$0xf] }
 0x2c4   : > { %v18038_v24 = vrot.slane %v4789_v55, 5  ;;  %v4795_v29 = vrot.slane %v4793_v33, 4  ;;  %v4720_v27 = vsel %vm16748_vm11, %v4715_v1, %v18003_v51  ;;  %v4730_v63 = vsel %vm16748_vm11, %v4725_v5, %v4729_v61 }
 0x2c5   : > { %v4744_v31 = vsel %vm16748_vm11, %v4739_v49, %v18005_v6  ;;  %v4806_v20 = vrot.slane %v4804_v56, 4  ;;  %v4809_v62 = vrot.slane %v4807_v10, 5  ;;  %v4819_v38 = vrot.slane %v4817_v35, 4 }
 0x2c6   : > { %v18054_v51 = vrot.slane %v4762_v39, 4  ;;  %v18056_v1 = vrot.slane %v4772_v43, 4  ;;  %v4796_v7 = vor.u32 %v4795_v29, %v18038_v24  ;;  %v4828_v55 = vshrl.u32 %v4569_v19, 16  ;;  %v18074_v43 = vld [vmem:[#allocation2 + $0x98] sm:$0x1] }
 0x2c7   : > { %14773 = vmatmul.mubr.bf16.vlgmr.msra.gmra.mrb[0].mxu0 %v13466_v8  ;;  %v4775_v8 = vshll.u32 %v17800_v15, 16  ;;  %v4754_v15 = vsel %vm16748_vm11, %v4749_v25, %v4753_v9  ;;  %v4831_v33 = vshll.u32 %v4569_v19, 16  ;;  %v4837_v5 = vshll.u32 %v18052_v36, 16  ;;  %v4575_v29 = vld [vmem:[#allocation2 + $0xa8] sm:$0xf] }
 0x2c8   : > { %14805 = vmatpush3.bf16.msra.mxu0 %v17827_v47  ;;  %14776 = vmatprep.mubr.bf16.mxu0 %v13467_v58  ;;  %v18036_v47 = vld [vmem:[#allocation2 + $0x80] sm:$0x1]  ;;  %v4782_v58 = vrot.slane %v4780_v59, 4  ;;  %v4841_v49 = vshrl.u32 %v18052_v36, 16  ;;  %v13470_v25 = vcombine.low %v4720_v27, %v4730_v63  ;;  %v4810_v9 = vor.u32 %v4809_v62, %v4806_v20 }
 0x2c9   : > { %14806 = vmatprep.subr.bf16.mxu0 %v15915_v40  ;;  %v18058_v61 = vrot.slane %v4775_v8, 5  ;;  %v4799_v6 = vshll.u32 %v18036_v47, 16  ;;  %v4823_v10 = vshll.u32 %v17822_v45, 16  ;;  %v13471_v35 = vcombine.low %v4744_v31, %v4754_v15 }
 0x2ca   : > { %v4786_v59 = vor.u32 %v4785_v13, %v4782_v58  ;;  %v4797_v58 = vrot.slane %v4796_v7, 4  ;;  %v4830_v13 = vrot.slane %v4828_v55, 4  ;;  %v4833_v45 = vrot.slane %v4831_v33, 5 }
 0x2cb   : > { %v4801_v39 = vrot.slane %v4799_v6, 5  ;;  %v18076_v27 = vrot.slane %v4837_v5, 5  ;;  %v4843_v63 = vrot.slane %v4841_v49, 4  ;;  %v4811_v19 = vrot.slane %v4810_v9, 4 }
 0x2cc   : > { %14807 = vmatpush3.bf16.msra.mxu0 %v15915_v40  ;;  %v18050_v40 = vrot.slane %v4813_v11, 5  ;;  %v15918_v11 = vld [vmem:[#allocation7 + $0x220] sm:$0xff]   ;;  %v4787_v8 = vrot.slane %v4786_v59, 4  ;;  %v4825_v62 = vrot.slane %v4823_v10, 5  ;;  %v4876_v6 = vshrl.u32 %v4575_v29, 16  ;;  %v15920_v10 = vld [vmem:[#allocation7 + $0x230] sm:$0xff]  }
 0x2cd   : > { %14808 = vmatprep.subr.bf16.mxu0 %v15916_v18  ;;  %v4802_v7 = vsel %vm16748_vm11, %v4797_v58, %v4801_v39  ;;  %v4834_v5 = vor.u32 %v4833_v45, %v4830_v13  ;;  %v4844_v49 = vor.u32 %v4843_v63, %v18076_v27  ;;  %v18098_v13 = vld [vmem:[#allocation2 + $0xb0] sm:$0x1]  ;;  %v4578_v63 = vld [vmem:[#allocation2 + $0xb4] sm:$0xf] }
 0x2ce   : > { %v4820_v56 = vor.u32 %v4819_v38, %v18050_v40  ;;  %v4847_v38 = vshll.u32 %v18074_v43, 16  ;;  %v4792_v59 = vsel %vm16748_vm11, %v4787_v8, %v18038_v24 }
 0x2cf   : > { %14777 = vmatmul.mubr.bf16.gmra.mrb[4].mxu0 %v13468_v0  ;;  %v4572_v0 = vld [vmem:[#allocation2 + $0x9c] sm:$0xf]  ;;  %v13473_v58 = vcombine.low %v4792_v59, %v4802_v7  ;;  %v4909_v59 = vshll.u32 %v17895_v42, 16  ;;  %v4913_v7 = vshrl.u32 %v17895_v42, 16 }
 0x2d0   : > { %14780 = vmatprep.mubr.bf16.mxu0 %v13469_v48  ;;  %14809 = vmatpush3.bf16.msra.mxu0 %v15916_v18  ;;  %v4768_v48 = vsel %vm16748_vm11, %v18054_v51, %v18027_v30  ;;  %v4778_v18 = vsel %vm16748_vm11, %v18056_v1, %v18058_v61  ;;  %v4852_v31 = vshrl.u32 %v4572_v0, 16  ;;  %v4855_v15 = vshll.u32 %v4572_v0, 16  ;;  %v18078_v30 = vld [vmem:[#allocation2 + $0xac] sm:$0xf]  ;;  %v15919_v51 = vld [vmem:[#allocation7 + $0x228] sm:$0xff]  }
 0x2d1   : > { %14810 = vmatprep.subr.bf16.mxu0 %v15917_v44  ;;  %v4821_v20 = vrot.slane %v4820_v56, 4  ;;  %v4861_v1 = vshll.u32 %v17857_v46, 16  ;;  %v4865_v61 = vshrl.u32 %v17857_v46, 16  ;;  %v4885_v55 = vshll.u32 %v18078_v30, 16 }
 0x2d2   : > { %v4889_v33 = vshrl.u32 %v18078_v30, 16  ;;  %v4854_v46 = vrot.slane %v4852_v31, 4  ;;  %v4857_v9 = vrot.slane %v4855_v15, 5  ;;  %v4849_v56 = vrot.slane %v4847_v38, 5 }
 0x2d3   : > { %v4826_v24 = vsel %vm16748_vm11, %v4821_v20, %v4825_v62  ;;  %v18096_v0 = vrot.slane %v4861_v1, 5  ;;  %v4867_v39 = vrot.slane %v4865_v61, 4  ;;  %v13472_v8 = vcombine.low %v4768_v48, %v4778_v18  ;;  %v15921_v62 = vld [vmem:[#allocation7 + $0x238] sm:$0xff]  }
 0x2d4   : > { %14811 = vmatpush3.bf16.msra.mxu0 %v15917_v44  ;;  %v4879_v44 = vshll.u32 %v4575_v29, 16  ;;  %v18100_v45 = vrot.slane %v4885_v55, 5  ;;  %v4891_v29 = vrot.slane %v4889_v33, 4  ;;  %v4845_v31 = vrot.slane %v4844_v49, 4  ;;  %v4581_v61 = vld [vmem:[#allocation2 + $0xc0] sm:$0xf] }
 0x2d5   : > { %14812 = vmatprep.subr.bf16.mxu0 %v15918_v11  ;;  %v4858_v15 = vor.u32 %v4857_v9, %v4854_v46  ;;  %v4868_v38 = vor.u32 %v4867_v39, %v18096_v0  ;;  %v4895_v48 = vshll.u32 %v18098_v13, 16  ;;  %v4900_v18 = vshrl.u32 %v4578_v63, 16 }
 0x2d6   : > { %v4927_v49 = vshll.u32 %v4581_v61, 16  ;;  %v4933_v46 = vshll.u32 %v17943_v37, 16  ;;  %v4937_v9 = vshrl.u32 %v17943_v37, 16 }
 0x2d7   : > { %14781 = vmatmul.mubr.bf16.gmra.mrb[8].mxu0 %v13470_v25  ;;  %v4816_v25 = vsel %vm16748_vm11, %v4811_v19, %v18050_v40  ;;  %v4835_v40 = vrot.slane %v4834_v5, 4  ;;  %v4871_v19 = vshll.u32 %v17859_v4, 16  ;;  %v4859_v55 = vrot.slane %v4858_v15, 4 }
 0x2d8   : > { %14784 = vmatprep.mubr.bf16.mxu0 %v13471_v35  ;;  %14813 = vmatpush3.bf16.msra.mxu0 %v15918_v11  ;;  %v4878_v35 = vrot.slane %v4876_v6, 4  ;;  %v4881_v11 = vrot.slane %v4879_v44, 5  ;;  %v13474_v20 = vcombine.low %v4816_v25, %v4826_v24  ;;  %v4892_v6 = vor.u32 %v4891_v29, %v18100_v45 }
 0x2d9   : > { %14814 = vmatprep.subr.bf16.mxu0 %v15919_v51  ;;  %v4903_v44 = vshll.u32 %v4578_v63, 16  ;;  %v4840_v4 = vsel %vm16748_vm11, %v4835_v40, %v18076_v27  ;;  %v4873_v33 = vrot.slane %v4871_v19, 5  ;;  %v4924_v5 = vshrl.u32 %v4581_v61, 16  ;;  %v4584_v40 = vld [vmem:[#allocation2 + $0xcc] sm:$0xf] }
 0x2da   : > { %v4882_v1 = vor.u32 %v4881_v11, %v4878_v35  ;;  %v4869_v25 = vrot.slane %v4868_v38, 4  ;;  %v4897_v24 = vrot.slane %v4895_v48, 5  ;;  %v4902_v39 = vrot.slane %v4900_v18, 4 }
 0x2db   : > { %v4893_v35 = vrot.slane %v4892_v6, 4  ;;  %v4905_v11 = vrot.slane %v4903_v44, 5  ;;  %v4911_v27 = vrot.slane %v4909_v59, 5  ;;  %v4929_v29 = vrot.slane %v4927_v49, 5 }
 0x2dc   : > { %14815 = vmatpush3.bf16.msra.mxu0 %v15919_v51  ;;  %v4850_v51 = vsel %vm16748_vm11, %v4845_v31, %v4849_v56  ;;  %v4883_v42 = vrot.slane %v4882_v1, 4  ;;  %v4926_v56 = vrot.slane %v4924_v5, 4  ;;  %v4939_v63 = vrot.slane %v4937_v9, 4 }
 0x2dd   : > { %14816 = vmatprep.subr.bf16.mxu0 %v15920_v10  ;;  %v4864_v37 = vsel %vm16748_vm11, %v4859_v55, %v18096_v0  ;;  %v4874_v31 = vsel %vm16748_vm11, %v4869_v25, %v4873_v33  ;;  %v4919_v15 = vshll.u32 %v17897_v23, 16  ;;  %v4906_v38 = vor.u32 %v4905_v11, %v4902_v39 }
 0x2de   : > { %v4888_v19 = vsel %vm16748_vm11, %v4883_v42, %v18100_v45  ;;  %v4948_v48 = vshrl.u32 %v4584_v40, 16  ;;  %v4951_v18 = vshll.u32 %v4584_v40, 16  ;;  %v4957_v0 = vshll.u32 %v17947_v26, 16 }
 0x2df   : > { %14785 = vmatmul.mubr.bf16.gmra.mrb[12].mxu0 %v13472_v8  ;;  %v4915_v8 = vrot.slane %v4913_v7, 4  ;;  %v4961_v61 = vshrl.u32 %v17947_v26, 16  ;;  %v4930_v6 = vor.u32 %v4929_v29, %v4926_v56  ;;  %v4943_v23 = vshll.u32 %v17945_v41, 16 }
 0x2e0   : > { %14788 = vmatprep.mubr.bf16.mxu0 %v13473_v58  ;;  %14817 = vmatpush3.bf16.msra.mxu0 %v15920_v10  ;;  %v13475_v58 = vcombine.low %v4840_v4, %v4850_v51  ;;  %v4935_v10 = vrot.slane %v4933_v46, 5  ;;  %v4907_v7 = vrot.slane %v4906_v38, 4  ;;  %v4921_v4 = vrot.slane %v4919_v15, 5 }
 0x2e1   : > { %14818 = vmatprep.subr.bf16.mxu0 %v15921_v62  ;;  %v4916_v1 = vor.u32 %v4915_v8, %v4911_v27  ;;  %v4950_v51 = vrot.slane %v4948_v48, 4  ;;  %v4953_v55 = vrot.slane %v4951_v18, 5  ;;  %v4959_v33 = vrot.slane %v4957_v0, 5  ;;  %v5293_v8 = vld [vmem:[#allocation2 + $0x18] sm:$0xe] }
 0x2e2   : > { %v4940_v44 = vor.u32 %v4939_v63, %v4935_v10  ;;  %v4963_v5 = vrot.slane %v4961_v61, 4  ;;  %v4931_v49 = vrot.slane %v4930_v6, 4  ;;  %v4945_v9 = vrot.slane %v4943_v23, 5 }
 0x2e3   : > { %v4917_v45 = vrot.slane %v4916_v1, 4  ;;  %v4912_v26 = vsel %vm16748_vm11, %v4907_v7, %v4911_v27  ;;  %v4954_v25 = vor.u32 %v4953_v55, %v4950_v51  ;;  %v5359_v11 = vrot.slane %v17804_v22, 5  ;;  %v5296_v7 = vld [vmem:[#allocation2 + $0x3c] sm:$0xe] }
 0x2e4   : > { %14819 = vmatpush3.bf16.msra.mxu0 %v15921_v62  ;;  %v4898_v62 = vsel %vm16748_vm11, %v4893_v35, %v4897_v24  ;;  %v4941_v46 = vrot.slane %v4940_v44, 4  ;;  %v4964_v42 = vor.u32 %v4963_v5, %v4959_v33  ;;  %v4967_v24 = vshll.u32 %v17949_v60, 16  ;;  %v19860_v5 = vld [vmem:[#allocation33_spill] sm:$0xff] }
 0x2e5   : > { %v13477_v59 = vcombine.low %v4888_v19, %v4898_v62  ;;  %v4922_v41 = vsel %vm16748_vm11, %v4917_v45, %v4921_v4  ;;  %v4936_v39 = vsel %vm16748_vm11, %v4931_v49, %v4935_v10  ;;  %v4955_v27 = vrot.slane %v4954_v25, 4  ;;  %v5294_v62 = vld [vmem:[#allocation2 + $0x24] sm:$0xe] }
 0x2e6   : > { %v4946_v35 = vsel %vm16748_vm11, %v4941_v46, %v4945_v9  ;;  %v4965_v29 = vrot.slane %v4964_v42, 4  ;;  %v4969_v63 = vrot.slane %v4967_v24, 5  ;;  %v13489_v40 = vrot.slane %v5293_v8, 9 }
 0x2e7   : > { %14789 = vmatmul.mubr.bf16.gmra.mrb[16].mxu0 %v13474_v20  ;;  %v13476_v20 = vcombine.low %v4864_v37, %v4874_v31  ;;  %v13479_v56 = vcombine.low %v4936_v39, %v4946_v35  ;;  %v5361_v37 = vrot.slane %v5359_v11, 4  ;;  %v5362_v31 = vrot.slane %v17829_v16, 5  ;;  %v5295_v16 = vld [vmem:[#allocation2 + $0x30] sm:$0xe]  ;;  %v5299_v39 = vld [vmem:[#allocation2 + $0x60] sm:$0xe] }
 0x2e8   : > { %14792 = vmatprep.mubr.bf16.mxu0 %v13475_v58  ;;  %v13478_v58 = vcombine.low %v4912_v26, %v4922_v41  ;;  %v4960_v60 = vsel %vm16748_vm11, %v4955_v27, %v4959_v33  ;;  %v4970_v10 = vsel %vm16748_vm11, %v4965_v29, %v4969_v63  ;;  %v5366_v22 = vrot.slane %v17818_v53, 5  ;;  %v19861_v26 = vld [vmem:[#allocation39_spill] sm:$0xff] }
 0x2e9   : > { %v5360_v15 = vsel %vm17103_vm14, %v13489_v40, %v5359_v11  ;;  %v5363_v19 = vsel %vm17103_vm14, %v5361_v37, %v5362_v31  ;;  %v5373_v38 = vrot.slane %v17833_v12, 5  ;;  %v13480_v1 = vcombine.low %v4960_v60, %v4970_v10  ;;  %v5301_v40 = vld [vmem:[#allocation2 + $0x78] sm:$0xe]  ;;  %v19862_v10 = vld [vmem:[#allocation21_spill] sm:$0xff] }
 0x2ea   : > { %v13505_v48 = vcombine.low %v5360_v15, %v5363_v19  ;;  %v13490_v18 = vrot.slane %v5294_v62, 9  ;;  %v5368_v0 = vrot.slane %v5366_v22, 4  ;;  %v5369_v61 = vrot.slane %v17844_v17, 5 }
 0x2eb   : > { %v13491_v6 = vrot.slane %v5295_v16, 9  ;;  %v5375_v44 = vrot.slane %v5373_v38, 4  ;;  %v5376_v53 = vrot.slane %v17870_v2, 5  ;;  %v5380_v12 = vrot.slane %v17854_v57, 5  ;;  %v5297_v2 = vld [vmem:[#allocation2 + $0x48] sm:$0xe] }
 0x2ec   : > { %v5367_v23 = vsel %vm17103_vm14, %v13490_v18, %v5366_v22  ;;  %v5387_v45 = vrot.slane %v17886_v52, 5  ;;  %v13492_v55 = vrot.slane %v5296_v7, 9  ;;  %v5383_v49 = vrot.slane %v19860_v5, 5  ;;  %v19863_v22 = vld [vmem:[#allocation22_spill] sm:$0xff]  ;;  %v19866_v18 = vld [vmem:[#allocation24_spill] sm:$0xff] }
 0x2ed   : > { %v5377_v17 = vsel %vm17103_vm14, %v5375_v44, %v5376_v53  ;;  %v5382_v33 = vrot.slane %v5380_v12, 4  ;;  %v13493_v46 = vrot.slane %v5297_v2, 9  ;;  %v5390_v57 = vrot.slane %v19861_v26, 5 }
 0x2ee   : > { %v5389_v9 = vrot.slane %v5387_v45, 4  ;;  %v5381_v41 = vsel %vm17103_vm14, %v13492_v55, %v5380_v12  ;;  %v5401_v24 = vrot.slane %v17956_v21, 5  ;;  %v13495_v8 = vrot.slane %v5299_v39, 9  ;;  %v19874_v55 = vld [vmem:[#allocation37_spill] sm:$0xff] }
 0x2ef   : > { %14793 = vmatmul.mubr.bf16.gmra.mrb[20].mxu0 %v13476_v20  ;;  %v5370_v20 = vsel %vm17103_vm14, %v5368_v0, %v5369_v61  ;;  %v5384_v25 = vsel %vm17103_vm14, %v5382_v33, %v5383_v49  ;;  %v5388_v52 = vsel %vm17103_vm14, %v13493_v46, %v5387_v45  ;;  %v5415_v63 = vrot.slane %v18020_v54, 5  ;;  %v5303_v54 = vld [vmem:[#allocation2 + $0x90] sm:$0xe]  ;;  %v19875_v33 = vld [vmem:[#allocation34_spill] sm:$0xff] }
 0x2f0   : > { %14796 = vmatprep.mubr.bf16.mxu0 %v13477_v59  ;;  %v5374_v59 = vsel %vm17103_vm14, %v13491_v6, %v5373_v38  ;;  %v13506_v4 = vcombine.low %v5367_v23, %v5370_v20  ;;  %v5391_v42 = vsel %vm17103_vm14, %v5389_v9, %v5390_v57  ;;  %v13508_v35 = vcombine.low %v5381_v41, %v5384_v25  ;;  %v19878_v49 = vld [vmem:[#allocation38_spill] sm:$0xff]  ;;  %v487_v9 = vld [vmem:[#allocation3 + $0xc] sm:$0x1]  ;;  %v457_v41 = vld [vmem:[#allocation3 + $0x8] sm:$0x1] }
 0x2f1   : > { %v13507_v51 = vcombine.low %v5374_v59, %v5377_v17  ;;  %v13509_v11 = vcombine.low %v5388_v52, %v5391_v42  ;;  %v5402_v27 = vsel %vm17103_vm14, %v13495_v8, %v5401_v24  ;;  %v13497_v21 = vrot.slane %v5301_v40, 9  ;;  %v19869_v59 = vld [vmem:[#allocation26_spill] sm:$0xff]  ;;  %v496_v8 = vld [vmem:[#allocation3 + $0x24] sm:$0x1] }
 0x2f2   : > { %v5417_v31 = vrot.slane %v5415_v63, 4  ;;  %v5418_v60 = vrot.slane %v18036_v47, 5  ;;  %v19864_v15 = vcombine.low %v19862_v10, %v19863_v22  ;;  %v5429_v62 = vrot.slane %v18052_v36, 5  ;;  %v19865_v47 = vld [vmem:[#allocation23_spill] sm:$0xff]  ;;  %v5305_v36 = vld [vmem:[#allocation2 + $0xa8] sm:$0xe] }
 0x2f3   : > { %v13499_v16 = vrot.slane %v5303_v54, 9  ;;  %v19867_v0 = vcombine.low %v19865_v47, %v19866_v18  ;;  %v5443_v44 = vrot.slane %v18078_v30, 5  ;;  %v13501_v23 = vrot.slane %v5305_v36, 9  ;;  %v19872_v30 = vld [vmem:[#allocation32_spill] sm:$0xff]  ;;  %v490_v42 = vld [vmem:[#allocation3 + $0x14] sm:$0x1] }
 0x2f4   : > { %v5419_v19 = vsel %vm17103_vm14, %v5417_v31, %v5418_v60  ;;  %v5446_v12 = vrot.slane %v18098_v13, 5  ;;  %v19876_v13 = vcombine.low %v19874_v55, %v19875_v33  ;;  %v19877_v5 = vcombine.low %v17962_v28, %v17966_v14  ;;  %v460_v28 = vld [vmem:[#allocation3 + $0x10] sm:$0x1] }
 0x2f5   : > { %v5430_v61 = vsel %vm17103_vm14, %v13499_v16, %v5429_v62  ;;  %v5445_v20 = vrot.slane %v5443_v44, 4  ;;  %v5444_v7 = vsel %vm17103_vm14, %v13501_v23, %v5443_v44  ;;  %v19879_v46 = vcombine.low %v17970_v32, %v19878_v49  ;;  %v493_v32 = vld [vmem:[#allocation3 + $0x1c] sm:$0x1] }
 0x2f6   : > { %v488_v57 = vsel %vm16702_vm4, 0, %v487_v9  ;;  %v458_v52 = vsel %vm16697_vm3, 0, %v457_v41  ;;  %v461_v14 = vsel %vm16697_vm3, 0, %v460_v28  ;;  %v494_v39 = vsel %vm16702_vm4, 0, %v493_v32 }
 0x2f7   : > { %14797 = vmatmul.mubr.bf16.gmra.mrb[24].mxu0 %v13478_v58  ;;  %v5403_v58 = vrot.slane %v5401_v24, 4  ;;  %v5447_v45 = vsel %vm17103_vm14, %v5445_v20, %v5446_v12  ;;  %489 = vst [vmem:[#allocation3 + $0xc] sm:$0x1] %v488_v57  ;;  %459 = vst [vmem:[#allocation3 + $0x8] sm:$0x1] %v458_v52  ;;  %v491_v24 = vsel %vm16702_vm4, 0, %v490_v42 }
 0x2f8   : > { %14800 = vmatprep.mubr.bf16.mxu0 %v13479_v56  ;;  %v5404_v56 = vrot.slane %v18008_v34, 5  ;;  %v5416_v34 = vsel %vm17103_vm14, %v13497_v21, %v5415_v63  ;;  %v13517_v2 = vcombine.low %v5444_v7, %v5447_v45  ;;  %492 = vst [vmem:[#allocation3 + $0x14] sm:$0x1] %v491_v24  ;;  %462 = vst [vmem:[#allocation3 + $0x10] sm:$0x1] %v461_v14 }
 0x2f9   : > { %v13513_v38 = vcombine.low %v5416_v34, %v5419_v19  ;;  %495 = vst [vmem:[#allocation3 + $0x1c] sm:$0x1] %v494_v39  ;;  %v466_v63 = vld [vmem:[#allocation3 + $0x20] sm:$0x1] }
 0x2fa   : > { %v5405_v29 = vsel %vm17103_vm14, %v5403_v58, %v5404_v56  ;;  %v497_v58 = vsel %vm16702_vm4, 0, %v496_v8  ;;  %v16412_v56 = vmov 1983009808   ;;  %v467_v40 = vsel %vm16697_vm3, 0, %v466_v63  ;;  %v18261_v8 = vld [vmem:[%s19711_s5] ss:$0 sm:$0xff] }
 0x2fb   : > { %v13511_v37 = vcombine.low %v5402_v27, %v5405_v29  ;;  %498 = vst [vmem:[#allocation3 + $0x24] sm:$0x1] %v497_v58  ;;  %v5827_v27 = vunpack.c.l.s4 %v16412_v56  ;;  %v5829_v29 = vlaneseq  ;;  %468 = vst [vmem:[#allocation3 + $0x20] sm:$0x1] %v467_v40 }
 0x2fd   : > { %v18233_v21 = vshrl.u32 %v5829_v29, 7 }
 0x2ff   : > { %14801 = vmatmul.mubr.bf16.gmra.mrb[28].mxu0 %v13480_v1  ;;  %v5431_v1 = vrot.slane %v5429_v62, 4 }
 0x300   : > { %14820 = vmatprep.mubr.bf16.mxu0 %v13505_v48  ;;  %v5432_v48 = vrot.slane %v18074_v43, 5  ;;  %v19868_v43 = vld [vmem:[#allocation25_spill] sm:$0xff] }
 0x301   : > { %v19870_v17 = vcombine.low %v19868_v43, %v19869_v59 }
 0x302   : > { %v5433_v6 = vsel %vm17103_vm14, %v5431_v1, %v5432_v48 }
 0x303   : > { %v13515_v53 = vcombine.low %v5430_v61, %v5433_v6 }
 0x307   : > { %14821 = vmatmul.mubr.bf16.vlgmr.msra.gmra.mrb[0].mxu0 %v13506_v4  ;;  %v19871_v4 = vld [vmem:[#allocation27_spill] sm:$0xff] }
 0x308   : > { %14824 = vmatprep.mubr.bf16.mxu0 %v13507_v51  ;;  %v19873_v51 = vcombine.low %v19871_v4, %v19872_v30 }
 0x30f   : > { %14825 = vmatmul.mubr.bf16.gmra.mrb[4].mxu0 %v13508_v35  ;;  %v463_v35 = vld [vmem:[#allocation3 + $0x18] sm:$0x1] }
 0x310   : > { %14828 = vmatprep.mubr.bf16.mxu0 %v13509_v11  ;;  %v464_v11 = vsel %vm16697_vm3, 0, %v463_v35 }
 0x311   : > { %465 = vst [vmem:[#allocation3 + $0x18] sm:$0x1] %v464_v11 }
 0x317   : > { %14829 = vmatmul.mubr.bf16.gmra.mrb[8].mxu0 %v19864_v15 }
 0x318   : > { %14832 = vmatprep.mubr.bf16.mxu0 %v13511_v37  ;;  %v5828_v37 = vunpack.c.0.s8 %v5827_v27 }
 0x31a   : > { %v18236_v60 = vsub.s32 %v5828_v37, %v18233_v21 }
 0x31f   : > { %14833 = vmatmul.mubr.bf16.gmra.mrb[12].mxu0 %v19867_v0 }
 0x320   : > { %14836 = vmatprep.mubr.bf16.mxu0 %v13513_v38 }
 0x327   : > { %14837 = vmatmul.mubr.bf16.gmra.mrb[16].mxu0 %v19870_v17 }
 0x328   : > { %14840 = vmatprep.mubr.bf16.mxu0 %v13515_v53 }
 0x32f   : > { %14841 = vmatmul.mubr.bf16.gmra.mrb[20].mxu0 %v19873_v51 }
 0x330   : > { %14844 = vmatprep.mubr.bf16.mxu0 %v13517_v2 }
 0x337   : > { %14845 = vmatmul.mubr.bf16.gmra.mrb[24].mxu0 %v19876_v13 }
 0x338   : > { %14848 = vmatprep.mubr.bf16.mxu0 %v19877_v5 }
 0x33f   : > { %14849 = vmatmul.mubr.bf16.gmra.mrb[28].mxu0 %v19879_v46 }
 0x3da   : > { %v14822_v31 = vpop.f32.mrb[0].mxu0 }
 0x3db   : > { %v5632_v10 = vpop.f32.mrb[1].mxu0 }
 0x3dc   : > { %v5793_v22 = vmax.f32 %v5632_v10, %v14822_v31  ;;  %v14823_v15 = vpop.f32.mrb[2].mxu0 }
 0x3dd   : > { %v5635_v34 = vpop.f32.mrb[3].mxu0 }
 0x3de   : > { %v5825_v19 = vcombine.high %v5793_v22, %v5793_v22  ;;  %v5832_v62 = vrot.slane %v5793_v22, %v18236_v60  ;;  %v5794_v54 = vmax.f32 %v5635_v34, %v14823_v15  ;;  %v18270_v15 = vld [vmem:[%s19711_s5 + $0x1] ss:$0 sm:$0xff] }
 0x3e0   : > { %v5839_v38 = vrot.slane %v5825_v19, %v18236_v60  ;;  %v5840_v16 = vcombine.high %v5832_v62, %v5832_v62  ;;  %v6162_v1 = vsel %vm6161_vm15, %v5832_v62, -inf  ;;  %v5842_v48 = vcombine.high %v5794_v54, %v5794_v54 }
 0x3e1   : > { %v6163_v47 = vrot.slane %v6162_v1, 4  ;;  %v5849_v18 = vrot.slane %v5794_v54, %v18236_v60 }
 0x3e2   : > { %v5841_v0 = vcombine.high %v5839_v38, %v5839_v38  ;;  %v6169_v61 = vsel %vm6161_vm15, %v5840_v16, -inf  ;;  %v6176_v6 = vsel %vm6161_vm15, %v5839_v38, -inf  ;;  %v5856_v44 = vrot.slane %v5842_v48, %v18236_v60  ;;  %v18245_v36 = vpop.f32.mrb[4].mxu0 }
 0x3e3   : > { %v6164_v53 = vmax.f32 %v6162_v1, %v6163_v47  ;;  %v6170_v23 = vrot.slane %v6169_v61, 4  ;;  %v6177_v20 = vrot.slane %v6176_v6, 4  ;;  %v5857_v12 = vcombine.high %v5849_v18, %v5849_v18  ;;  %v18247_v43 = vpop.f32.mrb[5].mxu0 }
 0x3e4   : > { %v6183_v59 = vsel %vm6161_vm15, %v5841_v0, -inf  ;;  %v5858_v17 = vcombine.high %v5856_v44, %v5856_v44  ;;  %v6190_v7 = vsel %vm6161_vm15, %v5849_v18, -inf  ;;  %v6204_v45 = vsel %vm6161_vm15, %v5856_v44, -inf  ;;  %v18252_v2 = vpop.f32.mrb[6].mxu0 }
 0x3e5   : > { %v6165_v4 = vrot.slane %v6164_v53, 2  ;;  %v6171_v30 = vmax.f32 %v6169_v61, %v6170_v23  ;;  %v6178_v51 = vmax.f32 %v6176_v6, %v6177_v20  ;;  %v6184_v55 = vrot.slane %v6183_v59, 4  ;;  %v18254_v33 = vpop.f32.mrb[7].mxu0 }
 0x3e6   : > { %v6191_v13 = vrot.slane %v6190_v7, 4  ;;  %v6197_v5 = vsel %vm6161_vm15, %v5857_v12, -inf  ;;  %v6205_v49 = vrot.slane %v6204_v45, 4  ;;  %v6211_v46 = vsel %vm6161_vm15, %v5858_v17, -inf }
 0x3e7   : > { %v6166_v9 = vmax.f32 %v6164_v53, %v6165_v4  ;;  %v6172_v57 = vrot.slane %v6171_v30, 2  ;;  %v6179_v41 = vrot.slane %v6178_v51, 2  ;;  %v6185_v52 = vmax.f32 %v6183_v59, %v6184_v55 }
 0x3e8   : > { %v6192_v42 = vmax.f32 %v6190_v7, %v6191_v13  ;;  %v6198_v24 = vrot.slane %v6197_v5, 4  ;;  %v6206_v28 = vmax.f32 %v6204_v45, %v6205_v49  ;;  %v6212_v14 = vrot.slane %v6211_v46, 4 }
 0x3e9   : > { %v6167_v32 = vrot.slane %v6166_v9, 1  ;;  %v6173_v39 = vmax.f32 %v6171_v30, %v6172_v57  ;;  %v6180_v35 = vmax.f32 %v6178_v51, %v6179_v41  ;;  %v6186_v11 = vrot.slane %v6185_v52, 2 }
 0x3ea   : > { %v6193_v58 = vrot.slane %v6192_v42, 2  ;;  %v6199_v56 = vmax.f32 %v6197_v5, %v6198_v24  ;;  %v6207_v27 = vrot.slane %v6206_v28, 2  ;;  %v6213_v29 = vmax.f32 %v6211_v46, %v6212_v14  ;;  %v18263_v63 = vpop.f32.mrb[8].mxu0 }
 0x3eb   : > { %v6168_v40 = vmax.f32 %v6166_v9, %v6167_v32  ;;  %v6174_v37 = vrot.slane %v6173_v39, 1  ;;  %v6181_v31 = vrot.slane %v6180_v35, 1  ;;  %v6187_v10 = vmax.f32 %v6185_v52, %v6186_v11  ;;  %v18265_v22 = vpop.f32.mrb[9].mxu0 }
 0x3ec   : > { %v6194_v34 = vmax.f32 %v6192_v42, %v6193_v58  ;;  %v6200_v19 = vrot.slane %v6199_v56, 2  ;;  %v6208_v62 = vmax.f32 %v6206_v28, %v6207_v27  ;;  %v6214_v54 = vrot.slane %v6213_v29, 2  ;;  %v18272_v38 = vpop.f32.mrb[10].mxu0 }
 0x3ed   : > { %v6175_v16 = vmax.f32 %v6173_v39, %v6174_v37  ;;  %v6182_v1 = vmax.f32 %v6180_v35, %v6181_v31  ;;  %v6188_v48 = vrot.slane %v6187_v10, 1  ;;  %v6614_v47 = vmul.f32 %v18261_v8, %v6168_v40  ;;  %v18275_v18 = vpop.f32.mrb[11].mxu0 }
 0x3ee   : > { %v6195_v0 = vrot.slane %v6194_v34, 1  ;;  %v6201_v61 = vmax.f32 %v6199_v56, %v6200_v19  ;;  %v6209_v6 = vrot.slane %v6208_v62, 1  ;;  %v6215_v44 = vmax.f32 %v6213_v29, %v6214_v54 }
 0x3ef   : > { %v6189_v53 = vmax.f32 %v6187_v10, %v6188_v48  ;;  %v6615_v23 = vmul.f32 %v18261_v8, %v6175_v16  ;;  %v6616_v20 = vmul.f32 %v18261_v8, %v6182_v1  ;;  %v6682_v12 = vadd.f32 %v18270_v15, %v6614_v47 }
 0x3f0   : > { %v6196_v59 = vmax.f32 %v6194_v34, %v6195_v0  ;;  %v6202_v17 = vrot.slane %v6201_v61, 1  ;;  %v6210_v7 = vmax.f32 %v6208_v62, %v6209_v6  ;;  %v6216_v45 = vrot.slane %v6215_v44, 1 }
 0x3f1   : > { %v6617_v4 = vmul.f32 %v18261_v8, %v6189_v53  ;;  %v6683_v30 = vadd.f32 %v18270_v15, %v6615_v23  ;;  %v6684_v51 = vadd.f32 %v18270_v15, %v6616_v20  ;;  %v6746_v55 = vmax.f32 %v6682_v12, 0.0 }
 0x3f2   : > { %v6203_v13 = vmax.f32 %v6201_v61, %v6202_v17  ;;  %v6217_v5 = vmax.f32 %v6215_v44, %v6216_v45  ;;  %v6618_v49 = vmul.f32 %v18261_v8, %v6196_v59  ;;  %v6620_v46 = vmul.f32 %v18261_v8, %v6210_v7  ;;  %v18285_v9 = vpop.f32.mrb[12].mxu0  ;;  %v7276_v59 = vld [vmem:[#allocation3 + $0xc] sm:$0x1] }
 0x3f3   : > { %v6685_v57 = vadd.f32 %v18270_v15, %v6617_v4  ;;  %v6747_v41 = vmax.f32 %v6683_v30, 0.0  ;;  %v6748_v52 = vmax.f32 %v6684_v51, 0.0  ;;  %v13895_v42 = vpack.c.bf16 %v6746_v55, %v6746_v55  ;;  %v18288_v24 = vpop.f32.mrb[13].mxu0 }
 0x3f4   : > { %v6619_v28 = vmul.f32 %v18261_v8, %v6203_v13  ;;  %v6621_v14 = vmul.f32 %v18261_v8, %v6217_v5  ;;  %v6686_v32 = vadd.f32 %v18270_v15, %v6618_v49  ;;  %v6688_v39 = vadd.f32 %v18270_v15, %v6620_v46  ;;  %v18294_v35 = vpop.f32.mrb[14].mxu0 }
 0x3f5   : > { %v6749_v11 = vmax.f32 %v6685_v57, 0.0  ;;  %v13896_v58 = vpack.c.bf16 %v6747_v41, %v6747_v41  ;;  %v13897_v56 = vpack.c.bf16 %v6748_v52, %v6748_v52  ;;  %v7066_v27 = vunpack.c.l.b16 %v13895_v42  ;;  %v18296_v29 = vpop.f32.mrb[15].mxu0 }
 0x3f6   : > { %v6687_v40 = vadd.f32 %v18270_v15, %v6619_v28  ;;  %v6689_v37 = vadd.f32 %v18270_v15, %v6621_v14  ;;  %v6750_v31 = vmax.f32 %v6686_v32, 0.0  ;;  %v6752_v10 = vmax.f32 %v6688_v39, 0.0 }
 0x3f7   : > { %v13898_v34 = vpack.c.bf16 %v6749_v11, %v6749_v11  ;;  %v7067_v19 = vunpack.c.l.b16 %v13896_v58  ;;  %v7068_v62 = vunpack.c.l.b16 %v13897_v56  ;;  %v7130_v54 = vrot.slane %v7066_v27, 7 }
 0x3f8   : > { %v6751_v16 = vmax.f32 %v6687_v40, 0.0  ;;  %v6753_v1 = vmax.f32 %v6689_v37, 0.0  ;;  %v13899_v48 = vpack.c.bf16 %v6750_v31, %v6750_v31  ;;  %v13901_v47 = vpack.c.bf16 %v6752_v10, %v6752_v10 }
 0x3f9   : > { %v7069_v0 = vunpack.c.l.b16 %v13898_v34  ;;  %v7131_v61 = vrot.slane %v7067_v19, 6  ;;  %v7134_v6 = vrot.slane %v7068_v62, 5  ;;  %v5795_v44 = vmax.f32 %v18247_v43, %v18245_v36  ;;  %v7273_v34 = vld [vmem:[#allocation3 + $0x8] sm:$0xf] }
 0x3fa   : > { %v13900_v53 = vpack.c.bf16 %v6751_v16, %v6751_v16  ;;  %v7070_v23 = vunpack.c.l.b16 %v13899_v48  ;;  %v7072_v20 = vunpack.c.l.b16 %v13901_v47  ;;  %v13959_v12 = vpack.c.bf16 %v6753_v1, %v6753_v1  ;;  %v18302_v17 = vpop.f32.mrb[16].mxu0 }
 0x3fb   : > { %v7133_v7 = vsel %vm7132_vm0, %v7131_v61, %v7130_v54  ;;  %v7137_v45 = vrot.slane %v7069_v0, 4  ;;  %v5859_v4 = vcombine.high %v5795_v44, %v5795_v44  ;;  %v5866_v30 = vrot.slane %v5795_v44, %v18236_v60  ;;  %v18306_v51 = vpop.f32.mrb[17].mxu0 }
 0x3fc   : > { %v7136_v55 = vsel %vm7135_vm1, %v7134_v6, %v7133_v7  ;;  %v7071_v13 = vunpack.c.l.b16 %v13900_v53  ;;  %v7140_v5 = vrot.slane %v7070_v23, 3  ;;  %v7146_v36 = vrot.slane %v7072_v20, 1  ;;  %v18309_v43 = vpop.f32.mrb[18].mxu0  ;;  %v15922_v53 = vld [vmem:[#allocation9 + $0x40] sm:$0xff]  }
 0x3fd   : > { %v7139_v49 = vsel %vm7138_vm2, %v7137_v45, %v7136_v55  ;;  %v7277_v46 = vsel %vm16697_vm3, %v13959_v12, %v7276_v59  ;;  %v5873_v57 = vrot.slane %v5859_v4, %v18236_v60  ;;  %v5874_v41 = vcombine.high %v5866_v30, %v5866_v30  ;;  %v18315_v52 = vpop.f32.mrb[19].mxu0  ;;  %14852 = vmatprep.subr.bf16.mxu1 %v15922_v53 }
 0x3fe   : > { %v7142_v42 = vsel %vm7141_vm5, %v7140_v5, %v7139_v49  ;;  %v7143_v28 = vrot.slane %v7071_v13, 2  ;;  %7278 = vst [vmem:[#allocation3 + $0xc] sm:$0x1] %v7277_v46  ;;  %v6218_v14 = vsel %vm6161_vm15, %v5866_v30, -inf  ;;  %v5796_v32 = vmax.f32 %v18254_v33, %v18252_v2  ;;  %14853 = vmatpush3.bf16.msra.mxu1 %v15922_v53 }
 0x3ff   : > { %v5875_v39 = vcombine.high %v5873_v57, %v5873_v57  ;;  %v6219_v11 = vrot.slane %v6218_v14, 4  ;;  %v6225_v58 = vsel %vm6161_vm15, %v5874_v41, -inf  ;;  %v6232_v56 = vsel %vm6161_vm15, %v5873_v57, -inf }
 0x400   : > { %v7145_v27 = vsel %vm7144_vm6, %v7143_v28, %v7142_v42  ;;  %v6226_v40 = vrot.slane %v6225_v58, 4  ;;  %v6233_v37 = vrot.slane %v6232_v56, 4  ;;  %v5876_v31 = vcombine.high %v5796_v32, %v5796_v32 }
 0x401   : > { %v7148_v10 = vsel %vm7147_vm7, %v7146_v36, %v7145_v27  ;;  %v6220_v19 = vmax.f32 %v6218_v14, %v6219_v11  ;;  %v6239_v62 = vsel %vm6161_vm15, %v5875_v39, -inf  ;;  %v5883_v54 = vrot.slane %v5796_v32, %v18236_v60 }
 0x402   : > { %v7240_v2 = vpack.c.b16 %v7148_v10, %v7148_v10  ;;  %v6227_v33 = vmax.f32 %v6225_v58, %v6226_v40  ;;  %v6234_v16 = vmax.f32 %v6232_v56, %v6233_v37  ;;  %v6240_v1 = vrot.slane %v6239_v62, 4  ;;  %v18327_v48 = vpop.f32.mrb[20].mxu0 }
 0x403   : > { %v6221_v47 = vrot.slane %v6220_v19, 2  ;;  %v5890_v0 = vrot.slane %v5876_v31, %v18236_v60  ;;  %v5891_v61 = vcombine.high %v5883_v54, %v5883_v54  ;;  %v6246_v6 = vsel %vm6161_vm15, %v5883_v54, -inf  ;;  %v18331_v44 = vpop.f32.mrb[21].mxu0 }
 0x404   : > { %v7274_v20 = vsel %vm16724_vm8, %v7240_v2, %v7273_v34  ;;  %v6228_v12 = vrot.slane %v6227_v33, 2  ;;  %v6235_v59 = vrot.slane %v6234_v16, 2  ;;  %v6241_v7 = vmax.f32 %v6239_v62, %v6240_v1  ;;  %v18335_v45 = vpop.f32.mrb[22].mxu0 }
 0x405   : > { %7275 = vst [vmem:[#allocation3 + $0x8] sm:$0xf] %v7274_v20  ;;  %v6222_v4 = vmax.f32 %v6220_v19, %v6221_v47  ;;  %v5892_v30 = vcombine.high %v5890_v0, %v5890_v0  ;;  %v6247_v55 = vrot.slane %v6246_v6, 4  ;;  %v6253_v13 = vsel %vm6161_vm15, %v5891_v61, -inf  ;;  %v18338_v5 = vpop.f32.mrb[23].mxu0  ;;  %v15923_v47 = vld [vmem:[#allocation9 + $0x48] sm:$0xff]  }
 0x406   : > { %v6229_v36 = vmax.f32 %v6227_v33, %v6228_v12  ;;  %v6236_v49 = vmax.f32 %v6234_v16, %v6235_v59  ;;  %v6242_v46 = vrot.slane %v6241_v7, 2  ;;  %v6254_v57 = vrot.slane %v6253_v13, 4  ;;  %14854 = vmatprep.subr.bf16.mxu1 %v15923_v47 }
 0x407   : > { %v6223_v41 = vrot.slane %v6222_v4, 1  ;;  %v6248_v42 = vmax.f32 %v6246_v6, %v6247_v55  ;;  %v6260_v28 = vsel %vm6161_vm15, %v5890_v0, -inf  ;;  %v6267_v14 = vsel %vm6161_vm15, %v5892_v30, -inf  ;;  %14855 = vmatpush3.bf16.msra.mxu1 %v15923_v47 }
 0x408   : > { %v6230_v32 = vrot.slane %v6229_v36, 1  ;;  %v6237_v39 = vrot.slane %v6236_v49, 1  ;;  %v6243_v11 = vmax.f32 %v6241_v7, %v6242_v46  ;;  %v6255_v58 = vmax.f32 %v6253_v13, %v6254_v57 }
 0x409   : > { %v6224_v56 = vmax.f32 %v6222_v4, %v6223_v41  ;;  %v6249_v27 = vrot.slane %v6248_v42, 2  ;;  %v6261_v40 = vrot.slane %v6260_v28, 4  ;;  %v6268_v37 = vrot.slane %v6267_v14, 4 }
 0x40a   : > { %v6231_v31 = vmax.f32 %v6229_v36, %v6230_v32  ;;  %v6238_v10 = vmax.f32 %v6236_v49, %v6237_v39  ;;  %v6244_v34 = vrot.slane %v6243_v11, 1  ;;  %v6256_v19 = vrot.slane %v6255_v58, 2  ;;  %v18342_v62 = vpop.f32.mrb[24].mxu0 }
 0x40b   : > { %v6622_v54 = vmul.f32 %v18261_v8, %v6224_v56  ;;  %v6250_v2 = vmax.f32 %v6248_v42, %v6249_v27  ;;  %v6262_v33 = vmax.f32 %v6260_v28, %v6261_v40  ;;  %v6269_v16 = vmax.f32 %v6267_v14, %v6268_v37  ;;  %v18345_v1 = vpop.f32.mrb[25].mxu0 }
 0x40c   : > { %v6245_v0 = vmax.f32 %v6243_v11, %v6244_v34  ;;  %v6623_v61 = vmul.f32 %v18261_v8, %v6231_v31  ;;  %v6624_v6 = vmul.f32 %v18261_v8, %v6238_v10  ;;  %v6257_v53 = vmax.f32 %v6255_v58, %v6256_v19  ;;  %v18353_v36 = vpop.f32.mrb[26].mxu0 }
 0x40d   : > { %v6690_v20 = vadd.f32 %v18270_v15, %v6622_v54  ;;  %v6251_v12 = vrot.slane %v6250_v2, 1  ;;  %v6263_v59 = vrot.slane %v6262_v33, 2  ;;  %v6270_v7 = vrot.slane %v6269_v16, 2  ;;  %v18355_v42 = vpop.f32.mrb[27].mxu0 }
 0x40e   : > { %v6625_v4 = vmul.f32 %v18261_v8, %v6245_v0  ;;  %v6691_v30 = vadd.f32 %v18270_v15, %v6623_v61  ;;  %v6692_v55 = vadd.f32 %v18270_v15, %v6624_v6  ;;  %v6258_v13 = vrot.slane %v6257_v53, 1 }
 0x40f   : > { %v6754_v49 = vmax.f32 %v6690_v20, 0.0  ;;  %v6252_v46 = vmax.f32 %v6250_v2, %v6251_v12  ;;  %v6264_v57 = vmax.f32 %v6262_v33, %v6263_v59  ;;  %v6271_v41 = vmax.f32 %v6269_v16, %v6270_v7 }
 0x410   : > { %v6693_v28 = vadd.f32 %v18270_v15, %v6625_v4  ;;  %v6755_v14 = vmax.f32 %v6691_v30, 0.0  ;;  %v6756_v32 = vmax.f32 %v6692_v55, 0.0  ;;  %v6259_v39 = vmax.f32 %v6257_v53, %v6258_v13 }
 0x411   : > { %v13903_v11 = vpack.c.bf16 %v6754_v49, %v6754_v49  ;;  %v6265_v58 = vrot.slane %v6264_v57, 1  ;;  %v6272_v56 = vrot.slane %v6271_v41, 1  ;;  %v6626_v27 = vmul.f32 %v18261_v8, %v6252_v46 }
 0x412   : > { %v6757_v40 = vmax.f32 %v6693_v28, 0.0  ;;  %v13904_v37 = vpack.c.bf16 %v6755_v14, %v6755_v14  ;;  %v13905_v31 = vpack.c.bf16 %v6756_v32, %v6756_v32  ;;  %v6627_v10 = vmul.f32 %v18261_v8, %v6259_v39 }
 0x413   : > { %v7074_v34 = vunpack.c.l.b16 %v13903_v11  ;;  %v6266_v19 = vmax.f32 %v6264_v57, %v6265_v58  ;;  %v6273_v54 = vmax.f32 %v6271_v41, %v6272_v56  ;;  %v6694_v2 = vadd.f32 %v18270_v15, %v6626_v27  ;;  %v7282_v27 = vld [vmem:[#allocation3 + $0x14] sm:$0x1] }
 0x414   : > { %v13906_v33 = vpack.c.bf16 %v6757_v40, %v6757_v40  ;;  %v7075_v16 = vunpack.c.l.b16 %v13904_v37  ;;  %v7076_v47 = vunpack.c.l.b16 %v13905_v31  ;;  %v6695_v0 = vadd.f32 %v18270_v15, %v6627_v10 }
 0x415   : > { %v7149_v61 = vrot.slane %v7074_v34, 7  ;;  %v6628_v6 = vmul.f32 %v18261_v8, %v6266_v19  ;;  %v6629_v53 = vmul.f32 %v18261_v8, %v6273_v54  ;;  %v6758_v20 = vmax.f32 %v6694_v2, 0.0 }
 0x416   : > { %v7077_v12 = vunpack.c.l.b16 %v13906_v33  ;;  %v7150_v59 = vrot.slane %v7075_v16, 6  ;;  %v7152_v7 = vrot.slane %v7076_v47, 5  ;;  %v6759_v4 = vmax.f32 %v6695_v0, 0.0 }
 0x417   : > { %v6696_v30 = vadd.f32 %v18270_v15, %v6628_v6  ;;  %v6697_v55 = vadd.f32 %v18270_v15, %v6629_v53  ;;  %v13907_v13 = vpack.c.bf16 %v6758_v20, %v6758_v20  ;;  %v5797_v49 = vmax.f32 %v18265_v22, %v18263_v63 }
 0x418   : > { %v7151_v46 = vsel %vm7132_vm0, %v7150_v59, %v7149_v61  ;;  %v7154_v57 = vrot.slane %v7077_v12, 4  ;;  %v13908_v41 = vpack.c.bf16 %v6759_v4, %v6759_v4  ;;  %v5798_v28 = vmax.f32 %v18275_v18, %v18272_v38 }
 0x419   : > { %v7153_v14 = vsel %vm7135_vm1, %v7152_v7, %v7151_v46  ;;  %v6760_v32 = vmax.f32 %v6696_v30, 0.0  ;;  %v6761_v39 = vmax.f32 %v6697_v55, 0.0  ;;  %v7078_v11 = vunpack.c.l.b16 %v13907_v13 }
 0x41a   : > { %v7079_v58 = vunpack.c.l.b16 %v13908_v41  ;;  %v7155_v56 = vsel %vm7138_vm2, %v7154_v57, %v7153_v14  ;;  %v5893_v40 = vcombine.high %v5797_v49, %v5797_v49  ;;  %v5900_v37 = vrot.slane %v5797_v49, %v18236_v60  ;;  %v7279_v49 = vld [vmem:[#allocation3 + $0x10] sm:$0xf] }
 0x41b   : > { %v13909_v63 = vpack.c.bf16 %v6760_v32, %v6760_v32  ;;  %v7156_v22 = vrot.slane %v7078_v11, 3  ;;  %v13960_v31 = vpack.c.bf16 %v6761_v39, %v6761_v39  ;;  %v5910_v10 = vcombine.high %v5798_v28, %v5798_v28 }
 0x41c   : > { %v7158_v34 = vrot.slane %v7079_v58, 2  ;;  %v5907_v19 = vrot.slane %v5893_v40, %v18236_v60  ;;  %v5908_v38 = vcombine.high %v5900_v37, %v5900_v37  ;;  %v6274_v18 = vsel %vm6161_vm15, %v5900_v37, -inf }
 0x41d   : > { %v7080_v54 = vunpack.c.l.b16 %v13909_v63  ;;  %v7157_v2 = vsel %vm7141_vm5, %v7156_v22, %v7155_v56  ;;  %v7283_v33 = vsel %vm16697_vm3, %v13960_v31, %v7282_v27  ;;  %v6275_v16 = vrot.slane %v6274_v18, 4  ;;  %v15924_v63 = vld [vmem:[#allocation9 + $0x50] sm:$0xff]  }
 0x41e   : > { %v7159_v47 = vsel %vm7144_vm6, %v7158_v34, %v7157_v2  ;;  %7284 = vst [vmem:[#allocation3 + $0x14] sm:$0x1] %v7283_v33  ;;  %v5909_v0 = vcombine.high %v5907_v19, %v5907_v19  ;;  %v6281_v61 = vsel %vm6161_vm15, %v5908_v38, -inf  ;;  %v6288_v6 = vsel %vm6161_vm15, %v5907_v19, -inf  ;;  %14856 = vmatprep.subr.bf16.mxu1 %v15924_v63 }
 0x41f   : > { %v7160_v53 = vrot.slane %v7080_v54, 1  ;;  %v6276_v20 = vmax.f32 %v6274_v18, %v6275_v16  ;;  %v6282_v12 = vrot.slane %v6281_v61, 4  ;;  %v6289_v59 = vrot.slane %v6288_v6, 4  ;;  %14857 = vmatpush3.bf16.msra.mxu1 %v15924_v63 }
 0x420   : > { %v6295_v7 = vsel %vm6161_vm15, %v5909_v0, -inf  ;;  %v5917_v4 = vrot.slane %v5798_v28, %v18236_v60  ;;  %v5924_v30 = vrot.slane %v5910_v10, %v18236_v60  ;;  %v18387_v55 = vmax.f32 %v18288_v24, %v18285_v9 }
 0x421   : > { %v7161_v13 = vsel %vm7147_vm7, %v7160_v53, %v7159_v47  ;;  %v6277_v46 = vrot.slane %v6276_v20, 2  ;;  %v6283_v57 = vmax.f32 %v6281_v61, %v6282_v12  ;;  %v6290_v41 = vmax.f32 %v6288_v6, %v6289_v59 }
 0x422   : > { %v7242_v14 = vpack.c.b16 %v7161_v13, %v7161_v13  ;;  %v6296_v32 = vrot.slane %v6295_v7, 4  ;;  %v5925_v39 = vcombine.high %v5917_v4, %v5917_v4  ;;  %v5926_v11 = vcombine.high %v5924_v30, %v5924_v30  ;;  %v18397_v13 = vpop.f32.mrb[28].mxu0 }
 0x423   : > { %v6278_v58 = vmax.f32 %v6276_v20, %v6277_v46  ;;  %v6284_v56 = vrot.slane %v6283_v57, 2  ;;  %v6291_v27 = vrot.slane %v6290_v41, 2  ;;  %v6302_v28 = vsel %vm6161_vm15, %v5917_v4, -inf  ;;  %v15925_v20 = vld [vmem:[#allocation9 + $0x58] sm:$0xff]  }
 0x424   : > { %v7280_v40 = vsel %vm16724_vm8, %v7242_v14, %v7279_v49  ;;  %v6297_v9 = vmax.f32 %v6295_v7, %v6296_v32  ;;  %v6303_v24 = vrot.slane %v6302_v28, 4  ;;  %v6309_v37 = vsel %vm6161_vm15, %v5925_v39, -inf  ;;  %14858 = vmatprep.subr.bf16.mxu1 %v15925_v20 }
 0x425   : > { %7281 = vst [vmem:[#allocation3 + $0x10] sm:$0xf] %v7280_v40  ;;  %v6279_v22 = vrot.slane %v6278_v58, 1  ;;  %v6285_v31 = vmax.f32 %v6283_v57, %v6284_v56  ;;  %v6292_v10 = vmax.f32 %v6290_v41, %v6291_v27  ;;  %v6310_v34 = vrot.slane %v6309_v37, 4  ;;  %v18399_v41 = vpop.f32.mrb[29].mxu0  ;;  %14859 = vmatpush3.bf16.msra.mxu1 %v15925_v20 }
 0x426   : > { %v6298_v19 = vrot.slane %v6297_v9, 2  ;;  %v6304_v38 = vmax.f32 %v6302_v28, %v6303_v24  ;;  %v6316_v18 = vsel %vm6161_vm15, %v5924_v30, -inf  ;;  %v6323_v54 = vsel %vm6161_vm15, %v5926_v11, -inf }
 0x427   : > { %v6280_v2 = vmax.f32 %v6278_v58, %v6279_v22  ;;  %v6286_v33 = vrot.slane %v6285_v31, 1  ;;  %v6293_v16 = vrot.slane %v6292_v10, 1  ;;  %v6311_v47 = vmax.f32 %v6309_v37, %v6310_v34  ;;  %v18404_v58 = vpop.f32.mrb[30].mxu0 }
 0x428   : > { %v6299_v0 = vmax.f32 %v6297_v9, %v6298_v19  ;;  %v6305_v61 = vrot.slane %v6304_v38, 2  ;;  %v6317_v6 = vrot.slane %v6316_v18, 4  ;;  %v6324_v53 = vrot.slane %v6323_v54, 4  ;;  %v18409_v19 = vpop.f32.mrb[31].mxu0 }
 0x429   : > { %v6287_v12 = vmax.f32 %v6285_v31, %v6286_v33  ;;  %v6294_v59 = vmax.f32 %v6292_v10, %v6293_v16  ;;  %v6630_v7 = vmul.f32 %v18261_v8, %v6280_v2  ;;  %v6312_v4 = vrot.slane %v6311_v47, 2 }
 0x42a   : > { %v6300_v30 = vrot.slane %v6299_v0, 1  ;;  %v6306_v49 = vmax.f32 %v6304_v38, %v6305_v61  ;;  %v6318_v46 = vmax.f32 %v6316_v18, %v6317_v6  ;;  %v6325_v57 = vmax.f32 %v6323_v54, %v6324_v53 }
 0x42b   : > { %v6631_v14 = vmul.f32 %v18261_v8, %v6287_v12  ;;  %v6632_v32 = vmul.f32 %v18261_v8, %v6294_v59  ;;  %v6698_v39 = vadd.f32 %v18270_v15, %v6630_v7  ;;  %v6313_v11 = vmax.f32 %v6311_v47, %v6312_v4 }
 0x42c   : > { %v6301_v56 = vmax.f32 %v6299_v0, %v6300_v30  ;;  %v6307_v27 = vrot.slane %v6306_v49, 1  ;;  %v6319_v28 = vrot.slane %v6318_v46, 2  ;;  %v6326_v40 = vrot.slane %v6325_v57, 2 }
 0x42d   : > { %v6699_v9 = vadd.f32 %v18270_v15, %v6631_v14  ;;  %v6700_v24 = vadd.f32 %v18270_v15, %v6632_v32  ;;  %v6762_v37 = vmax.f32 %v6698_v39, 0.0  ;;  %v6314_v63 = vrot.slane %v6313_v11, 1 }
 0x42e   : > { %v6633_v22 = vmul.f32 %v18261_v8, %v6301_v56  ;;  %v6308_v31 = vmax.f32 %v6306_v49, %v6307_v27  ;;  %v6320_v10 = vmax.f32 %v6318_v46, %v6319_v28  ;;  %v6327_v34 = vmax.f32 %v6325_v57, %v6326_v40 }
 0x42f   : > { %v6763_v38 = vmax.f32 %v6699_v9, 0.0  ;;  %v6764_v18 = vmax.f32 %v6700_v24, 0.0  ;;  %v13911_v54 = vpack.c.bf16 %v6762_v37, %v6762_v37  ;;  %v6315_v2 = vmax.f32 %v6313_v11, %v6314_v63 }
 0x430   : > { %v6701_v33 = vadd.f32 %v18270_v15, %v6633_v22  ;;  %v6321_v16 = vrot.slane %v6320_v10, 1  ;;  %v6328_v47 = vrot.slane %v6327_v34, 1  ;;  %v6634_v0 = vmul.f32 %v18261_v8, %v6308_v31 }
 0x431   : > { %v13912_v61 = vpack.c.bf16 %v6763_v38, %v6763_v38  ;;  %v13913_v6 = vpack.c.bf16 %v6764_v18, %v6764_v18  ;;  %v7082_v53 = vunpack.c.l.b16 %v13911_v54  ;;  %v6635_v20 = vmul.f32 %v18261_v8, %v6315_v2 }
 0x432   : > { %v6765_v12 = vmax.f32 %v6701_v33, 0.0  ;;  %v6322_v59 = vmax.f32 %v6320_v10, %v6321_v16  ;;  %v6329_v7 = vmax.f32 %v6327_v34, %v6328_v47  ;;  %v6702_v4 = vadd.f32 %v18270_v15, %v6634_v0  ;;  %v7288_v47 = vld [vmem:[#allocation3 + $0x1c] sm:$0x1] }
 0x433   : > { %v7083_v30 = vunpack.c.l.b16 %v13912_v61  ;;  %v7084_v49 = vunpack.c.l.b16 %v13913_v6  ;;  %v7162_v46 = vrot.slane %v7082_v53, 7  ;;  %v6703_v57 = vadd.f32 %v18270_v15, %v6635_v20 }
 0x434   : > { %v13914_v14 = vpack.c.bf16 %v6765_v12, %v6765_v12  ;;  %v6636_v32 = vmul.f32 %v18261_v8, %v6322_v59  ;;  %v6637_v39 = vmul.f32 %v18261_v8, %v6329_v7  ;;  %v6766_v11 = vmax.f32 %v6702_v4, 0.0 }
 0x435   : > { %v7163_v56 = vrot.slane %v7083_v30, 6  ;;  %v7165_v27 = vrot.slane %v7084_v49, 5  ;;  %v6767_v28 = vmax.f32 %v6703_v57, 0.0  ;;  %v5927_v40 = vcombine.high %v18387_v55, %v18387_v55 }
 0x436   : > { %v7085_v9 = vunpack.c.l.b16 %v13914_v14  ;;  %v6704_v24 = vadd.f32 %v18270_v15, %v6636_v32  ;;  %v6705_v37 = vadd.f32 %v18270_v15, %v6637_v39  ;;  %v13915_v63 = vpack.c.bf16 %v6766_v11, %v6766_v11 }
 0x437   : > { %v7164_v22 = vsel %vm7132_vm0, %v7163_v56, %v7162_v46  ;;  %v13916_v31 = vpack.c.bf16 %v6767_v28, %v6767_v28  ;;  %v5934_v10 = vrot.slane %v18387_v55, %v18236_v60  ;;  %v5941_v34 = vrot.slane %v5927_v40, %v18236_v60  ;;  %v469_v56 = vld [vmem:[#allocation3 + $0x28] sm:$0x1] }
 0x438   : > { %v7166_v38 = vsel %vm7135_vm1, %v7165_v27, %v7164_v22  ;;  %v7167_v18 = vrot.slane %v7085_v9, 4  ;;  %v6768_v54 = vmax.f32 %v6704_v24, 0.0  ;;  %v6769_v2 = vmax.f32 %v6705_v37, 0.0 }
 0x439   : > { %v7086_v33 = vunpack.c.l.b16 %v13915_v63  ;;  %v7087_v16 = vunpack.c.l.b16 %v13916_v31  ;;  %v5942_v0 = vcombine.high %v5934_v10, %v5934_v10  ;;  %v5943_v61 = vcombine.high %v5941_v34, %v5941_v34 }
 0x43a   : > { %v13917_v6 = vpack.c.bf16 %v6768_v54, %v6768_v54  ;;  %v7168_v53 = vsel %vm7138_vm2, %v7167_v18, %v7166_v38  ;;  %v13961_v20 = vpack.c.bf16 %v6769_v2, %v6769_v2  ;;  %v6330_v12 = vsel %vm6161_vm15, %v5934_v10, -inf  ;;  %v7285_v10 = vld [vmem:[#allocation3 + $0x18] sm:$0xf] }
 0x43b   : > { %v7169_v59 = vrot.slane %v7086_v33, 3  ;;  %v7171_v55 = vrot.slane %v7087_v16, 2  ;;  %v6331_v7 = vrot.slane %v6330_v12, 4  ;;  %v6337_v4 = vsel %vm6161_vm15, %v5942_v0, -inf }
 0x43c   : > { %v7088_v30 = vunpack.c.l.b16 %v13917_v6  ;;  %v7289_v49 = vsel %vm16697_vm3, %v13961_v20, %v7288_v47  ;;  %v6338_v46 = vrot.slane %v6337_v4, 4  ;;  %v6344_v57 = vsel %vm6161_vm15, %v5941_v34, -inf }
 0x43d   : > { %v7170_v14 = vsel %vm7141_vm5, %v7169_v59, %v7168_v53  ;;  %7290 = vst [vmem:[#allocation3 + $0x1c] sm:$0x1] %v7289_v49  ;;  %v6332_v32 = vmax.f32 %v6330_v12, %v6331_v7  ;;  %v6345_v39 = vrot.slane %v6344_v57, 4  ;;  %v6351_v11 = vsel %vm6161_vm15, %v5943_v61, -inf }
 0x43e   : > { %v7172_v27 = vsel %vm7144_vm6, %v7171_v55, %v7170_v14  ;;  %v7173_v28 = vrot.slane %v7088_v30, 1  ;;  %v6339_v40 = vmax.f32 %v6337_v4, %v6338_v46  ;;  %v6352_v9 = vrot.slane %v6351_v11, 4  ;;  %v15926_v55 = vld [vmem:[#allocation9 + $0x60] sm:$0xff]  }
 0x43f   : > { %v6333_v24 = vrot.slane %v6332_v32, 2  ;;  %v6346_v37 = vmax.f32 %v6344_v57, %v6345_v39  ;;  %v5800_v63 = vmax.f32 %v18296_v29, %v18294_v35  ;;  %v18440_v22 = vmax.f32 %v18306_v51, %v18302_v17  ;;  %14860 = vmatprep.subr.bf16.mxu1 %v15926_v55 }
 0x440   : > { %v7174_v31 = vsel %vm7147_vm7, %v7173_v28, %v7172_v27  ;;  %v6340_v34 = vrot.slane %v6339_v40, 2  ;;  %v6353_v38 = vmax.f32 %v6351_v11, %v6352_v9  ;;  %v470_v18 = vsel %vm16697_vm3, 0, %v469_v56  ;;  %14861 = vmatpush3.bf16.msra.mxu1 %v15926_v55 }
 0x441   : > { %v7244_v54 = vpack.c.b16 %v7174_v31, %v7174_v31  ;;  %v6334_v2 = vmax.f32 %v6332_v32, %v6333_v24  ;;  %v6347_v33 = vrot.slane %v6346_v37, 2  ;;  %v5944_v16 = vcombine.high %v5800_v63, %v5800_v63  ;;  %471 = vst [vmem:[#allocation3 + $0x28] sm:$0x1] %v470_v18 }
 0x442   : > { %v6341_v47 = vmax.f32 %v6339_v40, %v6340_v34  ;;  %v6354_v0 = vrot.slane %v6353_v38, 2  ;;  %v5951_v35 = vrot.slane %v5800_v63, %v18236_v60  ;;  %v5961_v29 = vcombine.high %v18440_v22, %v18440_v22 }
 0x443   : > { %v7286_v17 = vsel %vm16724_vm8, %v7244_v54, %v7285_v10  ;;  %v6335_v51 = vrot.slane %v6334_v2, 1  ;;  %v6348_v61 = vmax.f32 %v6346_v37, %v6347_v33  ;;  %v5958_v6 = vrot.slane %v5944_v16, %v18236_v60 }
 0x444   : > { %7287 = vst [vmem:[#allocation3 + $0x18] sm:$0xf] %v7286_v17  ;;  %v6342_v53 = vrot.slane %v6341_v47, 1  ;;  %v6355_v20 = vmax.f32 %v6353_v38, %v6354_v0  ;;  %v5959_v12 = vcombine.high %v5951_v35, %v5951_v35  ;;  %v6358_v59 = vsel %vm6161_vm15, %v5951_v35, -inf }
 0x445   : > { %v6336_v7 = vmax.f32 %v6334_v2, %v6335_v51  ;;  %v6349_v4 = vrot.slane %v6348_v61, 1  ;;  %v5960_v30 = vcombine.high %v5958_v6, %v5958_v6  ;;  %v6359_v49 = vrot.slane %v6358_v59, 4 }
 0x446   : > { %v6343_v46 = vmax.f32 %v6341_v47, %v6342_v53  ;;  %v6356_v57 = vrot.slane %v6355_v20, 1  ;;  %v6365_v14 = vsel %vm6161_vm15, %v5959_v12, -inf  ;;  %v6372_v32 = vsel %vm6161_vm15, %v5958_v6, -inf }
 0x447   : > { %v6350_v39 = vmax.f32 %v6348_v61, %v6349_v4  ;;  %v6638_v11 = vmul.f32 %v18261_v8, %v6336_v7  ;;  %v6360_v56 = vmax.f32 %v6358_v59, %v6359_v49  ;;  %v6366_v27 = vrot.slane %v6365_v14, 4 }
 0x448   : > { %v6357_v28 = vmax.f32 %v6355_v20, %v6356_v57  ;;  %v6639_v40 = vmul.f32 %v18261_v8, %v6343_v46  ;;  %v6373_v9 = vrot.slane %v6372_v32, 4  ;;  %v6379_v24 = vsel %vm6161_vm15, %v5960_v30, -inf }
 0x449   : > { %v6640_v37 = vmul.f32 %v18261_v8, %v6350_v39  ;;  %v6706_v63 = vadd.f32 %v18270_v15, %v6638_v11  ;;  %v6361_v31 = vrot.slane %v6360_v56, 2  ;;  %v6367_v10 = vmax.f32 %v6365_v14, %v6366_v27 }
 0x44a   : > { %v6641_v34 = vmul.f32 %v18261_v8, %v6357_v28  ;;  %v6707_v38 = vadd.f32 %v18270_v15, %v6639_v40  ;;  %v6374_v18 = vmax.f32 %v6372_v32, %v6373_v9  ;;  %v6380_v54 = vrot.slane %v6379_v24, 4 }
 0x44b   : > { %v6708_v2 = vadd.f32 %v18270_v15, %v6640_v37  ;;  %v6770_v33 = vmax.f32 %v6706_v63, 0.0  ;;  %v6362_v16 = vmax.f32 %v6360_v56, %v6361_v31  ;;  %v6368_v47 = vrot.slane %v6367_v10, 2 }
 0x44c   : > { %v6709_v0 = vadd.f32 %v18270_v15, %v6641_v34  ;;  %v6771_v35 = vmax.f32 %v6707_v38, 0.0  ;;  %v6375_v17 = vrot.slane %v6374_v18, 2  ;;  %v6381_v51 = vmax.f32 %v6379_v24, %v6380_v54 }
 0x44d   : > { %v6772_v61 = vmax.f32 %v6708_v2, 0.0  ;;  %v13919_v6 = vpack.c.bf16 %v6770_v33, %v6770_v33  ;;  %v6363_v53 = vrot.slane %v6362_v16, 1  ;;  %v6369_v20 = vmax.f32 %v6367_v10, %v6368_v47 }
 0x44e   : > { %v6773_v12 = vmax.f32 %v6709_v0, 0.0  ;;  %v13920_v59 = vpack.c.bf16 %v6771_v35, %v6771_v35  ;;  %v6376_v55 = vmax.f32 %v6374_v18, %v6375_v17  ;;  %v6382_v7 = vrot.slane %v6381_v51, 2 }
 0x44f   : > { %v13921_v4 = vpack.c.bf16 %v6772_v61, %v6772_v61  ;;  %v7090_v30 = vunpack.c.l.b16 %v13919_v6  ;;  %v6364_v49 = vmax.f32 %v6362_v16, %v6363_v53  ;;  %v6370_v46 = vrot.slane %v6369_v20, 1 }
 0x450   : > { %v13922_v57 = vpack.c.bf16 %v6773_v12, %v6773_v12  ;;  %v7091_v14 = vunpack.c.l.b16 %v13920_v59  ;;  %v6377_v32 = vrot.slane %v6376_v55, 1  ;;  %v6383_v39 = vmax.f32 %v6381_v51, %v6382_v7 }
 0x451   : > { %v7092_v11 = vunpack.c.l.b16 %v13921_v4  ;;  %v7175_v56 = vrot.slane %v7090_v30, 7  ;;  %v6371_v27 = vmax.f32 %v6369_v20, %v6370_v46  ;;  %v6642_v28 = vmul.f32 %v18261_v8, %v6364_v49 }
 0x452   : > { %v7093_v40 = vunpack.c.l.b16 %v13922_v57  ;;  %v7176_v9 = vrot.slane %v7091_v14, 6  ;;  %v6378_v24 = vmax.f32 %v6376_v55, %v6377_v32  ;;  %v6384_v37 = vrot.slane %v6383_v39, 1 }
 0x453   : > { %v7178_v63 = vrot.slane %v7092_v11, 5  ;;  %v6643_v31 = vmul.f32 %v18261_v8, %v6371_v27  ;;  %v6710_v10 = vadd.f32 %v18270_v15, %v6642_v28  ;;  %v5968_v34 = vrot.slane %v18440_v22, %v18236_v60  ;;  %v7294_v11 = vld [vmem:[#allocation3 + $0x24] sm:$0x1] }
 0x454   : > { %v7177_v38 = vsel %vm7132_vm0, %v7176_v9, %v7175_v56  ;;  %v7180_v18 = vrot.slane %v7093_v40, 4  ;;  %v6385_v54 = vmax.f32 %v6383_v39, %v6384_v37  ;;  %v6644_v2 = vmul.f32 %v18261_v8, %v6378_v24  ;;  %v499_v24 = vld [vmem:[#allocation3 + $0x2c] sm:$0x1] }
 0x455   : > { %v7179_v33 = vsel %vm7135_vm1, %v7178_v63, %v7177_v38  ;;  %v6711_v16 = vadd.f32 %v18270_v15, %v6643_v31  ;;  %v6774_v47 = vmax.f32 %v6710_v10, 0.0  ;;  %v5975_v0 = vrot.slane %v5961_v29, %v18236_v60 }
 0x456   : > { %v6645_v35 = vmul.f32 %v18261_v8, %v6385_v54  ;;  %v6712_v17 = vadd.f32 %v18270_v15, %v6644_v2  ;;  %v7181_v51 = vsel %vm7138_vm2, %v7180_v18, %v7179_v33  ;;  %v5976_v61 = vcombine.high %v5968_v34, %v5968_v34 }
 0x457   : > { %v6775_v6 = vmax.f32 %v6711_v16, 0.0  ;;  %v13923_v53 = vpack.c.bf16 %v6774_v47, %v6774_v47  ;;  %v5977_v20 = vcombine.high %v5975_v0, %v5975_v0  ;;  %v6386_v12 = vsel %vm6161_vm15, %v5968_v34, -inf }
 0x458   : > { %v6713_v59 = vadd.f32 %v18270_v15, %v6645_v35  ;;  %v6776_v55 = vmax.f32 %v6712_v17, 0.0  ;;  %v6387_v7 = vrot.slane %v6386_v12, 4  ;;  %v6393_v4 = vsel %vm6161_vm15, %v5976_v61, -inf  ;;  %v7291_v35 = vld [vmem:[#allocation3 + $0x20] sm:$0xf] }
 0x459   : > { %v13924_v22 = vpack.c.bf16 %v6775_v6, %v6775_v6  ;;  %v7094_v29 = vunpack.c.l.b16 %v13923_v53  ;;  %v6394_v30 = vrot.slane %v6393_v4, 4  ;;  %v6400_v8 = vsel %vm6161_vm15, %v5975_v0, -inf }
 0x45a   : > { %v6777_v49 = vmax.f32 %v6713_v59, 0.0  ;;  %v13925_v46 = vpack.c.bf16 %v6776_v55, %v6776_v55  ;;  %v6388_v57 = vmax.f32 %v6386_v12, %v6387_v7  ;;  %v6401_v14 = vrot.slane %v6400_v8, 4 }
 0x45b   : > { %v7095_v32 = vunpack.c.l.b16 %v13924_v22  ;;  %v7182_v39 = vrot.slane %v7094_v29, 3  ;;  %v6395_v56 = vmax.f32 %v6393_v4, %v6394_v30  ;;  %v6407_v27 = vsel %vm6161_vm15, %v5977_v20, -inf }
 0x45c   : > { %v7096_v15 = vunpack.c.l.b16 %v13925_v46  ;;  %v13962_v28 = vpack.c.bf16 %v6777_v49, %v6777_v49  ;;  %v6389_v40 = vrot.slane %v6388_v57, 2  ;;  %v6402_v9 = vmax.f32 %v6400_v8, %v6401_v14  ;;  %v15927_v46 = vld [vmem:[#allocation9 + $0x68] sm:$0xff]  }
 0x45d   : > { %v7183_v37 = vsel %vm7141_vm5, %v7182_v39, %v7181_v51  ;;  %v7184_v63 = vrot.slane %v7095_v32, 2  ;;  %v6396_v31 = vrot.slane %v6395_v56, 2  ;;  %v6408_v10 = vrot.slane %v6407_v27, 4  ;;  %14862 = vmatprep.subr.bf16.mxu1 %v15927_v46 }
 0x45e   : > { %v7186_v34 = vrot.slane %v7096_v15, 1  ;;  %v7295_v38 = vsel %vm16697_vm3, %v13962_v28, %v7294_v11  ;;  %v6390_v18 = vmax.f32 %v6388_v57, %v6389_v40  ;;  %v6403_v54 = vrot.slane %v6402_v9, 2  ;;  %14863 = vmatpush3.bf16.msra.mxu1 %v15927_v46 }
 0x45f   : > { %v7185_v2 = vsel %vm7144_vm6, %v7184_v63, %v7183_v37  ;;  %7296 = vst [vmem:[#allocation3 + $0x24] sm:$0x1] %v7295_v38  ;;  %v6397_v33 = vmax.f32 %v6395_v56, %v6396_v31  ;;  %v6409_v16 = vmax.f32 %v6407_v27, %v6408_v10  ;;  %v500_v47 = vsel %vm16702_vm4, 0, %v499_v24  ;;  %v18519_v56 = vld [vmem:[%s19711_s5 + $0x1] ss:$0 sm:$0xff]  ;;  %v15928_v38 = vld [vmem:[#allocation9 + $0x70] sm:$0xff]  }
 0x460   : > { %v7187_v0 = vsel %vm7147_vm7, %v7186_v34, %v7185_v2  ;;  %v6391_v17 = vrot.slane %v6390_v18, 1  ;;  %v6404_v51 = vmax.f32 %v6402_v9, %v6403_v54  ;;  %501 = vst [vmem:[#allocation3 + $0x2c] sm:$0x1] %v500_v47  ;;  %v5802_v61 = vmax.f32 %v18315_v52, %v18309_v43  ;;  %14864 = vmatprep.subr.bf16.mxu1 %v15928_v38 }
 0x461   : > { %v7246_v6 = vpack.c.b16 %v7187_v0, %v7187_v0  ;;  %v6398_v53 = vrot.slane %v6397_v33, 1  ;;  %v6410_v20 = vrot.slane %v6409_v16, 2  ;;  %v18495_v12 = vmax.f32 %v18331_v44, %v18327_v48  ;;  %v18505_v48 = vld [vmem:[%s19711_s5] ss:$0 sm:$0xff] }
 0x462   : > { %v6392_v59 = vmax.f32 %v6390_v18, %v6391_v17  ;;  %v6405_v55 = vrot.slane %v6404_v51, 1  ;;  %v5978_v7 = vcombine.high %v5802_v61, %v5802_v61  ;;  %v5985_v4 = vrot.slane %v5802_v61, %v18236_v60  ;;  %14865 = vmatpush3.bf16.msra.mxu1 %v15928_v38 }
 0x463   : > { %v7292_v22 = vsel %vm16724_vm8, %v7246_v6, %v7291_v35  ;;  %v6399_v29 = vmax.f32 %v6397_v33, %v6398_v53  ;;  %v6411_v30 = vmax.f32 %v6409_v16, %v6410_v20  ;;  %v5995_v43 = vcombine.high %v18495_v12, %v18495_v12  ;;  %v15929_v16 = vld [vmem:[#allocation9 + $0x78] sm:$0xff]  }
 0x464   : > { %7293 = vst [vmem:[#allocation3 + $0x20] sm:$0xf] %v7292_v22  ;;  %v6406_v52 = vmax.f32 %v6404_v51, %v6405_v55  ;;  %v6646_v44 = vmul.f32 %v18505_v48, %v6392_v59  ;;  %v5992_v8 = vrot.slane %v5978_v7, %v18236_v60  ;;  %v5993_v49 = vcombine.high %v5985_v4, %v5985_v4 }
 0x465   : > { %v6412_v57 = vrot.slane %v6411_v30, 1  ;;  %v6647_v14 = vmul.f32 %v18505_v48, %v6399_v29  ;;  %v6414_v32 = vsel %vm6161_vm15, %v5985_v4, -inf  ;;  %v18513_v39 = vrot.slane %v18495_v12, %v18236_v60  ;;  %14866 = vmatprep.subr.bf16.mxu1 %v15929_v16  ;;  %v15930_v4 = vld [vmem:[#allocation9] sm:$0xff]  }
 0x466   : > { %v6648_v11 = vmul.f32 %v18505_v48, %v6406_v52  ;;  %v6714_v27 = vadd.f32 %v18519_v56, %v6646_v44  ;;  %v5994_v15 = vcombine.high %v5992_v8, %v5992_v8  ;;  %v6415_v28 = vrot.slane %v6414_v32, 4  ;;  %14867 = vmatpush3.bf16.msra.mxu1 %v15929_v16 }
 0x467   : > { %v6413_v40 = vmax.f32 %v6411_v30, %v6412_v57  ;;  %v6715_v9 = vadd.f32 %v18519_v56, %v6647_v14  ;;  %v6421_v24 = vsel %vm6161_vm15, %v5993_v49, -inf  ;;  %v6428_v37 = vsel %vm6161_vm15, %v5992_v8, -inf  ;;  %14876 = vmatprep.subr.bf16.mxu1 %v15930_v4 }
 0x468   : > { %v6716_v63 = vadd.f32 %v18519_v56, %v6648_v11  ;;  %v6778_v31 = vmax.f32 %v6714_v27, 0.0  ;;  %v6416_v10 = vmax.f32 %v6414_v32, %v6415_v28  ;;  %v6422_v34 = vrot.slane %v6421_v24, 4 }
 0x469   : > { %v6649_v18 = vmul.f32 %v18505_v48, %v6413_v40  ;;  %v6779_v54 = vmax.f32 %v6715_v9, 0.0  ;;  %v6429_v2 = vrot.slane %v6428_v37, 4  ;;  %v6435_v33 = vsel %vm6161_vm15, %v5994_v15, -inf }
 0x46a   : > { %v6780_v47 = vmax.f32 %v6716_v63, 0.0  ;;  %v13927_v0 = vpack.c.bf16 %v6778_v31, %v6778_v31  ;;  %v6417_v35 = vrot.slane %v6416_v10, 2  ;;  %v6423_v17 = vmax.f32 %v6421_v24, %v6422_v34 }
 0x46b   : > { %v6717_v51 = vadd.f32 %v18519_v56, %v6649_v18  ;;  %v13928_v61 = vpack.c.bf16 %v6779_v54, %v6779_v54  ;;  %v6430_v6 = vmax.f32 %v6428_v37, %v6429_v2  ;;  %v6436_v53 = vrot.slane %v6435_v33, 4 }
 0x46c   : > { %v13929_v20 = vpack.c.bf16 %v6780_v47, %v6780_v47  ;;  %v7098_v59 = vunpack.c.l.b16 %v13927_v0  ;;  %v6418_v55 = vmax.f32 %v6416_v10, %v6417_v35  ;;  %v6424_v7 = vrot.slane %v6423_v17, 2 }
 0x46d   : > { %v6781_v22 = vmax.f32 %v6717_v51, 0.0  ;;  %v7099_v29 = vunpack.c.l.b16 %v13928_v61  ;;  %v6431_v30 = vrot.slane %v6430_v6, 2  ;;  %v6437_v52 = vmax.f32 %v6435_v33, %v6436_v53 }
 0x46e   : > { %v7100_v44 = vunpack.c.l.b16 %v13929_v20  ;;  %v7188_v8 = vrot.slane %v7098_v59, 7  ;;  %v6419_v49 = vrot.slane %v6418_v55, 1  ;;  %v6425_v46 = vmax.f32 %v6423_v17, %v6424_v7 }
 0x46f   : > { %v13930_v57 = vpack.c.bf16 %v6781_v22, %v6781_v22  ;;  %v7189_v14 = vrot.slane %v7099_v29, 6  ;;  %v6432_v32 = vmax.f32 %v6430_v6, %v6431_v30  ;;  %v6438_v11 = vrot.slane %v6437_v52, 2 }
 0x470   : > { %v7191_v27 = vrot.slane %v7100_v44, 5  ;;  %v6420_v15 = vmax.f32 %v6418_v55, %v6419_v49  ;;  %v6426_v28 = vrot.slane %v6425_v46, 1  ;;  %v6009_v40 = vrot.slane %v5995_v43, %v18236_v60 }
 0x471   : > { %v7101_v9 = vunpack.c.l.b16 %v13930_v57  ;;  %v7190_v24 = vsel %vm7132_vm0, %v7189_v14, %v7188_v8  ;;  %v6433_v37 = vrot.slane %v6432_v32, 1  ;;  %v6439_v63 = vmax.f32 %v6437_v52, %v6438_v11 }
 0x472   : > { %v7192_v31 = vsel %vm7135_vm1, %v7191_v27, %v7190_v24  ;;  %v6427_v10 = vmax.f32 %v6425_v46, %v6426_v28  ;;  %v6650_v34 = vmul.f32 %v18505_v48, %v6420_v15  ;;  %v6010_v38 = vcombine.high %v18513_v39, %v18513_v39  ;;  %v7300_v24 = vld [vmem:[#allocation3 + $0x2c] sm:$0x1] }
 0x473   : > { %v7193_v18 = vrot.slane %v7101_v9, 4  ;;  %v6434_v54 = vmax.f32 %v6432_v32, %v6433_v37  ;;  %v6440_v2 = vrot.slane %v6439_v63, 1  ;;  %v6011_v33 = vcombine.high %v6009_v40, %v6009_v40 }
 0x474   : > { %v6651_v12 = vmul.f32 %v18505_v48, %v6427_v10  ;;  %v6718_v43 = vadd.f32 %v18519_v56, %v6650_v34  ;;  %v6442_v16 = vsel %vm6161_vm15, %v18513_v39, -inf  ;;  %v6449_v47 = vsel %vm6161_vm15, %v6010_v38, -inf }
 0x475   : > { %v6441_v0 = vmax.f32 %v6439_v63, %v6440_v2  ;;  %v6652_v35 = vmul.f32 %v18505_v48, %v6434_v54  ;;  %v7194_v17 = vsel %vm7138_vm2, %v7193_v18, %v7192_v31  ;;  %v6443_v51 = vrot.slane %v6442_v16, 4  ;;  %v472_v18 = vld [vmem:[#allocation3 + $0x30] sm:$0x1] }
 0x476   : > { %v6719_v61 = vadd.f32 %v18519_v56, %v6651_v12  ;;  %v6782_v6 = vmax.f32 %v6718_v43, 0.0  ;;  %v6450_v53 = vrot.slane %v6449_v47, 4  ;;  %v6456_v20 = vsel %vm6161_vm15, %v6009_v40, -inf  ;;  %v502_v43 = vld [vmem:[#allocation3 + $0x34] sm:$0x1] }
 0x477   : > { %v6653_v59 = vmul.f32 %v18505_v48, %v6441_v0  ;;  %v6720_v55 = vadd.f32 %v18519_v56, %v6652_v35  ;;  %v6444_v7 = vmax.f32 %v6442_v16, %v6443_v51  ;;  %v6457_v39 = vrot.slane %v6456_v20, 4 }
 0x478   : > { %v6783_v4 = vmax.f32 %v6719_v61, 0.0  ;;  %v13931_v22 = vpack.c.bf16 %v6782_v6, %v6782_v6  ;;  %v6451_v29 = vmax.f32 %v6449_v47, %v6450_v53  ;;  %v6463_v30 = vsel %vm6161_vm15, %v6011_v33, -inf }
 0x479   : > { %v6721_v52 = vadd.f32 %v18519_v56, %v6653_v59  ;;  %v6784_v44 = vmax.f32 %v6720_v55, 0.0  ;;  %v6445_v8 = vrot.slane %v6444_v7, 2  ;;  %v6458_v49 = vmax.f32 %v6456_v20, %v6457_v39  ;;  %v475_v20 = vld [vmem:[#allocation3 + $0x38] sm:$0x1]  ;;  %v7297_v59 = vld [vmem:[#allocation3 + $0x28] sm:$0xf] }
 0x47a   : > { %v13932_v46 = vpack.c.bf16 %v6783_v4, %v6783_v4  ;;  %v7102_v57 = vunpack.c.l.b16 %v13931_v22  ;;  %v6452_v14 = vrot.slane %v6451_v29, 2  ;;  %v6464_v32 = vrot.slane %v6463_v30, 4 }
 0x47b   : > { %v6785_v11 = vmax.f32 %v6721_v52, 0.0  ;;  %v13933_v27 = vpack.c.bf16 %v6784_v44, %v6784_v44  ;;  %v6446_v15 = vmax.f32 %v6444_v7, %v6445_v8  ;;  %v6459_v28 = vrot.slane %v6458_v49, 2 }
 0x47c   : > { %v7103_v40 = vunpack.c.l.b16 %v13932_v46  ;;  %v7195_v9 = vrot.slane %v7102_v57, 3  ;;  %v6453_v37 = vmax.f32 %v6451_v29, %v6452_v14  ;;  %v6465_v63 = vmax.f32 %v6463_v30, %v6464_v32 }
 0x47d   : > { %v7104_v31 = vunpack.c.l.b16 %v13933_v27  ;;  %v13963_v10 = vpack.c.bf16 %v6785_v11, %v6785_v11  ;;  %v6447_v34 = vrot.slane %v6446_v15, 1  ;;  %v6460_v38 = vmax.f32 %v6458_v49, %v6459_v28 }
 0x47e   : > { %v7196_v54 = vsel %vm7141_vm5, %v7195_v9, %v7194_v17  ;;  %v7197_v2 = vrot.slane %v7103_v40, 2  ;;  %v6454_v33 = vrot.slane %v6453_v37, 1  ;;  %v6466_v12 = vrot.slane %v6465_v63, 2 }
 0x47f   : > { %v7199_v16 = vrot.slane %v7104_v31, 1  ;;  %v7301_v47 = vsel %vm16697_vm3, %v13963_v10, %v7300_v24  ;;  %v6448_v0 = vmax.f32 %v6446_v15, %v6447_v34  ;;  %v6461_v35 = vrot.slane %v6460_v38, 1 }
 0x480   : > { %v7198_v51 = vsel %vm7144_vm6, %v7197_v2, %v7196_v54  ;;  %7302 = vst [vmem:[#allocation3 + $0x2c] sm:$0x1] %v7301_v47  ;;  %v6455_v61 = vmax.f32 %v6453_v37, %v6454_v33  ;;  %v6467_v6 = vmax.f32 %v6465_v63, %v6466_v12  ;;  %v473_v53 = vsel %vm16697_vm3, 0, %v472_v18 }
 0x481   : > { %v7200_v17 = vsel %vm7147_vm7, %v7199_v16, %v7198_v51  ;;  %v6462_v55 = vmax.f32 %v6460_v38, %v6461_v35  ;;  %v6654_v7 = vmul.f32 %v18505_v48, %v6448_v0  ;;  %474 = vst [vmem:[#allocation3 + $0x30] sm:$0x1] %v473_v53  ;;  %v503_v39 = vsel %vm16702_vm4, 0, %v502_v43 }
 0x482   : > { %v7248_v4 = vpack.c.b16 %v7200_v17, %v7200_v17  ;;  %v6468_v22 = vrot.slane %v6467_v6, 1  ;;  %v6655_v29 = vmul.f32 %v18505_v48, %v6455_v61  ;;  %504 = vst [vmem:[#allocation3 + $0x34] sm:$0x1] %v503_v39  ;;  %v5804_v30 = vmax.f32 %v18338_v5, %v18335_v45 }
 0x483   : > { %v6656_v52 = vmul.f32 %v18505_v48, %v6462_v55  ;;  %v6722_v44 = vadd.f32 %v18519_v56, %v6654_v7  ;;  %v5805_v8 = vmax.f32 %v18345_v1, %v18342_v62  ;;  %v476_v49 = vsel %vm16697_vm3, 0, %v475_v20 }
 0x484   : > { %v7298_v46 = vsel %vm16724_vm8, %v7248_v4, %v7297_v59  ;;  %v6469_v57 = vmax.f32 %v6467_v6, %v6468_v22  ;;  %v6723_v14 = vadd.f32 %v18519_v56, %v6655_v29  ;;  %v6012_v32 = vcombine.high %v5804_v30, %v5804_v30  ;;  %477 = vst [vmem:[#allocation3 + $0x38] sm:$0x1] %v476_v49 }
 0x485   : > { %7299 = vst [vmem:[#allocation3 + $0x28] sm:$0xf] %v7298_v46  ;;  %v6724_v45 = vadd.f32 %v18519_v56, %v6656_v52  ;;  %v6786_v5 = vmax.f32 %v6722_v44, 0.0  ;;  %v6019_v11 = vrot.slane %v5804_v30, %v18236_v60  ;;  %v6029_v27 = vcombine.high %v5805_v8, %v5805_v8 }
 0x486   : > { %v6657_v62 = vmul.f32 %v18505_v48, %v6469_v57  ;;  %v6787_v1 = vmax.f32 %v6723_v14, 0.0  ;;  %v6026_v15 = vrot.slane %v6012_v32, %v18236_v60  ;;  %v6036_v28 = vrot.slane %v5805_v8, %v18236_v60 }
 0x487   : > { %v6788_v40 = vmax.f32 %v6724_v45, 0.0  ;;  %v13935_v9 = vpack.c.bf16 %v6786_v5, %v6786_v5  ;;  %v6027_v24 = vcombine.high %v6019_v11, %v6019_v11  ;;  %v6470_v37 = vsel %vm6161_vm15, %v6019_v11, -inf }
 0x488   : > { %v6725_v63 = vadd.f32 %v18519_v56, %v6657_v62  ;;  %v13936_v31 = vpack.c.bf16 %v6787_v1, %v6787_v1  ;;  %v6028_v10 = vcombine.high %v6026_v15, %v6026_v15  ;;  %v6471_v34 = vrot.slane %v6470_v37, 4 }
 0x489   : > { %v13937_v38 = vpack.c.bf16 %v6788_v40, %v6788_v40  ;;  %v7106_v18 = vunpack.c.l.b16 %v13935_v9  ;;  %v6477_v54 = vsel %vm6161_vm15, %v6027_v24, -inf  ;;  %v6484_v2 = vsel %vm6161_vm15, %v6026_v15, -inf }
 0x48a   : > { %v6789_v33 = vmax.f32 %v6725_v63, 0.0  ;;  %v7107_v12 = vunpack.c.l.b16 %v13936_v31  ;;  %v6472_v43 = vmax.f32 %v6470_v37, %v6471_v34  ;;  %v6478_v16 = vrot.slane %v6477_v54, 4 }
 0x48b   : > { %v7108_v47 = vunpack.c.l.b16 %v13937_v38  ;;  %v7201_v0 = vrot.slane %v7106_v18, 7  ;;  %v6485_v35 = vrot.slane %v6484_v2, 4  ;;  %v6491_v51 = vsel %vm6161_vm15, %v6028_v10, -inf }
 0x48c   : > { %v13938_v61 = vpack.c.bf16 %v6789_v33, %v6789_v33  ;;  %v7202_v6 = vrot.slane %v7107_v12, 6  ;;  %v6473_v53 = vrot.slane %v6472_v43, 2  ;;  %v6479_v20 = vmax.f32 %v6477_v54, %v6478_v16 }
 0x48d   : > { %v7204_v17 = vrot.slane %v7108_v47, 5  ;;  %v6486_v59 = vmax.f32 %v6484_v2, %v6485_v35  ;;  %v6492_v55 = vrot.slane %v6491_v51, 4  ;;  %v6043_v7 = vrot.slane %v6029_v27, %v18236_v60 }
 0x48e   : > { %v7109_v39 = vunpack.c.l.b16 %v13938_v61  ;;  %v7203_v4 = vsel %vm7132_vm0, %v7202_v6, %v7201_v0  ;;  %v6474_v22 = vmax.f32 %v6472_v43, %v6473_v53  ;;  %v6480_v29 = vrot.slane %v6479_v20, 2 }
 0x48f   : > { %v7205_v30 = vsel %vm7135_vm1, %v7204_v17, %v7203_v4  ;;  %v6487_v52 = vrot.slane %v6486_v59, 2  ;;  %v6493_v44 = vmax.f32 %v6491_v51, %v6492_v55  ;;  %v6044_v8 = vcombine.high %v6036_v28, %v6036_v28 }
 0x490   : > { %v7206_v49 = vrot.slane %v7109_v39, 4  ;;  %v6475_v46 = vrot.slane %v6474_v22, 1  ;;  %v6481_v57 = vmax.f32 %v6479_v20, %v6480_v29  ;;  %v6045_v14 = vcombine.high %v6043_v7, %v6043_v7 }
 0x491   : > { %v6488_v32 = vmax.f32 %v6486_v59, %v6487_v52  ;;  %v6494_v45 = vrot.slane %v6493_v44, 2  ;;  %v6498_v5 = vsel %vm6161_vm15, %v6036_v28, -inf  ;;  %v6505_v11 = vsel %vm6161_vm15, %v6044_v8, -inf }
 0x492   : > { %v6476_v27 = vmax.f32 %v6474_v22, %v6475_v46  ;;  %v6482_v62 = vrot.slane %v6481_v57, 1  ;;  %v7207_v1 = vsel %vm7138_vm2, %v7206_v49, %v7205_v30  ;;  %v6499_v15 = vrot.slane %v6498_v5, 4 }
 0x493   : > { %v6489_v40 = vrot.slane %v6488_v32, 1  ;;  %v6495_v9 = vmax.f32 %v6493_v44, %v6494_v45  ;;  %v6506_v24 = vrot.slane %v6505_v11, 4  ;;  %v6512_v37 = vsel %vm6161_vm15, %v6043_v7, -inf }
 0x494   : > { %v6483_v63 = vmax.f32 %v6481_v57, %v6482_v62  ;;  %v6658_v31 = vmul.f32 %v18505_v48, %v6476_v27  ;;  %v6500_v10 = vmax.f32 %v6498_v5, %v6499_v15  ;;  %v6513_v34 = vrot.slane %v6512_v37, 4  ;;  %v7306_v62 = vld [vmem:[#allocation3 + $0x34] sm:$0x1] }
 0x495   : > { %v6490_v38 = vmax.f32 %v6488_v32, %v6489_v40  ;;  %v6496_v18 = vrot.slane %v6495_v9, 1  ;;  %v6507_v28 = vmax.f32 %v6505_v11, %v6506_v24  ;;  %v6519_v54 = vsel %vm6161_vm15, %v6045_v14, -inf }
 0x496   : > { %v6659_v2 = vmul.f32 %v18505_v48, %v6483_v63  ;;  %v6726_v33 = vadd.f32 %v18519_v56, %v6658_v31  ;;  %v6501_v12 = vrot.slane %v6500_v10, 2  ;;  %v6514_v43 = vmax.f32 %v6512_v37, %v6513_v34  ;;  %v505_v31 = vld [vmem:[#allocation3 + $0x3c] sm:$0x1] }
 0x497   : > { %v6497_v16 = vmax.f32 %v6495_v9, %v6496_v18  ;;  %v6660_v47 = vmul.f32 %v18505_v48, %v6490_v38  ;;  %v6508_v0 = vrot.slane %v6507_v28, 2  ;;  %v6520_v35 = vrot.slane %v6519_v54, 4 }
 0x498   : > { %v6727_v51 = vadd.f32 %v18519_v56, %v6659_v2  ;;  %v6790_v61 = vmax.f32 %v6726_v33, 0.0  ;;  %v6502_v6 = vmax.f32 %v6500_v10, %v6501_v12  ;;  %v6515_v53 = vrot.slane %v6514_v43, 2 }
 0x499   : > { %v6661_v20 = vmul.f32 %v18505_v48, %v6497_v16  ;;  %v6728_v17 = vadd.f32 %v18519_v56, %v6660_v47  ;;  %v6509_v59 = vmax.f32 %v6507_v28, %v6508_v0  ;;  %v6521_v55 = vmax.f32 %v6519_v54, %v6520_v35  ;;  %v7303_v0 = vld [vmem:[#allocation3 + $0x30] sm:$0xf] }
 0x49a   : > { %v6791_v7 = vmax.f32 %v6727_v51, 0.0  ;;  %v13939_v39 = vpack.c.bf16 %v6790_v61, %v6790_v61  ;;  %v6503_v4 = vrot.slane %v6502_v6, 1  ;;  %v6516_v22 = vmax.f32 %v6514_v43, %v6515_v53 }
 0x49b   : > { %v6729_v29 = vadd.f32 %v18519_v56, %v6661_v20  ;;  %v6792_v30 = vmax.f32 %v6728_v17, 0.0  ;;  %v6510_v52 = vrot.slane %v6509_v59, 1  ;;  %v6522_v44 = vrot.slane %v6521_v55, 2 }
 0x49c   : > { %v13940_v8 = vpack.c.bf16 %v6791_v7, %v6791_v7  ;;  %v7110_v49 = vunpack.c.l.b16 %v13939_v39  ;;  %v6504_v46 = vmax.f32 %v6502_v6, %v6503_v4  ;;  %v6517_v57 = vrot.slane %v6516_v22, 1 }
 0x49d   : > { %v6793_v14 = vmax.f32 %v6729_v29, 0.0  ;;  %v13941_v32 = vpack.c.bf16 %v6792_v30, %v6792_v30  ;;  %v6511_v45 = vmax.f32 %v6509_v59, %v6510_v52  ;;  %v6523_v5 = vmax.f32 %v6521_v55, %v6522_v44 }
 0x49e   : > { %v7111_v11 = vunpack.c.l.b16 %v13940_v8  ;;  %v7208_v27 = vrot.slane %v7110_v49, 3  ;;  %v6518_v15 = vmax.f32 %v6516_v22, %v6517_v57  ;;  %v6662_v40 = vmul.f32 %v18505_v48, %v6504_v46 }
 0x49f   : > { %v7112_v9 = vunpack.c.l.b16 %v13941_v32  ;;  %v13964_v24 = vpack.c.bf16 %v6793_v14, %v6793_v14  ;;  %v6524_v37 = vrot.slane %v6523_v5, 1  ;;  %v6663_v63 = vmul.f32 %v18505_v48, %v6511_v45 }
 0x4a0   : > { %v7209_v10 = vsel %vm7141_vm5, %v7208_v27, %v7207_v1  ;;  %v7210_v34 = vrot.slane %v7111_v11, 2  ;;  %v6664_v38 = vmul.f32 %v18505_v48, %v6518_v15  ;;  %v6730_v18 = vadd.f32 %v18519_v56, %v6662_v40 }
 0x4a1   : > { %v7212_v28 = vrot.slane %v7112_v9, 1  ;;  %v7307_v54 = vsel %vm16697_vm3, %v13964_v24, %v7306_v62  ;;  %v6525_v2 = vmax.f32 %v6523_v5, %v6524_v37  ;;  %v6731_v33 = vadd.f32 %v18519_v56, %v6663_v63 }
 0x4a2   : > { %v7211_v12 = vsel %vm7144_vm6, %v7210_v34, %v7209_v10  ;;  %7308 = vst [vmem:[#allocation3 + $0x34] sm:$0x1] %v7307_v54  ;;  %v6732_v43 = vadd.f32 %v18519_v56, %v6664_v38  ;;  %v6794_v16 = vmax.f32 %v6730_v18, 0.0  ;;  %v506_v1 = vsel %vm16702_vm4, 0, %v505_v31 }
 0x4a3   : > { %v7213_v47 = vsel %vm7147_vm7, %v7212_v28, %v7211_v12  ;;  %v6665_v35 = vmul.f32 %v18505_v48, %v6525_v2  ;;  %v6795_v51 = vmax.f32 %v6731_v33, 0.0  ;;  %507 = vst [vmem:[#allocation3 + $0x3c] sm:$0x1] %v506_v1  ;;  %v5806_v61 = vmax.f32 %v18355_v42, %v18353_v36 }
 0x4a4   : > { %v7250_v6 = vpack.c.b16 %v7213_v47, %v7213_v47  ;;  %v6796_v53 = vmax.f32 %v6732_v43, 0.0  ;;  %v13943_v20 = vpack.c.bf16 %v6794_v16, %v6794_v16  ;;  %v5807_v17 = vmax.f32 %v18399_v41, %v18397_v13 }
 0x4a5   : > { %v6733_v59 = vadd.f32 %v18519_v56, %v6665_v35  ;;  %v13944_v55 = vpack.c.bf16 %v6795_v51, %v6795_v51  ;;  %v6046_v7 = vcombine.high %v5806_v61, %v5806_v61  ;;  %v6053_v39 = vrot.slane %v5806_v61, %v18236_v60 }
 0x4a6   : > { %v7304_v4 = vsel %vm16724_vm8, %v7250_v6, %v7303_v0  ;;  %v13945_v22 = vpack.c.bf16 %v6796_v53, %v6796_v53  ;;  %v7114_v29 = vunpack.c.l.b16 %v13943_v20  ;;  %v6063_v30 = vcombine.high %v5807_v17, %v5807_v17 }
 0x4a7   : > { %7305 = vst [vmem:[#allocation3 + $0x30] sm:$0xf] %v7304_v4  ;;  %v6797_v36 = vmax.f32 %v6733_v59, 0.0  ;;  %v7115_v42 = vunpack.c.l.b16 %v13944_v55  ;;  %v6060_v52 = vrot.slane %v6046_v7, %v18236_v60  ;;  %v6061_v44 = vcombine.high %v6053_v39, %v6053_v39 }
 0x4a8   : > { %v7116_v8 = vunpack.c.l.b16 %v13945_v22  ;;  %v7214_v13 = vrot.slane %v7114_v29, 7  ;;  %v6526_v41 = vsel %vm6161_vm15, %v6053_v39, -inf  ;;  %v6070_v49 = vrot.slane %v5807_v17, %v18236_v60 }
 0x4a9   : > { %v13946_v46 = vpack.c.bf16 %v6797_v36, %v6797_v36  ;;  %v7215_v57 = vrot.slane %v7115_v42, 6  ;;  %v6062_v14 = vcombine.high %v6060_v52, %v6060_v52  ;;  %v6527_v32 = vrot.slane %v6526_v41, 4 }
 0x4aa   : > { %v7217_v45 = vrot.slane %v7116_v8, 5  ;;  %v6533_v5 = vsel %vm6161_vm15, %v6061_v44, -inf  ;;  %v6540_v11 = vsel %vm6161_vm15, %v6060_v52, -inf  ;;  %v6077_v27 = vrot.slane %v6063_v30, %v18236_v60 }
 0x4ab   : > { %v7117_v62 = vunpack.c.l.b16 %v13946_v46  ;;  %v7216_v15 = vsel %vm7132_vm0, %v7215_v57, %v7214_v13  ;;  %v6528_v40 = vmax.f32 %v6526_v41, %v6527_v32  ;;  %v6534_v9 = vrot.slane %v6533_v5, 4 }
 0x4ac   : > { %v7218_v24 = vsel %vm7135_vm1, %v7217_v45, %v7216_v15  ;;  %v6541_v37 = vrot.slane %v6540_v11, 4  ;;  %v6547_v63 = vsel %vm6161_vm15, %v6062_v14, -inf  ;;  %v6078_v31 = vcombine.high %v6070_v49, %v6070_v49 }
 0x4ad   : > { %v7219_v10 = vrot.slane %v7117_v62, 4  ;;  %v6529_v34 = vrot.slane %v6528_v40, 2  ;;  %v6535_v38 = vmax.f32 %v6533_v5, %v6534_v9  ;;  %v6548_v18 = vrot.slane %v6547_v63, 4 }
 0x4ae   : > { %v6542_v28 = vmax.f32 %v6540_v11, %v6541_v37  ;;  %v6079_v54 = vcombine.high %v6077_v27, %v6077_v27  ;;  %v6554_v2 = vsel %vm6161_vm15, %v6070_v49, -inf  ;;  %v6561_v33 = vsel %vm6161_vm15, %v6078_v31, -inf }
 0x4af   : > { %v6530_v12 = vmax.f32 %v6528_v40, %v6529_v34  ;;  %v6536_v43 = vrot.slane %v6535_v38, 2  ;;  %v6549_v16 = vmax.f32 %v6547_v63, %v6548_v18  ;;  %v18633_v1 = vsel %vm7138_vm2, %v7219_v10, %v7218_v24 }
 0x4b0   : > { %v6543_v47 = vrot.slane %v6542_v28, 2  ;;  %v6555_v0 = vrot.slane %v6554_v2, 4  ;;  %v6562_v35 = vrot.slane %v6561_v33, 4  ;;  %v6568_v51 = vsel %vm6161_vm15, %v6077_v27, -inf }
 0x4b1   : > { %v6531_v61 = vrot.slane %v6530_v12, 1  ;;  %v6537_v6 = vmax.f32 %v6535_v38, %v6536_v43  ;;  %v6550_v53 = vrot.slane %v6549_v16, 2  ;;  %v6569_v20 = vrot.slane %v6568_v51, 4 }
 0x4b2   : > { %v6544_v17 = vmax.f32 %v6542_v28, %v6543_v47  ;;  %v6556_v59 = vmax.f32 %v6554_v2, %v6555_v0  ;;  %v6563_v55 = vmax.f32 %v6561_v33, %v6562_v35  ;;  %v6575_v7 = vsel %vm6161_vm15, %v6079_v54, -inf }
 0x4b3   : > { %v6532_v39 = vmax.f32 %v6530_v12, %v6531_v61  ;;  %v6538_v4 = vrot.slane %v6537_v6, 1  ;;  %v6551_v22 = vmax.f32 %v6549_v16, %v6550_v53  ;;  %v6570_v29 = vmax.f32 %v6568_v51, %v6569_v20 }
 0x4b4   : > { %v6545_v30 = vrot.slane %v6544_v17, 1  ;;  %v6557_v36 = vrot.slane %v6556_v59, 2  ;;  %v6564_v42 = vrot.slane %v6563_v55, 2  ;;  %v6576_v52 = vrot.slane %v6575_v7, 4 }
 0x4b5   : > { %v6539_v44 = vmax.f32 %v6537_v6, %v6538_v4  ;;  %v6552_v8 = vrot.slane %v6551_v22, 1  ;;  %v6666_v13 = vmul.f32 %v18505_v48, %v6532_v39  ;;  %v6571_v41 = vrot.slane %v6570_v29, 2  ;;  %v7312_v6 = vld [vmem:[#allocation3 + $0x3c] sm:$0x1] }
 0x4b6   : > { %v6546_v49 = vmax.f32 %v6544_v17, %v6545_v30  ;;  %v6558_v46 = vmax.f32 %v6556_v59, %v6557_v36  ;;  %v6565_v57 = vmax.f32 %v6563_v55, %v6564_v42  ;;  %v6577_v14 = vmax.f32 %v6575_v7, %v6576_v52  ;;  %v478_v36 = vld [vmem:[#allocation3 + $0x40] sm:$0x1]  ;;  %v508_v42 = vld [vmem:[#allocation3 + $0x44] sm:$0x1] }
 0x4b7   : > { %v6553_v32 = vmax.f32 %v6551_v22, %v6552_v8  ;;  %v6667_v45 = vmul.f32 %v18505_v48, %v6539_v44  ;;  %v6734_v5 = vadd.f32 %v18519_v56, %v6666_v13  ;;  %v6572_v11 = vmax.f32 %v6570_v29, %v6571_v41 }
 0x4b8   : > { %v6668_v27 = vmul.f32 %v18505_v48, %v6546_v49  ;;  %v6559_v62 = vrot.slane %v6558_v46, 1  ;;  %v6566_v15 = vrot.slane %v6565_v57, 1  ;;  %v6578_v40 = vrot.slane %v6577_v14, 2  ;;  %v454_v49 = vld [vmem:[#allocation3] sm:$0x1] }
 0x4b9   : > { %v6669_v9 = vmul.f32 %v18505_v48, %v6553_v32  ;;  %v6735_v24 = vadd.f32 %v18519_v56, %v6667_v45  ;;  %v6798_v37 = vmax.f32 %v6734_v5, 0.0  ;;  %v6573_v63 = vrot.slane %v6572_v11, 1  ;;  %v484_v45 = vld [vmem:[#allocation3 + $0x4] sm:$0x1]  ;;  %v7309_v5 = vld [vmem:[#allocation3 + $0x38] sm:$0xf] }
 0x4ba   : > { %v6736_v31 = vadd.f32 %v18519_v56, %v6668_v27  ;;  %v6560_v10 = vmax.f32 %v6558_v46, %v6559_v62  ;;  %v6567_v34 = vmax.f32 %v6565_v57, %v6566_v15  ;;  %v6579_v38 = vmax.f32 %v6577_v14, %v6578_v40 }
 0x4bb   : > { %v6737_v18 = vadd.f32 %v18519_v56, %v6669_v9  ;;  %v6799_v28 = vmax.f32 %v6735_v24, 0.0  ;;  %v13947_v54 = vpack.c.bf16 %v6798_v37, %v6798_v37  ;;  %v6574_v2 = vmax.f32 %v6572_v11, %v6573_v63  ;;  %v18667_v24 = vld [vmem:[#allocation3 + $0x8] sm:$0xf] }
 0x4bc   : > { %v6800_v33 = vmax.f32 %v6736_v31, 0.0  ;;  %v6580_v12 = vrot.slane %v6579_v38, 1  ;;  %v6670_v43 = vmul.f32 %v18505_v48, %v6560_v10  ;;  %v6671_v16 = vmul.f32 %v18505_v48, %v6567_v34 }
 0x4bd   : > { %v6801_v47 = vmax.f32 %v6737_v18, 0.0  ;;  %v13948_v0 = vpack.c.bf16 %v6799_v28, %v6799_v28  ;;  %v7118_v35 = vunpack.c.l.b16 %v13947_v54  ;;  %v6672_v51 = vmul.f32 %v18505_v48, %v6574_v2 }
 0x4be   : > { %v13949_v61 = vpack.c.bf16 %v6800_v33, %v6800_v33  ;;  %v6581_v53 = vmax.f32 %v6579_v38, %v6580_v12  ;;  %v6738_v20 = vadd.f32 %v18519_v56, %v6670_v43  ;;  %v6739_v17 = vadd.f32 %v18519_v56, %v6671_v16 }
 0x4bf   : > { %v7119_v59 = vunpack.c.l.b16 %v13948_v0  ;;  %v7221_v55 = vrot.slane %v7118_v35, 3  ;;  %v13965_v7 = vpack.c.bf16 %v6801_v47, %v6801_v47  ;;  %v6740_v39 = vadd.f32 %v18519_v56, %v6672_v51 }
 0x4c0   : > { %v7120_v4 = vunpack.c.l.b16 %v13949_v61  ;;  %v6673_v22 = vmul.f32 %v18505_v48, %v6581_v53  ;;  %v6802_v29 = vmax.f32 %v6738_v20, 0.0  ;;  %v6803_v30 = vmax.f32 %v6739_v17, 0.0  ;;  %v18682_v17 = vld [vmem:[#allocation3 + $0xc] sm:$0x1] }
 0x4c1   : > { %v7222_v52 = vsel %vm7141_vm5, %v7221_v55, %v18633_v1  ;;  %v7223_v44 = vrot.slane %v7119_v59, 2  ;;  %v7313_v8 = vsel %vm16697_vm3, %v13965_v7, %v7312_v6  ;;  %v6804_v13 = vmax.f32 %v6740_v39, 0.0 }
 0x4c2   : > { %v7225_v41 = vrot.slane %v7120_v4, 1  ;;  %7314 = vst [vmem:[#allocation3 + $0x3c] sm:$0x1] %v7313_v8  ;;  %v6741_v57 = vadd.f32 %v18519_v56, %v6673_v22  ;;  %v479_v14 = vsel %vm16697_vm3, 0, %v478_v36  ;;  %v509_v32 = vsel %vm16702_vm4, 0, %v508_v42 }
 0x4c3   : > { %v7224_v46 = vsel %vm7144_vm6, %v7223_v44, %v7222_v52  ;;  %v13951_v11 = vpack.c.bf16 %v6802_v29, %v6802_v29  ;;  %v13952_v27 = vpack.c.bf16 %v6803_v30, %v6803_v30  ;;  %480 = vst [vmem:[#allocation3 + $0x40] sm:$0x1] %v479_v14  ;;  %510 = vst [vmem:[#allocation3 + $0x44] sm:$0x1] %v509_v32  ;;  %v455_v9 = vsel %vm16697_vm3, 0, %v454_v49 }
 0x4c4   : > { %v7226_v1 = vsel %vm7147_vm7, %v7225_v41, %v7224_v46  ;;  %v13953_v15 = vpack.c.bf16 %v6804_v13, %v6804_v13  ;;  %v5808_v40 = vmax.f32 %v18409_v19, %v18404_v58  ;;  %456 = vst [vmem:[#allocation3] sm:$0x1] %v455_v9  ;;  %v485_v37 = vsel %vm16702_vm4, 0, %v484_v45 }
 0x4c5   : > { %v7252_v62 = vpack.c.b16 %v7226_v1, %v7226_v1  ;;  %v6805_v31 = vmax.f32 %v6741_v57, 0.0  ;;  %486 = vst [vmem:[#allocation3 + $0x4] sm:$0x1] %v485_v37  ;;  %v7122_v38 = vunpack.c.l.b16 %v13951_v11  ;;  %v7123_v58 = vunpack.c.l.b16 %v13952_v27 }
 0x4c6   : > { %v6080_v10 = vcombine.high %v5808_v40, %v5808_v40  ;;  %v6087_v34 = vrot.slane %v5808_v40, %v18236_v60  ;;  %v7368_v19 = vshrl.u32 %v18667_v24, 16  ;;  %v7371_v18 = vshll.u32 %v18667_v24, 16 }
 0x4c7   : > { %v7310_v63 = vsel %vm16724_vm8, %v7252_v62, %v7309_v5  ;;  %v7124_v28 = vunpack.c.l.b16 %v13953_v15  ;;  %v18678_v47 = vpack.c.bf16 %v6805_v31, %v6805_v31  ;;  %v7227_v61 = vrot.slane %v7122_v38, 7  ;;  %v18694_v62 = vld [vmem:[#allocation3 + $0x10] sm:$0xf] }
 0x4c8   : > { %7311 = vst [vmem:[#allocation3 + $0x38] sm:$0xf] %v7310_v63  ;;  %v6094_v54 = vrot.slane %v6080_v10, %v18236_v60  ;;  %v6095_v2 = vcombine.high %v6087_v34, %v6087_v34  ;;  %v6582_v33 = vsel %vm6161_vm15, %v6087_v34, -inf  ;;  %v7370_v43 = vrot.slane %v7368_v19, 4 }
 0x4c9   : > { %v6583_v12 = vrot.slane %v6582_v33, 4  ;;  %v7373_v16 = vrot.slane %v7371_v18, 5  ;;  %v7228_v60 = vrot.slane %v7123_v58, 6  ;;  %v7230_v59 = vrot.slane %v7124_v28, 5 }
 0x4ca   : > { %v6096_v0 = vcombine.high %v6094_v54, %v6094_v54  ;;  %v6589_v35 = vsel %vm6161_vm15, %v6095_v2, -inf  ;;  %v6596_v51 = vsel %vm6161_vm15, %v6094_v54, -inf  ;;  %v7377_v8 = vshll.u32 %v18682_v17, 16 }
 0x4cb   : > { %v6584_v6 = vmax.f32 %v6582_v33, %v6583_v12  ;;  %v6590_v53 = vrot.slane %v6589_v35, 4  ;;  %v6597_v20 = vrot.slane %v6596_v51, 4  ;;  %v18685_v7 = vld [vmem:[#allocation3] sm:$0xf]  ;;  %v7374_v39 = vor.u32 %v7373_v16, %v7370_v43  ;;  %v18702_v12 = vld [vmem:[#allocation3 + $0x18] sm:$0xf] }
 0x4cc   : > { %v6603_v55 = vsel %vm6161_vm15, %v6096_v0, -inf  ;;  %v18687_v36 = vld [vmem:[#allocation3 + $0x4] sm:$0x1]  ;;  %v7354_v42 = vshrl.u32 %v18685_v7, 16  ;;  %v7357_v52 = vshll.u32 %v18685_v7, 16  ;;  %v7125_v57 = vunpack.c.l.b16 %v18678_v47 }
 0x4cd   : > { %v6585_v4 = vrot.slane %v6584_v6, 2  ;;  %v6591_v22 = vmax.f32 %v6589_v35, %v6590_v53  ;;  %v6598_v29 = vmax.f32 %v6596_v51, %v6597_v20  ;;  %v6604_v30 = vrot.slane %v6603_v55, 4  ;;  %v18704_v43 = vld [vmem:[#allocation3 + $0x14] sm:$0x1] }
 0x4ce   : > { %v7363_v44 = vshll.u32 %v18687_v36, 16  ;;  %v7356_v14 = vrot.slane %v7354_v42, 4  ;;  %v7359_v32 = vrot.slane %v7357_v52, 5  ;;  %v7375_v45 = vrot.slane %v7374_v39, 4  ;;  %v18719_v42 = vld [vmem:[#allocation3 + $0x1c] sm:$0x1] }
 0x4cf   : > { %v6586_v13 = vmax.f32 %v6584_v6, %v6585_v4  ;;  %v6592_v41 = vrot.slane %v6591_v22, 2  ;;  %v6599_v49 = vrot.slane %v6598_v29, 2  ;;  %v6605_v46 = vmax.f32 %v6603_v55, %v6604_v30 }
 0x4d0   : > { %v7229_v15 = vsel %vm7132_vm0, %v7228_v60, %v7227_v61  ;;  %v7360_v40 = vor.u32 %v7359_v32, %v7356_v14  ;;  %v7365_v9 = vrot.slane %v7363_v44, 5  ;;  %v7379_v37 = vrot.slane %v7377_v8, 5  ;;  %v18725_v32 = vld [vmem:[#allocation3 + $0x20] sm:$0xf] }
 0x4d1   : > { %v6587_v1 = vrot.slane %v6586_v13, 1  ;;  %v6593_v5 = vmax.f32 %v6591_v22, %v6592_v41  ;;  %v6600_v11 = vmax.f32 %v6598_v29, %v6599_v49  ;;  %v6606_v27 = vrot.slane %v6605_v46, 2 }
 0x4d2   : > { %v7361_v38 = vrot.slane %v7360_v40, 4  ;;  %v7380_v58 = vsel %vm16748_vm11, %v7375_v45, %v7379_v37  ;;  %v7382_v19 = vshrl.u32 %v18694_v62, 16  ;;  %v7385_v18 = vshll.u32 %v18694_v62, 16  ;;  %v7318_v40 = vld [vmem:[#allocation3 + $0x44] sm:$0x1] }
 0x4d3   : > { %v6588_v63 = vmax.f32 %v6586_v13, %v6587_v1  ;;  %v6594_v31 = vrot.slane %v6593_v5, 1  ;;  %v6601_v10 = vrot.slane %v6600_v11, 1  ;;  %v6607_v34 = vmax.f32 %v6605_v46, %v6606_v27  ;;  %v16144_v13 = vld [vmem:[%s19711_s5 + $0x1] ss:$0 sm:$0xff] }
 0x4d4   : > { %v7231_v16 = vsel %vm7135_vm1, %v7230_v59, %v7229_v15  ;;  %v7366_v47 = vsel %vm16748_vm11, %v7361_v38, %v7365_v9  ;;  %v7384_v0 = vrot.slane %v7382_v19, 4  ;;  %v7387_v35 = vrot.slane %v7385_v18, 5  ;;  %v16143_v59 = vld [vmem:[%s19711_s5] ss:$0 sm:$0xff] }
 0x4d5   : > { %v6595_v28 = vmax.f32 %v6593_v5, %v6594_v31  ;;  %v6602_v54 = vmax.f32 %v6600_v11, %v6601_v10  ;;  %v6608_v2 = vrot.slane %v6607_v34, 1  ;;  %v6674_v33 = vmul.f32 %v18505_v48, %v6588_v63  ;;  %v18731_v63 = vld [vmem:[#allocation3 + $0x24] sm:$0x1]  ;;  %v18734_v19 = vld [vmem:[#allocation3 + $0x28] sm:$0xf] }
 0x4d6   : > { %v13603_v20 = vcombine.low %v7366_v47, %v7380_v58  ;;  %v7388_v60 = vor.u32 %v7387_v35, %v7384_v0  ;;  %v7391_v55 = vshll.u32 %v18704_v43, 16  ;;  %v7396_v39 = vshrl.u32 %v18702_v12, 16 }
 0x4d7   : > { %v6609_v51 = vmax.f32 %v6607_v34, %v6608_v2  ;;  %v6675_v61 = vmul.f32 %v18505_v48, %v6595_v28  ;;  %v6676_v6 = vmul.f32 %v18505_v48, %v6602_v54  ;;  %v6742_v53 = vadd.f32 %v18519_v56, %v6674_v33  ;;  %v18736_v54 = vld [vmem:[#allocation3 + $0x2c] sm:$0x1] }
 0x4d8   : > { %v7232_v48 = vrot.slane %v7125_v57, 4  ;;  %14868 = vmatprep.mubr.bf16.mxu1 %v13603_v20  ;;  %v7389_v52 = vrot.slane %v7388_v60, 4  ;;  %v7398_v44 = vrot.slane %v7396_v39, 4  ;;  %v7399_v8 = vshll.u32 %v18702_v12, 16  ;;  %v15931_v39 = vld [vmem:[#allocation9 + $0x8] sm:$0xff]  }
 0x4d9   : > { %v6677_v4 = vmul.f32 %v16143_v59, %v6609_v51  ;;  %v6743_v22 = vadd.f32 %v18519_v56, %v6675_v61  ;;  %v6744_v29 = vadd.f32 %v18519_v56, %v6676_v6  ;;  %v6806_v30 = vmax.f32 %v6742_v53, 0.0  ;;  %v18743_v51 = vld [vmem:[#allocation3 + $0x30] sm:$0xf] }
 0x4da   : > { %v7393_v56 = vrot.slane %v7391_v55, 5  ;;  %v7401_v45 = vrot.slane %v7399_v8, 5  ;;  %v7405_v1 = vshll.u32 %v18719_v42, 16  ;;  %v7233_v15 = vsel %vm7138_vm2, %v7232_v48, %v7231_v16 }
 0x4db   : > { %v6745_v41 = vadd.f32 %v16144_v13, %v6677_v4  ;;  %v6807_v49 = vmax.f32 %v6743_v22, 0.0  ;;  %v6808_v46 = vmax.f32 %v6744_v29, 0.0  ;;  %v13955_v14 = vpack.c.bf16 %v6806_v30, %v6806_v30  ;;  %v18751_v22 = vld [vmem:[#allocation3 + $0x38] sm:$0xf]  ;;  %v7315_v30 = vld [vmem:[#allocation3 + $0x40] sm:$0xf] }
 0x4dc   : > { %v7394_v9 = vsel %vm16748_vm11, %v7389_v52, %v7393_v56  ;;  %v7402_v37 = vor.u32 %v7401_v45, %v7398_v44  ;;  %v7410_v31 = vshrl.u32 %v18725_v32, 16  ;;  %v7407_v28 = vrot.slane %v7405_v1, 5  ;;  %v18758_v56 = vld [vmem:[#allocation3 + $0x3c] sm:$0x1] }
 0x4dd   : > { %v6809_v57 = vmax.f32 %v6745_v41, 0.0  ;;  %v13956_v5 = vpack.c.bf16 %v6807_v49, %v6807_v49  ;;  %v13957_v11 = vpack.c.bf16 %v6808_v46, %v6808_v46  ;;  %v7126_v27 = vunpack.c.l.b16 %v13955_v14  ;;  %v18755_v41 = vld [vmem:[#allocation3 + $0x34] sm:$0x1] }
 0x4de   : > { %v7403_v18 = vrot.slane %v7402_v37, 4  ;;  %v7412_v2 = vrot.slane %v7410_v31, 4  ;;  %v7413_v33 = vshll.u32 %v18725_v32, 16  ;;  %v7419_v35 = vshll.u32 %v18731_v63, 16  ;;  %v16145_v46 = vld [vmem:[#allocation9] sm:$0xff]  }
 0x4df   : > { %v7127_v10 = vunpack.c.l.b16 %v13956_v5  ;;  %v7128_v34 = vunpack.c.l.b16 %v13957_v11  ;;  %v7234_v38 = vrot.slane %v7126_v27, 3  ;;  %v13966_v58 = vpack.c.bf16 %v6809_v57, %v6809_v57  ;;  %v15932_v5 = vld [vmem:[#allocation9 + $0x10] sm:$0xff]  }
 0x4e0   : > { %v7408_v6 = vsel %vm16748_vm11, %v7403_v18, %v7407_v28  ;;  %v7415_v53 = vrot.slane %v7413_v33, 5  ;;  %v7424_v20 = vshrl.u32 %v18734_v19, 16  ;;  %v7427_v59 = vshll.u32 %v18734_v19, 16 }
 0x4e1   : > { %v7235_v16 = vsel %vm7141_vm5, %v7234_v38, %v7233_v15  ;;  %v7236_v47 = vrot.slane %v7127_v10, 2  ;;  %v7319_v0 = vsel %vm16697_vm3, %v13966_v58, %v7318_v40  ;;  %v7238_v61 = vrot.slane %v7128_v34, 1 }
 0x4e2   : > { %7320 = vst [vmem:[#allocation3 + $0x44] sm:$0x1] %v7319_v0  ;;  %v13604_v55 = vcombine.low %v7394_v9, %v7408_v6  ;;  %v7433_v4 = vshll.u32 %v18736_v54, 16  ;;  %v7416_v48 = vor.u32 %v7415_v53, %v7412_v2  ;;  %v7426_v52 = vrot.slane %v7424_v20, 4  ;;  %v15933_v2 = vld [vmem:[#allocation9 + $0x18] sm:$0xff]   ;;  %v15934_v6 = vld [vmem:[#allocation9 + $0x20] sm:$0xff]  }
 0x4e3   : > { %v7237_v60 = vsel %vm7144_vm6, %v7236_v47, %v7235_v16  ;;  %v7438_v44 = vshrl.u32 %v18743_v51, 16  ;;  %v7429_v13 = vrot.slane %v7427_v59, 5  ;;  %v7441_v49 = vshll.u32 %v18743_v51, 16  ;;  %v15936_v59 = vld [vmem:[#allocation9 + $0x30] sm:$0xff]  }
 0x4e4   : > { %v7239_v29 = vsel %vm7147_vm7, %v7238_v61, %v7237_v60  ;;  %14869 = vmatmul.mubr.bf16.vlgmr.msra.gmra.mrb[0].mxu1 %v13604_v55  ;;  %v7417_v14 = vrot.slane %v7416_v48, 4  ;;  %v7452_v1 = vshrl.u32 %v18751_v22, 16  ;;  %v7455_v15 = vshll.u32 %v18751_v22, 16  ;;  %v7749_v48 = vld [vmem:[#allocation3 + $0x8] sm:$0xe] }
 0x4e5   : > { %v7254_v8 = vpack.c.b16 %v7239_v29, %v7239_v29  ;;  %14877 = vmatpush3.bf16.msra.mxu1 %v16145_v46  ;;  %v7440_v45 = vrot.slane %v7438_v44, 4  ;;  %v7430_v11 = vor.u32 %v7429_v13, %v7426_v52  ;;  %v7443_v27 = vrot.slane %v7441_v49, 5  ;;  %v15939_v29 = vld [vmem:[#allocation9 + $0x80] sm:$0xff]   ;;  %v15943_v49 = vld [vmem:[#allocation9 + $0x90] sm:$0xff]  }
 0x4e6   : > { %14878 = vmatprep.subr.bf16.mxu1 %v15931_v39  ;;  %v7421_v40 = vrot.slane %v7419_v35, 5  ;;  %v7435_v9 = vrot.slane %v7433_v4, 5  ;;  %v7447_v37 = vshll.u32 %v18755_v41, 16  ;;  %v7454_v31 = vrot.slane %v7452_v1, 4  ;;  %v15938_v4 = vld [vmem:[#allocation9 + $0x38] sm:$0xff]   ;;  %v15947_v1 = vld [vmem:[#allocation9 + $0xa8] sm:$0xff]  }
 0x4e7   : > { %v7316_v57 = vsel %vm16724_vm8, %v7254_v8, %v7315_v30  ;;  %v7431_v10 = vrot.slane %v7430_v11, 4  ;;  %v7444_v34 = vor.u32 %v7443_v27, %v7440_v45  ;;  %v7457_v38 = vrot.slane %v7455_v15, 5  ;;  %v7748_v30 = vld [vmem:[#allocation3] sm:$0xe]  ;;  %v7751_v11 = vld [vmem:[#allocation3 + $0x18] sm:$0xe] }
 0x4e8   : > { %7317 = vst [vmem:[#allocation3 + $0x40] sm:$0xf] %v7316_v57  ;;  %v7461_v58 = vshll.u32 %v18758_v56, 16  ;;  %v7422_v18 = vsel %vm16748_vm11, %v7417_v14, %v7421_v40  ;;  %v7449_v0 = vrot.slane %v7447_v37, 5  ;;  %v13615_v55 = vcombine.low %v18685_v7, %v18667_v24  ;;  %v15942_v7 = vld [vmem:[#allocation9 + $0x88] sm:$0xff]   ;;  %v15949_v27 = vld [vmem:[#allocation9 + $0xb8] sm:$0xff]  }
 0x4e9   : > { %14879 = vmatpush3.bf16.msra.mxu1 %v15931_v39  ;;  %v7436_v28 = vsel %vm16748_vm11, %v7431_v10, %v7435_v9  ;;  %v7445_v33 = vrot.slane %v7444_v34, 4  ;;  %v7458_v16 = vor.u32 %v7457_v38, %v7454_v31  ;;  %v15935_v39 = vld [vmem:[#allocation9 + $0x28] sm:$0xff]   ;;  %v13616_v24 = vcombine.low %v18694_v62, %v18702_v12  ;;  %v481_v12 = vld [vmem:[#allocation3 + $0x48] sm:$0x1]  ;;  %v511_v57 = vld [vmem:[#allocation3 + $0x4c] sm:$0x1] }
 0x4ea   : > { %14880 = vmatprep.subr.bf16.mxu1 %v15932_v5  ;;  %v13605_v47 = vcombine.low %v7422_v18, %v7436_v28  ;;  %v7463_v61 = vrot.slane %v7461_v58, 5  ;;  %v13617_v52 = vcombine.low %v18725_v32, %v18734_v19  ;;  %v7774_v44 = vrot.slane %v18687_v36, 5  ;;  %v15945_v32 = vld [vmem:[#allocation9 + $0x98] sm:$0xff]   ;;  %v7750_v15 = vld [vmem:[#allocation3 + $0x10] sm:$0xe] }
 0x4eb   : > { %v7459_v35 = vrot.slane %v7458_v16, 4  ;;  %v7450_v53 = vsel %vm16748_vm11, %v7445_v33, %v7449_v0  ;;  %v13627_v8 = vrot.slane %v7748_v30, 9  ;;  %v13628_v13 = vrot.slane %v7749_v48, 9  ;;  %v7752_v9 = vld [vmem:[#allocation3 + $0x20] sm:$0xe]  ;;  %v15950_v34 = vld [vmem:[#allocation9 + $0xc0] sm:$0xff]  }
 0x4ec   : > { %14872 = vmatprep.mubr.bf16.mxu1 %v13605_v47  ;;  %v7778_v46 = vrot.slane %v18682_v17, 5  ;;  %v13618_v36 = vcombine.low %v18743_v51, %v18751_v22  ;;  %v482_v45 = vsel %vm16697_vm3, 0, %v481_v12  ;;  %v15946_v17 = vld [vmem:[#allocation9 + $0xa0] sm:$0xff]   ;;  %v512_v51 = vsel %vm16702_vm4, 0, %v511_v57  ;;  %v7753_v22 = vld [vmem:[#allocation3 + $0x28] sm:$0xe] }
 0x4ed   : > { %14881 = vmatpush3.bf16.msra.mxu1 %v15932_v5  ;;  %v7464_v20 = vsel %vm16748_vm11, %v7459_v35, %v7463_v61  ;;  %v7775_v14 = vsel %vm17103_vm14, %v13627_v8, %v7774_v44  ;;  %483 = vst [vmem:[#allocation3 + $0x48] sm:$0x1] %v482_v45  ;;  %v15948_v5 = vld [vmem:[#allocation9 + $0xb0] sm:$0xff]   ;;  %513 = vst [vmem:[#allocation3 + $0x4c] sm:$0x1] %v512_v51  ;;  %v13630_v40 = vrot.slane %v7751_v11, 9 }
 0x4ee   : > { %14882 = vmatprep.subr.bf16.mxu1 %v15933_v2  ;;  %v13606_v60 = vcombine.low %v7450_v53, %v7464_v20  ;;  %v7779_v62 = vsel %vm17103_vm14, %v13628_v13, %v7778_v46  ;;  %v13632_v37 = vrot.slane %v7753_v22, 9  ;;  %v7786_v31 = vrot.slane %v18719_v42, 5  ;;  %v7755_v33 = vld [vmem:[#allocation3 + $0x38] sm:$0xe]  ;;  %v18810_v30 = vld [vmem:[#allocation3 + $0x8] sm:$0xf] }
 0x4ef   : > { %v13635_v19 = vcombine.low %v7775_v14, %v7779_v62  ;;  %v13629_v10 = vrot.slane %v7750_v15, 9  ;;  %v13631_v38 = vrot.slane %v7752_v9, 9  ;;  %v7794_v58 = vrot.slane %v18736_v54, 5  ;;  %v15951_v47 = vld [vmem:[#allocation9 + $0xc8] sm:$0xff]   ;;  %v18814_v62 = vld [vmem:[#allocation3 + $0x14] sm:$0x1] }
 0x4f0   : > { %14873 = vmatmul.mubr.bf16.gmra.mrb[4].mxu1 %v13606_v60  ;;  %v7782_v26 = vrot.slane %v18704_v43, 5  ;;  %v7787_v18 = vsel %vm17103_vm14, %v13630_v40, %v7786_v31  ;;  %v7790_v28 = vrot.slane %v18731_v63, 5  ;;  %v7754_v43 = vld [vmem:[#allocation3 + $0x30] sm:$0xe]  ;;  %v13634_v35 = vrot.slane %v7755_v33, 9  ;;  %v15964_v11 = vld [vmem:[#allocation9 + $0x110] sm:$0xff]  }
 0x4f1   : > { %14883 = vmatpush3.bf16.msra.mxu1 %v15933_v2  ;;  %14892 = vmatprep.mubr.bf16.mxu1 %v13615_v55  ;;  %v7795_v2 = vsel %vm17103_vm14, %v13632_v37, %v7794_v58  ;;  %v13633_v63 = vrot.slane %v7754_v43, 9  ;;  %v7802_v61 = vrot.slane %v18758_v56, 5  ;;  %v7798_v53 = vrot.slane %v18755_v41, 5  ;;  %v15955_v56 = vld [vmem:[#allocation9 + $0xe0] sm:$0xff]   ;;  %v15963_v40 = vld [vmem:[#allocation3 + $0x38] ss:$8 sps:$4 sm:$0xff]  }
 0x4f2   : > { %14884 = vmatprep.subr.bf16.mxu1 %v15934_v6  ;;  %v7783_v42 = vsel %vm17103_vm14, %v13629_v10, %v7782_v26  ;;  %v7791_v54 = vsel %vm17103_vm14, %v13631_v38, %v7790_v28  ;;  %v8130_v41 = vld [vmem:[#allocation3 + $0x10] sm:$0xf]  ;;  %v8148_v44 = vshll.u32 %v18810_v30, 16  ;;  %v15965_v37 = vld [vmem:[#allocation9 + $0x118] sm:$0xff]   ;;  %v8134_v10 = vld [vmem:[#allocation3 + $0x20] sm:$0xf] }
 0x4f3   : > { %v13636_v16 = vcombine.low %v7783_v42, %v7787_v18  ;;  %v13637_v0 = vcombine.low %v7791_v54, %v7795_v2  ;;  %v7803_v20 = vsel %vm17103_vm14, %v13634_v35, %v7802_v61  ;;  %v7799_v60 = vsel %vm17103_vm14, %v13633_v63, %v7798_v53  ;;  %v15966_v38 = vld [vmem:[#allocation9 + $0x120] sm:$0xff]   ;;  %v8132_v58 = vld [vmem:[#allocation3 + $0x18] sm:$0xf]  ;;  %v8136_v28 = vld [vmem:[#allocation3 + $0x28] sm:$0xf] }
 0x4f4   : > { %v13638_v55 = vcombine.low %v7799_v60, %v7803_v20  ;;  %v8159_v48 = vshrl.u32 %v8130_v41, 16  ;;  %v8150_v14 = vrot.slane %v8148_v44, 5  ;;  %v8187_v26 = vshrl.u32 %v8134_v10, 16  ;;  %v15967_v54 = vld [vmem:[#allocation9 + $0x128] sm:$0xff]   ;;  %v18824_v53 = vld [vmem:[#allocation3 + $0x24] sm:$0x1] }
 0x4f5   : > { %14885 = vmatpush3.bf16.msra.mxu1 %v15934_v6  ;;  %v15952_v6 = vld [vmem:[#allocation9 + $0xd0] sm:$0xff]   ;;  %v8190_v18 = vshll.u32 %v8134_v10, 16  ;;  %v8173_v42 = vshrl.u32 %v8132_v58, 16  ;;  %v8204_v43 = vshll.u32 %v8136_v28, 16  ;;  %v8196_v44 = vshll.u32 %v18824_v53, 16 }
 0x4f6   : > { %14886 = vmatprep.subr.bf16.mxu1 %v15935_v39  ;;  %v8161_v8 = vrot.slane %v8159_v48, 4 }
 0x4f7   : > { %v8192_v35 = vrot.slane %v8190_v18, 5  ;;  %v8175_v20 = vrot.slane %v8173_v42, 4 }
 0x4f9   : > { %14887 = vmatpush3.bf16.msra.mxu1 %v15935_v39  ;;  %v15954_v39 = vld [vmem:[#allocation9 + $0xd8] sm:$0xff]  }
 0x4fa   : > { %14888 = vmatprep.subr.bf16.mxu1 %v15936_v59 }
 0x4fd   : > { %14889 = vmatpush3.bf16.msra.mxu1 %v15936_v59  ;;  %v15953_v59 = vld [vmem:[#allocation3 + $0x8] ss:$8 sps:$4 sm:$0xff]  }
 0x4fe   : > { %14890 = vmatprep.subr.bf16.mxu1 %v15938_v4 }
 0x501   : > { %14891 = vmatpush3.bf16.msra.mxu1 %v15938_v4  ;;  %v15956_v4 = vld [vmem:[#allocation9 + $0xe8] sm:$0xff]  }
 0x502   : > { %14900 = vmatprep.subr.bf16.mxu1 %v15939_v29 }
 0x504   : > { %14893 = vmatmul.mubr.bf16.vlgmr.msra.gmra.mrb[0].mxu1 %v13616_v24  ;;  %v8162_v24 = vshll.u32 %v8130_v41, 16  ;;  %v18826_v41 = vld [vmem:[#allocation3 + $0x34] sm:$0x1] }
 0x505   : > { %14901 = vmatpush3.bf16.msra.mxu1 %v15939_v29  ;;  %14896 = vmatprep.mubr.bf16.mxu1 %v13617_v52  ;;  %v15957_v29 = vld [vmem:[#allocation9 + $0xf0] sm:$0xff]   ;;  %v8145_v52 = vshrl.u32 %v18810_v30, 16 }
 0x506   : > { %14902 = vmatprep.subr.bf16.mxu1 %v15942_v7  ;;  %v8164_v13 = vrot.slane %v8162_v24, 5  ;;  %v18828_v24 = vld [vmem:[#allocation3 + $0x1c] sm:$0x1] }
 0x507   : > { %v8147_v46 = vrot.slane %v8145_v52, 4 }
 0x508   : > { %v8165_v12 = vor.u32 %v8164_v13, %v8161_v8  ;;  %v18831_v8 = vld [vmem:[#allocation3 + $0x2c] sm:$0x1] }
 0x509   : > { %14903 = vmatpush3.bf16.msra.mxu1 %v15942_v7  ;;  %v15958_v7 = vld [vmem:[#allocation9 + $0xf8] sm:$0xff]   ;;  %v8151_v45 = vor.u32 %v8150_v14, %v8147_v46 }
 0x50a   : > { %14904 = vmatprep.subr.bf16.mxu1 %v15943_v49  ;;  %v15969_v46 = vld [vmem:[#allocation9 + $0x138] sm:$0xff]  }
 0x50b   : > { %v8152_v51 = vrot.slane %v8151_v45, 4 }
 0x50c   : > { %14897 = vmatmul.mubr.bf16.gmra.mrb[4].mxu1 %v13618_v36  ;;  %v18816_v36 = vld [vmem:[#allocation3 + $0xc] sm:$0x1] }
 0x50d   : > { %14905 = vmatpush3.bf16.msra.mxu1 %v15943_v49  ;;  %14916 = vmatprep.mubr.bf16.mxu1 %v13635_v19  ;;  %v15960_v49 = vld [vmem:[#allocation9 + $0x100] sm:$0xff]   ;;  %v15962_v19 = vld [vmem:[#allocation9 + $0x108] sm:$0xff]   ;;  %v8154_v57 = vshll.u32 %v18816_v36, 16 }
 0x50e   : > { %14906 = vmatprep.subr.bf16.mxu1 %v15945_v32 }
 0x511   : > { %14907 = vmatpush3.bf16.msra.mxu1 %v15945_v32  ;;  %v15959_v32 = vld [vmem:[#allocation3 + $0x18] ss:$8 sps:$4 sm:$0xff]  }
 0x512   : > { %14908 = vmatprep.subr.bf16.mxu1 %v15946_v17 }
 0x515   : > { %14909 = vmatpush3.bf16.msra.mxu1 %v15946_v17  ;;  %v8168_v17 = vshll.u32 %v18814_v62, 16 }
 0x516   : > { %14910 = vmatprep.subr.bf16.mxu1 %v15947_v1 }
 0x517   : > { %v8170_v22 = vrot.slane %v8168_v17, 5 }
 0x519   : > { %14911 = vmatpush3.bf16.msra.mxu1 %v15947_v1  ;;  %v15961_v1 = vld [vmem:[#allocation3 + $0x28] ss:$8 sps:$4 sm:$0xff]  }
 0x51a   : > { %14912 = vmatprep.subr.bf16.mxu1 %v15948_v5 }
 0x51d   : > { %14913 = vmatpush3.bf16.msra.mxu1 %v15948_v5  ;;  %v8166_v5 = vrot.slane %v8165_v12, 4  ;;  %v8224_v12 = vshll.u32 %v18826_v41, 16 }
 0x51e   : > { %14914 = vmatprep.subr.bf16.mxu1 %v15949_v27 }
 0x51f   : > { %v8171_v15 = vsel %vm16748_vm11, %v8166_v5, %v8170_v22 }
 0x521   : > { %14915 = vmatpush3.bf16.msra.mxu1 %v15949_v27  ;;  %v8156_v27 = vrot.slane %v8154_v57, 5 }
 0x522   : > { %14924 = vmatprep.subr.bf16.mxu1 %v15950_v34 }
 0x523   : > { %v8157_v9 = vsel %vm16748_vm11, %v8152_v51, %v8156_v27  ;;  %v15970_v27 = vld [vmem:[#allocation9 + $0x140] sm:$0xff]  }
 0x524   : > { %14917 = vmatmul.mubr.bf16.vlgmr.msra.gmra.mrb[0].mxu1 %v13636_v16  ;;  %v13659_v31 = vcombine.low %v8157_v9, %v8171_v15  ;;  %v8176_v16 = vshll.u32 %v8132_v58, 16  ;;  %v18836_v9 = vld [vmem:[#allocation3 + $0x44] sm:$0x1]  ;;  %v18842_v58 = vld [vmem:[#allocation3 + $0x3c] sm:$0x1] }
 0x525   : > { %14920 = vmatprep.mubr.bf16.mxu1 %v13637_v0  ;;  %14925 = vmatpush3.bf16.msra.mxu1 %v15950_v34  ;;  %v8138_v34 = vld [vmem:[#allocation3 + $0x30] sm:$0xf]  ;;  %v8189_v0 = vrot.slane %v8187_v26, 4 }
 0x526   : > { %14926 = vmatprep.subr.bf16.mxu1 %v15951_v47  ;;  %v8215_v2 = vshrl.u32 %v8138_v34, 16  ;;  %v8218_v33 = vshll.u32 %v8138_v34, 16  ;;  %v8178_v60 = vrot.slane %v8176_v16, 5  ;;  %v15971_v16 = vld [vmem:[#allocation9 + $0x148] sm:$0xff]  }
 0x528   : > { %v8217_v63 = vrot.slane %v8215_v2, 4  ;;  %v8220_v61 = vrot.slane %v8218_v33, 5  ;;  %v8179_v52 = vor.u32 %v8178_v60, %v8175_v20  ;;  %v8411_v2 = vld [vmem:[#allocation3 + $0x10] sm:$0xe]  ;;  %v8440_v60 = vrot.slane %v18814_v62, 5 }
 0x529   : > { %14927 = vmatpush3.bf16.msra.mxu1 %v15951_v47  ;;  %v8201_v47 = vshrl.u32 %v8136_v28, 16  ;;  %v8252_v28 = vshll.u32 %v18836_v9, 16 }
 0x52a   : > { %14928 = vmatprep.subr.bf16.mxu1 %v15952_v6  ;;  %v8180_v5 = vrot.slane %v8179_v52, 4  ;;  %v15974_v52 = vld [vmem:[#allocation9 + $0x160] sm:$0xff]  }
 0x52c   : > { %14921 = vmatmul.mubr.bf16.gmra.mrb[4].mxu1 %v13638_v55  ;;  %v15968_v55 = vld [vmem:[#allocation9 + $0x130] sm:$0xff]  }
 0x52d   : > { %14929 = vmatpush3.bf16.msra.mxu1 %v15952_v6  ;;  %14940 = vmatprep.mubr.bf16.mxu1 %v15953_v59  ;;  %v8142_v6 = vld [vmem:[#allocation3 + $0x40] sm:$0xf]  ;;  %v8206_v59 = vrot.slane %v8204_v43, 5 }
 0x52e   : > { %14930 = vmatprep.subr.bf16.mxu1 %v15954_v39  ;;  %v8246_v48 = vshll.u32 %v8142_v6, 16 }
 0x530   : > { %v8248_v17 = vrot.slane %v8246_v48, 5 }
 0x531   : > { %14931 = vmatpush3.bf16.msra.mxu1 %v15954_v39  ;;  %v8203_v39 = vrot.slane %v8201_v47, 4  ;;  %v8238_v47 = vshll.u32 %v18842_v58, 16 }
 0x532   : > { %14932 = vmatprep.subr.bf16.mxu1 %v15955_v56 }
 0x533   : > { %v8207_v14 = vor.u32 %v8206_v59, %v8203_v39  ;;  %v8436_v59 = vrot.slane %v18816_v36, 5  ;;  %v15975_v36 = vld [vmem:[#allocation9 + $0x168] sm:$0xff]  }
 0x535   : > { %14933 = vmatpush3.bf16.msra.mxu1 %v15955_v56  ;;  %v8140_v56 = vld [vmem:[#allocation3 + $0x38] sm:$0xf]  ;;  %v8208_v15 = vrot.slane %v8207_v14, 4 }
 0x536   : > { %14934 = vmatprep.subr.bf16.mxu1 %v15956_v4  ;;  %v8229_v13 = vshrl.u32 %v8140_v56, 16  ;;  %v8412_v14 = vld [vmem:[#allocation3 + $0x18] sm:$0xe] }
 0x538   : > { %v8231_v51 = vrot.slane %v8229_v13, 4  ;;  %v8413_v13 = vld [vmem:[#allocation3 + $0x20] sm:$0xe] }
 0x539   : > { %14935 = vmatpush3.bf16.msra.mxu1 %v15956_v4  ;;  %v8193_v4 = vor.u32 %v8192_v35, %v8189_v0  ;;  %v8410_v0 = vld [vmem:[#allocation3 + $0x8] sm:$0xe]  ;;  %v13672_v35 = vrot.slane %v8411_v2, 9 }
 0x53a   : > { %14936 = vmatprep.subr.bf16.mxu1 %v15957_v29  ;;  %v13671_v20 = vrot.slane %v8410_v0, 9 }
 0x53c   : > { %v8437_v48 = vsel %vm17103_vm14, %v13671_v20, %v8436_v59  ;;  %v18878_v59 = vld [vmem:[#allocation3 + $0x1c] sm:$0x1] }
 0x53d   : > { %14937 = vmatpush3.bf16.msra.mxu1 %v15957_v29  ;;  %v8243_v29 = vshrl.u32 %v8142_v6, 16  ;;  %v15972_v6 = vld [vmem:[#allocation9 + $0x150] sm:$0xff]  }
 0x53e   : > { %14938 = vmatprep.subr.bf16.mxu1 %v15958_v7 }
 0x53f   : > { %v8245_v45 = vrot.slane %v8243_v29, 4 }
 0x541   : > { %14939 = vmatpush3.bf16.msra.mxu1 %v15958_v7  ;;  %v8221_v7 = vor.u32 %v8220_v61, %v8217_v63  ;;  %v8249_v10 = vor.u32 %v8248_v17, %v8245_v45  ;;  %v8254_v61 = vrot.slane %v8252_v28, 5  ;;  %v13673_v45 = vrot.slane %v8412_v14, 9 }
 0x542   : > { %14948 = vmatprep.subr.bf16.mxu1 %v15960_v49  ;;  %v8448_v17 = vrot.slane %v18824_v53, 5 }
 0x543   : > { %v8222_v57 = vrot.slane %v8221_v7, 4  ;;  %v8250_v43 = vrot.slane %v8249_v10, 4  ;;  %v15973_v7 = vld [vmem:[#allocation9 + $0x158] sm:$0xff]  }
 0x544   : > { %14941 = vmatmul.mubr.bf16.vlgmr.msra.gmra.mrb[0].mxu1 %v15959_v32  ;;  %v8182_v32 = vshll.u32 %v18828_v24, 16 }
 0x545   : > { %14944 = vmatprep.mubr.bf16.mxu1 %v15961_v1  ;;  %14949 = vmatpush3.bf16.msra.mxu1 %v15960_v49  ;;  %v8232_v49 = vshll.u32 %v8140_v56, 16  ;;  %v8210_v1 = vshll.u32 %v18831_v8, 16  ;;  %v8255_v39 = vsel %vm16748_vm11, %v8250_v43, %v8254_v61  ;;  %v8441_v56 = vsel %vm17103_vm14, %v13672_v35, %v8440_v60  ;;  %v15986_v35 = vld [vmem:[#allocation9 + $0x1b8] sm:$0xff]   ;;  %v15988_v60 = vld [vmem:[#allocation9 + $0x1c0] sm:$0xff]  }
 0x546   : > { %14950 = vmatprep.subr.bf16.mxu1 %v15962_v19  ;;  %v13679_v62 = vcombine.low %v8437_v48, %v8441_v56  ;;  %v15990_v48 = vld [vmem:[#allocation9 + $0x1c8] sm:$0xff]  }
 0x547   : > { %v8234_v22 = vrot.slane %v8232_v49, 5  ;;  %v8212_v34 = vrot.slane %v8210_v1, 5  ;;  %v8415_v49 = vld [vmem:[#allocation3 + $0x30] sm:$0xe] }
 0x548   : > { %v15978_v1 = vld [vmem:[#allocation9 + $0x180] sm:$0xff]  }
 0x549   : > { %14951 = vmatpush3.bf16.msra.mxu1 %v15962_v19  ;;  %v8194_v19 = vrot.slane %v8193_v4, 4  ;;  %v8235_v18 = vor.u32 %v8234_v22, %v8231_v51  ;;  %v8213_v42 = vsel %vm16748_vm11, %v8208_v15, %v8212_v34  ;;  %v8452_v22 = vrot.slane %v18831_v8, 5  ;;  %v8417_v15 = vld [vmem:[#allocation3 + $0x40] sm:$0xe] }
 0x54a   : > { %14952 = vmatprep.subr.bf16.mxu1 %v15964_v11  ;;  %v13678_v10 = vrot.slane %v8417_v15, 9  ;;  %v8464_v34 = vrot.slane %v18836_v9, 5  ;;  %v15983_v9 = vld [vmem:[#allocation9 + $0x1a0] sm:$0xff]  }
 0x54b   : > { %v8236_v63 = vrot.slane %v8235_v18, 4 }
 0x54c   : > { %14945 = vmatmul.mubr.bf16.gmra.mrb[4].mxu1 %v15963_v40  ;;  %v8226_v40 = vrot.slane %v8224_v12, 5  ;;  %v13674_v12 = vrot.slane %v8413_v13, 9  ;;  %v8465_v18 = vsel %vm17103_vm14, %v13678_v10, %v8464_v34  ;;  %v15992_v13 = vld [vmem:[#allocation9 + $0x1d0] sm:$0xff]  }
 0x54d   : > { %14953 = vmatpush3.bf16.msra.mxu1 %v15964_v11  ;;  %14964 = vmatprep.mubr.bf16.mxu1 %v13659_v31  ;;  %v8198_v11 = vrot.slane %v8196_v44, 5  ;;  %v15976_v44 = vld [vmem:[#allocation9 + $0x170] sm:$0xff]  }
 0x54e   : > { %14954 = vmatprep.subr.bf16.mxu1 %v15965_v37  ;;  %v8449_v51 = vsel %vm17103_vm14, %v13674_v12, %v8448_v17 }
 0x54f   : > { %v8199_v31 = vsel %vm16748_vm11, %v8194_v19, %v8198_v11  ;;  %v13676_v19 = vrot.slane %v8415_v49, 9  ;;  %v8444_v11 = vrot.slane %v18828_v24, 5  ;;  %v8416_v24 = vld [vmem:[#allocation3 + $0x38] sm:$0xe] }
 0x550   : > { %v13677_v8 = vrot.slane %v8416_v24, 9 }
 0x551   : > { %14955 = vmatpush3.bf16.msra.mxu1 %v15965_v37  ;;  %v8184_v37 = vrot.slane %v8182_v32, 5  ;;  %v8414_v32 = vld [vmem:[#allocation3 + $0x28] sm:$0xe]  ;;  %v8445_v53 = vsel %vm17103_vm14, %v13673_v45, %v8444_v11  ;;  %v8795_v11 = vld [vmem:[#allocation3 + $0x20] sm:$0xf] }
 0x552   : > { %14956 = vmatprep.subr.bf16.mxu1 %v15966_v38  ;;  %v15993_v45 = vld [vmem:[#allocation9 + $0x1d8] sm:$0xff]  }
 0x553   : > { %v8185_v26 = vsel %vm16748_vm11, %v8180_v5, %v8184_v37  ;;  %v8456_v5 = vrot.slane %v18826_v41, 5  ;;  %v15979_v37 = vld [vmem:[#allocation9 + $0x188] sm:$0xff]  }
 0x554   : > { %v13660_v33 = vcombine.low %v8185_v26, %v8199_v31  ;;  %v8460_v26 = vrot.slane %v18842_v58, 5  ;;  %v8793_v58 = vld [vmem:[#allocation3 + $0x18] sm:$0xf] }
 0x555   : > { %14957 = vmatpush3.bf16.msra.mxu1 %v15966_v38  ;;  %v8227_v38 = vsel %vm16748_vm11, %v8222_v57, %v8226_v40  ;;  %v13675_v57 = vrot.slane %v8414_v32, 9  ;;  %v13680_v40 = vcombine.low %v8445_v53, %v8449_v51  ;;  %v8822_v43 = vshrl.u32 %v8793_v58, 16  ;;  %v15991_v32 = vld [vmem:[#allocation3 + $0x40] ss:$8 sps:$4 sm:$0xff]  }
 0x556   : > { %14958 = vmatprep.subr.bf16.mxu1 %v15967_v54  ;;  %v8461_v28 = vsel %vm17103_vm14, %v13677_v8, %v8460_v26  ;;  %v8825_v0 = vshll.u32 %v8793_v58, 16  ;;  %v8803_v26 = vld [vmem:[#allocation3 + $0x40] sm:$0xf] }
 0x557   : > { %v8453_v41 = vsel %vm17103_vm14, %v13675_v57, %v8452_v22  ;;  %v13682_v2 = vcombine.low %v8461_v28, %v8465_v18  ;;  %v8801_v57 = vld [vmem:[#allocation3 + $0x38] sm:$0xf]  ;;  %v8805_v18 = vld [vmem:[#allocation3 + $0x48] sm:$0xf]  ;;  %v18888_v28 = vld [vmem:[#allocation3 + $0x24] sm:$0x1] }
 0x558   : > { %v8827_v20 = vrot.slane %v8825_v0, 5  ;;  %v8878_v15 = vshrl.u32 %v8801_v57, 16  ;;  %v8881_v53 = vshll.u32 %v8801_v57, 16  ;;  %v8895_v0 = vshll.u32 %v8803_v26, 16 }
 0x559   : > { %14959 = vmatpush3.bf16.msra.mxu1 %v15967_v54  ;;  %v13661_v54 = vcombine.low %v8213_v42, %v8227_v38  ;;  %v15980_v38 = vld [vmem:[#allocation9 + $0x190] sm:$0xff]   ;;  %v15981_v42 = vld [vmem:[#allocation3 + $0x10] ss:$8 sps:$4 sm:$0xff]  }
 0x55a   : > { %14960 = vmatprep.subr.bf16.mxu1 %v15968_v55  ;;  %v8880_v34 = vrot.slane %v8878_v15, 4 }
 0x55d   : > { %14961 = vmatpush3.bf16.msra.mxu1 %v15968_v55  ;;  %v8240_v55 = vrot.slane %v8238_v47, 5  ;;  %v8791_v47 = vld [vmem:[#allocation3 + $0x10] sm:$0xf] }
 0x55e   : > { %14962 = vmatprep.subr.bf16.mxu1 %v15969_v46  ;;  %v8811_v61 = vshll.u32 %v8791_v47, 16 }
 0x55f   : > { %v8241_v4 = vsel %vm16748_vm11, %v8236_v63, %v8240_v55  ;;  %v8808_v63 = vshrl.u32 %v8791_v47, 16  ;;  %v18892_v47 = vld [vmem:[#allocation3 + $0x3c] sm:$0x1] }
 0x560   : > { %v13662_v29 = vcombine.low %v8241_v4, %v8255_v39  ;;  %v8813_v39 = vrot.slane %v8811_v61, 5  ;;  %v18880_v4 = vld [vmem:[#allocation3 + $0x14] sm:$0x1] }
 0x561   : > { %14963 = vmatpush3.bf16.msra.mxu1 %v15969_v46  ;;  %v15977_v46 = vld [vmem:[#allocation9 + $0x178] sm:$0xff]   ;;  %v8810_v55 = vrot.slane %v8808_v63, 4  ;;  %v8909_v63 = vshll.u32 %v8805_v18, 16 }
 0x562   : > { %14972 = vmatprep.subr.bf16.mxu1 %v15970_v27 }
 0x564   : > { %14965 = vmatmul.mubr.bf16.vlgmr.msra.gmra.mrb[0].mxu1 %v13660_v33  ;;  %v15982_v33 = vld [vmem:[#allocation9 + $0x198] sm:$0xff]  }
 0x565   : > { %14968 = vmatprep.mubr.bf16.mxu1 %v13661_v54  ;;  %14973 = vmatpush3.bf16.msra.mxu1 %v15970_v27  ;;  %v8457_v27 = vsel %vm17103_vm14, %v13676_v19, %v8456_v5  ;;  %v15985_v54 = vld [vmem:[#allocation9 + $0x1b0] sm:$0xff]   ;;  %v15994_v5 = vld [vmem:[#allocation9 + $0x1e0] sm:$0xff]  }
 0x566   : > { %14974 = vmatprep.subr.bf16.mxu1 %v15971_v16  ;;  %v13681_v31 = vcombine.low %v8453_v41, %v8457_v27  ;;  %v8799_v27 = vld [vmem:[#allocation3 + $0x30] sm:$0xf]  ;;  %v8839_v41 = vshll.u32 %v8795_v11, 16 }
 0x567   : > { %v8864_v10 = vshrl.u32 %v8799_v27, 16  ;;  %v8867_v8 = vshll.u32 %v8799_v27, 16 }
 0x569   : > { %14975 = vmatpush3.bf16.msra.mxu1 %v15971_v16  ;;  %v15984_v16 = vld [vmem:[#allocation9 + $0x1a8] sm:$0xff]   ;;  %v8866_v58 = vrot.slane %v8864_v10, 4 }
 0x56a   : > { %14976 = vmatprep.subr.bf16.mxu1 %v15972_v6 }
 0x56c   : > { %14969 = vmatmul.mubr.bf16.gmra.mrb[4].mxu1 %v13662_v29  ;;  %v15987_v29 = vld [vmem:[#allocation3 + $0x20] ss:$8 sps:$4 sm:$0xff]  }
 0x56d   : > { %14977 = vmatpush3.bf16.msra.mxu1 %v15972_v6  ;;  %14988 = vmatprep.mubr.bf16.mxu1 %v13679_v62  ;;  %v8824_v6 = vrot.slane %v8822_v43, 4  ;;  %v8831_v62 = vshll.u32 %v18878_v59, 16  ;;  %v8892_v43 = vshrl.u32 %v8803_v26, 16 }
 0x56e   : > { %14978 = vmatprep.subr.bf16.mxu1 %v15973_v7 }
 0x56f   : > { %v8828_v56 = vor.u32 %v8827_v20, %v8824_v6 }
 0x571   : > { %14979 = vmatpush3.bf16.msra.mxu1 %v15973_v7  ;;  %v8814_v7 = vor.u32 %v8813_v39, %v8810_v55  ;;  %v15997_v55 = vld [vmem:[#allocation9 + $0x1f8] sm:$0xff]   ;;  %v8845_v39 = vshll.u32 %v18888_v28, 16 }
 0x572   : > { %14980 = vmatprep.subr.bf16.mxu1 %v15974_v52 }
 0x573   : > { %v8815_v49 = vrot.slane %v8814_v7, 4  ;;  %v8894_v7 = vrot.slane %v8892_v43, 4 }
 0x575   : > { %14981 = vmatpush3.bf16.msra.mxu1 %v15974_v52  ;;  %v15989_v52 = vld [vmem:[#allocation3 + $0x30] ss:$8 sps:$4 sm:$0xff]  }
 0x576   : > { %14982 = vmatprep.subr.bf16.mxu1 %v15975_v36 }
 0x579   : > { %14983 = vmatpush3.bf16.msra.mxu1 %v15975_v36  ;;  %v8817_v36 = vshll.u32 %v18880_v4, 16 }
 0x57a   : > { %14984 = vmatprep.subr.bf16.mxu1 %v15976_v44 }
 0x57b   : > { %v8819_v14 = vrot.slane %v8817_v36, 5  ;;  %v8911_v36 = vrot.slane %v8909_v63, 5 }
 0x57d   : > { %14985 = vmatpush3.bf16.msra.mxu1 %v15976_v44  ;;  %v8829_v44 = vrot.slane %v8828_v56, 4  ;;  %v8820_v19 = vsel %vm16748_vm11, %v8815_v49, %v8819_v14  ;;  %v18900_v14 = vld [vmem:[#allocation3 + $0x44] sm:$0x1] }
 0x57e   : > { %14986 = vmatprep.subr.bf16.mxu1 %v15977_v46  ;;  %v8901_v15 = vshll.u32 %v18900_v14, 16 }
 0x580   : > { %v8903_v26 = vrot.slane %v8901_v15, 5  ;;  %v16008_v15 = vld [vmem:[#allocation10 + $0x50] sm:$0xff]  }
 0x581   : > { %14987 = vmatpush3.bf16.msra.mxu1 %v15977_v46  ;;  %v8833_v46 = vrot.slane %v8831_v62, 5  ;;  %v8897_v62 = vrot.slane %v8895_v0, 5 }
 0x582   : > { %14996 = vmatprep.subr.bf16.mxu1 %v15978_v1 }
 0x583   : > { %v8834_v12 = vsel %vm16748_vm11, %v8829_v44, %v8833_v46  ;;  %v8898_v57 = vor.u32 %v8897_v62, %v8894_v7 }
 0x584   : > { %14989 = vmatmul.mubr.bf16.vlgmr.msra.gmra.mrb[0].mxu1 %v13680_v40  ;;  %v13703_v17 = vcombine.low %v8820_v19, %v8834_v12  ;;  %v8836_v40 = vshrl.u32 %v8795_v11, 16  ;;  %v8847_v12 = vrot.slane %v8845_v39, 5  ;;  %v9075_v39 = vld [vmem:[#allocation3 + $0x20] sm:$0xe] }
 0x585   : > { %14992 = vmatprep.mubr.bf16.mxu1 %v13681_v31  ;;  %14997 = vmatpush3.bf16.msra.mxu1 %v15978_v1  ;;  %v8797_v1 = vld [vmem:[#allocation3 + $0x28] sm:$0xf]  ;;  %v13717_v7 = vrot.slane %v9075_v39, 9 }
 0x586   : > { %14998 = vmatprep.subr.bf16.mxu1 %v15979_v37  ;;  %v8850_v51 = vshrl.u32 %v8797_v1, 16  ;;  %v8853_v22 = vshll.u32 %v8797_v1, 16 }
 0x588   : > { %v8852_v24 = vrot.slane %v8850_v51, 4  ;;  %v8855_v31 = vrot.slane %v8853_v22, 5 }
 0x589   : > { %14999 = vmatpush3.bf16.msra.mxu1 %v15979_v37  ;;  %v15995_v37 = vld [vmem:[#allocation9 + $0x1e8] sm:$0xff]  }
 0x58a   : > { %15000 = vmatprep.subr.bf16.mxu1 %v15980_v38 }
 0x58c   : > { %14993 = vmatmul.mubr.bf16.gmra.mrb[4].mxu1 %v13682_v2  ;;  %v8838_v2 = vrot.slane %v8836_v40, 4 }
 0x58d   : > { %15001 = vmatpush3.bf16.msra.mxu1 %v15980_v38  ;;  %15012 = vmatprep.mubr.bf16.mxu1 %v15981_v42  ;;  %v8883_v38 = vrot.slane %v8881_v53, 5  ;;  %v15996_v42 = vld [vmem:[#allocation9 + $0x1f0] sm:$0xff]   ;;  %v9074_v53 = vld [vmem:[#allocation3 + $0x18] sm:$0xe] }
 0x58e   : > { %15002 = vmatprep.subr.bf16.mxu1 %v15982_v33 }
 0x58f   : > { %v8884_v61 = vor.u32 %v8883_v38, %v8880_v34  ;;  %v9073_v34 = vld [vmem:[#allocation3 + $0x10] sm:$0xe]  ;;  %v13716_v38 = vrot.slane %v9074_v53, 9  ;;  %v16011_v53 = vld [vmem:[#allocation10 + $0x68] sm:$0xff]  }
 0x591   : > { %15003 = vmatpush3.bf16.msra.mxu1 %v15982_v33  ;;  %v8841_v33 = vrot.slane %v8839_v41, 5 }
 0x592   : > { %15004 = vmatprep.subr.bf16.mxu1 %v15983_v9 }
 0x593   : > { %v8842_v6 = vor.u32 %v8841_v33, %v8838_v2  ;;  %v13715_v2 = vrot.slane %v9073_v34, 9  ;;  %v9103_v33 = vrot.slane %v18878_v59, 5  ;;  %v16002_v59 = vld [vmem:[#allocation9 + $0x220] sm:$0xff]  }
 0x595   : > { %15005 = vmatpush3.bf16.msra.mxu1 %v15983_v9  ;;  %v18890_v9 = vld [vmem:[#allocation3 + $0x2c] sm:$0x1]  ;;  %v8843_v49 = vrot.slane %v8842_v6, 4  ;;  %v9076_v6 = vld [vmem:[#allocation3 + $0x28] sm:$0xe] }
 0x596   : > { %15006 = vmatprep.subr.bf16.mxu1 %v15984_v16  ;;  %v8859_v20 = vshll.u32 %v18890_v9, 16  ;;  %v9111_v62 = vrot.slane %v18890_v9, 5 }
 0x597   : > { %v8848_v27 = vsel %vm16748_vm11, %v8843_v49, %v8847_v12  ;;  %v9079_v12 = vld [vmem:[#allocation3 + $0x40] sm:$0xe] }
 0x598   : > { %v8861_v46 = vrot.slane %v8859_v20, 5  ;;  %v9078_v20 = vld [vmem:[#allocation3 + $0x38] sm:$0xe] }
 0x599   : > { %15007 = vmatpush3.bf16.msra.mxu1 %v15984_v16  ;;  %v8856_v16 = vor.u32 %v8855_v31, %v8852_v24  ;;  %v8899_v31 = vrot.slane %v8898_v57, 4 }
 0x59a   : > { %15008 = vmatprep.subr.bf16.mxu1 %v15985_v54 }
 0x59b   : > { %v8857_v56 = vrot.slane %v8856_v16, 4 }
 0x59d   : > { %15009 = vmatpush3.bf16.msra.mxu1 %v15985_v54  ;;  %v8869_v54 = vrot.slane %v8867_v8, 5  ;;  %v8862_v1 = vsel %vm16748_vm11, %v8857_v56, %v8861_v46  ;;  %v13718_v56 = vrot.slane %v9076_v6, 9 }
 0x59e   : > { %15010 = vmatprep.subr.bf16.mxu1 %v15986_v35  ;;  %v13704_v40 = vcombine.low %v8848_v27, %v8862_v1  ;;  %v16007_v27 = vld [vmem:[#allocation10 + $0x48] sm:$0xff]  }
 0x5a1   : > { %15011 = vmatpush3.bf16.msra.mxu1 %v15986_v35  ;;  %v8906_v35 = vshrl.u32 %v8805_v18, 16  ;;  %v16000_v18 = vld [vmem:[#allocation9 + $0x210] sm:$0xff]  }
 0x5a2   : > { %15020 = vmatprep.subr.bf16.mxu1 %v15988_v60 }
 0x5a4   : > { %15013 = vmatmul.mubr.bf16.vlgmr.msra.gmra.mrb[0].mxu1 %v15987_v29  ;;  %v8870_v29 = vor.u32 %v8869_v54, %v8866_v58  ;;  %v9099_v58 = vrot.slane %v18880_v4, 5  ;;  %v9104_v54 = vsel %vm17103_vm14, %v13716_v38, %v9103_v33  ;;  %v16004_v4 = vld [vmem:[#allocation9 + $0x230] sm:$0xff]  }
 0x5a5   : > { %15016 = vmatprep.mubr.bf16.mxu1 %v15989_v52  ;;  %15021 = vmatpush3.bf16.msra.mxu1 %v15988_v60  ;;  %v18895_v60 = vld [vmem:[#allocation3 + $0x34] sm:$0x1]  ;;  %v8908_v52 = vrot.slane %v8906_v35, 4  ;;  %v16001_v35 = vld [vmem:[#allocation9 + $0x218] sm:$0xff]  }
 0x5a6   : > { %15022 = vmatprep.subr.bf16.mxu1 %v15990_v48  ;;  %v8873_v44 = vshll.u32 %v18895_v60, 16  ;;  %v8871_v19 = vrot.slane %v8870_v29, 4  ;;  %v9100_v0 = vsel %vm17103_vm14, %v13715_v2, %v9099_v58  ;;  %v9077_v29 = vld [vmem:[#allocation3 + $0x30] sm:$0xe]  ;;  %v9115_v49 = vrot.slane %v18895_v60, 5 }
 0x5a7   : > { %v13723_v63 = vcombine.low %v9100_v0, %v9104_v54  ;;  %v9123_v60 = vrot.slane %v18900_v14, 5  ;;  %v16010_v14 = vld [vmem:[#allocation10 + $0x60] sm:$0xff]  }
 0x5a8   : > { %v8875_v51 = vrot.slane %v8873_v44, 5  ;;  %v9107_v44 = vrot.slane %v18888_v28, 5  ;;  %v13721_v28 = vrot.slane %v9079_v12, 9 }
 0x5a9   : > { %15023 = vmatpush3.bf16.msra.mxu1 %v15990_v48  ;;  %v8887_v48 = vshll.u32 %v18892_v47, 16 }
 0x5aa   : > { %15024 = vmatprep.subr.bf16.mxu1 %v15992_v13  ;;  %v8876_v41 = vsel %vm16748_vm11, %v8871_v19, %v8875_v51  ;;  %v9108_v9 = vsel %vm17103_vm14, %v13717_v7, %v9107_v44 }
 0x5ac   : > { %15017 = vmatmul.mubr.bf16.gmra.mrb[4].mxu1 %v15991_v32  ;;  %v15998_v32 = vld [vmem:[#allocation9 + $0x200] sm:$0xff]  }
 0x5ad   : > { %15025 = vmatpush3.bf16.msra.mxu1 %v15992_v13  ;;  %15036 = vmatprep.mubr.bf16.mxu1 %v13703_v17  ;;  %v8885_v13 = vrot.slane %v8884_v61, 4  ;;  %v18902_v17 = vld [vmem:[#allocation3 + $0x4c] sm:$0x1]  ;;  %v16003_v61 = vld [vmem:[#allocation9 + $0x228] sm:$0xff]  }
 0x5ae   : > { %15026 = vmatprep.subr.bf16.mxu1 %v15993_v45  ;;  %v8915_v11 = vshll.u32 %v18902_v17, 16  ;;  %v9127_v57 = vrot.slane %v18902_v17, 5  ;;  %v16009_v17 = vld [vmem:[#allocation10 + $0x58] sm:$0xff]  }
 0x5b0   : > { %v8917_v8 = vrot.slane %v8915_v11, 5 }
 0x5b1   : > { %15027 = vmatpush3.bf16.msra.mxu1 %v15993_v45  ;;  %v8889_v45 = vrot.slane %v8887_v48, 5  ;;  %v13720_v48 = vrot.slane %v9078_v20, 9 }
 0x5b2   : > { %15028 = vmatprep.subr.bf16.mxu1 %v15994_v5 }
 0x5b3   : > { %v8890_v22 = vsel %vm16748_vm11, %v8885_v13, %v8889_v45  ;;  %v9112_v13 = vsel %vm17103_vm14, %v13718_v56, %v9111_v62 }
 0x5b4   : > { %v13705_v24 = vcombine.low %v8876_v41, %v8890_v22  ;;  %v13724_v19 = vcombine.low %v9108_v9, %v9112_v13  ;;  %v16006_v22 = vld [vmem:[#allocation10 + $0x40] sm:$0xff]   ;;  %v16013_v41 = vld [vmem:[#allocation10 + $0x78] sm:$0xff]  }
 0x5b5   : > { %15029 = vmatpush3.bf16.msra.mxu1 %v15994_v5  ;;  %v8912_v5 = vor.u32 %v8911_v36, %v8908_v52  ;;  %v13719_v52 = vrot.slane %v9077_v29, 9  ;;  %v9119_v36 = vrot.slane %v18892_v47, 5 }
 0x5b6   : > { %15030 = vmatprep.subr.bf16.mxu1 %v15995_v37 }
 0x5b7   : > { %v8913_v10 = vrot.slane %v8912_v5, 4  ;;  %v9120_v46 = vsel %vm17103_vm14, %v13720_v48, %v9119_v36  ;;  %v9116_v47 = vsel %vm17103_vm14, %v13719_v52, %v9115_v49  ;;  %v9124_v5 = vsel %vm17103_vm14, %v13721_v28, %v9123_v60 }
 0x5b8   : > { %v13725_v45 = vcombine.low %v9116_v47, %v9120_v46 }
 0x5b9   : > { %15031 = vmatpush3.bf16.msra.mxu1 %v15995_v37  ;;  %v15999_v37 = vld [vmem:[#allocation9 + $0x208] sm:$0xff]   ;;  %v8918_v16 = vsel %vm16748_vm11, %v8913_v10, %v8917_v8  ;;  %v18955_v8 = vld [vmem:[%s19711_s5 + $0x3] ss:$0 sm:$0xff] }
 0x5ba   : > { %15032 = vmatprep.subr.bf16.mxu1 %v15996_v42 }
 0x5bd   : > { %15033 = vmatpush3.bf16.msra.mxu1 %v15996_v42  ;;  %v8904_v42 = vsel %vm16748_vm11, %v8899_v31, %v8903_v26  ;;  %v18950_v31 = vld [vmem:[%s19711_s5 + $0x2] ss:$0 sm:$0xff] }
 0x5be   : > { %15034 = vmatprep.subr.bf16.mxu1 %v15997_v55  ;;  %v13706_v43 = vcombine.low %v8904_v42, %v8918_v16 }
 0x5c1   : > { %15035 = vmatpush3.bf16.msra.mxu1 %v15997_v55  ;;  %v16005_v55 = vld [vmem:[#allocation9 + $0x238] sm:$0xff]  }
 0x5c2   : > { %15044 = vmatprep.subr.bf16.mxu1 %v15998_v32 }
 0x5c4   : > { %15037 = vmatmul.mubr.bf16.vlgmr.msra.gmra.mrb[0].mxu1 %v13704_v40  ;;  %v16012_v40 = vld [vmem:[#allocation10 + $0x70] sm:$0xff]  }
 0x5c5   : > { %15040 = vmatprep.mubr.bf16.mxu1 %v13705_v24  ;;  %15045 = vmatpush3.bf16.msra.mxu1 %v15998_v32  ;;  %v9080_v32 = vld [vmem:[#allocation3 + $0x48] sm:$0xe]  ;;  %v18945_v24 = vld [vmem:[#allocation3] sm:$0xf] }
 0x5c6   : > { %15046 = vmatprep.subr.bf16.mxu1 %v15999_v37  ;;  %v13722_v1 = vrot.slane %v9080_v32, 9  ;;  %v9509_v34 = vshrl.u32 %v18945_v24, 16  ;;  %v9512_v38 = vshll.u32 %v18945_v24, 16 }
 0x5c8   : > { %v9128_v11 = vsel %vm17103_vm14, %v13722_v1, %v9127_v57  ;;  %v18965_v0 = vrot.slane %v9509_v34, 4 }
 0x5c9   : > { %15047 = vmatpush3.bf16.msra.mxu1 %v15999_v37  ;;  %v13726_v51 = vcombine.low %v9124_v5, %v9128_v11  ;;  %v18942_v37 = vld [vmem:[#allocation10] sm:$0xff]  }
 0x5ca   : > { %15048 = vmatprep.subr.bf16.mxu1 %v16000_v18 }
 0x5cc   : > { %15041 = vmatmul.mubr.bf16.gmra.mrb[4].mxu1 %v13706_v43 }
 0x5cd   : > { %15049 = vmatpush3.bf16.msra.mxu1 %v16000_v18  ;;  %15060 = vmatprep.mubr.bf16.mxu1 %v13723_v63 }
 0x5ce   : > { %15050 = vmatprep.subr.bf16.mxu1 %v16001_v35 }
 0x5d1   : > { %15051 = vmatpush3.bf16.msra.mxu1 %v16001_v35  ;;  %v18967_v35 = vrot.slane %v9512_v38, 5 }
 0x5d2   : > { %15052 = vmatprep.subr.bf16.mxu1 %v16002_v59 }
 0x5d3   : > { %v9515_v48 = vor.u32 %v18967_v35, %v18965_v0 }
 0x5d5   : > { %15053 = vmatpush3.bf16.msra.mxu1 %v16002_v59 }
 0x5d6   : > { %15054 = vmatprep.subr.bf16.mxu1 %v16003_v61 }
 0x5d9   : > { %15055 = vmatpush3.bf16.msra.mxu1 %v16003_v61 }
 0x5da   : > { %15056 = vmatprep.subr.bf16.mxu1 %v16004_v4 }
 0x5dd   : > { %15057 = vmatpush3.bf16.msra.mxu1 %v16004_v4 }
 0x5de   : > { %15058 = vmatprep.subr.bf16.mxu1 %v16005_v55 }
 0x5e1   : > { %15059 = vmatpush3.bf16.msra.mxu1 %v16005_v55  ;;  %v18971_v55 = vld [vmem:[#allocation3 + $0x4] sm:$0x1] }
 0x5e2   : > { %15068 = vmatprep.subr.bf16.mxu1 %v16006_v22  ;;  %v9518_v7 = vshll.u32 %v18971_v55, 16 }
 0x5e4   : > { %15061 = vmatmul.mubr.bf16.vlgmr.msra.gmra.mrb[0].mxu1 %v13724_v19 }
 0x5e5   : > { %15064 = vmatprep.mubr.bf16.mxu1 %v13725_v45  ;;  %15069 = vmatpush3.bf16.msra.mxu1 %v16006_v22 }
 0x5e6   : > { %15070 = vmatprep.subr.bf16.mxu1 %v16007_v27 }
 0x5e9   : > { %15071 = vmatpush3.bf16.msra.mxu1 %v16007_v27  ;;  %v9443_v27 = vld [vmem:[#allocation3 + $0x1c] sm:$0x1] }
 0x5ea   : > { %15072 = vmatprep.subr.bf16.mxu1 %v16008_v15 }
 0x5ec   : > { %15065 = vmatmul.mubr.bf16.gmra.mrb[4].mxu1 %v13726_v51 }
 0x5ed   : > { %15073 = vmatpush3.bf16.msra.mxu1 %v16008_v15 }
 0x5ee   : > { %15074 = vmatprep.subr.bf16.mxu1 %v16009_v17 }
 0x5f1   : > { %15075 = vmatpush3.bf16.msra.mxu1 %v16009_v17 }
 0x5f2   : > { %15076 = vmatprep.subr.bf16.mxu1 %v16010_v14 }
 0x5f5   : > { %15077 = vmatpush3.bf16.msra.mxu1 %v16010_v14  ;;  %v9440_v14 = vld [vmem:[#allocation3 + $0x18] sm:$0xf] }
 0x5f6   : > { %15078 = vmatprep.subr.bf16.mxu1 %v16011_v53 }
 0x5f9   : > { %15079 = vmatpush3.bf16.msra.mxu1 %v16011_v53 }
 0x5fa   : > { %15080 = vmatprep.subr.bf16.mxu1 %v16012_v40 }
 0x5fd   : > { %15081 = vmatpush3.bf16.msra.mxu1 %v16012_v40 }
 0x5fe   : > { %15082 = vmatprep.subr.bf16.mxu1 %v16013_v41 }
 0x601   : > { %15083 = vmatpush3.bf16.msra.mxu1 %v16013_v41 }
 0x602   : > { %15092 = vmatprep.subr.bf16.mxu1 %v18942_v37 }
 0x6b7   : > { %v15062_v10 = vpop.f32.mrb[0].mxu1 }
 0x6b8   : > { %v9291_v26 = vmul.f32 %v15062_v10, %v18950_v31  ;;  %v9244_v18 = vpop.f32.mrb[1].mxu1 }
 0x6b9   : > { %v9289_v2 = vmul.f32 %v18950_v31, %v9244_v18  ;;  %v15063_v33 = vpop.f32.mrb[2].mxu1 }
 0x6ba   : > { %v9303_v42 = vadd.f32 %v18955_v8, %v9291_v26  ;;  %v9292_v16 = vmul.f32 %v15063_v33, %v18950_v31  ;;  %v9247_v58 = vpop.f32.mrb[3].mxu1  ;;  %v9431_v26 = vld [vmem:[#allocation3 + $0xc] sm:$0x1] }
 0x6bb   : > { %v9301_v54 = vadd.f32 %v18955_v8, %v9289_v2  ;;  %v9290_v43 = vmul.f32 %v18950_v31, %v9247_v58  ;;  %v9449_v58 = vld [vmem:[#allocation3 + $0x24] sm:$0x1] }
 0x6bc   : > { %v9311_v63 = vmax.f32 %v9303_v42, 0.0  ;;  %v9304_v59 = vadd.f32 %v18955_v8, %v9292_v16  ;;  %v9446_v16 = vld [vmem:[#allocation3 + $0x20] sm:$0xf] }
 0x6bd   : > { %v9309_v61 = vmax.f32 %v9301_v54, 0.0  ;;  %v9302_v4 = vadd.f32 %v18955_v8, %v9290_v43 }
 0x6be   : > { %v13969_v6 = vpack.c.bf16 %v9311_v63, %v9311_v63  ;;  %v9312_v20 = vmax.f32 %v9304_v59, 0.0 }
 0x6bf   : > { %v13967_v39 = vpack.c.bf16 %v9309_v61, %v9309_v61  ;;  %v9310_v56 = vmax.f32 %v9302_v4, 0.0  ;;  %v15066_v29 = vpop.f32.mrb[4].mxu1  ;;  %v9434_v61 = vld [vmem:[#allocation3 + $0x10] sm:$0xf]  ;;  %v9437_v4 = vld [vmem:[#allocation3 + $0x14] sm:$0x1] }
 0x6c0   : > { %v9366_v62 = vshrl.u32 %v13969_v6, 16  ;;  %v9369_v52 = vshll.u32 %v13969_v6, 16  ;;  %v13970_v36 = vpack.c.bf16 %v9312_v20, %v9312_v20  ;;  %v9295_v44 = vmul.f32 %v15066_v29, %v18950_v31  ;;  %v9260_v13 = vpop.f32.mrb[5].mxu1 }
 0x6c1   : > { %v9350_v49 = vshrl.u32 %v13967_v39, 16  ;;  %v9353_v46 = vshll.u32 %v13967_v39, 16  ;;  %v13968_v12 = vpack.c.bf16 %v9310_v56, %v9310_v56  ;;  %v9293_v32 = vmul.f32 %v18950_v31, %v9260_v13  ;;  %v15067_v9 = vpop.f32.mrb[6].mxu1 }
 0x6c2   : > { %v9368_v19 = vrot.slane %v9366_v62, 7  ;;  %v9374_v47 = vshrl.u32 %v13970_v36, 16  ;;  %v9377_v45 = vshll.u32 %v13970_v36, 16  ;;  %v9307_v28 = vadd.f32 %v18955_v8, %v9295_v44  ;;  %v9263_v1 = vpop.f32.mrb[7].mxu1 }
 0x6c3   : > { %v9352_v57 = vrot.slane %v9350_v49, 7  ;;  %v9358_v60 = vshrl.u32 %v13968_v12, 16  ;;  %v9361_v5 = vshll.u32 %v13968_v12, 16  ;;  %v9305_v11 = vadd.f32 %v18955_v8, %v9293_v32 }
 0x6c4   : > { %v9371_v51 = vor.u32 %v9369_v52, %v9368_v19  ;;  %v9372_v22 = vrot.slane %v9368_v19, 4  ;;  %v9376_v15 = vrot.slane %v9374_v47, 7  ;;  %v9315_v17 = vmax.f32 %v9307_v28, 0.0  ;;  %v9452_v19 = vld [vmem:[#allocation3 + $0x28] sm:$0xf] }
 0x6c5   : > { %v9355_v53 = vor.u32 %v9353_v46, %v9352_v57  ;;  %v9356_v40 = vrot.slane %v9352_v57, 4  ;;  %v9360_v41 = vrot.slane %v9358_v60, 7  ;;  %v9313_v10 = vmax.f32 %v9305_v11, 0.0  ;;  %v9455_v47 = vld [vmem:[#allocation3 + $0x2c] sm:$0x1] }
 0x6c6   : > { %v9441_v34 = vsel %vm16724_vm8, %v9371_v51, %v9440_v14  ;;  %v9444_v38 = vsel %vm16697_vm3, %v9372_v22, %v9443_v27  ;;  %v9379_v18 = vor.u32 %v9377_v45, %v9376_v15  ;;  %v9380_v2 = vrot.slane %v9376_v15, 4  ;;  %v9464_v57 = vld [vmem:[#allocation3 + $0x38] sm:$0xf] }
 0x6c7   : > { %9445 = vst [vmem:[#allocation3 + $0x1c] sm:$0x1] %v9444_v38  ;;  %9442 = vst [vmem:[#allocation3 + $0x18] sm:$0xf] %v9441_v34  ;;  %v9429_v33 = vsel %vm16724_vm8, %v9355_v53, %v18810_v30  ;;  %v9432_v42 = vsel %vm16697_vm3, %v9356_v40, %v9431_v26  ;;  %v9363_v54 = vor.u32 %v9361_v5, %v9360_v41  ;;  %v9364_v43 = vrot.slane %v9360_v41, 4 }
 0x6c8   : > { %9430 = vst [vmem:[#allocation3 + $0x8] sm:$0xf] %v9429_v33  ;;  %9433 = vst [vmem:[#allocation3 + $0xc] sm:$0x1] %v9432_v42  ;;  %v9447_v63 = vsel %vm16724_vm8, %v9379_v18, %v9446_v16  ;;  %v9450_v59 = vsel %vm16697_vm3, %v9380_v2, %v9449_v58  ;;  %v13973_v6 = vpack.c.bf16 %v9315_v17, %v9315_v17  ;;  %v19004_v13 = vrot.slane %v9515_v48, 4 }
 0x6c9   : > { %v13971_v20 = vpack.c.bf16 %v9313_v10, %v9313_v10  ;;  %9451 = vst [vmem:[#allocation3 + $0x24] sm:$0x1] %v9450_v59  ;;  %9448 = vst [vmem:[#allocation3 + $0x20] sm:$0xf] %v9447_v63  ;;  %v9435_v30 = vsel %vm16724_vm8, %v9363_v54, %v9434_v61  ;;  %v9438_v39 = vsel %vm16697_vm3, %v9364_v43, %v9437_v4  ;;  %v19008_v49 = vrot.slane %v9518_v7, 5 }
 0x6ca   : > { %v9296_v56 = vmul.f32 %v15067_v9, %v18950_v31  ;;  %v9294_v29 = vmul.f32 %v18950_v31, %v9263_v1  ;;  %9439 = vst [vmem:[#allocation3 + $0x14] sm:$0x1] %v9438_v39  ;;  %9436 = vst [vmem:[#allocation3 + $0x10] sm:$0xf] %v9435_v30  ;;  %v9398_v62 = vshrl.u32 %v13973_v6, 16  ;;  %v9401_v12 = vshll.u32 %v13973_v6, 16 }
 0x6cb   : > { %v9382_v52 = vshrl.u32 %v13971_v20, 16  ;;  %v9385_v32 = vshll.u32 %v13971_v20, 16  ;;  %v9467_v9 = vld [vmem:[#allocation3 + $0x3c] sm:$0x1]  ;;  %v9521_v51 = vsel %vm16748_vm11, %v19004_v13, %v19008_v49  ;;  %v9470_v43 = vld [vmem:[#allocation3 + $0x40] sm:$0xf] }
 0x6cc   : > { %v9308_v36 = vadd.f32 %v18955_v8, %v9296_v56  ;;  %v9306_v44 = vadd.f32 %v18955_v8, %v9294_v29  ;;  %v9400_v46 = vrot.slane %v9398_v62, 7  ;;  %v9473_v63 = vld [vmem:[#allocation3 + $0x44] sm:$0x1]  ;;  %v9458_v59 = vld [vmem:[#allocation3 + $0x30] sm:$0xf] }
 0x6cd   : > { %v9384_v31 = vrot.slane %v9382_v52, 7  ;;  %v9461_v61 = vld [vmem:[#allocation3 + $0x34] sm:$0x1] }
 0x6ce   : > { %v9316_v45 = vmax.f32 %v9308_v36, 0.0  ;;  %v9314_v28 = vmax.f32 %v9306_v44, 0.0  ;;  %v9403_v1 = vor.u32 %v9401_v12, %v9400_v46  ;;  %v9404_v8 = vrot.slane %v9400_v46, 4  ;;  %v19010_v35 = vld [vmem:[#allocation3 + $0x18] sm:$0xf] }
 0x6cf   : > { %v9387_v60 = vor.u32 %v9385_v32, %v9384_v31  ;;  %v9388_v0 = vrot.slane %v9384_v31, 4  ;;  %v19012_v7 = vld [vmem:[#allocation3 + $0x8] sm:$0xf]  ;;  %v19014_v11 = vld [vmem:[#allocation3 + $0xc] sm:$0x1]  ;;  %v9551_v22 = vshrl.u32 %v19010_v35, 16 }
 0x6d0   : > { %v13974_v48 = vpack.c.bf16 %v9316_v45, %v9316_v45  ;;  %v13972_v5 = vpack.c.bf16 %v9314_v28, %v9314_v28  ;;  %v9465_v27 = vsel %vm16724_vm8, %v9403_v1, %v9464_v57  ;;  %v9468_v15 = vsel %vm16697_vm3, %v9404_v8, %v9467_v9  ;;  %v19039_v20 = vld [vmem:[#allocation3 + $0x1c] sm:$0x1]  ;;  %v19042_v36 = vld [vmem:[#allocation3 + $0x20] sm:$0xf]  ;;  %v19052_v45 = vld [vmem:[#allocation3 + $0x24] sm:$0x1] }
 0x6d1   : > { %v9453_v17 = vsel %vm16724_vm8, %v9387_v60, %v9452_v19  ;;  %v9456_v14 = vsel %vm16697_vm3, %v9388_v0, %v9455_v47  ;;  %9469 = vst [vmem:[#allocation3 + $0x3c] sm:$0x1] %v9468_v15  ;;  %9466 = vst [vmem:[#allocation3 + $0x38] sm:$0xf] %v9465_v27  ;;  %v19029_v10 = vld [vmem:[#allocation3 + $0x10] sm:$0xf] }
 0x6d2   : > { %9457 = vst [vmem:[#allocation3 + $0x2c] sm:$0x1] %v9456_v14  ;;  %9454 = vst [vmem:[#allocation3 + $0x28] sm:$0xf] %v9453_v17  ;;  %v9406_v53 = vshrl.u32 %v13974_v48, 16  ;;  %v9409_v40 = vshll.u32 %v13974_v48, 16 }
 0x6d3   : > { %v9390_v41 = vshrl.u32 %v13972_v5, 16  ;;  %v9554_v34 = vshll.u32 %v19010_v35, 16  ;;  %v9523_v38 = vshrl.u32 %v19012_v7, 16  ;;  %v9526_v26 = vshll.u32 %v19012_v7, 16  ;;  %v19035_v2 = vld [vmem:[#allocation3 + $0x14] sm:$0x1] }
 0x6d4   : > { %v9532_v18 = vshll.u32 %v19014_v11, 16  ;;  %v9537_v33 = vshrl.u32 %v19029_v10, 16  ;;  %v9408_v42 = vrot.slane %v9406_v53, 7  ;;  %v9393_v58 = vshll.u32 %v13972_v5, 16 }
 0x6d5   : > { %v9392_v16 = vrot.slane %v9390_v41, 7  ;;  %v9540_v54 = vshll.u32 %v19029_v10, 16  ;;  %v9525_v4 = vrot.slane %v9523_v38, 4  ;;  %v9528_v6 = vrot.slane %v9526_v26, 5 }
 0x6d6   : > { %v9539_v30 = vrot.slane %v9537_v33, 4  ;;  %v9546_v39 = vshll.u32 %v19035_v2, 16  ;;  %v9411_v56 = vor.u32 %v9409_v40, %v9408_v42  ;;  %v9412_v29 = vrot.slane %v9408_v42, 4 }
 0x6d7   : > { %v9395_v62 = vor.u32 %v9393_v58, %v9392_v16  ;;  %v9396_v52 = vrot.slane %v9392_v16, 4  ;;  %v9529_v44 = vor.u32 %v9528_v6, %v9525_v4  ;;  %v9534_v46 = vrot.slane %v9532_v18, 5 }
 0x6d8   : > { %v9542_v12 = vrot.slane %v9540_v54, 5  ;;  %v9553_v31 = vrot.slane %v9551_v22, 4  ;;  %v9471_v32 = vsel %vm16724_vm8, %v9411_v56, %v9470_v43  ;;  %v9474_v9 = vsel %vm16697_vm3, %v9412_v29, %v9473_v63  ;;  %v19065_v14 = vld [vmem:[#allocation3 + $0x38] sm:$0xf]  ;;  %v19076_v58 = vld [vmem:[#allocation3 + $0x3c] sm:$0x1] }
 0x6d9   : > { %v9459_v19 = vsel %vm16724_vm8, %v9395_v62, %v9458_v59  ;;  %v9462_v47 = vsel %vm16697_vm3, %v9396_v52, %v9461_v61  ;;  %9475 = vst [vmem:[#allocation3 + $0x44] sm:$0x1] %v9474_v9  ;;  %9472 = vst [vmem:[#allocation3 + $0x40] sm:$0xf] %v9471_v32  ;;  %v9530_v28 = vrot.slane %v9529_v44, 4  ;;  %v9556_v8 = vrot.slane %v9554_v34, 5 }
 0x6da   : > { %9463 = vst [vmem:[#allocation3 + $0x34] sm:$0x1] %v9462_v47  ;;  %9460 = vst [vmem:[#allocation3 + $0x30] sm:$0xf] %v9459_v19  ;;  %v9543_v1 = vor.u32 %v9542_v12, %v9539_v30  ;;  %v9560_v57 = vshll.u32 %v19039_v20, 16  ;;  %v9548_v0 = vrot.slane %v9546_v39, 5 }
 0x6db   : > { %v19055_v60 = vld [vmem:[#allocation3 + $0x28] sm:$0xf]  ;;  %v9565_v23 = vshrl.u32 %v19042_v36, 16  ;;  %v9568_v48 = vshll.u32 %v19042_v36, 16  ;;  %v9535_v5 = vsel %vm16748_vm11, %v9530_v28, %v9534_v46  ;;  %v9557_v27 = vor.u32 %v9556_v8, %v9553_v31  ;;  %v19062_v15 = vld [vmem:[#allocation3 + $0x2c] sm:$0x1] }
 0x6dc   : > { %v9579_v25 = vshrl.u32 %v19055_v60, 16  ;;  %v9544_v22 = vrot.slane %v9543_v1, 4  ;;  %v9574_v17 = vshll.u32 %v19052_v45, 16  ;;  %v13745_v53 = vcombine.low %v9521_v51, %v9535_v5  ;;  %v16015_v63 = vld [vmem:[#allocation10 + $0x8] sm:$0xff]   ;;  %v9905_v29 = vld [vmem:[#allocation3 + $0x10] sm:$0xe] }
 0x6dd   : > { %v9562_v40 = vrot.slane %v9560_v57, 5  ;;  %v9567_v41 = vrot.slane %v9565_v23, 4  ;;  %v9570_v34 = vrot.slane %v9568_v48, 5  ;;  %v9558_v26 = vrot.slane %v9557_v27, 4  ;;  %v9906_v19 = vld [vmem:[#allocation3 + $0x18] sm:$0xe] }
 0x6de   : > { %v9549_v38 = vsel %vm16748_vm11, %v9544_v22, %v9548_v0  ;;  %v9581_v18 = vrot.slane %v9579_v25, 4  ;;  %v9582_v33 = vshll.u32 %v19055_v60, 16  ;;  %15084 = vmatprep.mubr.bf16.mxu1 %v13745_v53  ;;  %v9588_v16 = vshll.u32 %v19062_v15, 16  ;;  %v16016_v47 = vld [vmem:[#allocation10 + $0x10] sm:$0xff]  }
 0x6df   : > { %v9571_v42 = vor.u32 %v9570_v34, %v9567_v41  ;;  %v9607_v54 = vshrl.u32 %v19065_v14, 16  ;;  %v9610_v13 = vshll.u32 %v19065_v14, 16  ;;  %v9563_v49 = vsel %vm16748_vm11, %v9558_v26, %v9562_v40  ;;  %v16018_v40 = vld [vmem:[#allocation10 + $0x18] sm:$0xff]   ;;  %v9910_v34 = vld [vmem:[#allocation3 + $0x38] sm:$0xe] }
 0x6e0   : > { %v9584_v51 = vrot.slane %v9582_v33, 5  ;;  %v13746_v43 = vcombine.low %v9549_v38, %v9563_v49  ;;  %v9576_v59 = vrot.slane %v9574_v17, 5  ;;  %v9590_v62 = vrot.slane %v9588_v16, 5  ;;  %v16019_v49 = vld [vmem:[#allocation10 + $0x20] sm:$0xff]  }
 0x6e1   : > { %v19082_v61 = vld [vmem:[#allocation3 + $0x30] sm:$0xf]  ;;  %v9506_v4 = vld [vmem:[#allocation3 + $0x34] sm:$0x1]  ;;  %v9572_v6 = vrot.slane %v9571_v42, 4  ;;  %v9609_v52 = vrot.slane %v9607_v54, 4  ;;  %v13757_v42 = vcombine.low %v18945_v24, %v19012_v7 }
 0x6e2   : > { %v9585_v30 = vor.u32 %v9584_v51, %v9581_v18  ;;  %v9593_v39 = vshrl.u32 %v19082_v61, 16  ;;  %v9596_v56 = vshll.u32 %v19082_v61, 16  ;;  %15085 = vmatmul.mubr.bf16.vlgmr.msra.gmra.mrb[8].mxu1 %v13746_v43  ;;  %v9612_v44 = vrot.slane %v9610_v13, 5  ;;  %v9909_v53 = vld [vmem:[#allocation3 + $0x30] sm:$0xe]  ;;  %v16020_v24 = vld [vmem:[#allocation10 + $0x28] sm:$0xff]  }
 0x6e3   : > { %v9616_v46 = vshll.u32 %v19076_v58, 16  ;;  %15093 = vmatpush3.bf16.msra.mxu1 %v18942_v37  ;;  %v9602_v9 = vshll.u32 %v9506_v4, 16  ;;  %v9577_v1 = vsel %vm16748_vm11, %v9572_v6, %v9576_v59  ;;  %v13771_v0 = vrot.slane %v9905_v29, 9  ;;  %v16021_v7 = vld [vmem:[#allocation10 + $0x30] sm:$0xff]   ;;  %v16024_v59 = vld [vmem:[#allocation10 + $0x80] sm:$0xff]  }
 0x6e4   : > { %v9586_v12 = vrot.slane %v9585_v30, 4  ;;  %v9595_v31 = vrot.slane %v9593_v39, 4  ;;  %v9598_v32 = vrot.slane %v9596_v56, 5  ;;  %15094 = vmatprep.subr.bf16.mxu1 %v16015_v63  ;;  %v9613_v28 = vor.u32 %v9612_v44, %v9609_v52  ;;  %v9904_v6 = vld [vmem:[#allocation3 + $0x8] sm:$0xe]  ;;  %v16026_v39 = vld [vmem:[#allocation10 + $0x88] sm:$0xff]  }
 0x6e5   : > { %v9937_v37 = vrot.slane %v19035_v2, 5  ;;  %v13772_v25 = vrot.slane %v9906_v19, 9  ;;  %v9604_v22 = vrot.slane %v9602_v9, 5  ;;  %v9618_v27 = vrot.slane %v9616_v46, 5  ;;  %v16028_v46 = vld [vmem:[#allocation10 + $0x90] sm:$0xff]   ;;  %v16033_v9 = vld [vmem:[#allocation10 + $0xb8] sm:$0xff]  }
 0x6e6   : > { %v9591_v8 = vsel %vm16748_vm11, %v9586_v12, %v9590_v62  ;;  %v9599_v57 = vor.u32 %v9598_v32, %v9595_v31  ;;  %v9614_v48 = vrot.slane %v9613_v28, 4  ;;  %v9941_v17 = vrot.slane %v19039_v20, 5  ;;  %v16032_v31 = vld [vmem:[#allocation10 + $0xb0] sm:$0xff]   ;;  %v9908_v32 = vld [vmem:[#allocation3 + $0x28] sm:$0xe] }
 0x6e7   : > { %v13747_v23 = vcombine.low %v9577_v1, %v9591_v8  ;;  %15095 = vmatpush3.bf16.msra.mxu1 %v16015_v63  ;;  %v19096_v41 = vsel %vm17103_vm14, %v13771_v0, %v9937_v37  ;;  %v13775_v33 = vrot.slane %v9909_v53, 9  ;;  %v9953_v16 = vrot.slane %v9506_v4, 5  ;;  %v9903_v4 = vld [vmem:[#allocation3] sm:$0xe]  ;;  %v16035_v0 = vld [vmem:[#allocation10 + $0xc8] sm:$0xff]   ;;  %v16039_v37 = vld [vmem:[#allocation10 + $0xe0] sm:$0xff]  }
 0x6e8   : > { %v9600_v5 = vrot.slane %v9599_v57, 4  ;;  %15096 = vmatprep.subr.bf16.mxu1 %v16016_v47  ;;  %v9619_v2 = vsel %vm16748_vm11, %v9614_v48, %v9618_v27  ;;  %v19104_v26 = vsel %vm17103_vm14, %v13772_v25, %v9941_v17  ;;  %v13776_v54 = vrot.slane %v9910_v34, 9  ;;  %v9907_v19 = vld [vmem:[#allocation3 + $0x20] sm:$0xe]  ;;  %v16037_v48 = vld [vmem:[#allocation3 + $0x8] ss:$8 sps:$4 sm:$0xff]  }
 0x6e9   : > { %15088 = vmatprep.mubr.bf16.mxu1 %v13747_v23  ;;  %v13778_v18 = vcombine.low %v19096_v41, %v19104_v26  ;;  %v9957_v13 = vrot.slane %v19076_v58, 5  ;;  %v19113_v51 = vsel %vm17103_vm14, %v13775_v33, %v9953_v16  ;;  %v16022_v58 = vld [vmem:[#allocation10 + $0x38] sm:$0xff]   ;;  %v13758_v30 = vcombine.low %v19029_v10, %v19010_v35  ;;  %v16040_v25 = vld [vmem:[#allocation10 + $0xe8] sm:$0xff]   ;;  %v16044_v26 = vld [vmem:[#allocation10 + $0x100] sm:$0xff]  }
 0x6ea   : > { %v9605_v38 = vsel %vm16748_vm11, %v9600_v5, %v9604_v22  ;;  %v13759_v56 = vcombine.low %v19042_v36, %v19055_v60  ;;  %v13769_v29 = vrot.slane %v9903_v4, 9  ;;  %v9929_v62 = vrot.slane %v18971_v55, 5  ;;  %v16029_v36 = vld [vmem:[#allocation10 + $0x98] sm:$0xff]   ;;  %v16031_v60 = vld [vmem:[#allocation10 + $0xa8] sm:$0xff]   ;;  %v10285_v5 = vld [vmem:[#allocation3 + $0x10] sm:$0xf] }
 0x6eb   : > { %v13748_v20 = vcombine.low %v9605_v38, %v9619_v2  ;;  %15097 = vmatpush3.bf16.msra.mxu1 %v16016_v47  ;;  %v19117_v43 = vsel %vm17103_vm14, %v13776_v54, %v9957_v13  ;;  %v13770_v52 = vrot.slane %v9904_v6, 9  ;;  %v9933_v44 = vrot.slane %v19014_v11, 5  ;;  %v16030_v11 = vld [vmem:[#allocation10 + $0xa0] sm:$0xff]   ;;  %v16041_v22 = vld [vmem:[#allocation10 + $0xf0] sm:$0xff]   ;;  %v10283_v27 = vld [vmem:[#allocation3 + $0x8] sm:$0xf] }
 0x6ec   : > { %15098 = vmatprep.subr.bf16.mxu1 %v16018_v40  ;;  %v13780_v63 = vcombine.low %v19113_v51, %v19117_v43  ;;  %v9930_v12 = vsel %vm17103_vm14, %v13769_v29, %v9929_v62  ;;  %v13760_v10 = vcombine.low %v19082_v61, %v19065_v14  ;;  %v13774_v14 = vrot.slane %v9908_v32, 9  ;;  %v16034_v47 = vld [vmem:[#allocation10 + $0xc0] sm:$0xff]   ;;  %v19147_v16 = vld [vmem:[#allocation3 + $0xc] sm:$0x1]  ;;  %v16043_v54 = vld [vmem:[#allocation3 + $0x18] ss:$8 sps:$4 sm:$0xff]  }
 0x6ed   : > { %15089 = vmatmul.mubr.bf16.gmra.mrb[12].mxu1 %v13748_v20  ;;  %v9934_v35 = vsel %vm17103_vm14, %v13770_v52, %v9933_v44  ;;  %v9949_v61 = vrot.slane %v19062_v15, 5  ;;  %v13773_v28 = vrot.slane %v9907_v19, 9  ;;  %v9945_v1 = vrot.slane %v19052_v45, 5  ;;  %v16036_v15 = vld [vmem:[#allocation10 + $0xd0] sm:$0xff]   ;;  %v16038_v45 = vld [vmem:[#allocation10 + $0xd8] sm:$0xff]   ;;  %v16046_v13 = vld [vmem:[#allocation10 + $0x108] sm:$0xff]  }
 0x6ee   : > { %15108 = vmatprep.mubr.bf16.mxu1 %v13757_v42  ;;  %v13777_v55 = vcombine.low %v9930_v12, %v9934_v35  ;;  %v10314_v17 = vshrl.u32 %v10285_v5, 16  ;;  %v10317_v53 = vshll.u32 %v10285_v5, 16  ;;  %v10300_v41 = vshrl.u32 %v10283_v27, 16  ;;  %v19145_v33 = vld [vmem:[#allocation3 + $0x14] sm:$0x1]  ;;  %v16085_v52 = vld [vmem:[#allocation12 + $0x8] sm:$0xff]  }
 0x6ef   : > { %15099 = vmatpush3.bf16.msra.mxu1 %v16018_v40  ;;  %v9950_v8 = vsel %vm17103_vm14, %v13774_v14, %v9949_v61  ;;  %v9946_v57 = vsel %vm17103_vm14, %v13773_v28, %v9945_v1  ;;  %v16042_v40 = vld [vmem:[#allocation10 + $0xf8] sm:$0xff]   ;;  %v10303_v34 = vshll.u32 %v10283_v27, 16  ;;  %v10323_v51 = vshll.u32 %v19145_v33, 16  ;;  %v10287_v6 = vld [vmem:[#allocation3 + $0x18] sm:$0xf]  ;;  %v16087_v19 = vld [vmem:[#allocation12 + $0x10] sm:$0xff]  }
 0x6f0   : > { %15100 = vmatprep.subr.bf16.mxu1 %v16019_v49  ;;  %v13779_v23 = vcombine.low %v9946_v57, %v9950_v8  ;;  %v10316_v38 = vrot.slane %v10314_v17, 4  ;;  %v10319_v2 = vrot.slane %v10317_v53, 5  ;;  %v10302_v20 = vrot.slane %v10300_v41, 4  ;;  %v16045_v43 = vld [vmem:[#allocation3 + $0x28] ss:$8 sps:$4 sm:$0xff]  }
 0x6f1   : > { %v10325_v4 = vrot.slane %v10323_v51, 5  ;;  %v10328_v29 = vshrl.u32 %v10287_v6, 16  ;;  %v10331_v62 = vshll.u32 %v10287_v6, 16  ;;  %v16047_v44 = vld [vmem:[#allocation3 + $0x38] ss:$8 sps:$4 sm:$0xff]   ;;  %v16049_v12 = vld [vmem:[#allocation10 + $0x118] sm:$0xff]  }
 0x6f2   : > { %v10320_v42 = vor.u32 %v10319_v2, %v10316_v38  ;;  %v16050_v14 = vld [vmem:[#allocation10 + $0x120] sm:$0xff]   ;;  %v19155_v8 = vld [vmem:[#allocation3 + $0x1c] sm:$0x1]  ;;  %v16089_v5 = vld [vmem:[#allocation12 + $0x18] sm:$0xff]   ;;  %vm12848_vm3 = vcmask 1041409  }
 0x6f3   : > { %15101 = vmatpush3.bf16.msra.mxu1 %v16019_v49  ;;  %v10333_v32 = vrot.slane %v10331_v62, 5  ;;  %v19159_v17 = vld [vmem:[#allocation3 + $0x2c] sm:$0x1]  ;;  %v10337_v41 = vshll.u32 %v19155_v8, 16 }
 0x6f4   : > { %15102 = vmatprep.subr.bf16.mxu1 %v16020_v24 }
 0x6f5   : > { %v19176_v6 = vrot.slane %v10337_v41, 5  ;;  %v16054_v41 = vld [vmem:[#allocation10 + $0x140] sm:$0xff]  }
 0x6f7   : > { %15103 = vmatpush3.bf16.msra.mxu1 %v16020_v24  ;;  %v10321_v24 = vrot.slane %v10320_v42, 4 }
 0x6f8   : > { %15104 = vmatprep.subr.bf16.mxu1 %v16021_v7 }
 0x6fb   : > { %15105 = vmatpush3.bf16.msra.mxu1 %v16021_v7  ;;  %v16083_v7 = vld [vmem:[#allocation12] sm:$0xff]  }
 0x6fc   : > { %15106 = vmatprep.subr.bf16.mxu1 %v16022_v58  ;;  %15284 = vmatprep.subr.bf16.mxu0 %v16083_v7 }
 0x6fd   : > { %15285 = vmatpush3.bf16.msra.mxu0 %v16083_v7  ;;  %v16052_v7 = vld [vmem:[#allocation10 + $0x130] sm:$0xff]  }
 0x6fe   : > { %15286 = vmatprep.subr.bf16.mxu0 %v16085_v52 }
 0x6ff   : > { %15107 = vmatpush3.bf16.msra.mxu1 %v16022_v58  ;;  %v16048_v58 = vld [vmem:[#allocation10 + $0x110] sm:$0xff]  }
 0x700   : > { %15116 = vmatprep.subr.bf16.mxu1 %v16024_v59 }
 0x701   : > { %15287 = vmatpush3.bf16.msra.mxu0 %v16085_v52 }
 0x702   : > { %15109 = vmatmul.mubr.bf16.vlgmr.msra.gmra.mrb[8].mxu1 %v13758_v30  ;;  %v10289_v30 = vld [vmem:[#allocation3 + $0x20] sm:$0xf]  ;;  %15288 = vmatprep.subr.bf16.mxu0 %v16087_v19 }
 0x703   : > { %15112 = vmatprep.mubr.bf16.mxu1 %v13759_v56  ;;  %15117 = vmatpush3.bf16.msra.mxu1 %v16024_v59  ;;  %v10326_v56 = vsel %vm16748_vm11, %v10321_v24, %v10325_v4  ;;  %v10342_v35 = vshrl.u32 %v10289_v30, 16  ;;  %v16091_v24 = vld [vmem:[#allocation12 + $0x20] sm:$0xff]   ;;  %v19174_v4 = vld [vmem:[#allocation3 + $0x44] sm:$0x1] }
 0x704   : > { %15118 = vmatprep.subr.bf16.mxu1 %v16026_v39 }
 0x705   : > { %v10344_v61 = vrot.slane %v10342_v35, 4  ;;  %15289 = vmatpush3.bf16.msra.mxu0 %v16087_v19 }
 0x706   : > { %15290 = vmatprep.subr.bf16.mxu0 %v16089_v5 }
 0x707   : > { %15119 = vmatpush3.bf16.msra.mxu1 %v16026_v39 }
 0x708   : > { %15120 = vmatprep.subr.bf16.mxu1 %v16028_v46 }
 0x709   : > { %15291 = vmatpush3.bf16.msra.mxu0 %v16089_v5  ;;  %v10572_v5 = vld [vmem:[#allocation3 + $0x40] sm:$0xe] }
 0x70a   : > { %15113 = vmatmul.mubr.bf16.gmra.mrb[12].mxu1 %v13760_v10  ;;  %v10345_v10 = vshll.u32 %v10289_v30, 16  ;;  %15292 = vmatprep.subr.bf16.mxu0 %v16091_v24 }
 0x70b   : > { %15121 = vmatpush3.bf16.msra.mxu1 %v16028_v46  ;;  %15132 = vmatprep.mubr.bf16.mxu1 %v13777_v55  ;;  %v10293_v55 = vld [vmem:[#allocation3 + $0x30] sm:$0xf] }
 0x70c   : > { %15122 = vmatprep.subr.bf16.mxu1 %v16029_v36  ;;  %v10370_v28 = vshrl.u32 %v10293_v55, 16  ;;  %v10373_v1 = vshll.u32 %v10293_v55, 16  ;;  %v10407_v55 = vshll.u32 %v19174_v4, 16 }
 0x70d   : > { %15293 = vmatpush3.bf16.msra.mxu0 %v16091_v24 }
 0x70e   : > { %v10372_v53 = vrot.slane %v10370_v28, 4 }
 0x70f   : > { %15123 = vmatpush3.bf16.msra.mxu1 %v16029_v36 }
 0x710   : > { %15124 = vmatprep.subr.bf16.mxu1 %v16030_v11 }
 0x713   : > { %15125 = vmatpush3.bf16.msra.mxu1 %v16030_v11  ;;  %v10291_v11 = vld [vmem:[#allocation3 + $0x28] sm:$0xf] }
 0x714   : > { %15126 = vmatprep.subr.bf16.mxu1 %v16031_v60 }
 0x717   : > { %15127 = vmatpush3.bf16.msra.mxu1 %v16031_v60  ;;  %v10297_v60 = vld [vmem:[#allocation3 + $0x40] sm:$0xf] }
 0x718   : > { %15128 = vmatprep.subr.bf16.mxu1 %v16032_v31  ;;  %v10398_v57 = vshrl.u32 %v10297_v60, 16 }
 0x71a   : > { %v10400_v38 = vrot.slane %v10398_v57, 4 }
 0x71b   : > { %15129 = vmatpush3.bf16.msra.mxu1 %v16032_v31  ;;  %v10330_v31 = vrot.slane %v10328_v29, 4 }
 0x71c   : > { %15130 = vmatprep.subr.bf16.mxu1 %v16033_v9 }
 0x71f   : > { %15131 = vmatpush3.bf16.msra.mxu1 %v16033_v9  ;;  %v10295_v9 = vld [vmem:[#allocation3 + $0x38] sm:$0xf] }
 0x720   : > { %15140 = vmatprep.subr.bf16.mxu1 %v16034_v47 }
 0x722   : > { %15133 = vmatmul.mubr.bf16.vlgmr.msra.gmra.mrb[8].mxu1 %v13778_v18  ;;  %v10305_v18 = vrot.slane %v10303_v34, 5 }
 0x723   : > { %15136 = vmatprep.mubr.bf16.mxu1 %v13779_v23  ;;  %15141 = vmatpush3.bf16.msra.mxu1 %v16034_v47  ;;  %v10347_v47 = vrot.slane %v10345_v10, 5  ;;  %v19157_v23 = vld [vmem:[#allocation3 + $0x24] sm:$0x1] }
 0x724   : > { %15142 = vmatprep.subr.bf16.mxu1 %v16035_v0  ;;  %v10306_v49 = vor.u32 %v10305_v18, %v10302_v20  ;;  %v10351_v34 = vshll.u32 %v19157_v23, 16 }
 0x725   : > { %v10348_v27 = vor.u32 %v10347_v47, %v10344_v61  ;;  %v10569_v61 = vld [vmem:[#allocation3 + $0x28] sm:$0xe]  ;;  %v10570_v47 = vld [vmem:[#allocation3 + $0x30] sm:$0xe] }
 0x726   : > { %v10307_v59 = vrot.slane %v10306_v49, 4  ;;  %v10353_v29 = vrot.slane %v10351_v34, 5 }
 0x727   : > { %15143 = vmatpush3.bf16.msra.mxu1 %v16035_v0  ;;  %v10401_v0 = vshll.u32 %v10297_v60, 16  ;;  %v16093_v60 = vld [vmem:[#allocation12 + $0x28] sm:$0xff]  }
 0x728   : > { %15144 = vmatprep.subr.bf16.mxu1 %v16036_v15  ;;  %15294 = vmatprep.subr.bf16.mxu0 %v16093_v60 }
 0x729   : > { %v10403_v2 = vrot.slane %v10401_v0, 5  ;;  %v10603_v0 = vrot.slane %v19157_v23, 5  ;;  %15295 = vmatpush3.bf16.msra.mxu0 %v16093_v60 }
 0x72a   : > { %15137 = vmatmul.mubr.bf16.gmra.mrb[12].mxu1 %v13780_v63  ;;  %v10309_v63 = vshll.u32 %v19147_v16, 16 }
 0x72b   : > { %15145 = vmatpush3.bf16.msra.mxu1 %v16036_v15  ;;  %15156 = vmatprep.mubr.bf16.mxu1 %v16037_v48  ;;  %v10356_v15 = vshrl.u32 %v10291_v11, 16  ;;  %v10384_v48 = vshrl.u32 %v10295_v9, 16 }
 0x72c   : > { %15146 = vmatprep.subr.bf16.mxu1 %v16038_v45  ;;  %v10311_v39 = vrot.slane %v10309_v63, 5  ;;  %v19170_v63 = vld [vmem:[#allocation3 + $0x3c] sm:$0x1] }
 0x72d   : > { %v10358_v20 = vrot.slane %v10356_v15, 4  ;;  %v10386_v42 = vrot.slane %v10384_v48, 4  ;;  %v10571_v15 = vld [vmem:[#allocation3 + $0x38] sm:$0xe] }
 0x72e   : > { %v10312_v46 = vsel %vm16748_vm11, %v10307_v59, %v10311_v39  ;;  %v10404_v39 = vor.u32 %v10403_v2, %v10400_v38  ;;  %v10599_v2 = vrot.slane %v19155_v8, 5 }
 0x72f   : > { %15147 = vmatpush3.bf16.msra.mxu1 %v16038_v45  ;;  %v13801_v36 = vcombine.low %v10312_v46, %v10326_v56  ;;  %v10359_v45 = vshll.u32 %v10291_v11, 16  ;;  %v10566_v56 = vld [vmem:[#allocation3 + $0x10] sm:$0xe]  ;;  %v19180_v46 = vld [vmem:[#allocation3 + $0x8] sm:$0xe] }
 0x730   : > { %15148 = vmatprep.subr.bf16.mxu1 %v16039_v37  ;;  %v10567_v11 = vld [vmem:[#allocation3 + $0x18] sm:$0xe]  ;;  %v13814_v19 = vrot.slane %v10566_v56, 9 }
 0x731   : > { %v10361_v18 = vrot.slane %v10359_v45, 5  ;;  %v13815_v38 = vrot.slane %v10567_v11, 9 }
 0x733   : > { %15149 = vmatpush3.bf16.msra.mxu1 %v16039_v37  ;;  %v10387_v37 = vshll.u32 %v10295_v9, 16  ;;  %v10362_v62 = vor.u32 %v10361_v18, %v10358_v20  ;;  %v10607_v18 = vrot.slane %v19159_v17, 5 }
 0x734   : > { %15150 = vmatprep.subr.bf16.mxu1 %v16040_v25 }
 0x735   : > { %v10363_v45 = vrot.slane %v10362_v62, 4 }
 0x737   : > { %15151 = vmatpush3.bf16.msra.mxu1 %v16040_v25  ;;  %v10334_v25 = vor.u32 %v10333_v32, %v10330_v31  ;;  %v16053_v31 = vld [vmem:[#allocation10 + $0x138] sm:$0xff]  }
 0x738   : > { %15152 = vmatprep.subr.bf16.mxu1 %v16041_v22 }
 0x739   : > { %v19167_v51 = vrot.slane %v10334_v25, 4  ;;  %v13813_v25 = vrot.slane %v19180_v46, 9  ;;  %v16172_v46 = vld.sshfl [vmem:[%s16682_s17 + $0x10] sm:$0x33 pattern:$0x75316420] }
 0x73b   : > { %15153 = vmatpush3.bf16.msra.mxu1 %v16041_v22  ;;  %v16051_v22 = vld [vmem:[#allocation10 + $0x128] sm:$0xff]   ;;  %v10340_v10 = vsel %vm16748_vm11, %v19167_v51, %v19176_v6 }
 0x73c   : > { %15154 = vmatprep.subr.bf16.mxu1 %v16042_v40 }
 0x73f   : > { %15155 = vmatpush3.bf16.msra.mxu1 %v16042_v40  ;;  %v10375_v40 = vrot.slane %v10373_v1, 5  ;;  %v10405_v1 = vrot.slane %v10404_v39, 4 }
 0x740   : > { %15164 = vmatprep.subr.bf16.mxu1 %v16044_v26 }
 0x741   : > { %v10376_v59 = vor.u32 %v10375_v40, %v10372_v53  ;;  %v16095_v40 = vld [vmem:[#allocation12 + $0x30] sm:$0xff]  }
 0x742   : > { %15157 = vmatmul.mubr.bf16.vlgmr.msra.gmra.mrb[8].mxu1 %v16043_v54  ;;  %v10389_v54 = vrot.slane %v10387_v37, 5  ;;  %15296 = vmatprep.subr.bf16.mxu0 %v16095_v40 }
 0x743   : > { %15160 = vmatprep.mubr.bf16.mxu1 %v16045_v43  ;;  %15165 = vmatpush3.bf16.msra.mxu1 %v16044_v26  ;;  %v19163_v26 = vld [vmem:[#allocation3 + $0x34] sm:$0x1]  ;;  %v10365_v43 = vshll.u32 %v19159_v17, 16  ;;  %v10377_v9 = vrot.slane %v10376_v59, 4  ;;  %v16097_v17 = vld [vmem:[#allocation12 + $0x38] sm:$0xff]   ;;  %v19227_v59 = vsel %vm17103_vm14, %v13815_v38, %v10599_v2 }
 0x744   : > { %15166 = vmatprep.subr.bf16.mxu1 %v16046_v13  ;;  %v10379_v30 = vshll.u32 %v19163_v26, 16  ;;  %v10390_v52 = vor.u32 %v10389_v54, %v10386_v42  ;;  %v10611_v53 = vrot.slane %v19163_v26, 5  ;;  %v13817_v26 = vrot.slane %v10569_v61, 9  ;;  %15297 = vmatpush3.bf16.msra.mxu0 %v16095_v40  ;;  %v16058_v2 = vld [vmem:[#allocation10 + $0x160] sm:$0xff]  }
 0x745   : > { %v13819_v42 = vrot.slane %v10571_v15, 9  ;;  %v10615_v54 = vrot.slane %v19170_v63, 5  ;;  %15298 = vmatprep.subr.bf16.mxu0 %v16097_v17 }
 0x746   : > { %v10381_v28 = vrot.slane %v10379_v30, 5  ;;  %v10391_v48 = vrot.slane %v10390_v52, 4  ;;  %v19234_v39 = vsel %vm17103_vm14, %v13817_v26, %v10607_v18  ;;  %v16170_v52 = vld.sshfl [vmem:[%s16682_s17] sm:$0x33 pattern:$0x75316420] }
 0x747   : > { %15167 = vmatpush3.bf16.msra.mxu1 %v16046_v13  ;;  %v16413_v13 = vmov 1966171168   ;;  %v11494_v11 = vcombine.high %v16170_v52, %v16170_v52 }
 0x748   : > { %15168 = vmatprep.subr.bf16.mxu1 %v16048_v58  ;;  %v19165_v49 = vunpack.c.l.s4 %v16413_v13  ;;  %v10382_v23 = vsel %vm16748_vm11, %v10377_v9, %v10381_v28  ;;  %v13820_v13 = vrot.slane %v10572_v5, 9  ;;  %15299 = vmatpush3.bf16.msra.mxu0 %v16097_v17  ;;  %v11542_v9 = vcombine.high %v16172_v46, %v16172_v46 }
 0x74a   : > { %15161 = vmatmul.mubr.bf16.gmra.mrb[12].mxu1 %v16047_v44  ;;  %v10393_v44 = vshll.u32 %v19170_v63, 16  ;;  %v11489_v35 = vunpack.c.0.s8 %v19165_v49  ;;  %v10619_v49 = vrot.slane %v19174_v4, 5  ;;  %v16055_v63 = vld [vmem:[#allocation10 + $0x148] sm:$0xff]  }
 0x74b   : > { %15169 = vmatpush3.bf16.msra.mxu1 %v16048_v58  ;;  %15180 = vmatprep.mubr.bf16.mxu1 %v13801_v36  ;;  %v19172_v58 = vrot.slane %v10348_v27, 4  ;;  %v10367_v36 = vrot.slane %v10365_v43, 5  ;;  %v13818_v27 = vrot.slane %v10570_v47, 9 }
 0x74c   : > { %15170 = vmatprep.subr.bf16.mxu1 %v16049_v12  ;;  %v10395_v37 = vrot.slane %v10393_v44, 5  ;;  %v19213_v8 = vsub.s32 %v11489_v35, %v18233_v21  ;;  %v19244_v62 = vsel %vm17103_vm14, %v13820_v13, %v10619_v49  ;;  %v16171_v44 = vld.sshfl [vmem:[%s16682_s17 + $0x4] sm:$0x33 pattern:$0x75316420] }
 0x74d   : > { %v10354_v32 = vsel %vm16748_vm11, %v19172_v58, %v10353_v29  ;;  %v10368_v43 = vsel %vm16748_vm11, %v10363_v45, %v10367_v36  ;;  %v19219_v24 = vsel %vm17103_vm14, %v13818_v27, %v10611_v53  ;;  %v19240_v29 = vsel %vm17103_vm14, %v13819_v42, %v10615_v54  ;;  %v16173_v35 = vld.sshfl [vmem:[%s16682_s17 + $0x14] sm:$0x33 pattern:$0x75316420] }
 0x74e   : > { %v13802_v51 = vcombine.low %v10340_v10, %v10354_v32  ;;  %v10396_v58 = vsel %vm16748_vm11, %v10391_v48, %v10395_v37  ;;  %v13823_v56 = vcombine.low %v19234_v39, %v19219_v24  ;;  %v19251_v10 = vld.sshfl [vmem:[%s16682_s17 + $0x20] sm:$0x33 pattern:$0x75316420]  ;;  %v11501_v60 = vrot.slane %v16170_v52, %v19213_v8  ;;  %v16059_v52 = vld [vmem:[#allocation10 + $0x168] sm:$0xff]  }
 0x74f   : > { %15171 = vmatpush3.bf16.msra.mxu1 %v16049_v12  ;;  %v10568_v12 = vld [vmem:[#allocation3 + $0x20] sm:$0xe]  ;;  %v19254_v36 = vld.sshfl [vmem:[%s16682_s17 + $0x24] sm:$0x33 pattern:$0x75316420]  ;;  %v11525_v32 = vrot.slane %v16171_v44, %v19213_v8  ;;  %v11573_v61 = vrot.slane %v16173_v35, %v19213_v8  ;;  %v11508_v47 = vrot.slane %v11494_v11, %v19213_v8  ;;  %v11556_v15 = vrot.slane %v11542_v9, %v19213_v8 }
 0x750   : > { %15172 = vmatprep.subr.bf16.mxu1 %v16050_v14  ;;  %v13816_v57 = vrot.slane %v10568_v12, 9  ;;  %v16056_v12 = vld [vmem:[#allocation10 + $0x150] sm:$0xff]   ;;  %v11509_v28 = vcombine.high %v11501_v60, %v11501_v60 }
 0x751   : > { %v11581_v37 = vcombine.high %v11573_v61, %v11573_v61  ;;  %v11558_v27 = vcombine.high %v11556_v15, %v11556_v15 }
 0x752   : > { %v11921_v40 = vrot.slane %v11509_v28, %v19213_v8 }
 0x753   : > { %15173 = vmatpush3.bf16.msra.mxu1 %v16050_v14  ;;  %v10595_v14 = vrot.slane %v19145_v33, 5  ;;  %v10591_v33 = vrot.slane %v19147_v16, 5  ;;  %v19207_v16 = vsel %vm17103_vm14, %v13816_v57, %v10603_v0  ;;  %v11533_v57 = vcombine.high %v11525_v32, %v11525_v32  ;;  %v16057_v0 = vld [vmem:[#allocation10 + $0x158] sm:$0xff]  }
 0x754   : > { %15174 = vmatprep.subr.bf16.mxu1 %v16051_v22  ;;  %v13822_v30 = vcombine.low %v19227_v59, %v19207_v16  ;;  %v16064_v16 = vld [vmem:[#allocation10 + $0x190] sm:$0xff]  }
 0x755   : > { %v19200_v34 = vsel %vm17103_vm14, %v13814_v19, %v10595_v14  ;;  %v10592_v21 = vsel %vm17103_vm14, %v13813_v25, %v10591_v33  ;;  %v11549_v19 = vrot.slane %v16172_v46, %v19213_v8  ;;  %v11566_v14 = vcombine.high %v16173_v35, %v16173_v35 }
 0x756   : > { %v13821_v6 = vcombine.low %v10592_v21, %v19200_v34  ;;  %v11510_v25 = vcombine.high %v11508_v47, %v11508_v47  ;;  %v11907_v33 = vrot.slane %v11508_v47, %v19213_v8  ;;  %v11977_v42 = vrot.slane %v11533_v57, %v19213_v8 }
 0x757   : > { %15175 = vmatpush3.bf16.msra.mxu1 %v16051_v22  ;;  %v10409_v22 = vrot.slane %v10407_v55, 5  ;;  %v19257_v55 = vld.sshfl [vmem:[%s16682_s17 + $0x30] sm:$0x33 pattern:$0x75316420]  ;;  %v11557_v45 = vcombine.high %v11549_v19, %v11549_v19  ;;  %v11580_v48 = vrot.slane %v11566_v14, %v19213_v8  ;;  %v12005_v49 = vrot.slane %v11549_v19, %v19213_v8 }
 0x758   : > { %15176 = vmatprep.subr.bf16.mxu1 %v16052_v7  ;;  %v11914_v34 = vrot.slane %v11907_v33, %v19213_v8  ;;  %v11935_v38 = vrot.slane %v11510_v25, %v19213_v8  ;;  %v11984_v17 = vrot.slane %v11977_v42, %v19213_v8  ;;  %v12089_v35 = vrot.slane %v11581_v37, %v19213_v8 }
 0x759   : > { %v10410_v20 = vsel %vm16748_vm11, %v10405_v1, %v10409_v22  ;;  %v11893_v22 = vrot.slane %v11501_v60, %v19213_v8  ;;  %v11582_v53 = vcombine.high %v11580_v48, %v11580_v48  ;;  %v12012_v21 = vrot.slane %v12005_v49, %v19213_v8 }
 0x75a   : > { %v13804_v4 = vcombine.low %v10396_v58, %v10410_v20  ;;  %v11928_v20 = vrot.slane %v11921_v40, %v19213_v8  ;;  %v11942_v54 = vrot.slane %v11935_v38, %v19213_v8  ;;  %v12096_v19 = vrot.slane %v12089_v35, %v19213_v8 }
 0x75b   : > { %15177 = vmatpush3.bf16.msra.mxu1 %v16052_v7  ;;  %v13803_v7 = vcombine.low %v10368_v43, %v10382_v23  ;;  %v19272_v23 = vrot.slane %v11893_v22, %v19213_v8  ;;  %v12103_v60 = vrot.slane %v11582_v53, %v19213_v8  ;;  %v12789_v57 = vunpack.c.l.b16 %v11984_v17 }
 0x75c   : > { %15178 = vmatprep.subr.bf16.mxu1 %v16053_v31  ;;  %v12785_v14 = vunpack.c.l.b16 %v11928_v20  ;;  %v12797_v33 = vunpack.c.l.b16 %v12096_v19  ;;  %v16061_v20 = vld [vmem:[#allocation10 + $0x178] sm:$0xff]  }
 0x75d   : > { %v12110_v47 = vrot.slane %v12103_v60, %v19213_v8  ;;  %v12858_v38 = vrot.slane %v12789_v57, 2  ;;  %v16063_v57 = vld [vmem:[#allocation10 + $0x188] sm:$0xff]  }
 0x75e   : > { %v12850_v40 = vrot.slane %v12785_v14, 6 }
 0x75f   : > { %15179 = vmatpush3.bf16.msra.mxu1 %v16053_v31  ;;  %v11518_v31 = vcombine.high %v16171_v44, %v16171_v44 }
 0x760   : > { %15188 = vmatprep.subr.bf16.mxu1 %v16054_v41 }
 0x761   : > { %v11532_v1 = vrot.slane %v11518_v31, %v19213_v8  ;;  %v12783_v31 = vunpack.c.l.b16 %v19272_v23 }
 0x762   : > { %15181 = vmatmul.mubr.bf16.vlgmr.msra.gmra.mrb[8].mxu1 %v13802_v51  ;;  %v12019_v51 = vrot.slane %v11556_v15, %v19213_v8 }
 0x763   : > { %15184 = vmatprep.mubr.bf16.mxu1 %v13803_v7  ;;  %15189 = vmatpush3.bf16.msra.mxu1 %v16054_v41  ;;  %v11534_v5 = vcombine.high %v11532_v1, %v11532_v1  ;;  %v11949_v41 = vrot.slane %v11525_v32, %v19213_v8  ;;  %v11963_v18 = vrot.slane %v11532_v1, %v19213_v8  ;;  %v12784_v32 = vunpack.c.l.b16 %v11914_v34 }
 0x764   : > { %15190 = vmatprep.subr.bf16.mxu1 %v16055_v63  ;;  %v12033_v7 = vrot.slane %v11557_v45, %v19213_v8  ;;  %v12791_v45 = vunpack.c.l.b16 %v12012_v21 }
 0x765   : > { %v11956_v26 = vrot.slane %v11949_v41, %v19213_v8  ;;  %v11991_v13 = vrot.slane %v11534_v5, %v19213_v8  ;;  %v11970_v43 = vrot.slane %v11963_v18, %v19213_v8  ;;  %v12847_v53 = vrot.slane %v12784_v32, 7 }
 0x766   : > { %v12040_v44 = vrot.slane %v12033_v7, %v19213_v8 }
 0x767   : > { %15191 = vmatpush3.bf16.msra.mxu1 %v16055_v63  ;;  %v12047_v63 = vrot.slane %v11558_v27, %v19213_v8  ;;  %v11998_v58 = vrot.slane %v11991_v13, %v19213_v8  ;;  %v12787_v28 = vunpack.c.l.b16 %v11956_v26  ;;  %v12788_v1 = vunpack.c.l.b16 %v11970_v43 }
 0x768   : > { %15192 = vmatprep.subr.bf16.mxu1 %v16056_v12  ;;  %v12793_v37 = vunpack.c.l.b16 %v12040_v44  ;;  %v12798_v27 = vunpack.c.l.b16 %v12110_v47  ;;  %v12849_v26 = vsel %vm12848_vm3, %v12847_v53, %v12783_v31  ;;  %v12872_v43 = vrot.slane %v12797_v33, 2  ;;  %v16062_v44 = vld [vmem:[#allocation10 + $0x180] sm:$0xff]  }
 0x769   : > { %v12054_v46 = vrot.slane %v12047_v63, %v19213_v8  ;;  %v12790_v15 = vunpack.c.l.b16 %v11998_v58  ;;  %v12854_v23 = vrot.slane %v12787_v28, 4  ;;  %v12856_v34 = vrot.slane %v12788_v1, 3 }
 0x76a   : > { %15185 = vmatmul.mubr.bf16.gmra.mrb[12].mxu1 %v13804_v4  ;;  %v12026_v4 = vrot.slane %v12019_v51, %v19213_v8  ;;  %v12864_v42 = vrot.slane %v12793_v37, 6  ;;  %v12851_v13 = vsel %vm7132_vm0, %v12850_v40, %v12849_v26  ;;  %v12874_v63 = vrot.slane %v12798_v27, 1 }
 0x76b   : > { %15193 = vmatpush3.bf16.msra.mxu1 %v16056_v12  ;;  %15204 = vmatprep.mubr.bf16.mxu1 %v13821_v6  ;;  %v12061_v6 = vrot.slane %v11573_v61, %v19213_v8  ;;  %v12075_v12 = vrot.slane %v11580_v48, %v19213_v8  ;;  %v12786_v61 = vunpack.c.l.b16 %v11942_v54  ;;  %v12794_v25 = vunpack.c.l.b16 %v12054_v46 }
 0x76c   : > { %15194 = vmatprep.subr.bf16.mxu1 %v16057_v0  ;;  %v12792_v48 = vunpack.c.l.b16 %v12026_v4  ;;  %v11590_v58 = vcombine.high %v19251_v10, %v19251_v10  ;;  %v11638_v28 = vcombine.high %v19257_v55, %v19257_v55  ;;  %v11645_v1 = vrot.slane %v19257_v55, %v19213_v8 }
 0x76d   : > { %v12068_v11 = vrot.slane %v12061_v6, %v19213_v8  ;;  %v12082_v9 = vrot.slane %v12075_v12, %v19213_v8  ;;  %v12852_v41 = vrot.slane %v12786_v61, 5  ;;  %v12866_v54 = vrot.slane %v12794_v25, 5 }
 0x76e   : > { %v12862_v18 = vrot.slane %v12792_v48, 7  ;;  %v11597_v6 = vrot.slane %v19251_v10, %v19213_v8  ;;  %v11604_v35 = vrot.slane %v11590_v58, %v19213_v8  ;;  %v11652_v37 = vrot.slane %v11638_v28, %v19213_v8 }
 0x76f   : > { %15195 = vmatpush3.bf16.msra.mxu1 %v16057_v0  ;;  %v16060_v0 = vld [vmem:[#allocation10 + $0x170] sm:$0xff]   ;;  %v12795_v5 = vunpack.c.l.b16 %v12068_v11  ;;  %v12796_v22 = vunpack.c.l.b16 %v12082_v9  ;;  %v12853_v17 = vsel %vm7135_vm1, %v12852_v41, %v12851_v13  ;;  %v11621_v11 = vrot.slane %v19254_v36, %v19213_v8  ;;  %v16066_v13 = vld [vmem:[#allocation10 + $0x198] sm:$0xff]  }
 0x770   : > { %15196 = vmatprep.subr.bf16.mxu1 %v16058_v2  ;;  %v12863_v7 = vsel %vm12848_vm3, %v12862_v18, %v12791_v45  ;;  %v12855_v21 = vsel %vm7138_vm2, %v12854_v23, %v12853_v17  ;;  %v11605_v10 = vcombine.high %v11597_v6, %v11597_v6  ;;  %v13824_v9 = vcombine.low %v19240_v29, %v19244_v62  ;;  %v16177_v29 = vld.sshfl [vmem:[%s16682_s17 + $0x34] sm:$0x33 pattern:$0x75316420] }
 0x771   : > { %v12868_v49 = vrot.slane %v12795_v5, 4  ;;  %v12870_v51 = vrot.slane %v12796_v22, 3  ;;  %v12865_v4 = vsel %vm7132_vm0, %v12864_v42, %v12863_v7  ;;  %v12857_v46 = vsel %vm7141_vm5, %v12856_v34, %v12855_v21  ;;  %v16065_v7 = vld [vmem:[#allocation3 + $0x10] ss:$8 sps:$4 sm:$0xff]  }
 0x772   : > { %v12867_v12 = vsel %vm7135_vm1, %v12866_v54, %v12865_v4  ;;  %v12859_v60 = vsel %vm7144_vm6, %v12858_v38, %v12857_v46  ;;  %v11606_v61 = vcombine.high %v11604_v35, %v11604_v35  ;;  %v12117_v62 = vrot.slane %v11597_v6, %v19213_v8 }
 0x773   : > { %15197 = vmatpush3.bf16.msra.mxu1 %v16058_v2  ;;  %v12860_v2 = vrot.slane %v12790_v15, 1  ;;  %v12869_v31 = vsel %vm7138_vm2, %v12868_v49, %v12867_v12  ;;  %v12131_v15 = vrot.slane %v11604_v35, %v19213_v8  ;;  %v12145_v25 = vrot.slane %v11605_v10, %v19213_v8 }
 0x774   : > { %15198 = vmatprep.subr.bf16.mxu1 %v16059_v52  ;;  %v12871_v14 = vsel %vm7141_vm5, %v12870_v51, %v12869_v31  ;;  %v11653_v55 = vcombine.high %v11645_v1, %v11645_v1  ;;  %v11662_v5 = vcombine.high %v16177_v29, %v16177_v29  ;;  %v11669_v22 = vrot.slane %v16177_v29, %v19213_v8  ;;  %v16067_v31 = vld [vmem:[#allocation10 + $0x1a0] sm:$0xff]  }
 0x775   : > { %v12861_v19 = vsel %vm7147_vm7, %v12860_v2, %v12859_v60  ;;  %v12873_v47 = vsel %vm7144_vm6, %v12872_v43, %v12871_v14  ;;  %v19342_v33 = vrot.slane %v12117_v62, %v19213_v8  ;;  %v11654_v27 = vcombine.high %v11652_v37, %v11652_v37 }
 0x776   : > { %v12138_v53 = vrot.slane %v12131_v15, %v19213_v8  ;;  %v12159_v40 = vrot.slane %v11606_v61, %v19213_v8  ;;  %v11676_v59 = vrot.slane %v11662_v5, %v19213_v8  ;;  %v12173_v41 = vrot.slane %v11621_v11, %v19213_v8 }
 0x777   : > { %15199 = vmatpush3.bf16.msra.mxu1 %v16059_v52  ;;  %v11614_v52 = vcombine.high %v19254_v36, %v19254_v36  ;;  %v11629_v36 = vcombine.high %v11621_v11, %v11621_v11  ;;  %v11677_v23 = vcombine.high %v11669_v22, %v11669_v22  ;;  %v12229_v2 = vrot.slane %v11645_v1, %v19213_v8 }
 0x778   : > { %15200 = vmatprep.subr.bf16.mxu1 %v16060_v0  ;;  %v12166_v38 = vrot.slane %v12159_v40, %v19213_v8  ;;  %v12180_v26 = vrot.slane %v12173_v41, %v19213_v8  ;;  %v12257_v54 = vrot.slane %v11653_v55, %v19213_v8  ;;  %v12271_v43 = vrot.slane %v11654_v27, %v19213_v8  ;;  %v10945_v41 = vld [vmem:[#allocation3 + $0x10] sm:$0xf] }
 0x779   : > { %v11628_v32 = vrot.slane %v11614_v52, %v19213_v8  ;;  %v12201_v24 = vrot.slane %v11629_v36, %v19213_v8  ;;  %v12285_v17 = vrot.slane %v11669_v22, %v19213_v8  ;;  %v12299_v58 = vrot.slane %v11676_v59, %v19213_v8 }
 0x77a   : > { %v12313_v21 = vrot.slane %v11677_v23, %v19213_v8  ;;  %v12236_v6 = vrot.slane %v12229_v2, %v19213_v8  ;;  %v12278_v52 = vrot.slane %v12271_v43, %v19213_v8  ;;  %v12800_v46 = vunpack.c.l.b16 %v12138_v53 }
 0x77b   : > { %15201 = vmatpush3.bf16.msra.mxu1 %v16060_v0  ;;  %v12875_v0 = vsel %vm7147_vm7, %v12874_v63, %v12873_v47  ;;  %v11630_v48 = vcombine.high %v11628_v32, %v11628_v32  ;;  %v12187_v34 = vrot.slane %v11628_v32, %v19213_v8  ;;  %v12208_v42 = vrot.slane %v12201_v24, %v19213_v8 }
 0x77c   : > { %15202 = vmatprep.subr.bf16.mxu1 %v16061_v20  ;;  %v12960_v45 = vpack.c.b16 %v12875_v0, %v12861_v19  ;;  %v12264_v63 = vrot.slane %v12257_v54, %v19213_v8  ;;  %v12306_v12 = vrot.slane %v12299_v58, %v19213_v8  ;;  %v12320_v35 = vrot.slane %v12313_v21, %v19213_v8 }
 0x77d   : > { %v12215_v39 = vrot.slane %v11630_v48, %v19213_v8  ;;  %v12194_v18 = vrot.slane %v12187_v34, %v19213_v8  ;;  %v12802_v60 = vunpack.c.l.b16 %v12166_v38  ;;  %v12799_v32 = vunpack.c.l.b16 %v19342_v33  ;;  %v16068_v48 = vld [vmem:[#allocation10 + $0x1a8] sm:$0xff]  }
 0x77e   : > { %15300 = vmatprep.mubr.bf16.mxu0 %v12960_v45  ;;  %v12805_v14 = vunpack.c.l.b16 %v12208_v42  ;;  %v12809_v47 = vunpack.c.l.b16 %v12264_v63  ;;  %v12810_v36 = vunpack.c.l.b16 %v12278_v52  ;;  %v12807_v1 = vunpack.c.l.b16 %v12236_v6 }
 0x77f   : > { %15203 = vmatpush3.bf16.msra.mxu1 %v16061_v20  ;;  %v12243_v20 = vrot.slane %v11652_v37, %v19213_v8  ;;  %v12222_v49 = vrot.slane %v12215_v39, %v19213_v8  ;;  %v12804_v19 = vunpack.c.l.b16 %v12194_v18  ;;  %v12812_v0 = vunpack.c.l.b16 %v12306_v12 }
 0x780   : > { %15212 = vmatprep.subr.bf16.mxu1 %v16062_v44  ;;  %v12813_v29 = vunpack.c.l.b16 %v12320_v35  ;;  %v12876_v62 = vrot.slane %v12800_v46, 7  ;;  %v12880_v45 = vrot.slane %v12802_v60, 5  ;;  %v12892_v33 = vrot.slane %v12809_v47, 6  ;;  %v19391_v35 = vld [vmem:[#allocation3 + $0x14] sm:$0x1] }
 0x781   : > { %v12250_v51 = vrot.slane %v12243_v20, %v19213_v8  ;;  %v12806_v28 = vunpack.c.l.b16 %v12222_v49  ;;  %v12884_v55 = vrot.slane %v12804_v19, 3  ;;  %v12894_v27 = vrot.slane %v12810_v36, 5  ;;  %v19393_v60 = vld [vmem:[#allocation3 + $0x1c] sm:$0x1]  ;;  %v10959_v19 = vld [vmem:[#allocation3 + $0x48] sm:$0xf] }
 0x782   : > { %15205 = vmatmul.mubr.bf16.vlgmr.msra.gmra.mrb[8].mxu1 %v13822_v30  ;;  %v12152_v30 = vrot.slane %v12145_v25, %v19213_v8  ;;  %v12877_v22 = vsel %vm12848_vm3, %v12876_v62, %v12799_v32  ;;  %v12900_v39 = vrot.slane %v12813_v29, 2  ;;  %v10962_v54 = vshrl.u32 %v10945_v41, 16 }
 0x783   : > { %15208 = vmatprep.mubr.bf16.mxu1 %v13823_v56  ;;  %15213 = vmatpush3.bf16.msra.mxu1 %v16062_v44  ;;  %v11678_v56 = vcombine.high %v11676_v59, %v11676_v59  ;;  %v12292_v44 = vrot.slane %v12285_v17, %v19213_v8  ;;  %v12808_v61 = vunpack.c.l.b16 %v12250_v51  ;;  %v12888_v34 = vrot.slane %v12806_v28, 1  ;;  %v16076_v28 = vld [vmem:[#allocation10 + $0x1d0] sm:$0xff]  }
 0x784   : > { %15214 = vmatprep.subr.bf16.mxu1 %v16063_v57  ;;  %v12801_v11 = vunpack.c.l.b16 %v12152_v30  ;;  %v12898_v30 = vrot.slane %v12812_v0, 3  ;;  %v10964_v6 = vrot.slane %v10962_v54, 4  ;;  %v10971_v32 = vshll.u32 %v19391_v35, 16  ;;  %v10951_v0 = vld [vmem:[#allocation3 + $0x28] sm:$0xf] }
 0x785   : > { %v12327_v4 = vrot.slane %v11678_v56, %v19213_v8  ;;  %v12890_v5 = vrot.slane %v12808_v61, 7  ;;  %v16069_v56 = vld [vmem:[#allocation10 + $0x1b0] sm:$0xff]   ;;  %v10985_v47 = vshll.u32 %v19393_v60, 16  ;;  %v11060_v36 = vshrl.u32 %v10959_v19, 16 }
 0x786   : > { %v12878_v15 = vrot.slane %v12801_v11, 6  ;;  %v11063_v29 = vshll.u32 %v10959_v19, 16 }
 0x787   : > { %15215 = vmatpush3.bf16.msra.mxu1 %v16063_v57  ;;  %v12334_v10 = vrot.slane %v12327_v4, %v19213_v8  ;;  %v12811_v57 = vunpack.c.l.b16 %v12292_v44  ;;  %v12891_v59 = vsel %vm12848_vm3, %v12890_v5, %v12807_v1  ;;  %v16072_v44 = vld [vmem:[#allocation10 + $0x1c0] sm:$0xff]   ;;  %v10973_v1 = vrot.slane %v10971_v32, 5  ;;  %v19414_v32 = vld [vmem:[#allocation3 + $0x3c] sm:$0x1] }
 0x788   : > { %15216 = vmatprep.subr.bf16.mxu1 %v16064_v16  ;;  %v12879_v40 = vsel %vm7132_vm0, %v12878_v15, %v12877_v22  ;;  %v12893_v24 = vsel %vm7132_vm0, %v12892_v33, %v12891_v59  ;;  %v10987_v15 = vrot.slane %v10985_v47, 5  ;;  %v16077_v22 = vld [vmem:[#allocation10 + $0x1d8] sm:$0xff]   ;;  %v10953_v33 = vld [vmem:[#allocation3 + $0x30] sm:$0xf] }
 0x789   : > { %v12814_v37 = vunpack.c.l.b16 %v12334_v10  ;;  %v12896_v53 = vrot.slane %v12811_v57, 4  ;;  %v12881_v23 = vsel %vm7135_vm1, %v12880_v45, %v12879_v40  ;;  %v12895_v2 = vsel %vm7135_vm1, %v12894_v27, %v12893_v24  ;;  %v16074_v10 = vld [vmem:[#allocation10 + $0x1c8] sm:$0xff]   ;;  %v10949_v45 = vld [vmem:[#allocation3 + $0x20] sm:$0xf]  ;;  %v10960_v59 = vld [vmem:[#allocation3 + $0x4c] sm:$0x1] }
 0x78a   : > { %15209 = vmatmul.mubr.bf16.gmra.mrb[12].mxu1 %v13824_v9  ;;  %v12803_v9 = vunpack.c.l.b16 %v12180_v26  ;;  %v10947_v26 = vld [vmem:[#allocation3 + $0x18] sm:$0xf]  ;;  %v11065_v27 = vrot.slane %v11063_v29, 5  ;;  %v10990_v40 = vshrl.u32 %v10949_v45, 16  ;;  %v11021_v24 = vshll.u32 %v10953_v33, 16 }
 0x78b   : > { %15217 = vmatpush3.bf16.msra.mxu1 %v16064_v16  ;;  %15228 = vmatprep.mubr.bf16.mxu1 %v16065_v7  ;;  %v12886_v16 = vrot.slane %v12805_v14, 2  ;;  %v12902_v20 = vrot.slane %v12814_v37, 1  ;;  %v12897_v42 = vsel %vm7138_vm2, %v12896_v53, %v12895_v2  ;;  %v16070_v7 = vld [vmem:[#allocation10 + $0x1b8] sm:$0xff]   ;;  %v10976_v63 = vshrl.u32 %v10947_v26, 16  ;;  %v16073_v14 = vld [vmem:[#allocation3 + $0x30] ss:$8 sps:$4 sm:$0xff]  }
 0x78c   : > { %15218 = vmatprep.subr.bf16.mxu1 %v16066_v13  ;;  %v12882_v25 = vrot.slane %v12803_v9, 4  ;;  %v12899_v51 = vsel %vm7141_vm5, %v12898_v30, %v12897_v42  ;;  %v10979_v58 = vshll.u32 %v10947_v26, 16  ;;  %v11007_v37 = vshll.u32 %v10951_v0, 16  ;;  %v11234_v30 = vld [vmem:[#allocation3 + $0x48] sm:$0xe] }
 0x78d   : > { %v12901_v17 = vsel %vm7144_vm6, %v12900_v39, %v12899_v51  ;;  %v10978_v46 = vrot.slane %v10976_v63, 4  ;;  %v16078_v39 = vld [vmem:[#allocation10 + $0x1e0] sm:$0xff]   ;;  %v10955_v2 = vld [vmem:[#allocation3 + $0x38] sm:$0xf]  ;;  %v11281_v26 = vrot.slane %v10960_v59, 5  ;;  %v10992_v42 = vrot.slane %v10990_v40, 4 }
 0x78e   : > { %v12883_v38 = vsel %vm7138_vm2, %v12882_v25, %v12881_v23  ;;  %v12903_v21 = vsel %vm7147_vm7, %v12902_v20, %v12901_v17  ;;  %v10981_v12 = vrot.slane %v10979_v58, 5  ;;  %v11062_v25 = vrot.slane %v11060_v36, 4  ;;  %v16079_v63 = vld [vmem:[#allocation10 + $0x1e8] sm:$0xff]   ;;  %v16081_v40 = vld [vmem:[#allocation10 + $0x1f8] sm:$0xff]  }
 0x78f   : > { %15219 = vmatpush3.bf16.msra.mxu1 %v16066_v13  ;;  %v12885_v18 = vsel %vm7141_vm5, %v12884_v55, %v12883_v38  ;;  %v10965_v13 = vshll.u32 %v10945_v41, 16  ;;  %v16075_v55 = vld [vmem:[#allocation3 + $0x40] ss:$8 sps:$4 sm:$0xff]   ;;  %v11009_v23 = vrot.slane %v11007_v37, 5  ;;  %v11069_v38 = vshll.u32 %v10960_v59, 16 }
 0x790   : > { %15220 = vmatprep.subr.bf16.mxu1 %v16067_v31  ;;  %v12887_v49 = vsel %vm7144_vm6, %v12886_v16, %v12885_v18  ;;  %v10982_v9 = vor.u32 %v10981_v12, %v10978_v46  ;;  %v10993_v16 = vshll.u32 %v10949_v45, 16  ;;  %v13864_v20 = vrot.slane %v11234_v30, 9  ;;  %v19401_v18 = vld [vmem:[#allocation3 + $0x2c] sm:$0x1]  ;;  %v11227_v45 = vld [vmem:[#allocation3 + $0x10] sm:$0xe] }
 0x791   : > { %v12889_v43 = vsel %vm7147_vm7, %v12888_v34, %v12887_v49  ;;  %v10967_v52 = vrot.slane %v10965_v13, 5  ;;  %v11018_v34 = vshrl.u32 %v10953_v33, 16  ;;  %v10957_v13 = vld [vmem:[#allocation3 + $0x40] sm:$0xf]  ;;  %v19403_v49 = vld [vmem:[#allocation3 + $0x24] sm:$0x1] }
 0x792   : > { %v12961_v4 = vpack.c.b16 %v12903_v21, %v12889_v43  ;;  %v10983_v57 = vrot.slane %v10982_v9, 4  ;;  %v10995_v54 = vrot.slane %v10993_v16, 5  ;;  %v11023_v17 = vrot.slane %v11021_v24, 5 }
 0x793   : > { %15221 = vmatpush3.bf16.msra.mxu1 %v16067_v31  ;;  %v10968_v11 = vor.u32 %v10967_v52, %v10964_v6  ;;  %v16071_v31 = vld [vmem:[#allocation3 + $0x20] ss:$8 sps:$4 sm:$0xff]   ;;  %v11020_v43 = vrot.slane %v11018_v34, 4  ;;  %v11032_v58 = vshrl.u32 %v10955_v2, 16  ;;  %v11035_v21 = vshll.u32 %v10955_v2, 16 }
 0x794   : > { %15222 = vmatprep.subr.bf16.mxu1 %v16068_v48  ;;  %15301 = vmatmul.mubr.bf16.vlgmr.msra.gmra.mrb[32].mxu0 %v12961_v4  ;;  %v10988_v5 = vsel %vm16748_vm11, %v10983_v57, %v10987_v15  ;;  %v19408_v6 = vrot.slane %v11069_v38, 5  ;;  %v11013_v52 = vshll.u32 %v19401_v18, 16  ;;  %v11049_v46 = vshll.u32 %v10957_v13, 16  ;;  %v11229_v38 = vld [vmem:[#allocation3 + $0x20] sm:$0xe] }
 0x795   : > { %v10969_v61 = vrot.slane %v10968_v11, 4  ;;  %v10996_v12 = vor.u32 %v10995_v54, %v10992_v42  ;;  %v10999_v11 = vshll.u32 %v19403_v49, 16  ;;  %v11024_v9 = vor.u32 %v11023_v17, %v11020_v43 }
 0x796   : > { %v11034_v47 = vrot.slane %v11032_v58, 4  ;;  %v11037_v36 = vrot.slane %v11035_v21, 5  ;;  %v19425_v57 = vsel %vm17103_vm14, %v13864_v20, %v11281_v26  ;;  %v11051_v15 = vrot.slane %v11049_v46, 5  ;;  %v19458_v21 = vld [vmem:[#allocation3 + $0x28] sm:$0xe] }
 0x797   : > { %15223 = vmatpush3.bf16.msra.mxu1 %v16068_v48  ;;  %v10974_v62 = vsel %vm16748_vm11, %v10969_v61, %v10973_v1  ;;  %v11004_v48 = vshrl.u32 %v10951_v0, 16  ;;  %v16080_v61 = vld [vmem:[#allocation10 + $0x1f0] sm:$0xff]   ;;  %v11015_v0 = vrot.slane %v11013_v52, 5  ;;  %v11001_v37 = vrot.slane %v10999_v11, 5 }
 0x798   : > { %15224 = vmatprep.subr.bf16.mxu1 %v16069_v56  ;;  %v13845_v53 = vcombine.low %v10974_v62, %v10988_v5  ;;  %v11025_v33 = vrot.slane %v11024_v9, 4  ;;  %v11038_v16 = vor.u32 %v11037_v36, %v11034_v47  ;;  %v13857_v30 = vrot.slane %v11227_v45, 9  ;;  %v16180_v20 = vld.sshfl [vmem:[%s16682_s17 + $0x44] sm:$0x33 pattern:$0x75316420] }
 0x799   : > { %v11006_v41 = vrot.slane %v11004_v48, 4  ;;  %v10997_v48 = vrot.slane %v10996_v12, 4  ;;  %v13859_v52 = vrot.slane %v11229_v38, 9  ;;  %v11710_v46 = vcombine.high %v16180_v20, %v16180_v20  ;;  %v16084_v36 = vld [vmem:[#allocation10 + $0x208] sm:$0xff]   ;;  %v19476_v45 = vld [vmem:[#allocation3 + $0x30] sm:$0xe] }
 0x79a   : > { %v11039_v43 = vrot.slane %v11038_v16, 4  ;;  %v16181_v11 = vld.sshfl [vmem:[%s16682_s17 + $0x54] sm:$0x33 pattern:$0x75316420]  ;;  %v11261_v9 = vrot.slane %v19403_v49, 5 }
 0x79b   : > { %15225 = vmatpush3.bf16.msra.mxu1 %v16069_v56  ;;  %v11066_v56 = vor.u32 %v11065_v27, %v11062_v25  ;;  %v11010_v51 = vor.u32 %v11009_v23, %v11006_v41  ;;  %v11041_v25 = vshll.u32 %v19414_v32, 16  ;;  %v11253_v41 = vrot.slane %v19391_v35, 5  ;;  %v16086_v16 = vld [vmem:[#allocation10 + $0x210] sm:$0xff]  }
 0x79c   : > { %15226 = vmatprep.subr.bf16.mxu1 %v16070_v7 }
 0x79d   : > { %v19406_v4 = vrot.slane %v11066_v56, 4  ;;  %v11002_v56 = vsel %vm16748_vm11, %v10997_v48, %v11001_v37  ;;  %v11043_v54 = vrot.slane %v11041_v25, 5  ;;  %v11724_v25 = vrot.slane %v11710_v46, %v19213_v8 }
 0x79f   : > { %15227 = vmatpush3.bf16.msra.mxu1 %v16070_v7  ;;  %v16178_v7 = vld.sshfl [vmem:[%s16682_s17 + $0x40] sm:$0x33 pattern:$0x75316420]  ;;  %v11072_v1 = vsel %vm16748_vm11, %v19406_v4, %v19408_v6  ;;  %v11044_v47 = vsel %vm16748_vm11, %v11039_v43, %v11043_v54  ;;  %v12411_v38 = vrot.slane %v11724_v25, %v19213_v8 }
 0x7a0   : > { %15236 = vmatprep.subr.bf16.mxu1 %v16072_v44  ;;  %v11686_v19 = vcombine.high %v16178_v7, %v16178_v7  ;;  %v19430_v5 = vrot.slane %v16178_v7, %v19213_v8  ;;  %v19452_v7 = vsel %vm17103_vm14, %v13857_v30, %v11253_v41  ;;  %v11765_v30 = vrot.slane %v16181_v11, %v19213_v8 }
 0x7a1   : > { %v12418_v3 = vrot.slane %v12411_v38, %v19213_v8 }
 0x7a2   : > { %15229 = vmatmul.mubr.bf16.vlgmr.msra.gmra.mrb[8].mxu1 %v16071_v31  ;;  %v19412_v31 = vld [vmem:[#allocation3 + $0x34] sm:$0x1]  ;;  %v11700_v27 = vrot.slane %v11686_v19, %v19213_v8  ;;  %v11701_v2 = vcombine.high %v19430_v5, %v19430_v5  ;;  %v12341_v19 = vrot.slane %v19430_v5, %v19213_v8 }
 0x7a3   : > { %15232 = vmatprep.mubr.bf16.mxu1 %v16073_v14  ;;  %15237 = vmatpush3.bf16.msra.mxu1 %v16072_v44  ;;  %v11046_v44 = vshrl.u32 %v10957_v13, 16  ;;  %v16179_v14 = vld.sshfl [vmem:[%s16682_s17 + $0x50] sm:$0x33 pattern:$0x75316420]  ;;  %v11027_v29 = vshll.u32 %v19412_v31, 16 }
 0x7a4   : > { %15238 = vmatprep.subr.bf16.mxu1 %v16074_v10  ;;  %v19444_v26 = vrot.slane %v16179_v14, %v19213_v8  ;;  %v12355_v13 = vrot.slane %v11700_v27, %v19213_v8 }
 0x7a5   : > { %v11048_v62 = vrot.slane %v11046_v44, 4  ;;  %v11029_v23 = vrot.slane %v11027_v29, 5  ;;  %v11702_v44 = vcombine.high %v11700_v27, %v11700_v27  ;;  %v13860_v29 = vrot.slane %v19458_v21, 9 }
 0x7a6   : > { %v11749_v12 = vcombine.high %v19444_v26, %v19444_v26 }
 0x7a7   : > { %15239 = vmatpush3.bf16.msra.mxu1 %v16074_v10  ;;  %v11011_v10 = vrot.slane %v11010_v51, 4  ;;  %v11052_v34 = vor.u32 %v11051_v15, %v11048_v62  ;;  %v11030_v51 = vsel %vm16748_vm11, %v11025_v33, %v11029_v23  ;;  %v11717_v62 = vrot.slane %v16180_v20, %v19213_v8 }
 0x7a8   : > { %15240 = vmatprep.subr.bf16.mxu1 %v16076_v28  ;;  %v13847_v49 = vcombine.low %v11030_v51, %v11044_v47  ;;  %v11265_v15 = vrot.slane %v19401_v18, 5  ;;  %v12383_v37 = vrot.slane %v11702_v44, %v19213_v8  ;;  %v12348_v33 = vrot.slane %v12341_v19, %v19213_v8 }
 0x7a9   : > { %v12453_v18 = vrot.slane %v19444_v26, %v19213_v8  ;;  %v12397_v41 = vrot.slane %v11717_v62, %v19213_v8  ;;  %v19493_v23 = vsel %vm17103_vm14, %v13859_v52, %v11261_v9  ;;  %v11726_v51 = vcombine.high %v11724_v25, %v11724_v25 }
 0x7aa   : > { %15233 = vmatmul.mubr.bf16.gmra.mrb[12].mxu1 %v16075_v55  ;;  %v11228_v55 = vld [vmem:[#allocation3 + $0x18] sm:$0xe]  ;;  %v12820_v25 = vunpack.c.l.b16 %v12418_v3 }
 0x7ab   : > { %15241 = vmatpush3.bf16.msra.mxu1 %v16076_v28  ;;  %15252 = vmatprep.mubr.bf16.mxu1 %v13845_v53  ;;  %v19417_v28 = vld [vmem:[#allocation3 + $0x44] sm:$0x1]  ;;  %v11734_v53 = vcombine.high %v16179_v14, %v16179_v14  ;;  %v13858_v24 = vrot.slane %v11228_v55, 9  ;;  %v12362_v14 = vrot.slane %v12355_v13, %v19213_v8  ;;  %v11758_v55 = vcombine.high %v16181_v11, %v16181_v11 }
 0x7ac   : > { %15242 = vmatprep.subr.bf16.mxu1 %v16077_v22  ;;  %v11055_v59 = vshll.u32 %v19417_v28, 16  ;;  %v12460_v26 = vrot.slane %v12453_v18, %v19213_v8  ;;  %v12404_v43 = vrot.slane %v12397_v41, %v19213_v8  ;;  %v19519_v11 = vsel %vm17103_vm14, %v13860_v29, %v11265_v15 }
 0x7ad   : > { %v11748_v35 = vrot.slane %v11734_v53, %v19213_v8  ;;  %v12816_v53 = vunpack.c.l.b16 %v12362_v14  ;;  %v11232_v14 = vld [vmem:[#allocation3 + $0x38] sm:$0xe] }
 0x7ae   : > { %v11057_v17 = vrot.slane %v11055_v59, 5  ;;  %v13861_v59 = vrot.slane %v19476_v45, 9  ;;  %v12823_v44 = vunpack.c.l.b16 %v12460_v26  ;;  %v12819_v19 = vunpack.c.l.b16 %v12404_v43  ;;  %v16094_v26 = vld [vmem:[#allocation10 + $0x230] sm:$0xff]  }
 0x7af   : > { %15243 = vmatpush3.bf16.msra.mxu1 %v16077_v22  ;;  %v11016_v22 = vsel %vm16748_vm11, %v11011_v10, %v11015_v0  ;;  %v12369_v10 = vrot.slane %v11701_v2, %v19213_v8  ;;  %v11750_v48 = vcombine.high %v11748_v35, %v11748_v35 }
 0x7b0   : > { %15244 = vmatprep.subr.bf16.mxu1 %v16078_v39  ;;  %v13846_v42 = vcombine.low %v11002_v56, %v11016_v22  ;;  %v12481_v22 = vrot.slane %v11749_v12, %v19213_v8  ;;  %v19498_v56 = vrot.slane %v11758_v55, %v19213_v8  ;;  %v16090_v12 = vld [vmem:[#allocation10 + $0x220] sm:$0xff]  }
 0x7b1   : > { %v12376_v5 = vrot.slane %v12369_v10, %v19213_v8  ;;  %v12439_v10 = vrot.slane %v11726_v51, %v19213_v8 }
 0x7b2   : > { %v12488_v2 = vrot.slane %v12481_v22, %v19213_v8  ;;  %v13862_v22 = vrot.slane %v11232_v14, 9 }
 0x7b3   : > { %15245 = vmatpush3.bf16.msra.mxu1 %v16078_v39  ;;  %v11257_v39 = vrot.slane %v19393_v60, 5  ;;  %v16082_v60 = vld [vmem:[#allocation10 + $0x200] sm:$0xff]   ;;  %v12817_v20 = vunpack.c.l.b16 %v12376_v5  ;;  %v16092_v5 = vld [vmem:[#allocation10 + $0x228] sm:$0xff]   ;;  %v12446_v41 = vrot.slane %v12439_v10, %v19213_v8 }
 0x7b4   : > { %15246 = vmatprep.subr.bf16.mxu1 %v16079_v63  ;;  %v12825_v4 = vunpack.c.l.b16 %v12488_v2 }
 0x7b5   : > { %v19456_v58 = vsel %vm17103_vm14, %v13858_v24, %v11257_v39  ;;  %v12390_v24 = vrot.slane %v12383_v37, %v19213_v8  ;;  %v12495_v39 = vrot.slane %v11750_v48, %v19213_v8  ;;  %v12906_v6 = vrot.slane %v12817_v20, 6 }
 0x7b6   : > { %v13865_v0 = vcombine.low %v19452_v7, %v19456_v58  ;;  %v11269_v7 = vrot.slane %v19412_v31, 5  ;;  %v12920_v37 = vrot.slane %v12825_v4, 6  ;;  %v12912_v20 = vrot.slane %v12820_v25, 3 }
 0x7b7   : > { %15247 = vmatpush3.bf16.msra.mxu1 %v16079_v63  ;;  %v11053_v63 = vrot.slane %v11052_v34, 4  ;;  %v11725_v34 = vcombine.high %v11717_v62, %v11717_v62  ;;  %v12502_v58 = vrot.slane %v12495_v39, %v19213_v8  ;;  %v12818_v21 = vunpack.c.l.b16 %v12390_v24 }
 0x7b8   : > { %15248 = vmatprep.subr.bf16.mxu1 %v16080_v61  ;;  %v11774_v62 = vcombine.high %v19498_v56, %v19498_v56 }
 0x7b9   : > { %v12425_v52 = vrot.slane %v11725_v34, %v19213_v8  ;;  %v12908_v47 = vrot.slane %v12818_v21, 5  ;;  %v12822_v21 = vunpack.c.l.b16 %v12446_v41  ;;  %v16162_v41 = vld [vmem:[#allocation12] sm:$0xff]  }
 0x7ba   : > { %v12551_v24 = vrot.slane %v11774_v62, %v19213_v8 }
 0x7bb   : > { %15249 = vmatpush3.bf16.msra.mxu1 %v16080_v61  ;;  %v12467_v61 = vrot.slane %v11748_v35, %v19213_v8  ;;  %v12904_v35 = vrot.slane %v12816_v53, 7  ;;  %v12432_v29 = vrot.slane %v12425_v52, %v19213_v8 }
 0x7bc   : > { %15250 = vmatprep.subr.bf16.mxu1 %v16081_v40 }
 0x7bd   : > { %v12474_v27 = vrot.slane %v12467_v61, %v19213_v8  ;;  %v12826_v61 = vunpack.c.l.b16 %v12502_v58  ;;  %v12821_v38 = vunpack.c.l.b16 %v12432_v29  ;;  %v12558_v58 = vrot.slane %v12551_v24, %v19213_v8 }
 0x7bf   : > { %15251 = vmatpush3.bf16.msra.mxu1 %v16081_v40  ;;  %v11058_v40 = vsel %vm16748_vm11, %v11053_v63, %v11057_v17  ;;  %v12824_v54 = vunpack.c.l.b16 %v12474_v27  ;;  %v12509_v17 = vrot.slane %v11765_v30, %v19213_v8  ;;  %v11773_v63 = vcombine.high %v11765_v30, %v11765_v30 }
 0x7c0   : > { %15260 = vmatprep.subr.bf16.mxu1 %v16082_v60  ;;  %v13848_v13 = vcombine.low %v11058_v40, %v11072_v1  ;;  %v12523_v1 = vrot.slane %v19498_v56, %v19213_v8  ;;  %v12910_v27 = vrot.slane %v12819_v19, 4  ;;  %v12922_v40 = vrot.slane %v12826_v61, 5 }
 0x7c1   : > { %v12918_v46 = vrot.slane %v12824_v54, 7  ;;  %v12516_v9 = vrot.slane %v12509_v17, %v19213_v8  ;;  %v13866_v56 = vcombine.low %v19493_v23, %v19519_v11  ;;  %v12914_v45 = vrot.slane %v12821_v38, 2 }
 0x7c2   : > { %15253 = vmatmul.mubr.bf16.vlgmr.msra.gmra.mrb[8].mxu1 %v13846_v42  ;;  %v12815_v42 = vunpack.c.l.b16 %v12348_v33  ;;  %v12530_v15 = vrot.slane %v12523_v1, %v19213_v8  ;;  %v11273_v33 = vrot.slane %v19414_v32, 5  ;;  %v11233_v32 = vld [vmem:[#allocation3 + $0x40] sm:$0xe]  ;;  %v12830_v14 = vunpack.c.l.b16 %v12558_v58 }
 0x7c3   : > { %15256 = vmatprep.mubr.bf16.mxu1 %v13847_v49  ;;  %15261 = vmatpush3.bf16.msra.mxu1 %v16082_v60  ;;  %v16088_v60 = vld [vmem:[#allocation10 + $0x218] sm:$0xff]   ;;  %v12537_v49 = vrot.slane %v11773_v63, %v19213_v8  ;;  %v12919_v55 = vsel %vm12848_vm3, %v12918_v46, %v12823_v44  ;;  %v12827_v18 = vunpack.c.l.b16 %v12516_v9  ;;  %v13863_v63 = vrot.slane %v11233_v32, 9 }
 0x7c4   : > { %15262 = vmatprep.subr.bf16.mxu1 %v16084_v36  ;;  %v12905_v31 = vsel %vm12848_vm3, %v12904_v35, %v12815_v42  ;;  %v12921_v39 = vsel %vm7132_vm0, %v12920_v37, %v12919_v55  ;;  %v12828_v2 = vunpack.c.l.b16 %v12530_v15  ;;  %v11274_v46 = vsel %vm17103_vm14, %v13862_v22, %v11273_v33 }
 0x7c5   : > { %v12907_v48 = vsel %vm7132_vm0, %v12906_v6, %v12905_v31  ;;  %v12544_v34 = vrot.slane %v12537_v49, %v19213_v8  ;;  %v12924_v54 = vrot.slane %v12827_v18, 4  ;;  %v12923_v51 = vsel %vm7135_vm1, %v12922_v40, %v12921_v39  ;;  %v16184_v6 = vld.sshfl [vmem:[%s16682_s17 + $0x64] sm:$0x33 pattern:$0x75316420] }
 0x7c6   : > { %v12909_v53 = vsel %vm7135_vm1, %v12908_v47, %v12907_v48  ;;  %v12926_v4 = vrot.slane %v12828_v2, 3  ;;  %v16185_v31 = vld.sshfl [vmem:[%s16682_s17 + $0x74] sm:$0x33 pattern:$0x75316420]  ;;  %v12916_v61 = vrot.slane %v12822_v21, 1  ;;  %v11806_v48 = vcombine.high %v16184_v6, %v16184_v6 }
 0x7c7   : > { %15263 = vmatpush3.bf16.msra.mxu1 %v16084_v36  ;;  %v16182_v36 = vld.sshfl [vmem:[%s16682_s17 + $0x60] sm:$0x33 pattern:$0x75316420]  ;;  %v12911_v42 = vsel %vm7138_vm2, %v12910_v27, %v12909_v53  ;;  %v12829_v3 = vunpack.c.l.b16 %v12544_v34  ;;  %v11854_v37 = vcombine.high %v16185_v31, %v16185_v31  ;;  %v12930_v33 = vrot.slane %v12830_v14, 1 }
 0x7c8   : > { %15264 = vmatprep.subr.bf16.mxu1 %v16086_v16  ;;  %v11789_v35 = vrot.slane %v16182_v36, %v19213_v8  ;;  %v12913_v52 = vsel %vm7141_vm5, %v12912_v20, %v12911_v42  ;;  %v11813_v18 = vrot.slane %v16184_v6, %v19213_v8  ;;  %v11861_v27 = vrot.slane %v16185_v31, %v19213_v8  ;;  %v16164_v31 = vld [vmem:[#allocation12 + $0x10] sm:$0xff]  }
 0x7c9   : > { %v12928_v47 = vrot.slane %v12829_v3, 2  ;;  %v11820_v34 = vrot.slane %v11806_v48, %v19213_v8  ;;  %v11868_v50 = vrot.slane %v11854_v37, %v19213_v8  ;;  %v16165_v37 = vld [vmem:[#allocation12 + $0x18] sm:$0xff]  }
 0x7ca   : > { %15257 = vmatmul.mubr.bf16.gmra.mrb[12].mxu1 %v13848_v13  ;;  %v11797_v1 = vcombine.high %v11789_v35, %v11789_v35  ;;  %v12565_v15 = vrot.slane %v11789_v35, %v19213_v8  ;;  %v11821_v42 = vcombine.high %v11813_v18, %v11813_v18  ;;  %v12733_v35 = vrot.slane %v11861_v27, %v19213_v8 }
 0x7cb   : > { %15265 = vmatpush3.bf16.msra.mxu1 %v16086_v16  ;;  %15276 = vmatprep.mubr.bf16.mxu1 %v13865_v0  ;;  %v16183_v0 = vld.sshfl [vmem:[%s16682_s17 + $0x70] sm:$0x33 pattern:$0x75316420]  ;;  %v11782_v16 = vcombine.high %v16182_v36, %v16182_v36  ;;  %v12915_v36 = vsel %vm7144_vm6, %v12914_v45, %v12913_v52  ;;  %v12747_v23 = vrot.slane %v11868_v50, %v19213_v8  ;;  %s19657_s17 = scalar_lea.hbm %s19712_s6, %s13975_s12 }
 0x7cc   : > { %15266 = vmatprep.subr.bf16.mxu1 %v16088_v60  ;;  %v11830_v30 = vcombine.high %v16183_v0, %v16183_v0  ;;  %v11837_v13 = vrot.slane %v16183_v0, %v19213_v8  ;;  %v12917_v53 = vsel %vm7147_vm7, %v12916_v61, %v12915_v36  ;;  %v12572_v32 = vrot.slane %v12565_v15, %v19213_v8 }
 0x7cd   : > { %v11796_v43 = vrot.slane %v11782_v16, %v19213_v8  ;;  %v12740_v6 = vrot.slane %v12733_v35, %v19213_v8 }
 0x7ce   : > { %v11844_v17 = vrot.slane %v11830_v30, %v19213_v8  ;;  %v11845_v44 = vcombine.high %v11837_v13, %v11837_v13  ;;  %v12677_v55 = vrot.slane %v11837_v13, %v19213_v8  ;;  %v11869_v13 = vcombine.high %v11861_v27, %v11861_v27 }
 0x7cf   : > { %15267 = vmatpush3.bf16.msra.mxu1 %v16088_v60  ;;  %v19547_v60 = vsel %vm17103_vm14, %v13861_v59, %v11269_v7  ;;  %v16096_v59 = vld [vmem:[#allocation10 + $0x238] sm:$0xff]   ;;  %v12925_v7 = vsel %vm7138_vm2, %v12924_v54, %v12923_v51  ;;  %v12579_v10 = vrot.slane %v11796_v43, %v19213_v8  ;;  %v11798_v62 = vcombine.high %v11796_v43, %v11796_v43  ;;  %v16163_v43 = vld [vmem:[#allocation12 + $0x8] sm:$0xff]  }
 0x7d0   : > { %15268 = vmatprep.subr.bf16.mxu1 %v16090_v12  ;;  %v12691_v9 = vrot.slane %v11844_v17, %v19213_v8  ;;  %v13867_v19 = vcombine.low %v19547_v60, %v11274_v46  ;;  %v12927_v0 = vsel %vm7141_vm5, %v12926_v4, %v12925_v7  ;;  %v11846_v49 = vcombine.high %v11844_v17, %v11844_v17 }
 0x7d1   : > { %v12705_v29 = vrot.slane %v11845_v44, %v19213_v8  ;;  %v12586_v25 = vrot.slane %v12579_v10, %v19213_v8  ;;  %v12929_v40 = vsel %vm7144_vm6, %v12928_v47, %v12927_v0  ;;  %v12607_v16 = vrot.slane %v11798_v62, %v19213_v8 }
 0x7d2   : > { %v12719_v30 = vrot.slane %v11846_v49, %v19213_v8  ;;  %v12684_v38 = vrot.slane %v12677_v55, %v19213_v8  ;;  %v12621_v54 = vrot.slane %v11813_v18, %v19213_v8  ;;  %v12635_v17 = vrot.slane %v11820_v34, %v19213_v8 }
 0x7d3   : > { %15269 = vmatpush3.bf16.msra.mxu1 %v16090_v12  ;;  %v11277_v12 = vrot.slane %v19417_v28, 5  ;;  %v12593_v28 = vrot.slane %v11797_v1, %v19213_v8  ;;  %v12712_v39 = vrot.slane %v12705_v29, %v19213_v8  ;;  %v12832_v2 = vunpack.c.l.b16 %v12586_v25 }
 0x7d4   : > { %15270 = vmatprep.subr.bf16.mxu1 %v16092_v5  ;;  %v12614_v60 = vrot.slane %v12607_v16, %v19213_v8  ;;  %v12726_v51 = vrot.slane %v12719_v30, %v19213_v8  ;;  %v12839_v58 = vunpack.c.l.b16 %v12684_v38  ;;  %v12628_v4 = vrot.slane %v12621_v54, %v19213_v8  ;;  %v16166_v16 = vld [vmem:[#allocation12 + $0x20] sm:$0xff]  }
 0x7d5   : > { %v11278_v22 = vsel %vm17103_vm14, %v13863_v63, %v11277_v12  ;;  %v12600_v24 = vrot.slane %v12593_v28, %v19213_v8  ;;  %v12831_v63 = vunpack.c.l.b16 %v12572_v32  ;;  %v12932_v21 = vrot.slane %v12832_v2, 7  ;;  %v16167_v2 = vld [vmem:[#allocation12 + $0x28] sm:$0xff]  }
 0x7d6   : > { %v13868_v52 = vcombine.low %v11278_v22, %v19425_v57  ;;  %v11870_v7 = vcombine.high %v11868_v50, %v11868_v50  ;;  %v12834_v1 = vunpack.c.l.b16 %v12614_v60  ;;  %v12842_v44 = vunpack.c.l.b16 %v12726_v51 }
 0x7d7   : > { %15271 = vmatpush3.bf16.msra.mxu1 %v16092_v5  ;;  %v12698_v5 = vrot.slane %v12691_v9, %v19213_v8  ;;  %v12833_v11 = vunpack.c.l.b16 %v12600_v24  ;;  %v12649_v46 = vrot.slane %v11821_v42, %v19213_v8  ;;  %v12761_v12 = vrot.slane %v11869_v13, %v19213_v8  ;;  %v16168_v13 = vld [vmem:[#allocation12 + $0x30] sm:$0xff]  }
 0x7d8   : > { %15272 = vmatprep.subr.bf16.mxu1 %v16094_v26  ;;  %v12642_v57 = vrot.slane %v12635_v17, %v19213_v8  ;;  %v12933_v14 = vsel %vm12848_vm3, %v12932_v21, %v12831_v63  ;;  %v12835_v47 = vunpack.c.l.b16 %v12628_v4  ;;  %v12843_v36 = vunpack.c.l.b16 %v12740_v6  ;;  %v13878_v6 = vld [vmem:[%s19711_s5 + $0x5] ss:$0 sm:$0xff] }
 0x7d9   : > { %v12840_v20 = vunpack.c.l.b16 %v12698_v5  ;;  %v12934_v10 = vrot.slane %v12833_v11, 6  ;;  %v12775_v62 = vrot.slane %v11870_v7, %v19213_v8  ;;  %v12936_v49 = vrot.slane %v12834_v1, 5 }
 0x7da   : > { %v12950_v48 = vrot.slane %v12842_v44, 5  ;;  %v12656_v28 = vrot.slane %v12649_v46, %v19213_v8  ;;  %v12768_v29 = vrot.slane %v12761_v12, %v19213_v8  ;;  %v12836_v55 = vunpack.c.l.b16 %v12642_v57 }
 0x7db   : > { %15273 = vmatpush3.bf16.msra.mxu1 %v16094_v26  ;;  %v12931_v26 = vsel %vm7147_vm7, %v12930_v33, %v12929_v40  ;;  %v12946_v3 = vrot.slane %v12840_v20, 7  ;;  %v12935_v15 = vsel %vm7132_vm0, %v12934_v10, %v12933_v14  ;;  %v12938_v22 = vrot.slane %v12835_v47, 4 }
 0x7dc   : > { %15274 = vmatprep.subr.bf16.mxu1 %v16096_v59  ;;  %v12962_v45 = vpack.c.b16 %v12931_v26, %v12917_v53  ;;  %v12952_v33 = vrot.slane %v12843_v36, 4  ;;  %v12782_v27 = vrot.slane %v12775_v62, %v19213_v8  ;;  %v12937_v53 = vsel %vm7135_vm1, %v12936_v49, %v12935_v15 }
 0x7dd   : > { %v12947_v61 = vsel %vm12848_vm3, %v12946_v3, %v12839_v58  ;;  %v12837_v30 = vunpack.c.l.b16 %v12656_v28  ;;  %v12939_v24 = vsel %vm7138_vm2, %v12938_v22, %v12937_v53  ;;  %v13887_v3 = vld [vmem:[%s19711_s5 + $0x6] ss:$0 sm:$0xff] }
 0x7de   : > { %v12846_v38 = vunpack.c.l.b16 %v12782_v27 }
 0x7df   : > { %15275 = vmatpush3.bf16.msra.mxu1 %v16096_v59  ;;  %v11822_v59 = vcombine.high %v11820_v34, %v11820_v34  ;;  %v12940_v34 = vrot.slane %v12836_v55, 3 }
 0x7e0   : > { %15308 = vmatprep.subr.bf16.mxu1 %v16162_v41  ;;  %v12958_v35 = vrot.slane %v12846_v38, 1 }
 0x7e1   : > { %v12663_v0 = vrot.slane %v11822_v59, %v19213_v8  ;;  %v12941_v26 = vsel %vm7141_vm5, %v12940_v34, %v12939_v24  ;;  %v19634_v59 = vld [vmem:[%s19711_s5 + $0x7] ss:$0 sm:$0xff] }
 0x7e2   : > { %15277 = vmatmul.mubr.bf16.vlgmr.msra.gmra.mrb[8].mxu1 %v13866_v56  ;;  %v12841_v56 = vunpack.c.l.b16 %v12712_v39 }
 0x7e3   : > { %15280 = vmatprep.mubr.bf16.mxu1 %v13867_v19  ;;  %15316 = vmatpush3.bf16.msra.mxu1 %v16162_v41  ;;  %v12754_v19 = vrot.slane %v12747_v23, %v19213_v8  ;;  %v12670_v18 = vrot.slane %v12663_v0, %v19213_v8  ;;  %v12845_v41 = vunpack.c.l.b16 %v12768_v29  ;;  %v12942_v8 = vrot.slane %v12837_v30, 2  ;;  %v16169_v23 = vld [vmem:[#allocation12 + $0x38] sm:$0xff]  }
 0x7e4   : > { %15309 = vmatprep.subr.bf16.mxu1 %v16163_v43  ;;  %v12948_v9 = vrot.slane %v12841_v56, 6 }
 0x7e5   : > { %v12844_v5 = vunpack.c.l.b16 %v12754_v19  ;;  %v12838_v32 = vunpack.c.l.b16 %v12670_v18  ;;  %v12956_v20 = vrot.slane %v12845_v41, 2  ;;  %v12943_v60 = vsel %vm7144_vm6, %v12942_v8, %v12941_v26 }
 0x7e6   : > { %v12949_v25 = vsel %vm7132_vm0, %v12948_v9, %v12947_v61 }
 0x7e7   : > { %15317 = vmatpush3.bf16.msra.mxu1 %v16163_v43  ;;  %v12951_v40 = vsel %vm7135_vm1, %v12950_v48, %v12949_v25  ;;  %v12954_v50 = vrot.slane %v12844_v5, 3  ;;  %v12944_v54 = vrot.slane %v12838_v32, 1 }
 0x7e8   : > { %15310 = vmatprep.subr.bf16.mxu1 %v16164_v31  ;;  %v12953_v39 = vsel %vm7138_vm2, %v12952_v33, %v12951_v40 }
 0x7e9   : > { %v12955_v42 = vsel %vm7141_vm5, %v12954_v50, %v12953_v39  ;;  %v12945_v43 = vsel %vm7147_vm7, %v12944_v54, %v12943_v60 }
 0x7ea   : > { %15281 = vmatmul.mubr.bf16.gmra.mrb[12].mxu1 %v13868_v52  ;;  %v12957_v51 = vsel %vm7144_vm6, %v12956_v20, %v12955_v42  ;;  %v13877_v52 = vld [vmem:[%s19711_s5 + $0x4] ss:$0 sm:$0xff] }
 0x7eb   : > { %15318 = vmatpush3.bf16.msra.mxu1 %v16164_v31  ;;  %15304 = vmatprep.mubr.bf16.mxu1 %v12962_v45  ;;  %v12959_v17 = vsel %vm7147_vm7, %v12958_v35, %v12957_v51 }
 0x7ec   : > { %15311 = vmatprep.subr.bf16.mxu1 %v16165_v37  ;;  %v12963_v11 = vpack.c.b16 %v12959_v17, %v12945_v43 }
 0x7ef   : > { %15319 = vmatpush3.bf16.msra.mxu1 %v16165_v37 }
 0x7f0   : > { %15312 = vmatprep.subr.bf16.mxu1 %v16166_v16 }
 0x7f3   : > { %15320 = vmatpush3.bf16.msra.mxu1 %v16166_v16 }
 0x7f4   : > { %15313 = vmatprep.subr.bf16.mxu1 %v16167_v2 }
 0x7f7   : > { %15321 = vmatpush3.bf16.msra.mxu1 %v16167_v2 }
 0x7f8   : > { %15314 = vmatprep.subr.bf16.mxu1 %v16168_v13 }
 0x7fb   : > { %15322 = vmatpush3.bf16.msra.mxu1 %v16168_v13 }
 0x7fc   : > { %15315 = vmatprep.subr.bf16.mxu1 %v16169_v23 }
 0x7ff   : > { %15323 = vmatpush3.bf16.msra.mxu1 %v16169_v23 }
 0x802   : > { %15305 = vmatmul.mubr.bf16.vlgmr.msra.gmra.mrb[16].mxu1 %v12963_v11 }
 0x867   : > { %v15302_v56 = vpop.f32.mrb[32].mxu0 }
 0x868   : > { %v13050_v63 = vpop.f32.mrb[33].mxu0  ;;  %v13089_v45 = vmul.f32 %v15302_v56, %v13887_v3 }
 0x869   : > { %v15303_v58 = vpop.f32.mrb[34].mxu0  ;;  %v13087_v7 = vmul.f32 %v13887_v3, %v13050_v63 }
 0x86a   : > { %v13053_v21 = vpop.f32.mrb[35].mxu0  ;;  %v13090_v31 = vmul.f32 %v15303_v58, %v13887_v3  ;;  %v13101_v19 = vadd.f32 %v19634_v59, %v13089_v45 }
 0x86b   : > { %v13088_v10 = vmul.f32 %v13887_v3, %v13053_v21  ;;  %v13099_v36 = vadd.f32 %v19634_v59, %v13087_v7 }
 0x86c   : > { %v13102_v49 = vadd.f32 %v19634_v59, %v13090_v31 }
 0x86d   : > { %v13100_v28 = vadd.f32 %v19634_v59, %v13088_v10 }
 0x8b5   : > { %v15278_v4 = vpop.f32.mrb[8].mxu1 }
 0x8b6   : > { %v11445_v1 = vmul.f32 %v15278_v4, %v13877_v52  ;;  %v11398_v44 = vpop.f32.mrb[9].mxu1 }
 0x8b7   : > { %v11443_v46 = vmul.f32 %v13877_v52, %v11398_v44  ;;  %v15279_v12 = vpop.f32.mrb[10].mxu1 }
 0x8b8   : > { %v11457_v9 = vadd.f32 %v13878_v6, %v11445_v1  ;;  %v11446_v57 = vmul.f32 %v15279_v12, %v13877_v52  ;;  %v11401_v14 = vpop.f32.mrb[11].mxu1 }
 0x8b9   : > { %v11455_v61 = vadd.f32 %v13878_v6, %v11443_v46  ;;  %v11444_v47 = vmul.f32 %v13877_v52, %v11401_v14 }
 0x8ba   : > { %v11465_v0 = vmax.f32 %v11457_v9, 0.0  ;;  %v11458_v62 = vadd.f32 %v13878_v6, %v11446_v57 }
 0x8bb   : > { %v11463_v48 = vmax.f32 %v11455_v61, 0.0  ;;  %v11456_v37 = vadd.f32 %v13878_v6, %v11444_v47 }
 0x8bc   : > { %v11466_v29 = vmax.f32 %v11458_v62, 0.0  ;;  %v13109_v15 = vadd.f32 %v13101_v19, %v11465_v0 }
 0x8bd   : > { %v11464_v25 = vmax.f32 %v11456_v37, 0.0  ;;  %v13107_v55 = vadd.f32 %v13099_v36, %v11463_v48  ;;  %v15282_v5 = vpop.f32.mrb[12].mxu1 }
 0x8be   : > { %13117 = vst [vmem:[%s19641_s20 + $0x10] sm:$0xff] %v13109_v15  ;;  %v13110_v22 = vadd.f32 %v13102_v49, %v11466_v29  ;;  %v11414_v33 = vpop.f32.mrb[13].mxu1  ;;  %v11449_v40 = vmul.f32 %v15282_v5, %v13877_v52 }
 0x8bf   : > { %13115 = vst [vmem:[%s19641_s20] sm:$0xff] %v13107_v55  ;;  %v13108_v18 = vadd.f32 %v13100_v28, %v11464_v25  ;;  %v15283_v27 = vpop.f32.mrb[14].mxu1  ;;  %v11447_v16 = vmul.f32 %v13877_v52, %v11414_v33 }
 0x8c0   : > { %13118 = vst [vmem:[%s19641_s20 + $0x18] sm:$0xff] %v13110_v22  ;;  %v11417_v53 = vpop.f32.mrb[15].mxu1  ;;  %v11450_v30 = vmul.f32 %v15283_v27, %v13877_v52  ;;  %v11461_v34 = vadd.f32 %v13878_v6, %v11449_v40 }
 0x8c1   : > { %13116 = vst [vmem:[%s19641_s20 + $0x8] sm:$0xff] %v13108_v18  ;;  %v11448_v41 = vmul.f32 %v13877_v52, %v11417_v53  ;;  %v11459_v50 = vadd.f32 %v13878_v6, %v11447_v16 }
 0x8c2   : > { %v11462_v39 = vadd.f32 %v13878_v6, %v11450_v30  ;;  %v11469_v26 = vmax.f32 %v11461_v34, 0.0 }
 0x8c3   : > { %v11460_v2 = vadd.f32 %v13878_v6, %v11448_v41  ;;  %v11467_v13 = vmax.f32 %v11459_v50, 0.0 }
 0x8c4   : > { %v11470_v43 = vmax.f32 %v11462_v39, 0.0 }
 0x8c5   : > { %v11468_v11 = vmax.f32 %v11460_v2, 0.0 }
 0x8d5   : > { %v15306_v24 = vpop.f32.mrb[16].mxu1 }
 0x8d6   : > { %v13093_v32 = vmul.f32 %v15306_v24, %v13887_v3  ;;  %v13066_v38 = vpop.f32.mrb[17].mxu1 }
 0x8d7   : > { %v13091_v8 = vmul.f32 %v13887_v3, %v13066_v38  ;;  %v15307_v20 = vpop.f32.mrb[18].mxu1 }
 0x8d8   : > { %v13105_v42 = vadd.f32 %v19634_v59, %v13093_v32  ;;  %v13094_v54 = vmul.f32 %v15307_v20, %v13887_v3  ;;  %v13069_v35 = vpop.f32.mrb[19].mxu1 }
 0x8d9   : > { %v13103_v60 = vadd.f32 %v19634_v59, %v13091_v8  ;;  %v13092_v51 = vmul.f32 %v13887_v3, %v13069_v35 }
 0x8da   : > { %v13113_v17 = vadd.f32 %v13105_v42, %v11469_v26  ;;  %v13106_v23 = vadd.f32 %v19634_v59, %v13094_v54 }
 0x8db   : > { %v13111_v56 = vadd.f32 %v13103_v60, %v11467_v13  ;;  %v13104_v63 = vadd.f32 %v19634_v59, %v13092_v51 }
 0x8dc   : > { %13121 = vst [vmem:[%s19641_s20 + $0x30] sm:$0xff] %v13113_v17  ;;  %v13114_v58 = vadd.f32 %v13106_v23, %v11470_v43 }
 0x8dd   : > { %13119 = vst [vmem:[%s19641_s20 + $0x20] sm:$0xff] %v13111_v56  ;;  %v13112_v21 = vadd.f32 %v13104_v63, %v11468_v11 }
 0x8de   : > { %13122 = vst [vmem:[%s19641_s20 + $0x38] sm:$0xff] %v13114_v58 }
 0x8df   : > { %13120 = vst [vmem:[%s19641_s20 + $0x28] sm:$0xff] %v13112_v21 }
 0x8e0   : > { %16341 = shalt.err (!%p16338_p13)
}
 0x8e1   : > { %s16342_s8 = scalar_lea.hbm %s19657_s17, 1024  ;;  %s16346_s26 = scalar_lea.hbm %s19712_s6, 2048 }
 0x8e2   : > { %p16343_p9 = scmp.ne.s32.totalorder %s19657_s17, %s16342_s8  ;;  %p16347_p4 = scmp.lt.u32.totalorder %s19657_s17, %s19712_s6 }
 0x8e3   : > { %p16348_p8 = scmp.lt.u32.totalorder %s16346_s26, %s16342_s8  ;;  %p16350_p3 = scmp.lt.u32.totalorder %s16342_s8, %s19657_s17 }
 0x8e4   : > { %p16344_p0 = pnand %p16343_p9, %p16623_p10 }
 0x8e5   : > { %p16349_p6 = por %p16348_p8, %p16347_p4 }
 0x8e6   : > { %p16345_p11 = pneg %p16344_p0 }
 0x8e7   : > { %p16351_p5 = por %p16350_p3, %p16349_p6 }
 0x8e9   : > { %p16352_p7 = pnand %p16351_p5, %p16345_p11 }
 0x8eb   : > { %16355 = shalt.err (!%p16352_p7)
}
 0x8ec   : > { %s16415_s29 = smov 128   ;;  %s16416_s30 = smov 8  }
 0x8ed   : > { %15726 = dma.vmem_to_hbm [thread:$0]  (%p16623_p10), %s19659_s27, 1024, %s19657_s17, %s13124_s25, %s16415_s29, %s16415_s29, %s16416_s30  }
 0x8ee PF: > { %s13152_s9 = sand.u32 1, %s16390_s21   ;;  %p19883_p12 = scmp.ne.s32.totalorder %s19750_s28, 0 }
 0x8ef   : > { %p19884_p1 = scmp.ge.s32.totalorder %s16402_s24, 2  ;;  %s13153_s7 = scalar_lea.sflag [#allocation6], %s13152_s9 }
 0x8f1   : > { %p15746_p2 = pnand %p19884_p1, %p19883_p12 }
 0x8f3   : > { %16385 = dma.done.wait (!%p15746_p2), %s13153_s7, 1024  }
 0x8f4   : > { %16387 = vsyncadd (!%p15746_p2), %s13153_s7, 4294966272  ;;  %p21_p13 = scmp.ge.s32.totalorder %s16613_s18, 4   ;;  %s19885_s21 = smov %s16394_s22 }
 0x8f5   : > { %s19886_s22 = smov %s16398_s23  ;;  %s19887_s23 = smov %s16629_s16 }
 0x8f6   : > { %s19888_s24 = smov %s16613_s18  ;;  %23 = sbr.rel (!%p21_p13) target bundleno = 7 (0x7), region = 135 }
 0x8fd   :  { %13158 = vsyncpa [#allocation5], 1 }
 0x8fe   :  { %13160 = vsyncpa [#allocation5 + $0x1], 1 }
 0x8ff   :  { %13161 = vsyncpa [#allocation8], 1 }
 0x900   :  { %13162 = vsyncpa [#allocation11], 1 }
 0x901   :  { %13163 = vsyncpa [#allocation6], 1 }
 0x902   :  { %13165 = vsyncpa [#allocation6 + $0x1], 1 }

</bundles_post_ra>
